<compile_context>
chip_gen: v7x
topology: tpu7x:2x2x1
jax: 0.10.0
libtpu: 0.0.40
codegen_flags: <defaults>
</compile_context>

<pallas_src>
import functools
import math

import jax
import jax.numpy as jnp
from jax import lax
from jax.experimental import pallas as pl
from jax.experimental.pallas import tpu as pltpu


def _sum_all(x2d):
    # Full reduce of a 2-D tile to shape (1, 1): lane reduce then sublane reduce,
    # keeping all intermediates >= 2-D (safe Mosaic lowering).
    return jnp.sum(jnp.sum(x2d, axis=1, keepdims=True), axis=0, keepdims=True)


def _residual_block_kernel(
    x_ref,       # (1, C, H, W)   VMEM  one batch sample
    w1_ref,      # (C*C*9,)       SMEM  conv1 weight, flattened [co, ci, ky, kx]
    b1_ref,      # (C,)           SMEM  conv1 bias
    g1_ref,      # (C,)           SMEM  groupnorm1 gamma
    be1_ref,     # (C,)           SMEM  groupnorm1 beta
    w2_ref, b2_ref, g2_ref, be2_ref,    # same for the second conv / norm
    o_ref,       # (1, C, H, W)   VMEM
    xpad_ref,    # (C, H+2, W+2)  VMEM scratch (zero-padded conv input)
    *, C, H, W, eps, neg_slope,
):
    K = 3
    n_inv = 1.0 / float(C * H * W)

    # ---- stage zero-padded input for conv1 (borders stay zero for conv2 as well) ----
    xpad_ref[...] = jnp.zeros_like(xpad_ref)
    for c in range(C):
        xpad_ref[c, 1:H + 1, 1:W + 1] = x_ref[0, c]

    def conv3x3_gn(w_ref, b_ref, g_ref, be_ref, apply_act):
        # --- Conv3x3, padding=1: unrolled shifted-window MACs on the VPU ---
        acc = [jnp.zeros((H, W), jnp.float32) for _ in range(C)]
        for ci in range(C):
            for ky in range(K):
                for kx in range(K):
                    patch = xpad_ref[ci, ky:ky + H, kx:kx + W]
                    for co in range(C):
                        wv = w_ref[((co * C + ci) * K + ky) * K + kx]
                        acc[co] = acc[co] + wv * patch
        conv = [acc[co] + b_ref[co] for co in range(C)]

        # --- GroupNorm(num_groups=1): normalize over all (C, H, W) of this sample ---
        s = jnp.zeros((1, 1), jnp.float32)
        for co in range(C):
            s = s + _sum_all(conv[co])
        mean = s * n_inv

        sq = jnp.zeros((1, 1), jnp.float32)
        for co in range(C):
            d = conv[co] - mean
            sq = sq + _sum_all(d * d)
        inv = lax.rsqrt(sq * n_inv + eps)

        out = []
        for co in range(C):
            y = (conv[co] - mean) * inv * g_ref[co] + be_ref[co]
            if apply_act:
                y = jnp.where(y > 0, y, neg_slope * y)   # LeakyReLU(0.2)
            out.append(y)
        return out

    a1 = conv3x3_gn(w1_ref, b1_ref, g1_ref, be1_ref, apply_act=True)

    # ---- stage padded activations for conv2 (reuse scratch; borders are already zero) ----
    for c in range(C):
        xpad_ref[c, 1:H + 1, 1:W + 1] = a1[c]

    a2 = conv3x3_gn(w2_ref, b2_ref, g2_ref, be2_ref, apply_act=False)

    # ---- residual skip: out = x + block(x) ----
    for c in range(C):
        o_ref[0, c] = x_ref[0, c] + a2[c]


def residual_block_forward(x, params):
    """x: (B, C, H, W) float32. params: conv/gn parameters (in_features == out_features)."""
    B, C, H, W = x.shape
    assert params["w1"].shape == (C, C, 3, 3)
    assert params["w2"].shape == (C, C, 3, 3)

    w1f = params["w1"].reshape(-1)
    w2f = params["w2"].reshape(-1)

    kernel = functools.partial(
        _residual_block_kernel, C=C, H=H, W=W, eps=1e-5, neg_slope=0.2)

    sample_spec = pl.BlockSpec((1, C, H, W), lambda b: (b, 0, 0, 0))
    smem_spec = pl.BlockSpec(memory_space=pltpu.MemorySpace.SMEM)

    conv_flops = 2 * H * W * C * C * 9                       # per conv, per sample
    flops = B * (2 * conv_flops + 16 * C * H * W)            # + norms / act / residual
    bytes_accessed = (2 * B * C * H * W + 2 * (C * C * 9 + 3 * C)) * 4

    return pl.pallas_call(
        kernel,
        out_shape=jax.ShapeDtypeStruct((B, C, H, W), jnp.float32),
        grid=(B,),
        in_specs=[sample_spec] + [smem_spec] * 8,
        out_specs=sample_spec,
        scratch_shapes=[pltpu.VMEM((C, H + 2, W + 2), jnp.float32)],
        compiler_params=pltpu.CompilerParams(
            dimension_semantics=("parallel",)),
        cost_estimate=pl.CostEstimate(
            flops=flops, transcendentals=2 * B, bytes_accessed=bytes_accessed),
    )(x, w1f, params["b1"], params["g1"], params["be1"],
      w2f, params["b2"], params["g2"], params["be2"])


def init_params(key, C):
    """Deterministic params. Conv init ~ nn.Conv2d default bound 1/sqrt(fan_in);
    GroupNorm affine params are given non-trivial values to exercise that path."""
    ks = jax.random.split(key, 8)
    bound = 1.0 / math.sqrt(C * 9)

    def u(k, shape, lo, hi):
        return jax.random.uniform(k, shape, jnp.float32, lo, hi)

    return {
        "w1": u(ks[0], (C, C, 3, 3), -bound, bound),
        "b1": u(ks[1], (C,), -bound, bound),
        "g1": u(ks[2], (C,), 0.5, 1.5),
        "be1": u(ks[3], (C,), -0.5, 0.5),
        "w2": u(ks[4], (C, C, 3, 3), -bound, bound),
        "b2": u(ks[5], (C,), -bound, bound),
        "g2": u(ks[6], (C,), 0.5, 1.5),
        "be2": u(ks[7], (C,), -0.5, 0.5),
    }


def reference_forward(x, params, eps=1e-5, neg_slope=0.2):
    """Pure-JAX reference of ResidualBlock_B_.forward."""
    def conv(h, w, b):
        y = lax.conv_general_dilated(
            h, w, window_strides=(1, 1), padding=((1, 1), (1, 1)),
            dimension_numbers=("NCHW", "OIHW", "NCHW"),
            precision=lax.Precision.HIGHEST)
        return y + b[None, :, None, None]

    def gnorm(h, g, be):
        mean = jnp.mean(h, axis=(1, 2, 3), keepdims=True)
        var = jnp.mean((h - mean) ** 2, axis=(1, 2, 3), keepdims=True)
        return ((h - mean) * lax.rsqrt(var + eps)
                * g[None, :, None, None] + be[None, :, None, None])

    h = conv(x, params["w1"], params["b1"])
    h = gnorm(h, params["g1"], params["be1"])
    h = jnp.where(h > 0, h, neg_slope * h)
    h = conv(h, params["w2"], params["b2"])
    h = gnorm(h, params["g2"], params["be2"])
    return x + h


if __name__ == "__main__":
    # Residual add requires in_features == out_features.
    B, C, H, W = 2, 4, 16, 16

    key = jax.random.PRNGKey(0)
    kx, kp = jax.random.split(key)
    x = jax.random.normal(kx, (B, C, H, W), jnp.float32)
    params = init_params(kp, C)

    out = residual_block_forward(x, params)
    out = jax.block_until_ready(out)

    ref = reference_forward(x, params)
    assert out.shape == (B, C, H, W)
    assert jnp.allclose(out, ref, atol=1e-4, rtol=1e-4), float(jnp.max(jnp.abs(out - ref)))

    print("KERNEL_OK")
</pallas_src>

<mosaic_0001>
module attributes {stable_mosaic.version = 11 : i64} {
  func.func @_residual_block_kernel(%arg0: i32, %arg1: memref<1x4x16x16xf32, #tpu.memory_space<vmem>>, %arg2: memref<144xf32, #tpu.memory_space<smem>>, %arg3: memref<4xf32, #tpu.memory_space<smem>>, %arg4: memref<4xf32, #tpu.memory_space<smem>>, %arg5: memref<4xf32, #tpu.memory_space<smem>>, %arg6: memref<144xf32, #tpu.memory_space<smem>>, %arg7: memref<4xf32, #tpu.memory_space<smem>>, %arg8: memref<4xf32, #tpu.memory_space<smem>>, %arg9: memref<4xf32, #tpu.memory_space<smem>>, %arg10: memref<1x4x16x16xf32, #tpu.memory_space<vmem>>, %arg11: memref<4x18x18xf32, #tpu.memory_space<vmem>>) attributes {dimension_semantics = [#tpu.dimension_semantics<parallel>], iteration_bounds = array<i64: 2>, scalar_prefetch = 0 : i64, scratch_operands = 1 : i64, tpu.core_type = #tpu.core_type<tc>, window_params = [{transform_indices = @transform_0, window_bounds = array<i64: 1, 4, 16, 16>}, {transform_indices = @transform_1, window_bounds = array<i64: 144>}, {transform_indices = @transform_2, window_bounds = array<i64: 4>}, {transform_indices = @transform_3, window_bounds = array<i64: 4>}, {transform_indices = @transform_4, window_bounds = array<i64: 4>}, {transform_indices = @transform_5, window_bounds = array<i64: 144>}, {transform_indices = @transform_6, window_bounds = array<i64: 4>}, {transform_indices = @transform_7, window_bounds = array<i64: 4>}, {transform_indices = @transform_8, window_bounds = array<i64: 4>}, {transform_indices = @transform_9, window_bounds = array<i64: 1, 4, 16, 16>}]} {
    %cst = arith.constant 0.000000e+00 : f32
    %0 = vector.broadcast %cst : f32 to vector<4x18x18xf32>
    %c0 = arith.constant 0 : index
    %c0_0 = arith.constant 0 : index
    %c0_1 = arith.constant 0 : index
    %1 = vector.load %arg11[%c0, %c0_0, %c0_1] : memref<4x18x18xf32, #tpu.memory_space<vmem>>, vector<4x18x18xf32>
    tpu.vector_store %arg11[%c0, %c0_0, %c0_1], %0 {strides = array<i32>} : memref<4x18x18xf32, #tpu.memory_space<vmem>>, vector<4x18x18xf32>,
    %c0_2 = arith.constant 0 : index
    %c0_3 = arith.constant 0 : index
    %c0_4 = arith.constant 0 : index
    %c0_5 = arith.constant 0 : index
    %2 = vector.load %arg1[%c0_2, %c0_3, %c0_4, %c0_5] : memref<1x4x16x16xf32, #tpu.memory_space<vmem>>, vector<1x1x16x16xf32>
    %3 = vector.shape_cast %2 : vector<1x1x16x16xf32> to vector<16x16xf32>
    %c0_6 = arith.constant 0 : index
    %c1 = arith.constant 1 : index
    %c1_7 = arith.constant 1 : index
    %4 = vector.load %arg11[%c0_6, %c1, %c1_7] : memref<4x18x18xf32, #tpu.memory_space<vmem>>, vector<1x16x16xf32>
    %5 = vector.shape_cast %4 : vector<1x16x16xf32> to vector<16x16xf32>
    %6 = vector.shape_cast %3 : vector<16x16xf32> to vector<1x16x16xf32>
    tpu.vector_store %arg11[%c0_6, %c1, %c1_7], %6 {strides = array<i32>} : memref<4x18x18xf32, #tpu.memory_space<vmem>>, vector<1x16x16xf32>,
    %c0_8 = arith.constant 0 : index
    %c1_9 = arith.constant 1 : index
    %c0_10 = arith.constant 0 : index
    %c0_11 = arith.constant 0 : index
    %7 = vector.load %arg1[%c0_8, %c1_9, %c0_10, %c0_11] : memref<1x4x16x16xf32, #tpu.memory_space<vmem>>, vector<1x1x16x16xf32>
    %8 = vector.shape_cast %7 : vector<1x1x16x16xf32> to vector<16x16xf32>
    %c1_12 = arith.constant 1 : index
    %c1_13 = arith.constant 1 : index
    %c1_14 = arith.constant 1 : index
    %9 = vector.load %arg11[%c1_12, %c1_13, %c1_14] : memref<4x18x18xf32, #tpu.memory_space<vmem>>, vector<1x16x16xf32>
    %10 = vector.shape_cast %9 : vector<1x16x16xf32> to vector<16x16xf32>
    %11 = vector.shape_cast %8 : vector<16x16xf32> to vector<1x16x16xf32>
    tpu.vector_store %arg11[%c1_12, %c1_13, %c1_14], %11 {strides = array<i32>} : memref<4x18x18xf32, #tpu.memory_space<vmem>>, vector<1x16x16xf32>,
    %c0_15 = arith.constant 0 : index
    %c2 = arith.constant 2 : index
    %c0_16 = arith.constant 0 : index
    %c0_17 = arith.constant 0 : index
    %12 = vector.load %arg1[%c0_15, %c2, %c0_16, %c0_17] : memref<1x4x16x16xf32, #tpu.memory_space<vmem>>, vector<1x1x16x16xf32>
    %13 = vector.shape_cast %12 : vector<1x1x16x16xf32> to vector<16x16xf32>
    %c2_18 = arith.constant 2 : index
    %c1_19 = arith.constant 1 : index
    %c1_20 = arith.constant 1 : index
    %14 = vector.load %arg11[%c2_18, %c1_19, %c1_20] : memref<4x18x18xf32, #tpu.memory_space<vmem>>, vector<1x16x16xf32>
    %15 = vector.shape_cast %14 : vector<1x16x16xf32> to vector<16x16xf32>
    %16 = vector.shape_cast %13 : vector<16x16xf32> to vector<1x16x16xf32>
    tpu.vector_store %arg11[%c2_18, %c1_19, %c1_20], %16 {strides = array<i32>} : memref<4x18x18xf32, #tpu.memory_space<vmem>>, vector<1x16x16xf32>,
    %c0_21 = arith.constant 0 : index
    %c3 = arith.constant 3 : index
    %c0_22 = arith.constant 0 : index
    %c0_23 = arith.constant 0 : index
    %17 = vector.load %arg1[%c0_21, %c3, %c0_22, %c0_23] : memref<1x4x16x16xf32, #tpu.memory_space<vmem>>, vector<1x1x16x16xf32>
    %18 = vector.shape_cast %17 : vector<1x1x16x16xf32> to vector<16x16xf32>
    %c3_24 = arith.constant 3 : index
    %c1_25 = arith.constant 1 : index
    %c1_26 = arith.constant 1 : index
    %19 = vector.load %arg11[%c3_24, %c1_25, %c1_26] : memref<4x18x18xf32, #tpu.memory_space<vmem>>, vector<1x16x16xf32>
    %20 = vector.shape_cast %19 : vector<1x16x16xf32> to vector<16x16xf32>
    %21 = vector.shape_cast %18 : vector<16x16xf32> to vector<1x16x16xf32>
    tpu.vector_store %arg11[%c3_24, %c1_25, %c1_26], %21 {strides = array<i32>} : memref<4x18x18xf32, #tpu.memory_space<vmem>>, vector<1x16x16xf32>,
    %cst_27 = arith.constant 0.000000e+00 : f32
    %22 = vector.broadcast %cst_27 : f32 to vector<16x16xf32>
    %cst_28 = arith.constant 0.000000e+00 : f32
    %23 = vector.broadcast %cst_28 : f32 to vector<16x16xf32>
    %cst_29 = arith.constant 0.000000e+00 : f32
    %24 = vector.broadcast %cst_29 : f32 to vector<16x16xf32>
    %cst_30 = arith.constant 0.000000e+00 : f32
    %25 = vector.broadcast %cst_30 : f32 to vector<16x16xf32>
    %c0_31 = arith.constant 0 : index
    %c0_32 = arith.constant 0 : index
    %c0_33 = arith.constant 0 : index
    %26 = vector.load %arg11[%c0_31, %c0_32, %c0_33] : memref<4x18x18xf32, #tpu.memory_space<vmem>>, vector<1x16x16xf32>
    %27 = vector.shape_cast %26 : vector<1x16x16xf32> to vector<16x16xf32>
    %c0_34 = arith.constant 0 : index
    %28 = memref.load %arg2[%c0_34] : memref<144xf32, #tpu.memory_space<smem>>
    %29 = vector.broadcast %28 : f32 to vector<16x16xf32>
    %30 = arith.mulf %29, %27 : vector<16x16xf32>
    %31 = arith.addf %22, %30 : vector<16x16xf32>
    %c36 = arith.constant 36 : index
    %32 = memref.load %arg2[%c36] : memref<144xf32, #tpu.memory_space<smem>>
    %33 = vector.broadcast %32 : f32 to vector<16x16xf32>
    %34 = arith.mulf %33, %27 : vector<16x16xf32>
    %35 = arith.addf %23, %34 : vector<16x16xf32>
    %c72 = arith.constant 72 : index
    %36 = memref.load %arg2[%c72] : memref<144xf32, #tpu.memory_space<smem>>
    %37 = vector.broadcast %36 : f32 to vector<16x16xf32>
    %38 = arith.mulf %37, %27 : vector<16x16xf32>
    %39 = arith.addf %24, %38 : vector<16x16xf32>
    %c108 = arith.constant 108 : index
    %40 = memref.load %arg2[%c108] : memref<144xf32, #tpu.memory_space<smem>>
    %41 = vector.broadcast %40 : f32 to vector<16x16xf32>
    %42 = arith.mulf %41, %27 : vector<16x16xf32>
    %43 = arith.addf %25, %42 : vector<16x16xf32>
    %c0_35 = arith.constant 0 : index
    %c0_36 = arith.constant 0 : index
    %c1_37 = arith.constant 1 : index
    %44 = vector.load %arg11[%c0_35, %c0_36, %c1_37] : memref<4x18x18xf32, #tpu.memory_space<vmem>>, vector<1x16x16xf32>
    %45 = vector.shape_cast %44 : vector<1x16x16xf32> to vector<16x16xf32>
    %c1_38 = arith.constant 1 : index
    %46 = memref.load %arg2[%c1_38] : memref<144xf32, #tpu.memory_space<smem>>
    %47 = vector.broadcast %46 : f32 to vector<16x16xf32>
    %48 = arith.mulf %47, %45 : vector<16x16xf32>
    %49 = arith.addf %31, %48 : vector<16x16xf32>
    %c37 = arith.constant 37 : index
    %50 = memref.load %arg2[%c37] : memref<144xf32, #tpu.memory_space<smem>>
    %51 = vector.broadcast %50 : f32 to vector<16x16xf32>
    %52 = arith.mulf %51, %45 : vector<16x16xf32>
    %53 = arith.addf %35, %52 : vector<16x16xf32>
    %c73 = arith.constant 73 : index
    %54 = memref.load %arg2[%c73] : memref<144xf32, #tpu.memory_space<smem>>
    %55 = vector.broadcast %54 : f32 to vector<16x16xf32>
    %56 = arith.mulf %55, %45 : vector<16x16xf32>
    %57 = arith.addf %39, %56 : vector<16x16xf32>
    %c109 = arith.constant 109 : index
    %58 = memref.load %arg2[%c109] : memref<144xf32, #tpu.memory_space<smem>>
    %59 = vector.broadcast %58 : f32 to vector<16x16xf32>
    %60 = arith.mulf %59, %45 : vector<16x16xf32>
    %61 = arith.addf %43, %60 : vector<16x16xf32>
    %c0_39 = arith.constant 0 : index
    %c0_40 = arith.constant 0 : index
    %c2_41 = arith.constant 2 : index
    %62 = vector.load %arg11[%c0_39, %c0_40, %c2_41] : memref<4x18x18xf32, #tpu.memory_space<vmem>>, vector<1x16x16xf32>
    %63 = vector.shape_cast %62 : vector<1x16x16xf32> to vector<16x16xf32>
    %c2_42 = arith.constant 2 : index
    %64 = memref.load %arg2[%c2_42] : memref<144xf32, #tpu.memory_space<smem>>
    %65 = vector.broadcast %64 : f32 to vector<16x16xf32>
    %66 = arith.mulf %65, %63 : vector<16x16xf32>
    %67 = arith.addf %49, %66 : vector<16x16xf32>
    %c38 = arith.constant 38 : index
    %68 = memref.load %arg2[%c38] : memref<144xf32, #tpu.memory_space<smem>>
    %69 = vector.broadcast %68 : f32 to vector<16x16xf32>
    %70 = arith.mulf %69, %63 : vector<16x16xf32>
    %71 = arith.addf %53, %70 : vector<16x16xf32>
    %c74 = arith.constant 74 : index
    %72 = memref.load %arg2[%c74] : memref<144xf32, #tpu.memory_space<smem>>
    %73 = vector.broadcast %72 : f32 to vector<16x16xf32>
    %74 = arith.mulf %73, %63 : vector<16x16xf32>
    %75 = arith.addf %57, %74 : vector<16x16xf32>
    %c110 = arith.constant 110 : index
    %76 = memref.load %arg2[%c110] : memref<144xf32, #tpu.memory_space<smem>>
    %77 = vector.broadcast %76 : f32 to vector<16x16xf32>
    %78 = arith.mulf %77, %63 : vector<16x16xf32>
    %79 = arith.addf %61, %78 : vector<16x16xf32>
    %c0_43 = arith.constant 0 : index
    %c1_44 = arith.constant 1 : index
    %c0_45 = arith.constant 0 : index
    %80 = vector.load %arg11[%c0_43, %c1_44, %c0_45] : memref<4x18x18xf32, #tpu.memory_space<vmem>>, vector<1x16x16xf32>
    %81 = vector.shape_cast %80 : vector<1x16x16xf32> to vector<16x16xf32>
    %c3_46 = arith.constant 3 : index
    %82 = memref.load %arg2[%c3_46] : memref<144xf32, #tpu.memory_space<smem>>
    %83 = vector.broadcast %82 : f32 to vector<16x16xf32>
    %84 = arith.mulf %83, %81 : vector<16x16xf32>
    %85 = arith.addf %67, %84 : vector<16x16xf32>
    %c39 = arith.constant 39 : index
    %86 = memref.load %arg2[%c39] : memref<144xf32, #tpu.memory_space<smem>>
    %87 = vector.broadcast %86 : f32 to vector<16x16xf32>
    %88 = arith.mulf %87, %81 : vector<16x16xf32>
    %89 = arith.addf %71, %88 : vector<16x16xf32>
    %c75 = arith.constant 75 : index
    %90 = memref.load %arg2[%c75] : memref<144xf32, #tpu.memory_space<smem>>
    %91 = vector.broadcast %90 : f32 to vector<16x16xf32>
    %92 = arith.mulf %91, %81 : vector<16x16xf32>
    %93 = arith.addf %75, %92 : vector<16x16xf32>
    %c111 = arith.constant 111 : index
    %94 = memref.load %arg2[%c111] : memref<144xf32, #tpu.memory_space<smem>>
    %95 = vector.broadcast %94 : f32 to vector<16x16xf32>
    %96 = arith.mulf %95, %81 : vector<16x16xf32>
    %97 = arith.addf %79, %96 : vector<16x16xf32>
    %c0_47 = arith.constant 0 : index
    %c1_48 = arith.constant 1 : index
    %c1_49 = arith.constant 1 : index
    %98 = vector.load %arg11[%c0_47, %c1_48, %c1_49] : memref<4x18x18xf32, #tpu.memory_space<vmem>>, vector<1x16x16xf32>
    %99 = vector.shape_cast %98 : vector<1x16x16xf32> to vector<16x16xf32>
    %c4 = arith.constant 4 : index
    %100 = memref.load %arg2[%c4] : memref<144xf32, #tpu.memory_space<smem>>
    %101 = vector.broadcast %100 : f32 to vector<16x16xf32>
    %102 = arith.mulf %101, %99 : vector<16x16xf32>
    %103 = arith.addf %85, %102 : vector<16x16xf32>
    %c40 = arith.constant 40 : index
    %104 = memref.load %arg2[%c40] : memref<144xf32, #tpu.memory_space<smem>>
    %105 = vector.broadcast %104 : f32 to vector<16x16xf32>
    %106 = arith.mulf %105, %99 : vector<16x16xf32>
    %107 = arith.addf %89, %106 : vector<16x16xf32>
    %c76 = arith.constant 76 : index
    %108 = memref.load %arg2[%c76] : memref<144xf32, #tpu.memory_space<smem>>
    %109 = vector.broadcast %108 : f32 to vector<16x16xf32>
    %110 = arith.mulf %109, %99 : vector<16x16xf32>
    %111 = arith.addf %93, %110 : vector<16x16xf32>
    %c112 = arith.constant 112 : index
    %112 = memref.load %arg2[%c112] : memref<144xf32, #tpu.memory_space<smem>>
    %113 = vector.broadcast %112 : f32 to vector<16x16xf32>
    %114 = arith.mulf %113, %99 : vector<16x16xf32>
    %115 = arith.addf %97, %114 : vector<16x16xf32>
    %c0_50 = arith.constant 0 : index
    %c1_51 = arith.constant 1 : index
    %c2_52 = arith.constant 2 : index
    %116 = vector.load %arg11[%c0_50, %c1_51, %c2_52] : memref<4x18x18xf32, #tpu.memory_space<vmem>>, vector<1x16x16xf32>
    %117 = vector.shape_cast %116 : vector<1x16x16xf32> to vector<16x16xf32>
    %c5 = arith.constant 5 : index
    %118 = memref.load %arg2[%c5] : memref<144xf32, #tpu.memory_space<smem>>
    %119 = vector.broadcast %118 : f32 to vector<16x16xf32>
    %120 = arith.mulf %119, %117 : vector<16x16xf32>
    %121 = arith.addf %103, %120 : vector<16x16xf32>
    %c41 = arith.constant 41 : index
    %122 = memref.load %arg2[%c41] : memref<144xf32, #tpu.memory_space<smem>>
    %123 = vector.broadcast %122 : f32 to vector<16x16xf32>
    %124 = arith.mulf %123, %117 : vector<16x16xf32>
    %125 = arith.addf %107, %124 : vector<16x16xf32>
    %c77 = arith.constant 77 : index
    %126 = memref.load %arg2[%c77] : memref<144xf32, #tpu.memory_space<smem>>
    %127 = vector.broadcast %126 : f32 to vector<16x16xf32>
    %128 = arith.mulf %127, %117 : vector<16x16xf32>
    %129 = arith.addf %111, %128 : vector<16x16xf32>
    %c113 = arith.constant 113 : index
    %130 = memref.load %arg2[%c113] : memref<144xf32, #tpu.memory_space<smem>>
    %131 = vector.broadcast %130 : f32 to vector<16x16xf32>
    %132 = arith.mulf %131, %117 : vector<16x16xf32>
    %133 = arith.addf %115, %132 : vector<16x16xf32>
    %c0_53 = arith.constant 0 : index
    %c2_54 = arith.constant 2 : index
    %c0_55 = arith.constant 0 : index
    %134 = vector.load %arg11[%c0_53, %c2_54, %c0_55] : memref<4x18x18xf32, #tpu.memory_space<vmem>>, vector<1x16x16xf32>
    %135 = vector.shape_cast %134 : vector<1x16x16xf32> to vector<16x16xf32>
    %c6 = arith.constant 6 : index
    %136 = memref.load %arg2[%c6] : memref<144xf32, #tpu.memory_space<smem>>
    %137 = vector.broadcast %136 : f32 to vector<16x16xf32>
    %138 = arith.mulf %137, %135 : vector<16x16xf32>
    %139 = arith.addf %121, %138 : vector<16x16xf32>
    %c42 = arith.constant 42 : index
    %140 = memref.load %arg2[%c42] : memref<144xf32, #tpu.memory_space<smem>>
    %141 = vector.broadcast %140 : f32 to vector<16x16xf32>
    %142 = arith.mulf %141, %135 : vector<16x16xf32>
    %143 = arith.addf %125, %142 : vector<16x16xf32>
    %c78 = arith.constant 78 : index
    %144 = memref.load %arg2[%c78] : memref<144xf32, #tpu.memory_space<smem>>
    %145 = vector.broadcast %144 : f32 to vector<16x16xf32>
    %146 = arith.mulf %145, %135 : vector<16x16xf32>
    %147 = arith.addf %129, %146 : vector<16x16xf32>
    %c114 = arith.constant 114 : index
    %148 = memref.load %arg2[%c114] : memref<144xf32, #tpu.memory_space<smem>>
    %149 = vector.broadcast %148 : f32 to vector<16x16xf32>
    %150 = arith.mulf %149, %135 : vector<16x16xf32>
    %151 = arith.addf %133, %150 : vector<16x16xf32>
    %c0_56 = arith.constant 0 : index
    %c2_57 = arith.constant 2 : index
    %c1_58 = arith.constant 1 : index
    %152 = vector.load %arg11[%c0_56, %c2_57, %c1_58] : memref<4x18x18xf32, #tpu.memory_space<vmem>>, vector<1x16x16xf32>
    %153 = vector.shape_cast %152 : vector<1x16x16xf32> to vector<16x16xf32>
    %c7 = arith.constant 7 : index
    %154 = memref.load %arg2[%c7] : memref<144xf32, #tpu.memory_space<smem>>
    %155 = vector.broadcast %154 : f32 to vector<16x16xf32>
    %156 = arith.mulf %155, %153 : vector<16x16xf32>
    %157 = arith.addf %139, %156 : vector<16x16xf32>
    %c43 = arith.constant 43 : index
    %158 = memref.load %arg2[%c43] : memref<144xf32, #tpu.memory_space<smem>>
    %159 = vector.broadcast %158 : f32 to vector<16x16xf32>
    %160 = arith.mulf %159, %153 : vector<16x16xf32>
    %161 = arith.addf %143, %160 : vector<16x16xf32>
    %c79 = arith.constant 79 : index
    %162 = memref.load %arg2[%c79] : memref<144xf32, #tpu.memory_space<smem>>
    %163 = vector.broadcast %162 : f32 to vector<16x16xf32>
    %164 = arith.mulf %163, %153 : vector<16x16xf32>
    %165 = arith.addf %147, %164 : vector<16x16xf32>
    %c115 = arith.constant 115 : index
    %166 = memref.load %arg2[%c115] : memref<144xf32, #tpu.memory_space<smem>>
    %167 = vector.broadcast %166 : f32 to vector<16x16xf32>
    %168 = arith.mulf %167, %153 : vector<16x16xf32>
    %169 = arith.addf %151, %168 : vector<16x16xf32>
    %c0_59 = arith.constant 0 : index
    %c2_60 = arith.constant 2 : index
    %c2_61 = arith.constant 2 : index
    %170 = vector.load %arg11[%c0_59, %c2_60, %c2_61] : memref<4x18x18xf32, #tpu.memory_space<vmem>>, vector<1x16x16xf32>
    %171 = vector.shape_cast %170 : vector<1x16x16xf32> to vector<16x16xf32>
    %c8 = arith.constant 8 : index
    %172 = memref.load %arg2[%c8] : memref<144xf32, #tpu.memory_space<smem>>
    %173 = vector.broadcast %172 : f32 to vector<16x16xf32>
    %174 = arith.mulf %173, %171 : vector<16x16xf32>
    %175 = arith.addf %157, %174 : vector<16x16xf32>
    %c44 = arith.constant 44 : index
    %176 = memref.load %arg2[%c44] : memref<144xf32, #tpu.memory_space<smem>>
    %177 = vector.broadcast %176 : f32 to vector<16x16xf32>
    %178 = arith.mulf %177, %171 : vector<16x16xf32>
    %179 = arith.addf %161, %178 : vector<16x16xf32>
    %c80 = arith.constant 80 : index
    %180 = memref.load %arg2[%c80] : memref<144xf32, #tpu.memory_space<smem>>
    %181 = vector.broadcast %180 : f32 to vector<16x16xf32>
    %182 = arith.mulf %181, %171 : vector<16x16xf32>
    %183 = arith.addf %165, %182 : vector<16x16xf32>
    %c116 = arith.constant 116 : index
    %184 = memref.load %arg2[%c116] : memref<144xf32, #tpu.memory_space<smem>>
    %185 = vector.broadcast %184 : f32 to vector<16x16xf32>
    %186 = arith.mulf %185, %171 : vector<16x16xf32>
    %187 = arith.addf %169, %186 : vector<16x16xf32>
    %c1_62 = arith.constant 1 : index
    %c0_63 = arith.constant 0 : index
    %c0_64 = arith.constant 0 : index
    %188 = vector.load %arg11[%c1_62, %c0_63, %c0_64] : memref<4x18x18xf32, #tpu.memory_space<vmem>>, vector<1x16x16xf32>
    %189 = vector.shape_cast %188 : vector<1x16x16xf32> to vector<16x16xf32>
    %c9 = arith.constant 9 : index
    %190 = memref.load %arg2[%c9] : memref<144xf32, #tpu.memory_space<smem>>
    %191 = vector.broadcast %190 : f32 to vector<16x16xf32>
    %192 = arith.mulf %191, %189 : vector<16x16xf32>
    %193 = arith.addf %175, %192 : vector<16x16xf32>
    %c45 = arith.constant 45 : index
    %194 = memref.load %arg2[%c45] : memref<144xf32, #tpu.memory_space<smem>>
    %195 = vector.broadcast %194 : f32 to vector<16x16xf32>
    %196 = arith.mulf %195, %189 : vector<16x16xf32>
    %197 = arith.addf %179, %196 : vector<16x16xf32>
    %c81 = arith.constant 81 : index
    %198 = memref.load %arg2[%c81] : memref<144xf32, #tpu.memory_space<smem>>
    %199 = vector.broadcast %198 : f32 to vector<16x16xf32>
    %200 = arith.mulf %199, %189 : vector<16x16xf32>
    %201 = arith.addf %183, %200 : vector<16x16xf32>
    %c117 = arith.constant 117 : index
    %202 = memref.load %arg2[%c117] : memref<144xf32, #tpu.memory_space<smem>>
    %203 = vector.broadcast %202 : f32 to vector<16x16xf32>
    %204 = arith.mulf %203, %189 : vector<16x16xf32>
    %205 = arith.addf %187, %204 : vector<16x16xf32>
    %c1_65 = arith.constant 1 : index
    %c0_66 = arith.constant 0 : index
    %c1_67 = arith.constant 1 : index
    %206 = vector.load %arg11[%c1_65, %c0_66, %c1_67] : memref<4x18x18xf32, #tpu.memory_space<vmem>>, vector<1x16x16xf32>
    %207 = vector.shape_cast %206 : vector<1x16x16xf32> to vector<16x16xf32>
    %c10 = arith.constant 10 : index
    %208 = memref.load %arg2[%c10] : memref<144xf32, #tpu.memory_space<smem>>
    %209 = vector.broadcast %208 : f32 to vector<16x16xf32>
    %210 = arith.mulf %209, %207 : vector<16x16xf32>
    %211 = arith.addf %193, %210 : vector<16x16xf32>
    %c46 = arith.constant 46 : index
    %212 = memref.load %arg2[%c46] : memref<144xf32, #tpu.memory_space<smem>>
    %213 = vector.broadcast %212 : f32 to vector<16x16xf32>
    %214 = arith.mulf %213, %207 : vector<16x16xf32>
    %215 = arith.addf %197, %214 : vector<16x16xf32>
    %c82 = arith.constant 82 : index
    %216 = memref.load %arg2[%c82] : memref<144xf32, #tpu.memory_space<smem>>
    %217 = vector.broadcast %216 : f32 to vector<16x16xf32>
    %218 = arith.mulf %217, %207 : vector<16x16xf32>
    %219 = arith.addf %201, %218 : vector<16x16xf32>
    %c118 = arith.constant 118 : index
    %220 = memref.load %arg2[%c118] : memref<144xf32, #tpu.memory_space<smem>>
    %221 = vector.broadcast %220 : f32 to vector<16x16xf32>
    %222 = arith.mulf %221, %207 : vector<16x16xf32>
    %223 = arith.addf %205, %222 : vector<16x16xf32>
    %c1_68 = arith.constant 1 : index
    %c0_69 = arith.constant 0 : index
    %c2_70 = arith.constant 2 : index
    %224 = vector.load %arg11[%c1_68, %c0_69, %c2_70] : memref<4x18x18xf32, #tpu.memory_space<vmem>>, vector<1x16x16xf32>
    %225 = vector.shape_cast %224 : vector<1x16x16xf32> to vector<16x16xf32>
    %c11 = arith.constant 11 : index
    %226 = memref.load %arg2[%c11] : memref<144xf32, #tpu.memory_space<smem>>
    %227 = vector.broadcast %226 : f32 to vector<16x16xf32>
    %228 = arith.mulf %227, %225 : vector<16x16xf32>
    %229 = arith.addf %211, %228 : vector<16x16xf32>
    %c47 = arith.constant 47 : index
    %230 = memref.load %arg2[%c47] : memref<144xf32, #tpu.memory_space<smem>>
    %231 = vector.broadcast %230 : f32 to vector<16x16xf32>
    %232 = arith.mulf %231, %225 : vector<16x16xf32>
    %233 = arith.addf %215, %232 : vector<16x16xf32>
    %c83 = arith.constant 83 : index
    %234 = memref.load %arg2[%c83] : memref<144xf32, #tpu.memory_space<smem>>
    %235 = vector.broadcast %234 : f32 to vector<16x16xf32>
    %236 = arith.mulf %235, %225 : vector<16x16xf32>
    %237 = arith.addf %219, %236 : vector<16x16xf32>
    %c119 = arith.constant 119 : index
    %238 = memref.load %arg2[%c119] : memref<144xf32, #tpu.memory_space<smem>>
    %239 = vector.broadcast %238 : f32 to vector<16x16xf32>
    %240 = arith.mulf %239, %225 : vector<16x16xf32>
    %241 = arith.addf %223, %240 : vector<16x16xf32>
    %c1_71 = arith.constant 1 : index
    %c1_72 = arith.constant 1 : index
    %c0_73 = arith.constant 0 : index
    %242 = vector.load %arg11[%c1_71, %c1_72, %c0_73] : memref<4x18x18xf32, #tpu.memory_space<vmem>>, vector<1x16x16xf32>
    %243 = vector.shape_cast %242 : vector<1x16x16xf32> to vector<16x16xf32>
    %c12 = arith.constant 12 : index
    %244 = memref.load %arg2[%c12] : memref<144xf32, #tpu.memory_space<smem>>
    %245 = vector.broadcast %244 : f32 to vector<16x16xf32>
    %246 = arith.mulf %245, %243 : vector<16x16xf32>
    %247 = arith.addf %229, %246 : vector<16x16xf32>
    %c48 = arith.constant 48 : index
    %248 = memref.load %arg2[%c48] : memref<144xf32, #tpu.memory_space<smem>>
    %249 = vector.broadcast %248 : f32 to vector<16x16xf32>
    %250 = arith.mulf %249, %243 : vector<16x16xf32>
    %251 = arith.addf %233, %250 : vector<16x16xf32>
    %c84 = arith.constant 84 : index
    %252 = memref.load %arg2[%c84] : memref<144xf32, #tpu.memory_space<smem>>
    %253 = vector.broadcast %252 : f32 to vector<16x16xf32>
    %254 = arith.mulf %253, %243 : vector<16x16xf32>
    %255 = arith.addf %237, %254 : vector<16x16xf32>
    %c120 = arith.constant 120 : index
    %256 = memref.load %arg2[%c120] : memref<144xf32, #tpu.memory_space<smem>>
    %257 = vector.broadcast %256 : f32 to vector<16x16xf32>
    %258 = arith.mulf %257, %243 : vector<16x16xf32>
    %259 = arith.addf %241, %258 : vector<16x16xf32>
    %c1_74 = arith.constant 1 : index
    %c1_75 = arith.constant 1 : index
    %c1_76 = arith.constant 1 : index
    %260 = vector.load %arg11[%c1_74, %c1_75, %c1_76] : memref<4x18x18xf32, #tpu.memory_space<vmem>>, vector<1x16x16xf32>
    %261 = vector.shape_cast %260 : vector<1x16x16xf32> to vector<16x16xf32>
    %c13 = arith.constant 13 : index
    %262 = memref.load %arg2[%c13] : memref<144xf32, #tpu.memory_space<smem>>
    %263 = vector.broadcast %262 : f32 to vector<16x16xf32>
    %264 = arith.mulf %263, %261 : vector<16x16xf32>
    %265 = arith.addf %247, %264 : vector<16x16xf32>
    %c49 = arith.constant 49 : index
    %266 = memref.load %arg2[%c49] : memref<144xf32, #tpu.memory_space<smem>>
    %267 = vector.broadcast %266 : f32 to vector<16x16xf32>
    %268 = arith.mulf %267, %261 : vector<16x16xf32>
    %269 = arith.addf %251, %268 : vector<16x16xf32>
    %c85 = arith.constant 85 : index
    %270 = memref.load %arg2[%c85] : memref<144xf32, #tpu.memory_space<smem>>
    %271 = vector.broadcast %270 : f32 to vector<16x16xf32>
    %272 = arith.mulf %271, %261 : vector<16x16xf32>
    %273 = arith.addf %255, %272 : vector<16x16xf32>
    %c121 = arith.constant 121 : index
    %274 = memref.load %arg2[%c121] : memref<144xf32, #tpu.memory_space<smem>>
    %275 = vector.broadcast %274 : f32 to vector<16x16xf32>
    %276 = arith.mulf %275, %261 : vector<16x16xf32>
    %277 = arith.addf %259, %276 : vector<16x16xf32>
    %c1_77 = arith.constant 1 : index
    %c1_78 = arith.constant 1 : index
    %c2_79 = arith.constant 2 : index
    %278 = vector.load %arg11[%c1_77, %c1_78, %c2_79] : memref<4x18x18xf32, #tpu.memory_space<vmem>>, vector<1x16x16xf32>
    %279 = vector.shape_cast %278 : vector<1x16x16xf32> to vector<16x16xf32>
    %c14 = arith.constant 14 : index
    %280 = memref.load %arg2[%c14] : memref<144xf32, #tpu.memory_space<smem>>
    %281 = vector.broadcast %280 : f32 to vector<16x16xf32>
    %282 = arith.mulf %281, %279 : vector<16x16xf32>
    %283 = arith.addf %265, %282 : vector<16x16xf32>
    %c50 = arith.constant 50 : index
    %284 = memref.load %arg2[%c50] : memref<144xf32, #tpu.memory_space<smem>>
    %285 = vector.broadcast %284 : f32 to vector<16x16xf32>
    %286 = arith.mulf %285, %279 : vector<16x16xf32>
    %287 = arith.addf %269, %286 : vector<16x16xf32>
    %c86 = arith.constant 86 : index
    %288 = memref.load %arg2[%c86] : memref<144xf32, #tpu.memory_space<smem>>
    %289 = vector.broadcast %288 : f32 to vector<16x16xf32>
    %290 = arith.mulf %289, %279 : vector<16x16xf32>
    %291 = arith.addf %273, %290 : vector<16x16xf32>
    %c122 = arith.constant 122 : index
    %292 = memref.load %arg2[%c122] : memref<144xf32, #tpu.memory_space<smem>>
    %293 = vector.broadcast %292 : f32 to vector<16x16xf32>
    %294 = arith.mulf %293, %279 : vector<16x16xf32>
    %295 = arith.addf %277, %294 : vector<16x16xf32>
    %c1_80 = arith.constant 1 : index
    %c2_81 = arith.constant 2 : index
    %c0_82 = arith.constant 0 : index
    %296 = vector.load %arg11[%c1_80, %c2_81, %c0_82] : memref<4x18x18xf32, #tpu.memory_space<vmem>>, vector<1x16x16xf32>
    %297 = vector.shape_cast %296 : vector<1x16x16xf32> to vector<16x16xf32>
    %c15 = arith.constant 15 : index
    %298 = memref.load %arg2[%c15] : memref<144xf32, #tpu.memory_space<smem>>
    %299 = vector.broadcast %298 : f32 to vector<16x16xf32>
    %300 = arith.mulf %299, %297 : vector<16x16xf32>
    %301 = arith.addf %283, %300 : vector<16x16xf32>
    %c51 = arith.constant 51 : index
    %302 = memref.load %arg2[%c51] : memref<144xf32, #tpu.memory_space<smem>>
    %303 = vector.broadcast %302 : f32 to vector<16x16xf32>
    %304 = arith.mulf %303, %297 : vector<16x16xf32>
    %305 = arith.addf %287, %304 : vector<16x16xf32>
    %c87 = arith.constant 87 : index
    %306 = memref.load %arg2[%c87] : memref<144xf32, #tpu.memory_space<smem>>
    %307 = vector.broadcast %306 : f32 to vector<16x16xf32>
    %308 = arith.mulf %307, %297 : vector<16x16xf32>
    %309 = arith.addf %291, %308 : vector<16x16xf32>
    %c123 = arith.constant 123 : index
    %310 = memref.load %arg2[%c123] : memref<144xf32, #tpu.memory_space<smem>>
    %311 = vector.broadcast %310 : f32 to vector<16x16xf32>
    %312 = arith.mulf %311, %297 : vector<16x16xf32>
    %313 = arith.addf %295, %312 : vector<16x16xf32>
    %c1_83 = arith.constant 1 : index
    %c2_84 = arith.constant 2 : index
    %c1_85 = arith.constant 1 : index
    %314 = vector.load %arg11[%c1_83, %c2_84, %c1_85] : memref<4x18x18xf32, #tpu.memory_space<vmem>>, vector<1x16x16xf32>
    %315 = vector.shape_cast %314 : vector<1x16x16xf32> to vector<16x16xf32>
    %c16 = arith.constant 16 : index
    %316 = memref.load %arg2[%c16] : memref<144xf32, #tpu.memory_space<smem>>
    %317 = vector.broadcast %316 : f32 to vector<16x16xf32>
    %318 = arith.mulf %317, %315 : vector<16x16xf32>
    %319 = arith.addf %301, %318 : vector<16x16xf32>
    %c52 = arith.constant 52 : index
    %320 = memref.load %arg2[%c52] : memref<144xf32, #tpu.memory_space<smem>>
    %321 = vector.broadcast %320 : f32 to vector<16x16xf32>
    %322 = arith.mulf %321, %315 : vector<16x16xf32>
    %323 = arith.addf %305, %322 : vector<16x16xf32>
    %c88 = arith.constant 88 : index
    %324 = memref.load %arg2[%c88] : memref<144xf32, #tpu.memory_space<smem>>
    %325 = vector.broadcast %324 : f32 to vector<16x16xf32>
    %326 = arith.mulf %325, %315 : vector<16x16xf32>
    %327 = arith.addf %309, %326 : vector<16x16xf32>
    %c124 = arith.constant 124 : index
    %328 = memref.load %arg2[%c124] : memref<144xf32, #tpu.memory_space<smem>>
    %329 = vector.broadcast %328 : f32 to vector<16x16xf32>
    %330 = arith.mulf %329, %315 : vector<16x16xf32>
    %331 = arith.addf %313, %330 : vector<16x16xf32>
    %c1_86 = arith.constant 1 : index
    %c2_87 = arith.constant 2 : index
    %c2_88 = arith.constant 2 : index
    %332 = vector.load %arg11[%c1_86, %c2_87, %c2_88] : memref<4x18x18xf32, #tpu.memory_space<vmem>>, vector<1x16x16xf32>
    %333 = vector.shape_cast %332 : vector<1x16x16xf32> to vector<16x16xf32>
    %c17 = arith.constant 17 : index
    %334 = memref.load %arg2[%c17] : memref<144xf32, #tpu.memory_space<smem>>
    %335 = vector.broadcast %334 : f32 to vector<16x16xf32>
    %336 = arith.mulf %335, %333 : vector<16x16xf32>
    %337 = arith.addf %319, %336 : vector<16x16xf32>
    %c53 = arith.constant 53 : index
    %338 = memref.load %arg2[%c53] : memref<144xf32, #tpu.memory_space<smem>>
    %339 = vector.broadcast %338 : f32 to vector<16x16xf32>
    %340 = arith.mulf %339, %333 : vector<16x16xf32>
    %341 = arith.addf %323, %340 : vector<16x16xf32>
    %c89 = arith.constant 89 : index
    %342 = memref.load %arg2[%c89] : memref<144xf32, #tpu.memory_space<smem>>
    %343 = vector.broadcast %342 : f32 to vector<16x16xf32>
    %344 = arith.mulf %343, %333 : vector<16x16xf32>
    %345 = arith.addf %327, %344 : vector<16x16xf32>
    %c125 = arith.constant 125 : index
    %346 = memref.load %arg2[%c125] : memref<144xf32, #tpu.memory_space<smem>>
    %347 = vector.broadcast %346 : f32 to vector<16x16xf32>
    %348 = arith.mulf %347, %333 : vector<16x16xf32>
    %349 = arith.addf %331, %348 : vector<16x16xf32>
    %c2_89 = arith.constant 2 : index
    %c0_90 = arith.constant 0 : index
    %c0_91 = arith.constant 0 : index
    %350 = vector.load %arg11[%c2_89, %c0_90, %c0_91] : memref<4x18x18xf32, #tpu.memory_space<vmem>>, vector<1x16x16xf32>
    %351 = vector.shape_cast %350 : vector<1x16x16xf32> to vector<16x16xf32>
    %c18 = arith.constant 18 : index
    %352 = memref.load %arg2[%c18] : memref<144xf32, #tpu.memory_space<smem>>
    %353 = vector.broadcast %352 : f32 to vector<16x16xf32>
    %354 = arith.mulf %353, %351 : vector<16x16xf32>
    %355 = arith.addf %337, %354 : vector<16x16xf32>
    %c54 = arith.constant 54 : index
    %356 = memref.load %arg2[%c54] : memref<144xf32, #tpu.memory_space<smem>>
    %357 = vector.broadcast %356 : f32 to vector<16x16xf32>
    %358 = arith.mulf %357, %351 : vector<16x16xf32>
    %359 = arith.addf %341, %358 : vector<16x16xf32>
    %c90 = arith.constant 90 : index
    %360 = memref.load %arg2[%c90] : memref<144xf32, #tpu.memory_space<smem>>
    %361 = vector.broadcast %360 : f32 to vector<16x16xf32>
    %362 = arith.mulf %361, %351 : vector<16x16xf32>
    %363 = arith.addf %345, %362 : vector<16x16xf32>
    %c126 = arith.constant 126 : index
    %364 = memref.load %arg2[%c126] : memref<144xf32, #tpu.memory_space<smem>>
    %365 = vector.broadcast %364 : f32 to vector<16x16xf32>
    %366 = arith.mulf %365, %351 : vector<16x16xf32>
    %367 = arith.addf %349, %366 : vector<16x16xf32>
    %c2_92 = arith.constant 2 : index
    %c0_93 = arith.constant 0 : index
    %c1_94 = arith.constant 1 : index
    %368 = vector.load %arg11[%c2_92, %c0_93, %c1_94] : memref<4x18x18xf32, #tpu.memory_space<vmem>>, vector<1x16x16xf32>
    %369 = vector.shape_cast %368 : vector<1x16x16xf32> to vector<16x16xf32>
    %c19 = arith.constant 19 : index
    %370 = memref.load %arg2[%c19] : memref<144xf32, #tpu.memory_space<smem>>
    %371 = vector.broadcast %370 : f32 to vector<16x16xf32>
    %372 = arith.mulf %371, %369 : vector<16x16xf32>
    %373 = arith.addf %355, %372 : vector<16x16xf32>
    %c55 = arith.constant 55 : index
    %374 = memref.load %arg2[%c55] : memref<144xf32, #tpu.memory_space<smem>>
    %375 = vector.broadcast %374 : f32 to vector<16x16xf32>
    %376 = arith.mulf %375, %369 : vector<16x16xf32>
    %377 = arith.addf %359, %376 : vector<16x16xf32>
    %c91 = arith.constant 91 : index
    %378 = memref.load %arg2[%c91] : memref<144xf32, #tpu.memory_space<smem>>
    %379 = vector.broadcast %378 : f32 to vector<16x16xf32>
    %380 = arith.mulf %379, %369 : vector<16x16xf32>
    %381 = arith.addf %363, %380 : vector<16x16xf32>
    %c127 = arith.constant 127 : index
    %382 = memref.load %arg2[%c127] : memref<144xf32, #tpu.memory_space<smem>>
    %383 = vector.broadcast %382 : f32 to vector<16x16xf32>
    %384 = arith.mulf %383, %369 : vector<16x16xf32>
    %385 = arith.addf %367, %384 : vector<16x16xf32>
    %c2_95 = arith.constant 2 : index
    %c0_96 = arith.constant 0 : index
    %c2_97 = arith.constant 2 : index
    %386 = vector.load %arg11[%c2_95, %c0_96, %c2_97] : memref<4x18x18xf32, #tpu.memory_space<vmem>>, vector<1x16x16xf32>
    %387 = vector.shape_cast %386 : vector<1x16x16xf32> to vector<16x16xf32>
    %c20 = arith.constant 20 : index
    %388 = memref.load %arg2[%c20] : memref<144xf32, #tpu.memory_space<smem>>
    %389 = vector.broadcast %388 : f32 to vector<16x16xf32>
    %390 = arith.mulf %389, %387 : vector<16x16xf32>
    %391 = arith.addf %373, %390 : vector<16x16xf32>
    %c56 = arith.constant 56 : index
    %392 = memref.load %arg2[%c56] : memref<144xf32, #tpu.memory_space<smem>>
    %393 = vector.broadcast %392 : f32 to vector<16x16xf32>
    %394 = arith.mulf %393, %387 : vector<16x16xf32>
    %395 = arith.addf %377, %394 : vector<16x16xf32>
    %c92 = arith.constant 92 : index
    %396 = memref.load %arg2[%c92] : memref<144xf32, #tpu.memory_space<smem>>
    %397 = vector.broadcast %396 : f32 to vector<16x16xf32>
    %398 = arith.mulf %397, %387 : vector<16x16xf32>
    %399 = arith.addf %381, %398 : vector<16x16xf32>
    %c128 = arith.constant 128 : index
    %400 = memref.load %arg2[%c128] : memref<144xf32, #tpu.memory_space<smem>>
    %401 = vector.broadcast %400 : f32 to vector<16x16xf32>
    %402 = arith.mulf %401, %387 : vector<16x16xf32>
    %403 = arith.addf %385, %402 : vector<16x16xf32>
    %c2_98 = arith.constant 2 : index
    %c1_99 = arith.constant 1 : index
    %c0_100 = arith.constant 0 : index
    %404 = vector.load %arg11[%c2_98, %c1_99, %c0_100] : memref<4x18x18xf32, #tpu.memory_space<vmem>>, vector<1x16x16xf32>
    %405 = vector.shape_cast %404 : vector<1x16x16xf32> to vector<16x16xf32>
    %c21 = arith.constant 21 : index
    %406 = memref.load %arg2[%c21] : memref<144xf32, #tpu.memory_space<smem>>
    %407 = vector.broadcast %406 : f32 to vector<16x16xf32>
    %408 = arith.mulf %407, %405 : vector<16x16xf32>
    %409 = arith.addf %391, %408 : vector<16x16xf32>
    %c57 = arith.constant 57 : index
    %410 = memref.load %arg2[%c57] : memref<144xf32, #tpu.memory_space<smem>>
    %411 = vector.broadcast %410 : f32 to vector<16x16xf32>
    %412 = arith.mulf %411, %405 : vector<16x16xf32>
    %413 = arith.addf %395, %412 : vector<16x16xf32>
    %c93 = arith.constant 93 : index
    %414 = memref.load %arg2[%c93] : memref<144xf32, #tpu.memory_space<smem>>
    %415 = vector.broadcast %414 : f32 to vector<16x16xf32>
    %416 = arith.mulf %415, %405 : vector<16x16xf32>
    %417 = arith.addf %399, %416 : vector<16x16xf32>
    %c129 = arith.constant 129 : index
    %418 = memref.load %arg2[%c129] : memref<144xf32, #tpu.memory_space<smem>>
    %419 = vector.broadcast %418 : f32 to vector<16x16xf32>
    %420 = arith.mulf %419, %405 : vector<16x16xf32>
    %421 = arith.addf %403, %420 : vector<16x16xf32>
    %c2_101 = arith.constant 2 : index
    %c1_102 = arith.constant 1 : index
    %c1_103 = arith.constant 1 : index
    %422 = vector.load %arg11[%c2_101, %c1_102, %c1_103] : memref<4x18x18xf32, #tpu.memory_space<vmem>>, vector<1x16x16xf32>
    %423 = vector.shape_cast %422 : vector<1x16x16xf32> to vector<16x16xf32>
    %c22 = arith.constant 22 : index
    %424 = memref.load %arg2[%c22] : memref<144xf32, #tpu.memory_space<smem>>
    %425 = vector.broadcast %424 : f32 to vector<16x16xf32>
    %426 = arith.mulf %425, %423 : vector<16x16xf32>
    %427 = arith.addf %409, %426 : vector<16x16xf32>
    %c58 = arith.constant 58 : index
    %428 = memref.load %arg2[%c58] : memref<144xf32, #tpu.memory_space<smem>>
    %429 = vector.broadcast %428 : f32 to vector<16x16xf32>
    %430 = arith.mulf %429, %423 : vector<16x16xf32>
    %431 = arith.addf %413, %430 : vector<16x16xf32>
    %c94 = arith.constant 94 : index
    %432 = memref.load %arg2[%c94] : memref<144xf32, #tpu.memory_space<smem>>
    %433 = vector.broadcast %432 : f32 to vector<16x16xf32>
    %434 = arith.mulf %433, %423 : vector<16x16xf32>
    %435 = arith.addf %417, %434 : vector<16x16xf32>
    %c130 = arith.constant 130 : index
    %436 = memref.load %arg2[%c130] : memref<144xf32, #tpu.memory_space<smem>>
    %437 = vector.broadcast %436 : f32 to vector<16x16xf32>
    %438 = arith.mulf %437, %423 : vector<16x16xf32>
    %439 = arith.addf %421, %438 : vector<16x16xf32>
    %c2_104 = arith.constant 2 : index
    %c1_105 = arith.constant 1 : index
    %c2_106 = arith.constant 2 : index
    %440 = vector.load %arg11[%c2_104, %c1_105, %c2_106] : memref<4x18x18xf32, #tpu.memory_space<vmem>>, vector<1x16x16xf32>
    %441 = vector.shape_cast %440 : vector<1x16x16xf32> to vector<16x16xf32>
    %c23 = arith.constant 23 : index
    %442 = memref.load %arg2[%c23] : memref<144xf32, #tpu.memory_space<smem>>
    %443 = vector.broadcast %442 : f32 to vector<16x16xf32>
    %444 = arith.mulf %443, %441 : vector<16x16xf32>
    %445 = arith.addf %427, %444 : vector<16x16xf32>
    %c59 = arith.constant 59 : index
    %446 = memref.load %arg2[%c59] : memref<144xf32, #tpu.memory_space<smem>>
    %447 = vector.broadcast %446 : f32 to vector<16x16xf32>
    %448 = arith.mulf %447, %441 : vector<16x16xf32>
    %449 = arith.addf %431, %448 : vector<16x16xf32>
    %c95 = arith.constant 95 : index
    %450 = memref.load %arg2[%c95] : memref<144xf32, #tpu.memory_space<smem>>
    %451 = vector.broadcast %450 : f32 to vector<16x16xf32>
    %452 = arith.mulf %451, %441 : vector<16x16xf32>
    %453 = arith.addf %435, %452 : vector<16x16xf32>
    %c131 = arith.constant 131 : index
    %454 = memref.load %arg2[%c131] : memref<144xf32, #tpu.memory_space<smem>>
    %455 = vector.broadcast %454 : f32 to vector<16x16xf32>
    %456 = arith.mulf %455, %441 : vector<16x16xf32>
    %457 = arith.addf %439, %456 : vector<16x16xf32>
    %c2_107 = arith.constant 2 : index
    %c2_108 = arith.constant 2 : index
    %c0_109 = arith.constant 0 : index
    %458 = vector.load %arg11[%c2_107, %c2_108, %c0_109] : memref<4x18x18xf32, #tpu.memory_space<vmem>>, vector<1x16x16xf32>
    %459 = vector.shape_cast %458 : vector<1x16x16xf32> to vector<16x16xf32>
    %c24 = arith.constant 24 : index
    %460 = memref.load %arg2[%c24] : memref<144xf32, #tpu.memory_space<smem>>
    %461 = vector.broadcast %460 : f32 to vector<16x16xf32>
    %462 = arith.mulf %461, %459 : vector<16x16xf32>
    %463 = arith.addf %445, %462 : vector<16x16xf32>
    %c60 = arith.constant 60 : index
    %464 = memref.load %arg2[%c60] : memref<144xf32, #tpu.memory_space<smem>>
    %465 = vector.broadcast %464 : f32 to vector<16x16xf32>
    %466 = arith.mulf %465, %459 : vector<16x16xf32>
    %467 = arith.addf %449, %466 : vector<16x16xf32>
    %c96 = arith.constant 96 : index
    %468 = memref.load %arg2[%c96] : memref<144xf32, #tpu.memory_space<smem>>
    %469 = vector.broadcast %468 : f32 to vector<16x16xf32>
    %470 = arith.mulf %469, %459 : vector<16x16xf32>
    %471 = arith.addf %453, %470 : vector<16x16xf32>
    %c132 = arith.constant 132 : index
    %472 = memref.load %arg2[%c132] : memref<144xf32, #tpu.memory_space<smem>>
    %473 = vector.broadcast %472 : f32 to vector<16x16xf32>
    %474 = arith.mulf %473, %459 : vector<16x16xf32>
    %475 = arith.addf %457, %474 : vector<16x16xf32>
    %c2_110 = arith.constant 2 : index
    %c2_111 = arith.constant 2 : index
    %c1_112 = arith.constant 1 : index
    %476 = vector.load %arg11[%c2_110, %c2_111, %c1_112] : memref<4x18x18xf32, #tpu.memory_space<vmem>>, vector<1x16x16xf32>
    %477 = vector.shape_cast %476 : vector<1x16x16xf32> to vector<16x16xf32>
    %c25 = arith.constant 25 : index
    %478 = memref.load %arg2[%c25] : memref<144xf32, #tpu.memory_space<smem>>
    %479 = vector.broadcast %478 : f32 to vector<16x16xf32>
    %480 = arith.mulf %479, %477 : vector<16x16xf32>
    %481 = arith.addf %463, %480 : vector<16x16xf32>
    %c61 = arith.constant 61 : index
    %482 = memref.load %arg2[%c61] : memref<144xf32, #tpu.memory_space<smem>>
    %483 = vector.broadcast %482 : f32 to vector<16x16xf32>
    %484 = arith.mulf %483, %477 : vector<16x16xf32>
    %485 = arith.addf %467, %484 : vector<16x16xf32>
    %c97 = arith.constant 97 : index
    %486 = memref.load %arg2[%c97] : memref<144xf32, #tpu.memory_space<smem>>
    %487 = vector.broadcast %486 : f32 to vector<16x16xf32>
    %488 = arith.mulf %487, %477 : vector<16x16xf32>
    %489 = arith.addf %471, %488 : vector<16x16xf32>
    %c133 = arith.constant 133 : index
    %490 = memref.load %arg2[%c133] : memref<144xf32, #tpu.memory_space<smem>>
    %491 = vector.broadcast %490 : f32 to vector<16x16xf32>
    %492 = arith.mulf %491, %477 : vector<16x16xf32>
    %493 = arith.addf %475, %492 : vector<16x16xf32>
    %c2_113 = arith.constant 2 : index
    %c2_114 = arith.constant 2 : index
    %c2_115 = arith.constant 2 : index
    %494 = vector.load %arg11[%c2_113, %c2_114, %c2_115] : memref<4x18x18xf32, #tpu.memory_space<vmem>>, vector<1x16x16xf32>
    %495 = vector.shape_cast %494 : vector<1x16x16xf32> to vector<16x16xf32>
    %c26 = arith.constant 26 : index
    %496 = memref.load %arg2[%c26] : memref<144xf32, #tpu.memory_space<smem>>
    %497 = vector.broadcast %496 : f32 to vector<16x16xf32>
    %498 = arith.mulf %497, %495 : vector<16x16xf32>
    %499 = arith.addf %481, %498 : vector<16x16xf32>
    %c62 = arith.constant 62 : index
    %500 = memref.load %arg2[%c62] : memref<144xf32, #tpu.memory_space<smem>>
    %501 = vector.broadcast %500 : f32 to vector<16x16xf32>
    %502 = arith.mulf %501, %495 : vector<16x16xf32>
    %503 = arith.addf %485, %502 : vector<16x16xf32>
    %c98 = arith.constant 98 : index
    %504 = memref.load %arg2[%c98] : memref<144xf32, #tpu.memory_space<smem>>
    %505 = vector.broadcast %504 : f32 to vector<16x16xf32>
    %506 = arith.mulf %505, %495 : vector<16x16xf32>
    %507 = arith.addf %489, %506 : vector<16x16xf32>
    %c134 = arith.constant 134 : index
    %508 = memref.load %arg2[%c134] : memref<144xf32, #tpu.memory_space<smem>>
    %509 = vector.broadcast %508 : f32 to vector<16x16xf32>
    %510 = arith.mulf %509, %495 : vector<16x16xf32>
    %511 = arith.addf %493, %510 : vector<16x16xf32>
    %c3_116 = arith.constant 3 : index
    %c0_117 = arith.constant 0 : index
    %c0_118 = arith.constant 0 : index
    %512 = vector.load %arg11[%c3_116, %c0_117, %c0_118] : memref<4x18x18xf32, #tpu.memory_space<vmem>>, vector<1x16x16xf32>
    %513 = vector.shape_cast %512 : vector<1x16x16xf32> to vector<16x16xf32>
    %c27 = arith.constant 27 : index
    %514 = memref.load %arg2[%c27] : memref<144xf32, #tpu.memory_space<smem>>
    %515 = vector.broadcast %514 : f32 to vector<16x16xf32>
    %516 = arith.mulf %515, %513 : vector<16x16xf32>
    %517 = arith.addf %499, %516 : vector<16x16xf32>
    %c63 = arith.constant 63 : index
    %518 = memref.load %arg2[%c63] : memref<144xf32, #tpu.memory_space<smem>>
    %519 = vector.broadcast %518 : f32 to vector<16x16xf32>
    %520 = arith.mulf %519, %513 : vector<16x16xf32>
    %521 = arith.addf %503, %520 : vector<16x16xf32>
    %c99 = arith.constant 99 : index
    %522 = memref.load %arg2[%c99] : memref<144xf32, #tpu.memory_space<smem>>
    %523 = vector.broadcast %522 : f32 to vector<16x16xf32>
    %524 = arith.mulf %523, %513 : vector<16x16xf32>
    %525 = arith.addf %507, %524 : vector<16x16xf32>
    %c135 = arith.constant 135 : index
    %526 = memref.load %arg2[%c135] : memref<144xf32, #tpu.memory_space<smem>>
    %527 = vector.broadcast %526 : f32 to vector<16x16xf32>
    %528 = arith.mulf %527, %513 : vector<16x16xf32>
    %529 = arith.addf %511, %528 : vector<16x16xf32>
    %c3_119 = arith.constant 3 : index
    %c0_120 = arith.constant 0 : index
    %c1_121 = arith.constant 1 : index
    %530 = vector.load %arg11[%c3_119, %c0_120, %c1_121] : memref<4x18x18xf32, #tpu.memory_space<vmem>>, vector<1x16x16xf32>
    %531 = vector.shape_cast %530 : vector<1x16x16xf32> to vector<16x16xf32>
    %c28 = arith.constant 28 : index
    %532 = memref.load %arg2[%c28] : memref<144xf32, #tpu.memory_space<smem>>
    %533 = vector.broadcast %532 : f32 to vector<16x16xf32>
    %534 = arith.mulf %533, %531 : vector<16x16xf32>
    %535 = arith.addf %517, %534 : vector<16x16xf32>
    %c64 = arith.constant 64 : index
    %536 = memref.load %arg2[%c64] : memref<144xf32, #tpu.memory_space<smem>>
    %537 = vector.broadcast %536 : f32 to vector<16x16xf32>
    %538 = arith.mulf %537, %531 : vector<16x16xf32>
    %539 = arith.addf %521, %538 : vector<16x16xf32>
    %c100 = arith.constant 100 : index
    %540 = memref.load %arg2[%c100] : memref<144xf32, #tpu.memory_space<smem>>
    %541 = vector.broadcast %540 : f32 to vector<16x16xf32>
    %542 = arith.mulf %541, %531 : vector<16x16xf32>
    %543 = arith.addf %525, %542 : vector<16x16xf32>
    %c136 = arith.constant 136 : index
    %544 = memref.load %arg2[%c136] : memref<144xf32, #tpu.memory_space<smem>>
    %545 = vector.broadcast %544 : f32 to vector<16x16xf32>
    %546 = arith.mulf %545, %531 : vector<16x16xf32>
    %547 = arith.addf %529, %546 : vector<16x16xf32>
    %c3_122 = arith.constant 3 : index
    %c0_123 = arith.constant 0 : index
    %c2_124 = arith.constant 2 : index
    %548 = vector.load %arg11[%c3_122, %c0_123, %c2_124] : memref<4x18x18xf32, #tpu.memory_space<vmem>>, vector<1x16x16xf32>
    %549 = vector.shape_cast %548 : vector<1x16x16xf32> to vector<16x16xf32>
    %c29 = arith.constant 29 : index
    %550 = memref.load %arg2[%c29] : memref<144xf32, #tpu.memory_space<smem>>
    %551 = vector.broadcast %550 : f32 to vector<16x16xf32>
    %552 = arith.mulf %551, %549 : vector<16x16xf32>
    %553 = arith.addf %535, %552 : vector<16x16xf32>
    %c65 = arith.constant 65 : index
    %554 = memref.load %arg2[%c65] : memref<144xf32, #tpu.memory_space<smem>>
    %555 = vector.broadcast %554 : f32 to vector<16x16xf32>
    %556 = arith.mulf %555, %549 : vector<16x16xf32>
    %557 = arith.addf %539, %556 : vector<16x16xf32>
    %c101 = arith.constant 101 : index
    %558 = memref.load %arg2[%c101] : memref<144xf32, #tpu.memory_space<smem>>
    %559 = vector.broadcast %558 : f32 to vector<16x16xf32>
    %560 = arith.mulf %559, %549 : vector<16x16xf32>
    %561 = arith.addf %543, %560 : vector<16x16xf32>
    %c137 = arith.constant 137 : index
    %562 = memref.load %arg2[%c137] : memref<144xf32, #tpu.memory_space<smem>>
    %563 = vector.broadcast %562 : f32 to vector<16x16xf32>
    %564 = arith.mulf %563, %549 : vector<16x16xf32>
    %565 = arith.addf %547, %564 : vector<16x16xf32>
    %c3_125 = arith.constant 3 : index
    %c1_126 = arith.constant 1 : index
    %c0_127 = arith.constant 0 : index
    %566 = vector.load %arg11[%c3_125, %c1_126, %c0_127] : memref<4x18x18xf32, #tpu.memory_space<vmem>>, vector<1x16x16xf32>
    %567 = vector.shape_cast %566 : vector<1x16x16xf32> to vector<16x16xf32>
    %c30 = arith.constant 30 : index
    %568 = memref.load %arg2[%c30] : memref<144xf32, #tpu.memory_space<smem>>
    %569 = vector.broadcast %568 : f32 to vector<16x16xf32>
    %570 = arith.mulf %569, %567 : vector<16x16xf32>
    %571 = arith.addf %553, %570 : vector<16x16xf32>
    %c66 = arith.constant 66 : index
    %572 = memref.load %arg2[%c66] : memref<144xf32, #tpu.memory_space<smem>>
    %573 = vector.broadcast %572 : f32 to vector<16x16xf32>
    %574 = arith.mulf %573, %567 : vector<16x16xf32>
    %575 = arith.addf %557, %574 : vector<16x16xf32>
    %c102 = arith.constant 102 : index
    %576 = memref.load %arg2[%c102] : memref<144xf32, #tpu.memory_space<smem>>
    %577 = vector.broadcast %576 : f32 to vector<16x16xf32>
    %578 = arith.mulf %577, %567 : vector<16x16xf32>
    %579 = arith.addf %561, %578 : vector<16x16xf32>
    %c138 = arith.constant 138 : index
    %580 = memref.load %arg2[%c138] : memref<144xf32, #tpu.memory_space<smem>>
    %581 = vector.broadcast %580 : f32 to vector<16x16xf32>
    %582 = arith.mulf %581, %567 : vector<16x16xf32>
    %583 = arith.addf %565, %582 : vector<16x16xf32>
    %c3_128 = arith.constant 3 : index
    %c1_129 = arith.constant 1 : index
    %c1_130 = arith.constant 1 : index
    %584 = vector.load %arg11[%c3_128, %c1_129, %c1_130] : memref<4x18x18xf32, #tpu.memory_space<vmem>>, vector<1x16x16xf32>
    %585 = vector.shape_cast %584 : vector<1x16x16xf32> to vector<16x16xf32>
    %c31 = arith.constant 31 : index
    %586 = memref.load %arg2[%c31] : memref<144xf32, #tpu.memory_space<smem>>
    %587 = vector.broadcast %586 : f32 to vector<16x16xf32>
    %588 = arith.mulf %587, %585 : vector<16x16xf32>
    %589 = arith.addf %571, %588 : vector<16x16xf32>
    %c67 = arith.constant 67 : index
    %590 = memref.load %arg2[%c67] : memref<144xf32, #tpu.memory_space<smem>>
    %591 = vector.broadcast %590 : f32 to vector<16x16xf32>
    %592 = arith.mulf %591, %585 : vector<16x16xf32>
    %593 = arith.addf %575, %592 : vector<16x16xf32>
    %c103 = arith.constant 103 : index
    %594 = memref.load %arg2[%c103] : memref<144xf32, #tpu.memory_space<smem>>
    %595 = vector.broadcast %594 : f32 to vector<16x16xf32>
    %596 = arith.mulf %595, %585 : vector<16x16xf32>
    %597 = arith.addf %579, %596 : vector<16x16xf32>
    %c139 = arith.constant 139 : index
    %598 = memref.load %arg2[%c139] : memref<144xf32, #tpu.memory_space<smem>>
    %599 = vector.broadcast %598 : f32 to vector<16x16xf32>
    %600 = arith.mulf %599, %585 : vector<16x16xf32>
    %601 = arith.addf %583, %600 : vector<16x16xf32>
    %c3_131 = arith.constant 3 : index
    %c1_132 = arith.constant 1 : index
    %c2_133 = arith.constant 2 : index
    %602 = vector.load %arg11[%c3_131, %c1_132, %c2_133] : memref<4x18x18xf32, #tpu.memory_space<vmem>>, vector<1x16x16xf32>
    %603 = vector.shape_cast %602 : vector<1x16x16xf32> to vector<16x16xf32>
    %c32 = arith.constant 32 : index
    %604 = memref.load %arg2[%c32] : memref<144xf32, #tpu.memory_space<smem>>
    %605 = vector.broadcast %604 : f32 to vector<16x16xf32>
    %606 = arith.mulf %605, %603 : vector<16x16xf32>
    %607 = arith.addf %589, %606 : vector<16x16xf32>
    %c68 = arith.constant 68 : index
    %608 = memref.load %arg2[%c68] : memref<144xf32, #tpu.memory_space<smem>>
    %609 = vector.broadcast %608 : f32 to vector<16x16xf32>
    %610 = arith.mulf %609, %603 : vector<16x16xf32>
    %611 = arith.addf %593, %610 : vector<16x16xf32>
    %c104 = arith.constant 104 : index
    %612 = memref.load %arg2[%c104] : memref<144xf32, #tpu.memory_space<smem>>
    %613 = vector.broadcast %612 : f32 to vector<16x16xf32>
    %614 = arith.mulf %613, %603 : vector<16x16xf32>
    %615 = arith.addf %597, %614 : vector<16x16xf32>
    %c140 = arith.constant 140 : index
    %616 = memref.load %arg2[%c140] : memref<144xf32, #tpu.memory_space<smem>>
    %617 = vector.broadcast %616 : f32 to vector<16x16xf32>
    %618 = arith.mulf %617, %603 : vector<16x16xf32>
    %619 = arith.addf %601, %618 : vector<16x16xf32>
    %c3_134 = arith.constant 3 : index
    %c2_135 = arith.constant 2 : index
    %c0_136 = arith.constant 0 : index
    %620 = vector.load %arg11[%c3_134, %c2_135, %c0_136] : memref<4x18x18xf32, #tpu.memory_space<vmem>>, vector<1x16x16xf32>
    %621 = vector.shape_cast %620 : vector<1x16x16xf32> to vector<16x16xf32>
    %c33 = arith.constant 33 : index
    %622 = memref.load %arg2[%c33] : memref<144xf32, #tpu.memory_space<smem>>
    %623 = vector.broadcast %622 : f32 to vector<16x16xf32>
    %624 = arith.mulf %623, %621 : vector<16x16xf32>
    %625 = arith.addf %607, %624 : vector<16x16xf32>
    %c69 = arith.constant 69 : index
    %626 = memref.load %arg2[%c69] : memref<144xf32, #tpu.memory_space<smem>>
    %627 = vector.broadcast %626 : f32 to vector<16x16xf32>
    %628 = arith.mulf %627, %621 : vector<16x16xf32>
    %629 = arith.addf %611, %628 : vector<16x16xf32>
    %c105 = arith.constant 105 : index
    %630 = memref.load %arg2[%c105] : memref<144xf32, #tpu.memory_space<smem>>
    %631 = vector.broadcast %630 : f32 to vector<16x16xf32>
    %632 = arith.mulf %631, %621 : vector<16x16xf32>
    %633 = arith.addf %615, %632 : vector<16x16xf32>
    %c141 = arith.constant 141 : index
    %634 = memref.load %arg2[%c141] : memref<144xf32, #tpu.memory_space<smem>>
    %635 = vector.broadcast %634 : f32 to vector<16x16xf32>
    %636 = arith.mulf %635, %621 : vector<16x16xf32>
    %637 = arith.addf %619, %636 : vector<16x16xf32>
    %c3_137 = arith.constant 3 : index
    %c2_138 = arith.constant 2 : index
    %c1_139 = arith.constant 1 : index
    %638 = vector.load %arg11[%c3_137, %c2_138, %c1_139] : memref<4x18x18xf32, #tpu.memory_space<vmem>>, vector<1x16x16xf32>
    %639 = vector.shape_cast %638 : vector<1x16x16xf32> to vector<16x16xf32>
    %c34 = arith.constant 34 : index
    %640 = memref.load %arg2[%c34] : memref<144xf32, #tpu.memory_space<smem>>
    %641 = vector.broadcast %640 : f32 to vector<16x16xf32>
    %642 = arith.mulf %641, %639 : vector<16x16xf32>
    %643 = arith.addf %625, %642 : vector<16x16xf32>
    %c70 = arith.constant 70 : index
    %644 = memref.load %arg2[%c70] : memref<144xf32, #tpu.memory_space<smem>>
    %645 = vector.broadcast %644 : f32 to vector<16x16xf32>
    %646 = arith.mulf %645, %639 : vector<16x16xf32>
    %647 = arith.addf %629, %646 : vector<16x16xf32>
    %c106 = arith.constant 106 : index
    %648 = memref.load %arg2[%c106] : memref<144xf32, #tpu.memory_space<smem>>
    %649 = vector.broadcast %648 : f32 to vector<16x16xf32>
    %650 = arith.mulf %649, %639 : vector<16x16xf32>
    %651 = arith.addf %633, %650 : vector<16x16xf32>
    %c142 = arith.constant 142 : index
    %652 = memref.load %arg2[%c142] : memref<144xf32, #tpu.memory_space<smem>>
    %653 = vector.broadcast %652 : f32 to vector<16x16xf32>
    %654 = arith.mulf %653, %639 : vector<16x16xf32>
    %655 = arith.addf %637, %654 : vector<16x16xf32>
    %c3_140 = arith.constant 3 : index
    %c2_141 = arith.constant 2 : index
    %c2_142 = arith.constant 2 : index
    %656 = vector.load %arg11[%c3_140, %c2_141, %c2_142] : memref<4x18x18xf32, #tpu.memory_space<vmem>>, vector<1x16x16xf32>
    %657 = vector.shape_cast %656 : vector<1x16x16xf32> to vector<16x16xf32>
    %c35 = arith.constant 35 : index
    %658 = memref.load %arg2[%c35] : memref<144xf32, #tpu.memory_space<smem>>
    %659 = vector.broadcast %658 : f32 to vector<16x16xf32>
    %660 = arith.mulf %659, %657 : vector<16x16xf32>
    %661 = arith.addf %643, %660 : vector<16x16xf32>
    %c71 = arith.constant 71 : index
    %662 = memref.load %arg2[%c71] : memref<144xf32, #tpu.memory_space<smem>>
    %663 = vector.broadcast %662 : f32 to vector<16x16xf32>
    %664 = arith.mulf %663, %657 : vector<16x16xf32>
    %665 = arith.addf %647, %664 : vector<16x16xf32>
    %c107 = arith.constant 107 : index
    %666 = memref.load %arg2[%c107] : memref<144xf32, #tpu.memory_space<smem>>
    %667 = vector.broadcast %666 : f32 to vector<16x16xf32>
    %668 = arith.mulf %667, %657 : vector<16x16xf32>
    %669 = arith.addf %651, %668 : vector<16x16xf32>
    %c143 = arith.constant 143 : index
    %670 = memref.load %arg2[%c143] : memref<144xf32, #tpu.memory_space<smem>>
    %671 = vector.broadcast %670 : f32 to vector<16x16xf32>
    %672 = arith.mulf %671, %657 : vector<16x16xf32>
    %673 = arith.addf %655, %672 : vector<16x16xf32>
    %c0_143 = arith.constant 0 : index
    %674 = memref.load %arg3[%c0_143] : memref<4xf32, #tpu.memory_space<smem>>
    %675 = vector.broadcast %674 : f32 to vector<16x16xf32>
    %676 = arith.addf %661, %675 : vector<16x16xf32>
    %c1_144 = arith.constant 1 : index
    %677 = memref.load %arg3[%c1_144] : memref<4xf32, #tpu.memory_space<smem>>
    %678 = vector.broadcast %677 : f32 to vector<16x16xf32>
    %679 = arith.addf %665, %678 : vector<16x16xf32>
    %c2_145 = arith.constant 2 : index
    %680 = memref.load %arg3[%c2_145] : memref<4xf32, #tpu.memory_space<smem>>
    %681 = vector.broadcast %680 : f32 to vector<16x16xf32>
    %682 = arith.addf %669, %681 : vector<16x16xf32>
    %c3_146 = arith.constant 3 : index
    %683 = memref.load %arg3[%c3_146] : memref<4xf32, #tpu.memory_space<smem>>
    %684 = vector.broadcast %683 : f32 to vector<16x16xf32>
    %685 = arith.addf %673, %684 : vector<16x16xf32>
    %cst_147 = arith.constant 0.000000e+00 : f32
    %686 = vector.broadcast %cst_147 : f32 to vector<1x1xf32>
    %cst_148 = arith.constant dense<0.000000e+00> : vector<16xf32>
    %687 = vector.multi_reduction <add>, %676, %cst_148 [1] : vector<16x16xf32> to vector<16xf32>
    %688 = vector.shape_cast %687 : vector<16xf32> to vector<16x1xf32>
    %cst_149 = arith.constant dense<0.000000e+00> : vector<1xf32>
    %689 = vector.multi_reduction <add>, %688, %cst_149 [0] : vector<16x1xf32> to vector<1xf32>
    %690 = vector.shape_cast %689 : vector<1xf32> to vector<1x1xf32>
    %691 = arith.addf %686, %690 : vector<1x1xf32>
    %cst_150 = arith.constant dense<0.000000e+00> : vector<16xf32>
    %692 = vector.multi_reduction <add>, %679, %cst_150 [1] : vector<16x16xf32> to vector<16xf32>
    %693 = vector.shape_cast %692 : vector<16xf32> to vector<16x1xf32>
    %cst_151 = arith.constant dense<0.000000e+00> : vector<1xf32>
    %694 = vector.multi_reduction <add>, %693, %cst_151 [0] : vector<16x1xf32> to vector<1xf32>
    %695 = vector.shape_cast %694 : vector<1xf32> to vector<1x1xf32>
    %696 = arith.addf %691, %695 : vector<1x1xf32>
    %cst_152 = arith.constant dense<0.000000e+00> : vector<16xf32>
    %697 = vector.multi_reduction <add>, %682, %cst_152 [1] : vector<16x16xf32> to vector<16xf32>
    %698 = vector.shape_cast %697 : vector<16xf32> to vector<16x1xf32>
    %cst_153 = arith.constant dense<0.000000e+00> : vector<1xf32>
    %699 = vector.multi_reduction <add>, %698, %cst_153 [0] : vector<16x1xf32> to vector<1xf32>
    %700 = vector.shape_cast %699 : vector<1xf32> to vector<1x1xf32>
    %701 = arith.addf %696, %700 : vector<1x1xf32>
    %cst_154 = arith.constant dense<0.000000e+00> : vector<16xf32>
    %702 = vector.multi_reduction <add>, %685, %cst_154 [1] : vector<16x16xf32> to vector<16xf32>
    %703 = vector.shape_cast %702 : vector<16xf32> to vector<16x1xf32>
    %cst_155 = arith.constant dense<0.000000e+00> : vector<1xf32>
    %704 = vector.multi_reduction <add>, %703, %cst_155 [0] : vector<16x1xf32> to vector<1xf32>
    %705 = vector.shape_cast %704 : vector<1xf32> to vector<1x1xf32>
    %706 = arith.addf %701, %705 : vector<1x1xf32>
    %cst_156 = arith.constant 9.765625E-4 : f32
    %707 = vector.broadcast %cst_156 : f32 to vector<1x1xf32>
    %708 = arith.mulf %706, %707 : vector<1x1xf32>
    %cst_157 = arith.constant 0.000000e+00 : f32
    %709 = vector.broadcast %cst_157 : f32 to vector<1x1xf32>
    %710 = vector.broadcast %708 : vector<1x1xf32> to vector<16x16xf32>
    %711 = arith.subf %676, %710 : vector<16x16xf32>
    %712 = arith.mulf %711, %711 : vector<16x16xf32>
    %cst_158 = arith.constant dense<0.000000e+00> : vector<16xf32>
    %713 = vector.multi_reduction <add>, %712, %cst_158 [1] : vector<16x16xf32> to vector<16xf32>
    %714 = vector.shape_cast %713 : vector<16xf32> to vector<16x1xf32>
    %cst_159 = arith.constant dense<0.000000e+00> : vector<1xf32>
    %715 = vector.multi_reduction <add>, %714, %cst_159 [0] : vector<16x1xf32> to vector<1xf32>
    %716 = vector.shape_cast %715 : vector<1xf32> to vector<1x1xf32>
    %717 = arith.addf %709, %716 : vector<1x1xf32>
    %718 = vector.broadcast %708 : vector<1x1xf32> to vector<16x16xf32>
    %719 = arith.subf %679, %718 : vector<16x16xf32>
    %720 = arith.mulf %719, %719 : vector<16x16xf32>
    %cst_160 = arith.constant dense<0.000000e+00> : vector<16xf32>
    %721 = vector.multi_reduction <add>, %720, %cst_160 [1] : vector<16x16xf32> to vector<16xf32>
    %722 = vector.shape_cast %721 : vector<16xf32> to vector<16x1xf32>
    %cst_161 = arith.constant dense<0.000000e+00> : vector<1xf32>
    %723 = vector.multi_reduction <add>, %722, %cst_161 [0] : vector<16x1xf32> to vector<1xf32>
    %724 = vector.shape_cast %723 : vector<1xf32> to vector<1x1xf32>
    %725 = arith.addf %717, %724 : vector<1x1xf32>
    %726 = vector.broadcast %708 : vector<1x1xf32> to vector<16x16xf32>
    %727 = arith.subf %682, %726 : vector<16x16xf32>
    %728 = arith.mulf %727, %727 : vector<16x16xf32>
    %cst_162 = arith.constant dense<0.000000e+00> : vector<16xf32>
    %729 = vector.multi_reduction <add>, %728, %cst_162 [1] : vector<16x16xf32> to vector<16xf32>
    %730 = vector.shape_cast %729 : vector<16xf32> to vector<16x1xf32>
    %cst_163 = arith.constant dense<0.000000e+00> : vector<1xf32>
    %731 = vector.multi_reduction <add>, %730, %cst_163 [0] : vector<16x1xf32> to vector<1xf32>
    %732 = vector.shape_cast %731 : vector<1xf32> to vector<1x1xf32>
    %733 = arith.addf %725, %732 : vector<1x1xf32>
    %734 = vector.broadcast %708 : vector<1x1xf32> to vector<16x16xf32>
    %735 = arith.subf %685, %734 : vector<16x16xf32>
    %736 = arith.mulf %735, %735 : vector<16x16xf32>
    %cst_164 = arith.constant dense<0.000000e+00> : vector<16xf32>
    %737 = vector.multi_reduction <add>, %736, %cst_164 [1] : vector<16x16xf32> to vector<16xf32>
    %738 = vector.shape_cast %737 : vector<16xf32> to vector<16x1xf32>
    %cst_165 = arith.constant dense<0.000000e+00> : vector<1xf32>
    %739 = vector.multi_reduction <add>, %738, %cst_165 [0] : vector<16x1xf32> to vector<1xf32>
    %740 = vector.shape_cast %739 : vector<1xf32> to vector<1x1xf32>
    %741 = arith.addf %733, %740 : vector<1x1xf32>
    %cst_166 = arith.constant 9.765625E-4 : f32
    %742 = vector.broadcast %cst_166 : f32 to vector<1x1xf32>
    %743 = arith.mulf %741, %742 : vector<1x1xf32>
    %cst_167 = arith.constant 9.99999974E-6 : f32
    %744 = vector.broadcast %cst_167 : f32 to vector<1x1xf32>
    %745 = arith.addf %743, %744 : vector<1x1xf32>
    %746 = math.rsqrt %745 : vector<1x1xf32>
    %747 = vector.broadcast %708 : vector<1x1xf32> to vector<16x16xf32>
    %748 = arith.subf %676, %747 : vector<16x16xf32>
    %749 = vector.broadcast %746 : vector<1x1xf32> to vector<16x16xf32>
    %750 = arith.mulf %748, %749 : vector<16x16xf32>
    %c0_168 = arith.constant 0 : index
    %751 = memref.load %arg4[%c0_168] : memref<4xf32, #tpu.memory_space<smem>>
    %752 = vector.broadcast %751 : f32 to vector<16x16xf32>
    %753 = arith.mulf %750, %752 : vector<16x16xf32>
    %c0_169 = arith.constant 0 : index
    %754 = memref.load %arg5[%c0_169] : memref<4xf32, #tpu.memory_space<smem>>
    %755 = vector.broadcast %754 : f32 to vector<16x16xf32>
    %756 = arith.addf %753, %755 : vector<16x16xf32>
    %cst_170 = arith.constant 0.000000e+00 : f32
    %757 = vector.broadcast %cst_170 : f32 to vector<16x16xf32>
    %758 = arith.cmpf ogt, %756, %757 : vector<16x16xf32>
    %cst_171 = arith.constant 2.000000e-01 : f32
    %759 = vector.broadcast %cst_171 : f32 to vector<16x16xf32>
    %760 = arith.mulf %759, %756 : vector<16x16xf32>
    %761 = arith.select %758, %756, %760 : vector<16x16xi1>, vector<16x16xf32>
    %762 = vector.broadcast %708 : vector<1x1xf32> to vector<16x16xf32>
    %763 = arith.subf %679, %762 : vector<16x16xf32>
    %764 = vector.broadcast %746 : vector<1x1xf32> to vector<16x16xf32>
    %765 = arith.mulf %763, %764 : vector<16x16xf32>
    %c1_172 = arith.constant 1 : index
    %766 = memref.load %arg4[%c1_172] : memref<4xf32, #tpu.memory_space<smem>>
    %767 = vector.broadcast %766 : f32 to vector<16x16xf32>
    %768 = arith.mulf %765, %767 : vector<16x16xf32>
    %c1_173 = arith.constant 1 : index
    %769 = memref.load %arg5[%c1_173] : memref<4xf32, #tpu.memory_space<smem>>
    %770 = vector.broadcast %769 : f32 to vector<16x16xf32>
    %771 = arith.addf %768, %770 : vector<16x16xf32>
    %cst_174 = arith.constant 0.000000e+00 : f32
    %772 = vector.broadcast %cst_174 : f32 to vector<16x16xf32>
    %773 = arith.cmpf ogt, %771, %772 : vector<16x16xf32>
    %cst_175 = arith.constant 2.000000e-01 : f32
    %774 = vector.broadcast %cst_175 : f32 to vector<16x16xf32>
    %775 = arith.mulf %774, %771 : vector<16x16xf32>
    %776 = arith.select %773, %771, %775 : vector<16x16xi1>, vector<16x16xf32>
    %777 = vector.broadcast %708 : vector<1x1xf32> to vector<16x16xf32>
    %778 = arith.subf %682, %777 : vector<16x16xf32>
    %779 = vector.broadcast %746 : vector<1x1xf32> to vector<16x16xf32>
    %780 = arith.mulf %778, %779 : vector<16x16xf32>
    %c2_176 = arith.constant 2 : index
    %781 = memref.load %arg4[%c2_176] : memref<4xf32, #tpu.memory_space<smem>>
    %782 = vector.broadcast %781 : f32 to vector<16x16xf32>
    %783 = arith.mulf %780, %782 : vector<16x16xf32>
    %c2_177 = arith.constant 2 : index
    %784 = memref.load %arg5[%c2_177] : memref<4xf32, #tpu.memory_space<smem>>
    %785 = vector.broadcast %784 : f32 to vector<16x16xf32>
    %786 = arith.addf %783, %785 : vector<16x16xf32>
    %cst_178 = arith.constant 0.000000e+00 : f32
    %787 = vector.broadcast %cst_178 : f32 to vector<16x16xf32>
    %788 = arith.cmpf ogt, %786, %787 : vector<16x16xf32>
    %cst_179 = arith.constant 2.000000e-01 : f32
    %789 = vector.broadcast %cst_179 : f32 to vector<16x16xf32>
    %790 = arith.mulf %789, %786 : vector<16x16xf32>
    %791 = arith.select %788, %786, %790 : vector<16x16xi1>, vector<16x16xf32>
    %792 = vector.broadcast %708 : vector<1x1xf32> to vector<16x16xf32>
    %793 = arith.subf %685, %792 : vector<16x16xf32>
    %794 = vector.broadcast %746 : vector<1x1xf32> to vector<16x16xf32>
    %795 = arith.mulf %793, %794 : vector<16x16xf32>
    %c3_180 = arith.constant 3 : index
    %796 = memref.load %arg4[%c3_180] : memref<4xf32, #tpu.memory_space<smem>>
    %797 = vector.broadcast %796 : f32 to vector<16x16xf32>
    %798 = arith.mulf %795, %797 : vector<16x16xf32>
    %c3_181 = arith.constant 3 : index
    %799 = memref.load %arg5[%c3_181] : memref<4xf32, #tpu.memory_space<smem>>
    %800 = vector.broadcast %799 : f32 to vector<16x16xf32>
    %801 = arith.addf %798, %800 : vector<16x16xf32>
    %cst_182 = arith.constant 0.000000e+00 : f32
    %802 = vector.broadcast %cst_182 : f32 to vector<16x16xf32>
    %803 = arith.cmpf ogt, %801, %802 : vector<16x16xf32>
    %cst_183 = arith.constant 2.000000e-01 : f32
    %804 = vector.broadcast %cst_183 : f32 to vector<16x16xf32>
    %805 = arith.mulf %804, %801 : vector<16x16xf32>
    %806 = arith.select %803, %801, %805 : vector<16x16xi1>, vector<16x16xf32>
    %c0_184 = arith.constant 0 : index
    %c1_185 = arith.constant 1 : index
    %c1_186 = arith.constant 1 : index
    %807 = vector.load %arg11[%c0_184, %c1_185, %c1_186] : memref<4x18x18xf32, #tpu.memory_space<vmem>>, vector<1x16x16xf32>
    %808 = vector.shape_cast %807 : vector<1x16x16xf32> to vector<16x16xf32>
    %809 = vector.shape_cast %761 : vector<16x16xf32> to vector<1x16x16xf32>
    tpu.vector_store %arg11[%c0_184, %c1_185, %c1_186], %809 {strides = array<i32>} : memref<4x18x18xf32, #tpu.memory_space<vmem>>, vector<1x16x16xf32>,
    %c1_187 = arith.constant 1 : index
    %c1_188 = arith.constant 1 : index
    %c1_189 = arith.constant 1 : index
    %810 = vector.load %arg11[%c1_187, %c1_188, %c1_189] : memref<4x18x18xf32, #tpu.memory_space<vmem>>, vector<1x16x16xf32>
    %811 = vector.shape_cast %810 : vector<1x16x16xf32> to vector<16x16xf32>
    %812 = vector.shape_cast %776 : vector<16x16xf32> to vector<1x16x16xf32>
    tpu.vector_store %arg11[%c1_187, %c1_188, %c1_189], %812 {strides = array<i32>} : memref<4x18x18xf32, #tpu.memory_space<vmem>>, vector<1x16x16xf32>,
    %c2_190 = arith.constant 2 : index
    %c1_191 = arith.constant 1 : index
    %c1_192 = arith.constant 1 : index
    %813 = vector.load %arg11[%c2_190, %c1_191, %c1_192] : memref<4x18x18xf32, #tpu.memory_space<vmem>>, vector<1x16x16xf32>
    %814 = vector.shape_cast %813 : vector<1x16x16xf32> to vector<16x16xf32>
    %815 = vector.shape_cast %791 : vector<16x16xf32> to vector<1x16x16xf32>
    tpu.vector_store %arg11[%c2_190, %c1_191, %c1_192], %815 {strides = array<i32>} : memref<4x18x18xf32, #tpu.memory_space<vmem>>, vector<1x16x16xf32>,
    %c3_193 = arith.constant 3 : index
    %c1_194 = arith.constant 1 : index
    %c1_195 = arith.constant 1 : index
    %816 = vector.load %arg11[%c3_193, %c1_194, %c1_195] : memref<4x18x18xf32, #tpu.memory_space<vmem>>, vector<1x16x16xf32>
    %817 = vector.shape_cast %816 : vector<1x16x16xf32> to vector<16x16xf32>
    %818 = vector.shape_cast %806 : vector<16x16xf32> to vector<1x16x16xf32>
    tpu.vector_store %arg11[%c3_193, %c1_194, %c1_195], %818 {strides = array<i32>} : memref<4x18x18xf32, #tpu.memory_space<vmem>>, vector<1x16x16xf32>,
    %cst_196 = arith.constant 0.000000e+00 : f32
    %819 = vector.broadcast %cst_196 : f32 to vector<16x16xf32>
    %cst_197 = arith.constant 0.000000e+00 : f32
    %820 = vector.broadcast %cst_197 : f32 to vector<16x16xf32>
    %cst_198 = arith.constant 0.000000e+00 : f32
    %821 = vector.broadcast %cst_198 : f32 to vector<16x16xf32>
    %cst_199 = arith.constant 0.000000e+00 : f32
    %822 = vector.broadcast %cst_199 : f32 to vector<16x16xf32>
    %c0_200 = arith.constant 0 : index
    %c0_201 = arith.constant 0 : index
    %c0_202 = arith.constant 0 : index
    %823 = vector.load %arg11[%c0_200, %c0_201, %c0_202] : memref<4x18x18xf32, #tpu.memory_space<vmem>>, vector<1x16x16xf32>
    %824 = vector.shape_cast %823 : vector<1x16x16xf32> to vector<16x16xf32>
    %c0_203 = arith.constant 0 : index
    %825 = memref.load %arg6[%c0_203] : memref<144xf32, #tpu.memory_space<smem>>
    %826 = vector.broadcast %825 : f32 to vector<16x16xf32>
    %827 = arith.mulf %826, %824 : vector<16x16xf32>
    %828 = arith.addf %819, %827 : vector<16x16xf32>
    %c36_204 = arith.constant 36 : index
    %829 = memref.load %arg6[%c36_204] : memref<144xf32, #tpu.memory_space<smem>>
    %830 = vector.broadcast %829 : f32 to vector<16x16xf32>
    %831 = arith.mulf %830, %824 : vector<16x16xf32>
    %832 = arith.addf %820, %831 : vector<16x16xf32>
    %c72_205 = arith.constant 72 : index
    %833 = memref.load %arg6[%c72_205] : memref<144xf32, #tpu.memory_space<smem>>
    %834 = vector.broadcast %833 : f32 to vector<16x16xf32>
    %835 = arith.mulf %834, %824 : vector<16x16xf32>
    %836 = arith.addf %821, %835 : vector<16x16xf32>
    %c108_206 = arith.constant 108 : index
    %837 = memref.load %arg6[%c108_206] : memref<144xf32, #tpu.memory_space<smem>>
    %838 = vector.broadcast %837 : f32 to vector<16x16xf32>
    %839 = arith.mulf %838, %824 : vector<16x16xf32>
    %840 = arith.addf %822, %839 : vector<16x16xf32>
    %c0_207 = arith.constant 0 : index
    %c0_208 = arith.constant 0 : index
    %c1_209 = arith.constant 1 : index
    %841 = vector.load %arg11[%c0_207, %c0_208, %c1_209] : memref<4x18x18xf32, #tpu.memory_space<vmem>>, vector<1x16x16xf32>
    %842 = vector.shape_cast %841 : vector<1x16x16xf32> to vector<16x16xf32>
    %c1_210 = arith.constant 1 : index
    %843 = memref.load %arg6[%c1_210] : memref<144xf32, #tpu.memory_space<smem>>
    %844 = vector.broadcast %843 : f32 to vector<16x16xf32>
    %845 = arith.mulf %844, %842 : vector<16x16xf32>
    %846 = arith.addf %828, %845 : vector<16x16xf32>
    %c37_211 = arith.constant 37 : index
    %847 = memref.load %arg6[%c37_211] : memref<144xf32, #tpu.memory_space<smem>>
    %848 = vector.broadcast %847 : f32 to vector<16x16xf32>
    %849 = arith.mulf %848, %842 : vector<16x16xf32>
    %850 = arith.addf %832, %849 : vector<16x16xf32>
    %c73_212 = arith.constant 73 : index
    %851 = memref.load %arg6[%c73_212] : memref<144xf32, #tpu.memory_space<smem>>
    %852 = vector.broadcast %851 : f32 to vector<16x16xf32>
    %853 = arith.mulf %852, %842 : vector<16x16xf32>
    %854 = arith.addf %836, %853 : vector<16x16xf32>
    %c109_213 = arith.constant 109 : index
    %855 = memref.load %arg6[%c109_213] : memref<144xf32, #tpu.memory_space<smem>>
    %856 = vector.broadcast %855 : f32 to vector<16x16xf32>
    %857 = arith.mulf %856, %842 : vector<16x16xf32>
    %858 = arith.addf %840, %857 : vector<16x16xf32>
    %c0_214 = arith.constant 0 : index
    %c0_215 = arith.constant 0 : index
    %c2_216 = arith.constant 2 : index
    %859 = vector.load %arg11[%c0_214, %c0_215, %c2_216] : memref<4x18x18xf32, #tpu.memory_space<vmem>>, vector<1x16x16xf32>
    %860 = vector.shape_cast %859 : vector<1x16x16xf32> to vector<16x16xf32>
    %c2_217 = arith.constant 2 : index
    %861 = memref.load %arg6[%c2_217] : memref<144xf32, #tpu.memory_space<smem>>
    %862 = vector.broadcast %861 : f32 to vector<16x16xf32>
    %863 = arith.mulf %862, %860 : vector<16x16xf32>
    %864 = arith.addf %846, %863 : vector<16x16xf32>
    %c38_218 = arith.constant 38 : index
    %865 = memref.load %arg6[%c38_218] : memref<144xf32, #tpu.memory_space<smem>>
    %866 = vector.broadcast %865 : f32 to vector<16x16xf32>
    %867 = arith.mulf %866, %860 : vector<16x16xf32>
    %868 = arith.addf %850, %867 : vector<16x16xf32>
    %c74_219 = arith.constant 74 : index
    %869 = memref.load %arg6[%c74_219] : memref<144xf32, #tpu.memory_space<smem>>
    %870 = vector.broadcast %869 : f32 to vector<16x16xf32>
    %871 = arith.mulf %870, %860 : vector<16x16xf32>
    %872 = arith.addf %854, %871 : vector<16x16xf32>
    %c110_220 = arith.constant 110 : index
    %873 = memref.load %arg6[%c110_220] : memref<144xf32, #tpu.memory_space<smem>>
    %874 = vector.broadcast %873 : f32 to vector<16x16xf32>
    %875 = arith.mulf %874, %860 : vector<16x16xf32>
    %876 = arith.addf %858, %875 : vector<16x16xf32>
    %c0_221 = arith.constant 0 : index
    %c1_222 = arith.constant 1 : index
    %c0_223 = arith.constant 0 : index
    %877 = vector.load %arg11[%c0_221, %c1_222, %c0_223] : memref<4x18x18xf32, #tpu.memory_space<vmem>>, vector<1x16x16xf32>
    %878 = vector.shape_cast %877 : vector<1x16x16xf32> to vector<16x16xf32>
    %c3_224 = arith.constant 3 : index
    %879 = memref.load %arg6[%c3_224] : memref<144xf32, #tpu.memory_space<smem>>
    %880 = vector.broadcast %879 : f32 to vector<16x16xf32>
    %881 = arith.mulf %880, %878 : vector<16x16xf32>
    %882 = arith.addf %864, %881 : vector<16x16xf32>
    %c39_225 = arith.constant 39 : index
    %883 = memref.load %arg6[%c39_225] : memref<144xf32, #tpu.memory_space<smem>>
    %884 = vector.broadcast %883 : f32 to vector<16x16xf32>
    %885 = arith.mulf %884, %878 : vector<16x16xf32>
    %886 = arith.addf %868, %885 : vector<16x16xf32>
    %c75_226 = arith.constant 75 : index
    %887 = memref.load %arg6[%c75_226] : memref<144xf32, #tpu.memory_space<smem>>
    %888 = vector.broadcast %887 : f32 to vector<16x16xf32>
    %889 = arith.mulf %888, %878 : vector<16x16xf32>
    %890 = arith.addf %872, %889 : vector<16x16xf32>
    %c111_227 = arith.constant 111 : index
    %891 = memref.load %arg6[%c111_227] : memref<144xf32, #tpu.memory_space<smem>>
    %892 = vector.broadcast %891 : f32 to vector<16x16xf32>
    %893 = arith.mulf %892, %878 : vector<16x16xf32>
    %894 = arith.addf %876, %893 : vector<16x16xf32>
    %c0_228 = arith.constant 0 : index
    %c1_229 = arith.constant 1 : index
    %c1_230 = arith.constant 1 : index
    %895 = vector.load %arg11[%c0_228, %c1_229, %c1_230] : memref<4x18x18xf32, #tpu.memory_space<vmem>>, vector<1x16x16xf32>
    %896 = vector.shape_cast %895 : vector<1x16x16xf32> to vector<16x16xf32>
    %c4_231 = arith.constant 4 : index
    %897 = memref.load %arg6[%c4_231] : memref<144xf32, #tpu.memory_space<smem>>
    %898 = vector.broadcast %897 : f32 to vector<16x16xf32>
    %899 = arith.mulf %898, %896 : vector<16x16xf32>
    %900 = arith.addf %882, %899 : vector<16x16xf32>
    %c40_232 = arith.constant 40 : index
    %901 = memref.load %arg6[%c40_232] : memref<144xf32, #tpu.memory_space<smem>>
    %902 = vector.broadcast %901 : f32 to vector<16x16xf32>
    %903 = arith.mulf %902, %896 : vector<16x16xf32>
    %904 = arith.addf %886, %903 : vector<16x16xf32>
    %c76_233 = arith.constant 76 : index
    %905 = memref.load %arg6[%c76_233] : memref<144xf32, #tpu.memory_space<smem>>
    %906 = vector.broadcast %905 : f32 to vector<16x16xf32>
    %907 = arith.mulf %906, %896 : vector<16x16xf32>
    %908 = arith.addf %890, %907 : vector<16x16xf32>
    %c112_234 = arith.constant 112 : index
    %909 = memref.load %arg6[%c112_234] : memref<144xf32, #tpu.memory_space<smem>>
    %910 = vector.broadcast %909 : f32 to vector<16x16xf32>
    %911 = arith.mulf %910, %896 : vector<16x16xf32>
    %912 = arith.addf %894, %911 : vector<16x16xf32>
    %c0_235 = arith.constant 0 : index
    %c1_236 = arith.constant 1 : index
    %c2_237 = arith.constant 2 : index
    %913 = vector.load %arg11[%c0_235, %c1_236, %c2_237] : memref<4x18x18xf32, #tpu.memory_space<vmem>>, vector<1x16x16xf32>
    %914 = vector.shape_cast %913 : vector<1x16x16xf32> to vector<16x16xf32>
    %c5_238 = arith.constant 5 : index
    %915 = memref.load %arg6[%c5_238] : memref<144xf32, #tpu.memory_space<smem>>
    %916 = vector.broadcast %915 : f32 to vector<16x16xf32>
    %917 = arith.mulf %916, %914 : vector<16x16xf32>
    %918 = arith.addf %900, %917 : vector<16x16xf32>
    %c41_239 = arith.constant 41 : index
    %919 = memref.load %arg6[%c41_239] : memref<144xf32, #tpu.memory_space<smem>>
    %920 = vector.broadcast %919 : f32 to vector<16x16xf32>
    %921 = arith.mulf %920, %914 : vector<16x16xf32>
    %922 = arith.addf %904, %921 : vector<16x16xf32>
    %c77_240 = arith.constant 77 : index
    %923 = memref.load %arg6[%c77_240] : memref<144xf32, #tpu.memory_space<smem>>
    %924 = vector.broadcast %923 : f32 to vector<16x16xf32>
    %925 = arith.mulf %924, %914 : vector<16x16xf32>
    %926 = arith.addf %908, %925 : vector<16x16xf32>
    %c113_241 = arith.constant 113 : index
    %927 = memref.load %arg6[%c113_241] : memref<144xf32, #tpu.memory_space<smem>>
    %928 = vector.broadcast %927 : f32 to vector<16x16xf32>
    %929 = arith.mulf %928, %914 : vector<16x16xf32>
    %930 = arith.addf %912, %929 : vector<16x16xf32>
    %c0_242 = arith.constant 0 : index
    %c2_243 = arith.constant 2 : index
    %c0_244 = arith.constant 0 : index
    %931 = vector.load %arg11[%c0_242, %c2_243, %c0_244] : memref<4x18x18xf32, #tpu.memory_space<vmem>>, vector<1x16x16xf32>
    %932 = vector.shape_cast %931 : vector<1x16x16xf32> to vector<16x16xf32>
    %c6_245 = arith.constant 6 : index
    %933 = memref.load %arg6[%c6_245] : memref<144xf32, #tpu.memory_space<smem>>
    %934 = vector.broadcast %933 : f32 to vector<16x16xf32>
    %935 = arith.mulf %934, %932 : vector<16x16xf32>
    %936 = arith.addf %918, %935 : vector<16x16xf32>
    %c42_246 = arith.constant 42 : index
    %937 = memref.load %arg6[%c42_246] : memref<144xf32, #tpu.memory_space<smem>>
    %938 = vector.broadcast %937 : f32 to vector<16x16xf32>
    %939 = arith.mulf %938, %932 : vector<16x16xf32>
    %940 = arith.addf %922, %939 : vector<16x16xf32>
    %c78_247 = arith.constant 78 : index
    %941 = memref.load %arg6[%c78_247] : memref<144xf32, #tpu.memory_space<smem>>
    %942 = vector.broadcast %941 : f32 to vector<16x16xf32>
    %943 = arith.mulf %942, %932 : vector<16x16xf32>
    %944 = arith.addf %926, %943 : vector<16x16xf32>
    %c114_248 = arith.constant 114 : index
    %945 = memref.load %arg6[%c114_248] : memref<144xf32, #tpu.memory_space<smem>>
    %946 = vector.broadcast %945 : f32 to vector<16x16xf32>
    %947 = arith.mulf %946, %932 : vector<16x16xf32>
    %948 = arith.addf %930, %947 : vector<16x16xf32>
    %c0_249 = arith.constant 0 : index
    %c2_250 = arith.constant 2 : index
    %c1_251 = arith.constant 1 : index
    %949 = vector.load %arg11[%c0_249, %c2_250, %c1_251] : memref<4x18x18xf32, #tpu.memory_space<vmem>>, vector<1x16x16xf32>
    %950 = vector.shape_cast %949 : vector<1x16x16xf32> to vector<16x16xf32>
    %c7_252 = arith.constant 7 : index
    %951 = memref.load %arg6[%c7_252] : memref<144xf32, #tpu.memory_space<smem>>
    %952 = vector.broadcast %951 : f32 to vector<16x16xf32>
    %953 = arith.mulf %952, %950 : vector<16x16xf32>
    %954 = arith.addf %936, %953 : vector<16x16xf32>
    %c43_253 = arith.constant 43 : index
    %955 = memref.load %arg6[%c43_253] : memref<144xf32, #tpu.memory_space<smem>>
    %956 = vector.broadcast %955 : f32 to vector<16x16xf32>
    %957 = arith.mulf %956, %950 : vector<16x16xf32>
    %958 = arith.addf %940, %957 : vector<16x16xf32>
    %c79_254 = arith.constant 79 : index
    %959 = memref.load %arg6[%c79_254] : memref<144xf32, #tpu.memory_space<smem>>
    %960 = vector.broadcast %959 : f32 to vector<16x16xf32>
    %961 = arith.mulf %960, %950 : vector<16x16xf32>
    %962 = arith.addf %944, %961 : vector<16x16xf32>
    %c115_255 = arith.constant 115 : index
    %963 = memref.load %arg6[%c115_255] : memref<144xf32, #tpu.memory_space<smem>>
    %964 = vector.broadcast %963 : f32 to vector<16x16xf32>
    %965 = arith.mulf %964, %950 : vector<16x16xf32>
    %966 = arith.addf %948, %965 : vector<16x16xf32>
    %c0_256 = arith.constant 0 : index
    %c2_257 = arith.constant 2 : index
    %c2_258 = arith.constant 2 : index
    %967 = vector.load %arg11[%c0_256, %c2_257, %c2_258] : memref<4x18x18xf32, #tpu.memory_space<vmem>>, vector<1x16x16xf32>
    %968 = vector.shape_cast %967 : vector<1x16x16xf32> to vector<16x16xf32>
    %c8_259 = arith.constant 8 : index
    %969 = memref.load %arg6[%c8_259] : memref<144xf32, #tpu.memory_space<smem>>
    %970 = vector.broadcast %969 : f32 to vector<16x16xf32>
    %971 = arith.mulf %970, %968 : vector<16x16xf32>
    %972 = arith.addf %954, %971 : vector<16x16xf32>
    %c44_260 = arith.constant 44 : index
    %973 = memref.load %arg6[%c44_260] : memref<144xf32, #tpu.memory_space<smem>>
    %974 = vector.broadcast %973 : f32 to vector<16x16xf32>
    %975 = arith.mulf %974, %968 : vector<16x16xf32>
    %976 = arith.addf %958, %975 : vector<16x16xf32>
    %c80_261 = arith.constant 80 : index
    %977 = memref.load %arg6[%c80_261] : memref<144xf32, #tpu.memory_space<smem>>
    %978 = vector.broadcast %977 : f32 to vector<16x16xf32>
    %979 = arith.mulf %978, %968 : vector<16x16xf32>
    %980 = arith.addf %962, %979 : vector<16x16xf32>
    %c116_262 = arith.constant 116 : index
    %981 = memref.load %arg6[%c116_262] : memref<144xf32, #tpu.memory_space<smem>>
    %982 = vector.broadcast %981 : f32 to vector<16x16xf32>
    %983 = arith.mulf %982, %968 : vector<16x16xf32>
    %984 = arith.addf %966, %983 : vector<16x16xf32>
    %c1_263 = arith.constant 1 : index
    %c0_264 = arith.constant 0 : index
    %c0_265 = arith.constant 0 : index
    %985 = vector.load %arg11[%c1_263, %c0_264, %c0_265] : memref<4x18x18xf32, #tpu.memory_space<vmem>>, vector<1x16x16xf32>
    %986 = vector.shape_cast %985 : vector<1x16x16xf32> to vector<16x16xf32>
    %c9_266 = arith.constant 9 : index
    %987 = memref.load %arg6[%c9_266] : memref<144xf32, #tpu.memory_space<smem>>
    %988 = vector.broadcast %987 : f32 to vector<16x16xf32>
    %989 = arith.mulf %988, %986 : vector<16x16xf32>
    %990 = arith.addf %972, %989 : vector<16x16xf32>
    %c45_267 = arith.constant 45 : index
    %991 = memref.load %arg6[%c45_267] : memref<144xf32, #tpu.memory_space<smem>>
    %992 = vector.broadcast %991 : f32 to vector<16x16xf32>
    %993 = arith.mulf %992, %986 : vector<16x16xf32>
    %994 = arith.addf %976, %993 : vector<16x16xf32>
    %c81_268 = arith.constant 81 : index
    %995 = memref.load %arg6[%c81_268] : memref<144xf32, #tpu.memory_space<smem>>
    %996 = vector.broadcast %995 : f32 to vector<16x16xf32>
    %997 = arith.mulf %996, %986 : vector<16x16xf32>
    %998 = arith.addf %980, %997 : vector<16x16xf32>
    %c117_269 = arith.constant 117 : index
    %999 = memref.load %arg6[%c117_269] : memref<144xf32, #tpu.memory_space<smem>>
    %1000 = vector.broadcast %999 : f32 to vector<16x16xf32>
    %1001 = arith.mulf %1000, %986 : vector<16x16xf32>
    %1002 = arith.addf %984, %1001 : vector<16x16xf32>
    %c1_270 = arith.constant 1 : index
    %c0_271 = arith.constant 0 : index
    %c1_272 = arith.constant 1 : index
    %1003 = vector.load %arg11[%c1_270, %c0_271, %c1_272] : memref<4x18x18xf32, #tpu.memory_space<vmem>>, vector<1x16x16xf32>
    %1004 = vector.shape_cast %1003 : vector<1x16x16xf32> to vector<16x16xf32>
    %c10_273 = arith.constant 10 : index
    %1005 = memref.load %arg6[%c10_273] : memref<144xf32, #tpu.memory_space<smem>>
    %1006 = vector.broadcast %1005 : f32 to vector<16x16xf32>
    %1007 = arith.mulf %1006, %1004 : vector<16x16xf32>
    %1008 = arith.addf %990, %1007 : vector<16x16xf32>
    %c46_274 = arith.constant 46 : index
    %1009 = memref.load %arg6[%c46_274] : memref<144xf32, #tpu.memory_space<smem>>
    %1010 = vector.broadcast %1009 : f32 to vector<16x16xf32>
    %1011 = arith.mulf %1010, %1004 : vector<16x16xf32>
    %1012 = arith.addf %994, %1011 : vector<16x16xf32>
    %c82_275 = arith.constant 82 : index
    %1013 = memref.load %arg6[%c82_275] : memref<144xf32, #tpu.memory_space<smem>>
    %1014 = vector.broadcast %1013 : f32 to vector<16x16xf32>
    %1015 = arith.mulf %1014, %1004 : vector<16x16xf32>
    %1016 = arith.addf %998, %1015 : vector<16x16xf32>
    %c118_276 = arith.constant 118 : index
    %1017 = memref.load %arg6[%c118_276] : memref<144xf32, #tpu.memory_space<smem>>
    %1018 = vector.broadcast %1017 : f32 to vector<16x16xf32>
    %1019 = arith.mulf %1018, %1004 : vector<16x16xf32>
    %1020 = arith.addf %1002, %1019 : vector<16x16xf32>
    %c1_277 = arith.constant 1 : index
    %c0_278 = arith.constant 0 : index
    %c2_279 = arith.constant 2 : index
    %1021 = vector.load %arg11[%c1_277, %c0_278, %c2_279] : memref<4x18x18xf32, #tpu.memory_space<vmem>>, vector<1x16x16xf32>
    %1022 = vector.shape_cast %1021 : vector<1x16x16xf32> to vector<16x16xf32>
    %c11_280 = arith.constant 11 : index
    %1023 = memref.load %arg6[%c11_280] : memref<144xf32, #tpu.memory_space<smem>>
    %1024 = vector.broadcast %1023 : f32 to vector<16x16xf32>
    %1025 = arith.mulf %1024, %1022 : vector<16x16xf32>
    %1026 = arith.addf %1008, %1025 : vector<16x16xf32>
    %c47_281 = arith.constant 47 : index
    %1027 = memref.load %arg6[%c47_281] : memref<144xf32, #tpu.memory_space<smem>>
    %1028 = vector.broadcast %1027 : f32 to vector<16x16xf32>
    %1029 = arith.mulf %1028, %1022 : vector<16x16xf32>
    %1030 = arith.addf %1012, %1029 : vector<16x16xf32>
    %c83_282 = arith.constant 83 : index
    %1031 = memref.load %arg6[%c83_282] : memref<144xf32, #tpu.memory_space<smem>>
    %1032 = vector.broadcast %1031 : f32 to vector<16x16xf32>
    %1033 = arith.mulf %1032, %1022 : vector<16x16xf32>
    %1034 = arith.addf %1016, %1033 : vector<16x16xf32>
    %c119_283 = arith.constant 119 : index
    %1035 = memref.load %arg6[%c119_283] : memref<144xf32, #tpu.memory_space<smem>>
    %1036 = vector.broadcast %1035 : f32 to vector<16x16xf32>
    %1037 = arith.mulf %1036, %1022 : vector<16x16xf32>
    %1038 = arith.addf %1020, %1037 : vector<16x16xf32>
    %c1_284 = arith.constant 1 : index
    %c1_285 = arith.constant 1 : index
    %c0_286 = arith.constant 0 : index
    %1039 = vector.load %arg11[%c1_284, %c1_285, %c0_286] : memref<4x18x18xf32, #tpu.memory_space<vmem>>, vector<1x16x16xf32>
    %1040 = vector.shape_cast %1039 : vector<1x16x16xf32> to vector<16x16xf32>
    %c12_287 = arith.constant 12 : index
    %1041 = memref.load %arg6[%c12_287] : memref<144xf32, #tpu.memory_space<smem>>
    %1042 = vector.broadcast %1041 : f32 to vector<16x16xf32>
    %1043 = arith.mulf %1042, %1040 : vector<16x16xf32>
    %1044 = arith.addf %1026, %1043 : vector<16x16xf32>
    %c48_288 = arith.constant 48 : index
    %1045 = memref.load %arg6[%c48_288] : memref<144xf32, #tpu.memory_space<smem>>
    %1046 = vector.broadcast %1045 : f32 to vector<16x16xf32>
    %1047 = arith.mulf %1046, %1040 : vector<16x16xf32>
    %1048 = arith.addf %1030, %1047 : vector<16x16xf32>
    %c84_289 = arith.constant 84 : index
    %1049 = memref.load %arg6[%c84_289] : memref<144xf32, #tpu.memory_space<smem>>
    %1050 = vector.broadcast %1049 : f32 to vector<16x16xf32>
    %1051 = arith.mulf %1050, %1040 : vector<16x16xf32>
    %1052 = arith.addf %1034, %1051 : vector<16x16xf32>
    %c120_290 = arith.constant 120 : index
    %1053 = memref.load %arg6[%c120_290] : memref<144xf32, #tpu.memory_space<smem>>
    %1054 = vector.broadcast %1053 : f32 to vector<16x16xf32>
    %1055 = arith.mulf %1054, %1040 : vector<16x16xf32>
    %1056 = arith.addf %1038, %1055 : vector<16x16xf32>
    %c1_291 = arith.constant 1 : index
    %c1_292 = arith.constant 1 : index
    %c1_293 = arith.constant 1 : index
    %1057 = vector.load %arg11[%c1_291, %c1_292, %c1_293] : memref<4x18x18xf32, #tpu.memory_space<vmem>>, vector<1x16x16xf32>
    %1058 = vector.shape_cast %1057 : vector<1x16x16xf32> to vector<16x16xf32>
    %c13_294 = arith.constant 13 : index
    %1059 = memref.load %arg6[%c13_294] : memref<144xf32, #tpu.memory_space<smem>>
    %1060 = vector.broadcast %1059 : f32 to vector<16x16xf32>
    %1061 = arith.mulf %1060, %1058 : vector<16x16xf32>
    %1062 = arith.addf %1044, %1061 : vector<16x16xf32>
    %c49_295 = arith.constant 49 : index
    %1063 = memref.load %arg6[%c49_295] : memref<144xf32, #tpu.memory_space<smem>>
    %1064 = vector.broadcast %1063 : f32 to vector<16x16xf32>
    %1065 = arith.mulf %1064, %1058 : vector<16x16xf32>
    %1066 = arith.addf %1048, %1065 : vector<16x16xf32>
    %c85_296 = arith.constant 85 : index
    %1067 = memref.load %arg6[%c85_296] : memref<144xf32, #tpu.memory_space<smem>>
    %1068 = vector.broadcast %1067 : f32 to vector<16x16xf32>
    %1069 = arith.mulf %1068, %1058 : vector<16x16xf32>
    %1070 = arith.addf %1052, %1069 : vector<16x16xf32>
    %c121_297 = arith.constant 121 : index
    %1071 = memref.load %arg6[%c121_297] : memref<144xf32, #tpu.memory_space<smem>>
    %1072 = vector.broadcast %1071 : f32 to vector<16x16xf32>
    %1073 = arith.mulf %1072, %1058 : vector<16x16xf32>
    %1074 = arith.addf %1056, %1073 : vector<16x16xf32>
    %c1_298 = arith.constant 1 : index
    %c1_299 = arith.constant 1 : index
    %c2_300 = arith.constant 2 : index
    %1075 = vector.load %arg11[%c1_298, %c1_299, %c2_300] : memref<4x18x18xf32, #tpu.memory_space<vmem>>, vector<1x16x16xf32>
    %1076 = vector.shape_cast %1075 : vector<1x16x16xf32> to vector<16x16xf32>
    %c14_301 = arith.constant 14 : index
    %1077 = memref.load %arg6[%c14_301] : memref<144xf32, #tpu.memory_space<smem>>
    %1078 = vector.broadcast %1077 : f32 to vector<16x16xf32>
    %1079 = arith.mulf %1078, %1076 : vector<16x16xf32>
    %1080 = arith.addf %1062, %1079 : vector<16x16xf32>
    %c50_302 = arith.constant 50 : index
    %1081 = memref.load %arg6[%c50_302] : memref<144xf32, #tpu.memory_space<smem>>
    %1082 = vector.broadcast %1081 : f32 to vector<16x16xf32>
    %1083 = arith.mulf %1082, %1076 : vector<16x16xf32>
    %1084 = arith.addf %1066, %1083 : vector<16x16xf32>
    %c86_303 = arith.constant 86 : index
    %1085 = memref.load %arg6[%c86_303] : memref<144xf32, #tpu.memory_space<smem>>
    %1086 = vector.broadcast %1085 : f32 to vector<16x16xf32>
    %1087 = arith.mulf %1086, %1076 : vector<16x16xf32>
    %1088 = arith.addf %1070, %1087 : vector<16x16xf32>
    %c122_304 = arith.constant 122 : index
    %1089 = memref.load %arg6[%c122_304] : memref<144xf32, #tpu.memory_space<smem>>
    %1090 = vector.broadcast %1089 : f32 to vector<16x16xf32>
    %1091 = arith.mulf %1090, %1076 : vector<16x16xf32>
    %1092 = arith.addf %1074, %1091 : vector<16x16xf32>
    %c1_305 = arith.constant 1 : index
    %c2_306 = arith.constant 2 : index
    %c0_307 = arith.constant 0 : index
    %1093 = vector.load %arg11[%c1_305, %c2_306, %c0_307] : memref<4x18x18xf32, #tpu.memory_space<vmem>>, vector<1x16x16xf32>
    %1094 = vector.shape_cast %1093 : vector<1x16x16xf32> to vector<16x16xf32>
    %c15_308 = arith.constant 15 : index
    %1095 = memref.load %arg6[%c15_308] : memref<144xf32, #tpu.memory_space<smem>>
    %1096 = vector.broadcast %1095 : f32 to vector<16x16xf32>
    %1097 = arith.mulf %1096, %1094 : vector<16x16xf32>
    %1098 = arith.addf %1080, %1097 : vector<16x16xf32>
    %c51_309 = arith.constant 51 : index
    %1099 = memref.load %arg6[%c51_309] : memref<144xf32, #tpu.memory_space<smem>>
    %1100 = vector.broadcast %1099 : f32 to vector<16x16xf32>
    %1101 = arith.mulf %1100, %1094 : vector<16x16xf32>
    %1102 = arith.addf %1084, %1101 : vector<16x16xf32>
    %c87_310 = arith.constant 87 : index
    %1103 = memref.load %arg6[%c87_310] : memref<144xf32, #tpu.memory_space<smem>>
    %1104 = vector.broadcast %1103 : f32 to vector<16x16xf32>
    %1105 = arith.mulf %1104, %1094 : vector<16x16xf32>
    %1106 = arith.addf %1088, %1105 : vector<16x16xf32>
    %c123_311 = arith.constant 123 : index
    %1107 = memref.load %arg6[%c123_311] : memref<144xf32, #tpu.memory_space<smem>>
    %1108 = vector.broadcast %1107 : f32 to vector<16x16xf32>
    %1109 = arith.mulf %1108, %1094 : vector<16x16xf32>
    %1110 = arith.addf %1092, %1109 : vector<16x16xf32>
    %c1_312 = arith.constant 1 : index
    %c2_313 = arith.constant 2 : index
    %c1_314 = arith.constant 1 : index
    %1111 = vector.load %arg11[%c1_312, %c2_313, %c1_314] : memref<4x18x18xf32, #tpu.memory_space<vmem>>, vector<1x16x16xf32>
    %1112 = vector.shape_cast %1111 : vector<1x16x16xf32> to vector<16x16xf32>
    %c16_315 = arith.constant 16 : index
    %1113 = memref.load %arg6[%c16_315] : memref<144xf32, #tpu.memory_space<smem>>
    %1114 = vector.broadcast %1113 : f32 to vector<16x16xf32>
    %1115 = arith.mulf %1114, %1112 : vector<16x16xf32>
    %1116 = arith.addf %1098, %1115 : vector<16x16xf32>
    %c52_316 = arith.constant 52 : index
    %1117 = memref.load %arg6[%c52_316] : memref<144xf32, #tpu.memory_space<smem>>
    %1118 = vector.broadcast %1117 : f32 to vector<16x16xf32>
    %1119 = arith.mulf %1118, %1112 : vector<16x16xf32>
    %1120 = arith.addf %1102, %1119 : vector<16x16xf32>
    %c88_317 = arith.constant 88 : index
    %1121 = memref.load %arg6[%c88_317] : memref<144xf32, #tpu.memory_space<smem>>
    %1122 = vector.broadcast %1121 : f32 to vector<16x16xf32>
    %1123 = arith.mulf %1122, %1112 : vector<16x16xf32>
    %1124 = arith.addf %1106, %1123 : vector<16x16xf32>
    %c124_318 = arith.constant 124 : index
    %1125 = memref.load %arg6[%c124_318] : memref<144xf32, #tpu.memory_space<smem>>
    %1126 = vector.broadcast %1125 : f32 to vector<16x16xf32>
    %1127 = arith.mulf %1126, %1112 : vector<16x16xf32>
    %1128 = arith.addf %1110, %1127 : vector<16x16xf32>
    %c1_319 = arith.constant 1 : index
    %c2_320 = arith.constant 2 : index
    %c2_321 = arith.constant 2 : index
    %1129 = vector.load %arg11[%c1_319, %c2_320, %c2_321] : memref<4x18x18xf32, #tpu.memory_space<vmem>>, vector<1x16x16xf32>
    %1130 = vector.shape_cast %1129 : vector<1x16x16xf32> to vector<16x16xf32>
    %c17_322 = arith.constant 17 : index
    %1131 = memref.load %arg6[%c17_322] : memref<144xf32, #tpu.memory_space<smem>>
    %1132 = vector.broadcast %1131 : f32 to vector<16x16xf32>
    %1133 = arith.mulf %1132, %1130 : vector<16x16xf32>
    %1134 = arith.addf %1116, %1133 : vector<16x16xf32>
    %c53_323 = arith.constant 53 : index
    %1135 = memref.load %arg6[%c53_323] : memref<144xf32, #tpu.memory_space<smem>>
    %1136 = vector.broadcast %1135 : f32 to vector<16x16xf32>
    %1137 = arith.mulf %1136, %1130 : vector<16x16xf32>
    %1138 = arith.addf %1120, %1137 : vector<16x16xf32>
    %c89_324 = arith.constant 89 : index
    %1139 = memref.load %arg6[%c89_324] : memref<144xf32, #tpu.memory_space<smem>>
    %1140 = vector.broadcast %1139 : f32 to vector<16x16xf32>
    %1141 = arith.mulf %1140, %1130 : vector<16x16xf32>
    %1142 = arith.addf %1124, %1141 : vector<16x16xf32>
    %c125_325 = arith.constant 125 : index
    %1143 = memref.load %arg6[%c125_325] : memref<144xf32, #tpu.memory_space<smem>>
    %1144 = vector.broadcast %1143 : f32 to vector<16x16xf32>
    %1145 = arith.mulf %1144, %1130 : vector<16x16xf32>
    %1146 = arith.addf %1128, %1145 : vector<16x16xf32>
    %c2_326 = arith.constant 2 : index
    %c0_327 = arith.constant 0 : index
    %c0_328 = arith.constant 0 : index
    %1147 = vector.load %arg11[%c2_326, %c0_327, %c0_328] : memref<4x18x18xf32, #tpu.memory_space<vmem>>, vector<1x16x16xf32>
    %1148 = vector.shape_cast %1147 : vector<1x16x16xf32> to vector<16x16xf32>
    %c18_329 = arith.constant 18 : index
    %1149 = memref.load %arg6[%c18_329] : memref<144xf32, #tpu.memory_space<smem>>
    %1150 = vector.broadcast %1149 : f32 to vector<16x16xf32>
    %1151 = arith.mulf %1150, %1148 : vector<16x16xf32>
    %1152 = arith.addf %1134, %1151 : vector<16x16xf32>
    %c54_330 = arith.constant 54 : index
    %1153 = memref.load %arg6[%c54_330] : memref<144xf32, #tpu.memory_space<smem>>
    %1154 = vector.broadcast %1153 : f32 to vector<16x16xf32>
    %1155 = arith.mulf %1154, %1148 : vector<16x16xf32>
    %1156 = arith.addf %1138, %1155 : vector<16x16xf32>
    %c90_331 = arith.constant 90 : index
    %1157 = memref.load %arg6[%c90_331] : memref<144xf32, #tpu.memory_space<smem>>
    %1158 = vector.broadcast %1157 : f32 to vector<16x16xf32>
    %1159 = arith.mulf %1158, %1148 : vector<16x16xf32>
    %1160 = arith.addf %1142, %1159 : vector<16x16xf32>
    %c126_332 = arith.constant 126 : index
    %1161 = memref.load %arg6[%c126_332] : memref<144xf32, #tpu.memory_space<smem>>
    %1162 = vector.broadcast %1161 : f32 to vector<16x16xf32>
    %1163 = arith.mulf %1162, %1148 : vector<16x16xf32>
    %1164 = arith.addf %1146, %1163 : vector<16x16xf32>
    %c2_333 = arith.constant 2 : index
    %c0_334 = arith.constant 0 : index
    %c1_335 = arith.constant 1 : index
    %1165 = vector.load %arg11[%c2_333, %c0_334, %c1_335] : memref<4x18x18xf32, #tpu.memory_space<vmem>>, vector<1x16x16xf32>
    %1166 = vector.shape_cast %1165 : vector<1x16x16xf32> to vector<16x16xf32>
    %c19_336 = arith.constant 19 : index
    %1167 = memref.load %arg6[%c19_336] : memref<144xf32, #tpu.memory_space<smem>>
    %1168 = vector.broadcast %1167 : f32 to vector<16x16xf32>
    %1169 = arith.mulf %1168, %1166 : vector<16x16xf32>
    %1170 = arith.addf %1152, %1169 : vector<16x16xf32>
    %c55_337 = arith.constant 55 : index
    %1171 = memref.load %arg6[%c55_337] : memref<144xf32, #tpu.memory_space<smem>>
    %1172 = vector.broadcast %1171 : f32 to vector<16x16xf32>
    %1173 = arith.mulf %1172, %1166 : vector<16x16xf32>
    %1174 = arith.addf %1156, %1173 : vector<16x16xf32>
    %c91_338 = arith.constant 91 : index
    %1175 = memref.load %arg6[%c91_338] : memref<144xf32, #tpu.memory_space<smem>>
    %1176 = vector.broadcast %1175 : f32 to vector<16x16xf32>
    %1177 = arith.mulf %1176, %1166 : vector<16x16xf32>
    %1178 = arith.addf %1160, %1177 : vector<16x16xf32>
    %c127_339 = arith.constant 127 : index
    %1179 = memref.load %arg6[%c127_339] : memref<144xf32, #tpu.memory_space<smem>>
    %1180 = vector.broadcast %1179 : f32 to vector<16x16xf32>
    %1181 = arith.mulf %1180, %1166 : vector<16x16xf32>
    %1182 = arith.addf %1164, %1181 : vector<16x16xf32>
    %c2_340 = arith.constant 2 : index
    %c0_341 = arith.constant 0 : index
    %c2_342 = arith.constant 2 : index
    %1183 = vector.load %arg11[%c2_340, %c0_341, %c2_342] : memref<4x18x18xf32, #tpu.memory_space<vmem>>, vector<1x16x16xf32>
    %1184 = vector.shape_cast %1183 : vector<1x16x16xf32> to vector<16x16xf32>
    %c20_343 = arith.constant 20 : index
    %1185 = memref.load %arg6[%c20_343] : memref<144xf32, #tpu.memory_space<smem>>
    %1186 = vector.broadcast %1185 : f32 to vector<16x16xf32>
    %1187 = arith.mulf %1186, %1184 : vector<16x16xf32>
    %1188 = arith.addf %1170, %1187 : vector<16x16xf32>
    %c56_344 = arith.constant 56 : index
    %1189 = memref.load %arg6[%c56_344] : memref<144xf32, #tpu.memory_space<smem>>
    %1190 = vector.broadcast %1189 : f32 to vector<16x16xf32>
    %1191 = arith.mulf %1190, %1184 : vector<16x16xf32>
    %1192 = arith.addf %1174, %1191 : vector<16x16xf32>
    %c92_345 = arith.constant 92 : index
    %1193 = memref.load %arg6[%c92_345] : memref<144xf32, #tpu.memory_space<smem>>
    %1194 = vector.broadcast %1193 : f32 to vector<16x16xf32>
    %1195 = arith.mulf %1194, %1184 : vector<16x16xf32>
    %1196 = arith.addf %1178, %1195 : vector<16x16xf32>
    %c128_346 = arith.constant 128 : index
    %1197 = memref.load %arg6[%c128_346] : memref<144xf32, #tpu.memory_space<smem>>
    %1198 = vector.broadcast %1197 : f32 to vector<16x16xf32>
    %1199 = arith.mulf %1198, %1184 : vector<16x16xf32>
    %1200 = arith.addf %1182, %1199 : vector<16x16xf32>
    %c2_347 = arith.constant 2 : index
    %c1_348 = arith.constant 1 : index
    %c0_349 = arith.constant 0 : index
    %1201 = vector.load %arg11[%c2_347, %c1_348, %c0_349] : memref<4x18x18xf32, #tpu.memory_space<vmem>>, vector<1x16x16xf32>
    %1202 = vector.shape_cast %1201 : vector<1x16x16xf32> to vector<16x16xf32>
    %c21_350 = arith.constant 21 : index
    %1203 = memref.load %arg6[%c21_350] : memref<144xf32, #tpu.memory_space<smem>>
    %1204 = vector.broadcast %1203 : f32 to vector<16x16xf32>
    %1205 = arith.mulf %1204, %1202 : vector<16x16xf32>
    %1206 = arith.addf %1188, %1205 : vector<16x16xf32>
    %c57_351 = arith.constant 57 : index
    %1207 = memref.load %arg6[%c57_351] : memref<144xf32, #tpu.memory_space<smem>>
    %1208 = vector.broadcast %1207 : f32 to vector<16x16xf32>
    %1209 = arith.mulf %1208, %1202 : vector<16x16xf32>
    %1210 = arith.addf %1192, %1209 : vector<16x16xf32>
    %c93_352 = arith.constant 93 : index
    %1211 = memref.load %arg6[%c93_352] : memref<144xf32, #tpu.memory_space<smem>>
    %1212 = vector.broadcast %1211 : f32 to vector<16x16xf32>
    %1213 = arith.mulf %1212, %1202 : vector<16x16xf32>
    %1214 = arith.addf %1196, %1213 : vector<16x16xf32>
    %c129_353 = arith.constant 129 : index
    %1215 = memref.load %arg6[%c129_353] : memref<144xf32, #tpu.memory_space<smem>>
    %1216 = vector.broadcast %1215 : f32 to vector<16x16xf32>
    %1217 = arith.mulf %1216, %1202 : vector<16x16xf32>
    %1218 = arith.addf %1200, %1217 : vector<16x16xf32>
    %c2_354 = arith.constant 2 : index
    %c1_355 = arith.constant 1 : index
    %c1_356 = arith.constant 1 : index
    %1219 = vector.load %arg11[%c2_354, %c1_355, %c1_356] : memref<4x18x18xf32, #tpu.memory_space<vmem>>, vector<1x16x16xf32>
    %1220 = vector.shape_cast %1219 : vector<1x16x16xf32> to vector<16x16xf32>
    %c22_357 = arith.constant 22 : index
    %1221 = memref.load %arg6[%c22_357] : memref<144xf32, #tpu.memory_space<smem>>
    %1222 = vector.broadcast %1221 : f32 to vector<16x16xf32>
    %1223 = arith.mulf %1222, %1220 : vector<16x16xf32>
    %1224 = arith.addf %1206, %1223 : vector<16x16xf32>
    %c58_358 = arith.constant 58 : index
    %1225 = memref.load %arg6[%c58_358] : memref<144xf32, #tpu.memory_space<smem>>
    %1226 = vector.broadcast %1225 : f32 to vector<16x16xf32>
    %1227 = arith.mulf %1226, %1220 : vector<16x16xf32>
    %1228 = arith.addf %1210, %1227 : vector<16x16xf32>
    %c94_359 = arith.constant 94 : index
    %1229 = memref.load %arg6[%c94_359] : memref<144xf32, #tpu.memory_space<smem>>
    %1230 = vector.broadcast %1229 : f32 to vector<16x16xf32>
    %1231 = arith.mulf %1230, %1220 : vector<16x16xf32>
    %1232 = arith.addf %1214, %1231 : vector<16x16xf32>
    %c130_360 = arith.constant 130 : index
    %1233 = memref.load %arg6[%c130_360] : memref<144xf32, #tpu.memory_space<smem>>
    %1234 = vector.broadcast %1233 : f32 to vector<16x16xf32>
    %1235 = arith.mulf %1234, %1220 : vector<16x16xf32>
    %1236 = arith.addf %1218, %1235 : vector<16x16xf32>
    %c2_361 = arith.constant 2 : index
    %c1_362 = arith.constant 1 : index
    %c2_363 = arith.constant 2 : index
    %1237 = vector.load %arg11[%c2_361, %c1_362, %c2_363] : memref<4x18x18xf32, #tpu.memory_space<vmem>>, vector<1x16x16xf32>
    %1238 = vector.shape_cast %1237 : vector<1x16x16xf32> to vector<16x16xf32>
    %c23_364 = arith.constant 23 : index
    %1239 = memref.load %arg6[%c23_364] : memref<144xf32, #tpu.memory_space<smem>>
    %1240 = vector.broadcast %1239 : f32 to vector<16x16xf32>
    %1241 = arith.mulf %1240, %1238 : vector<16x16xf32>
    %1242 = arith.addf %1224, %1241 : vector<16x16xf32>
    %c59_365 = arith.constant 59 : index
    %1243 = memref.load %arg6[%c59_365] : memref<144xf32, #tpu.memory_space<smem>>
    %1244 = vector.broadcast %1243 : f32 to vector<16x16xf32>
    %1245 = arith.mulf %1244, %1238 : vector<16x16xf32>
    %1246 = arith.addf %1228, %1245 : vector<16x16xf32>
    %c95_366 = arith.constant 95 : index
    %1247 = memref.load %arg6[%c95_366] : memref<144xf32, #tpu.memory_space<smem>>
    %1248 = vector.broadcast %1247 : f32 to vector<16x16xf32>
    %1249 = arith.mulf %1248, %1238 : vector<16x16xf32>
    %1250 = arith.addf %1232, %1249 : vector<16x16xf32>
    %c131_367 = arith.constant 131 : index
    %1251 = memref.load %arg6[%c131_367] : memref<144xf32, #tpu.memory_space<smem>>
    %1252 = vector.broadcast %1251 : f32 to vector<16x16xf32>
    %1253 = arith.mulf %1252, %1238 : vector<16x16xf32>
    %1254 = arith.addf %1236, %1253 : vector<16x16xf32>
    %c2_368 = arith.constant 2 : index
    %c2_369 = arith.constant 2 : index
    %c0_370 = arith.constant 0 : index
    %1255 = vector.load %arg11[%c2_368, %c2_369, %c0_370] : memref<4x18x18xf32, #tpu.memory_space<vmem>>, vector<1x16x16xf32>
    %1256 = vector.shape_cast %1255 : vector<1x16x16xf32> to vector<16x16xf32>
    %c24_371 = arith.constant 24 : index
    %1257 = memref.load %arg6[%c24_371] : memref<144xf32, #tpu.memory_space<smem>>
    %1258 = vector.broadcast %1257 : f32 to vector<16x16xf32>
    %1259 = arith.mulf %1258, %1256 : vector<16x16xf32>
    %1260 = arith.addf %1242, %1259 : vector<16x16xf32>
    %c60_372 = arith.constant 60 : index
    %1261 = memref.load %arg6[%c60_372] : memref<144xf32, #tpu.memory_space<smem>>
    %1262 = vector.broadcast %1261 : f32 to vector<16x16xf32>
    %1263 = arith.mulf %1262, %1256 : vector<16x16xf32>
    %1264 = arith.addf %1246, %1263 : vector<16x16xf32>
    %c96_373 = arith.constant 96 : index
    %1265 = memref.load %arg6[%c96_373] : memref<144xf32, #tpu.memory_space<smem>>
    %1266 = vector.broadcast %1265 : f32 to vector<16x16xf32>
    %1267 = arith.mulf %1266, %1256 : vector<16x16xf32>
    %1268 = arith.addf %1250, %1267 : vector<16x16xf32>
    %c132_374 = arith.constant 132 : index
    %1269 = memref.load %arg6[%c132_374] : memref<144xf32, #tpu.memory_space<smem>>
    %1270 = vector.broadcast %1269 : f32 to vector<16x16xf32>
    %1271 = arith.mulf %1270, %1256 : vector<16x16xf32>
    %1272 = arith.addf %1254, %1271 : vector<16x16xf32>
    %c2_375 = arith.constant 2 : index
    %c2_376 = arith.constant 2 : index
    %c1_377 = arith.constant 1 : index
    %1273 = vector.load %arg11[%c2_375, %c2_376, %c1_377] : memref<4x18x18xf32, #tpu.memory_space<vmem>>, vector<1x16x16xf32>
    %1274 = vector.shape_cast %1273 : vector<1x16x16xf32> to vector<16x16xf32>
    %c25_378 = arith.constant 25 : index
    %1275 = memref.load %arg6[%c25_378] : memref<144xf32, #tpu.memory_space<smem>>
    %1276 = vector.broadcast %1275 : f32 to vector<16x16xf32>
    %1277 = arith.mulf %1276, %1274 : vector<16x16xf32>
    %1278 = arith.addf %1260, %1277 : vector<16x16xf32>
    %c61_379 = arith.constant 61 : index
    %1279 = memref.load %arg6[%c61_379] : memref<144xf32, #tpu.memory_space<smem>>
    %1280 = vector.broadcast %1279 : f32 to vector<16x16xf32>
    %1281 = arith.mulf %1280, %1274 : vector<16x16xf32>
    %1282 = arith.addf %1264, %1281 : vector<16x16xf32>
    %c97_380 = arith.constant 97 : index
    %1283 = memref.load %arg6[%c97_380] : memref<144xf32, #tpu.memory_space<smem>>
    %1284 = vector.broadcast %1283 : f32 to vector<16x16xf32>
    %1285 = arith.mulf %1284, %1274 : vector<16x16xf32>
    %1286 = arith.addf %1268, %1285 : vector<16x16xf32>
    %c133_381 = arith.constant 133 : index
    %1287 = memref.load %arg6[%c133_381] : memref<144xf32, #tpu.memory_space<smem>>
    %1288 = vector.broadcast %1287 : f32 to vector<16x16xf32>
    %1289 = arith.mulf %1288, %1274 : vector<16x16xf32>
    %1290 = arith.addf %1272, %1289 : vector<16x16xf32>
    %c2_382 = arith.constant 2 : index
    %c2_383 = arith.constant 2 : index
    %c2_384 = arith.constant 2 : index
    %1291 = vector.load %arg11[%c2_382, %c2_383, %c2_384] : memref<4x18x18xf32, #tpu.memory_space<vmem>>, vector<1x16x16xf32>
    %1292 = vector.shape_cast %1291 : vector<1x16x16xf32> to vector<16x16xf32>
    %c26_385 = arith.constant 26 : index
    %1293 = memref.load %arg6[%c26_385] : memref<144xf32, #tpu.memory_space<smem>>
    %1294 = vector.broadcast %1293 : f32 to vector<16x16xf32>
    %1295 = arith.mulf %1294, %1292 : vector<16x16xf32>
    %1296 = arith.addf %1278, %1295 : vector<16x16xf32>
    %c62_386 = arith.constant 62 : index
    %1297 = memref.load %arg6[%c62_386] : memref<144xf32, #tpu.memory_space<smem>>
    %1298 = vector.broadcast %1297 : f32 to vector<16x16xf32>
    %1299 = arith.mulf %1298, %1292 : vector<16x16xf32>
    %1300 = arith.addf %1282, %1299 : vector<16x16xf32>
    %c98_387 = arith.constant 98 : index
    %1301 = memref.load %arg6[%c98_387] : memref<144xf32, #tpu.memory_space<smem>>
    %1302 = vector.broadcast %1301 : f32 to vector<16x16xf32>
    %1303 = arith.mulf %1302, %1292 : vector<16x16xf32>
    %1304 = arith.addf %1286, %1303 : vector<16x16xf32>
    %c134_388 = arith.constant 134 : index
    %1305 = memref.load %arg6[%c134_388] : memref<144xf32, #tpu.memory_space<smem>>
    %1306 = vector.broadcast %1305 : f32 to vector<16x16xf32>
    %1307 = arith.mulf %1306, %1292 : vector<16x16xf32>
    %1308 = arith.addf %1290, %1307 : vector<16x16xf32>
    %c3_389 = arith.constant 3 : index
    %c0_390 = arith.constant 0 : index
    %c0_391 = arith.constant 0 : index
    %1309 = vector.load %arg11[%c3_389, %c0_390, %c0_391] : memref<4x18x18xf32, #tpu.memory_space<vmem>>, vector<1x16x16xf32>
    %1310 = vector.shape_cast %1309 : vector<1x16x16xf32> to vector<16x16xf32>
    %c27_392 = arith.constant 27 : index
    %1311 = memref.load %arg6[%c27_392] : memref<144xf32, #tpu.memory_space<smem>>
    %1312 = vector.broadcast %1311 : f32 to vector<16x16xf32>
    %1313 = arith.mulf %1312, %1310 : vector<16x16xf32>
    %1314 = arith.addf %1296, %1313 : vector<16x16xf32>
    %c63_393 = arith.constant 63 : index
    %1315 = memref.load %arg6[%c63_393] : memref<144xf32, #tpu.memory_space<smem>>
    %1316 = vector.broadcast %1315 : f32 to vector<16x16xf32>
    %1317 = arith.mulf %1316, %1310 : vector<16x16xf32>
    %1318 = arith.addf %1300, %1317 : vector<16x16xf32>
    %c99_394 = arith.constant 99 : index
    %1319 = memref.load %arg6[%c99_394] : memref<144xf32, #tpu.memory_space<smem>>
    %1320 = vector.broadcast %1319 : f32 to vector<16x16xf32>
    %1321 = arith.mulf %1320, %1310 : vector<16x16xf32>
    %1322 = arith.addf %1304, %1321 : vector<16x16xf32>
    %c135_395 = arith.constant 135 : index
    %1323 = memref.load %arg6[%c135_395] : memref<144xf32, #tpu.memory_space<smem>>
    %1324 = vector.broadcast %1323 : f32 to vector<16x16xf32>
    %1325 = arith.mulf %1324, %1310 : vector<16x16xf32>
    %1326 = arith.addf %1308, %1325 : vector<16x16xf32>
    %c3_396 = arith.constant 3 : index
    %c0_397 = arith.constant 0 : index
    %c1_398 = arith.constant 1 : index
    %1327 = vector.load %arg11[%c3_396, %c0_397, %c1_398] : memref<4x18x18xf32, #tpu.memory_space<vmem>>, vector<1x16x16xf32>
    %1328 = vector.shape_cast %1327 : vector<1x16x16xf32> to vector<16x16xf32>
    %c28_399 = arith.constant 28 : index
    %1329 = memref.load %arg6[%c28_399] : memref<144xf32, #tpu.memory_space<smem>>
    %1330 = vector.broadcast %1329 : f32 to vector<16x16xf32>
    %1331 = arith.mulf %1330, %1328 : vector<16x16xf32>
    %1332 = arith.addf %1314, %1331 : vector<16x16xf32>
    %c64_400 = arith.constant 64 : index
    %1333 = memref.load %arg6[%c64_400] : memref<144xf32, #tpu.memory_space<smem>>
    %1334 = vector.broadcast %1333 : f32 to vector<16x16xf32>
    %1335 = arith.mulf %1334, %1328 : vector<16x16xf32>
    %1336 = arith.addf %1318, %1335 : vector<16x16xf32>
    %c100_401 = arith.constant 100 : index
    %1337 = memref.load %arg6[%c100_401] : memref<144xf32, #tpu.memory_space<smem>>
    %1338 = vector.broadcast %1337 : f32 to vector<16x16xf32>
    %1339 = arith.mulf %1338, %1328 : vector<16x16xf32>
    %1340 = arith.addf %1322, %1339 : vector<16x16xf32>
    %c136_402 = arith.constant 136 : index
    %1341 = memref.load %arg6[%c136_402] : memref<144xf32, #tpu.memory_space<smem>>
    %1342 = vector.broadcast %1341 : f32 to vector<16x16xf32>
    %1343 = arith.mulf %1342, %1328 : vector<16x16xf32>
    %1344 = arith.addf %1326, %1343 : vector<16x16xf32>
    %c3_403 = arith.constant 3 : index
    %c0_404 = arith.constant 0 : index
    %c2_405 = arith.constant 2 : index
    %1345 = vector.load %arg11[%c3_403, %c0_404, %c2_405] : memref<4x18x18xf32, #tpu.memory_space<vmem>>, vector<1x16x16xf32>
    %1346 = vector.shape_cast %1345 : vector<1x16x16xf32> to vector<16x16xf32>
    %c29_406 = arith.constant 29 : index
    %1347 = memref.load %arg6[%c29_406] : memref<144xf32, #tpu.memory_space<smem>>
    %1348 = vector.broadcast %1347 : f32 to vector<16x16xf32>
    %1349 = arith.mulf %1348, %1346 : vector<16x16xf32>
    %1350 = arith.addf %1332, %1349 : vector<16x16xf32>
    %c65_407 = arith.constant 65 : index
    %1351 = memref.load %arg6[%c65_407] : memref<144xf32, #tpu.memory_space<smem>>
    %1352 = vector.broadcast %1351 : f32 to vector<16x16xf32>
    %1353 = arith.mulf %1352, %1346 : vector<16x16xf32>
    %1354 = arith.addf %1336, %1353 : vector<16x16xf32>
    %c101_408 = arith.constant 101 : index
    %1355 = memref.load %arg6[%c101_408] : memref<144xf32, #tpu.memory_space<smem>>
    %1356 = vector.broadcast %1355 : f32 to vector<16x16xf32>
    %1357 = arith.mulf %1356, %1346 : vector<16x16xf32>
    %1358 = arith.addf %1340, %1357 : vector<16x16xf32>
    %c137_409 = arith.constant 137 : index
    %1359 = memref.load %arg6[%c137_409] : memref<144xf32, #tpu.memory_space<smem>>
    %1360 = vector.broadcast %1359 : f32 to vector<16x16xf32>
    %1361 = arith.mulf %1360, %1346 : vector<16x16xf32>
    %1362 = arith.addf %1344, %1361 : vector<16x16xf32>
    %c3_410 = arith.constant 3 : index
    %c1_411 = arith.constant 1 : index
    %c0_412 = arith.constant 0 : index
    %1363 = vector.load %arg11[%c3_410, %c1_411, %c0_412] : memref<4x18x18xf32, #tpu.memory_space<vmem>>, vector<1x16x16xf32>
    %1364 = vector.shape_cast %1363 : vector<1x16x16xf32> to vector<16x16xf32>
    %c30_413 = arith.constant 30 : index
    %1365 = memref.load %arg6[%c30_413] : memref<144xf32, #tpu.memory_space<smem>>
    %1366 = vector.broadcast %1365 : f32 to vector<16x16xf32>
    %1367 = arith.mulf %1366, %1364 : vector<16x16xf32>
    %1368 = arith.addf %1350, %1367 : vector<16x16xf32>
    %c66_414 = arith.constant 66 : index
    %1369 = memref.load %arg6[%c66_414] : memref<144xf32, #tpu.memory_space<smem>>
    %1370 = vector.broadcast %1369 : f32 to vector<16x16xf32>
    %1371 = arith.mulf %1370, %1364 : vector<16x16xf32>
    %1372 = arith.addf %1354, %1371 : vector<16x16xf32>
    %c102_415 = arith.constant 102 : index
    %1373 = memref.load %arg6[%c102_415] : memref<144xf32, #tpu.memory_space<smem>>
    %1374 = vector.broadcast %1373 : f32 to vector<16x16xf32>
    %1375 = arith.mulf %1374, %1364 : vector<16x16xf32>
    %1376 = arith.addf %1358, %1375 : vector<16x16xf32>
    %c138_416 = arith.constant 138 : index
    %1377 = memref.load %arg6[%c138_416] : memref<144xf32, #tpu.memory_space<smem>>
    %1378 = vector.broadcast %1377 : f32 to vector<16x16xf32>
    %1379 = arith.mulf %1378, %1364 : vector<16x16xf32>
    %1380 = arith.addf %1362, %1379 : vector<16x16xf32>
    %c3_417 = arith.constant 3 : index
    %c1_418 = arith.constant 1 : index
    %c1_419 = arith.constant 1 : index
    %1381 = vector.load %arg11[%c3_417, %c1_418, %c1_419] : memref<4x18x18xf32, #tpu.memory_space<vmem>>, vector<1x16x16xf32>
    %1382 = vector.shape_cast %1381 : vector<1x16x16xf32> to vector<16x16xf32>
    %c31_420 = arith.constant 31 : index
    %1383 = memref.load %arg6[%c31_420] : memref<144xf32, #tpu.memory_space<smem>>
    %1384 = vector.broadcast %1383 : f32 to vector<16x16xf32>
    %1385 = arith.mulf %1384, %1382 : vector<16x16xf32>
    %1386 = arith.addf %1368, %1385 : vector<16x16xf32>
    %c67_421 = arith.constant 67 : index
    %1387 = memref.load %arg6[%c67_421] : memref<144xf32, #tpu.memory_space<smem>>
    %1388 = vector.broadcast %1387 : f32 to vector<16x16xf32>
    %1389 = arith.mulf %1388, %1382 : vector<16x16xf32>
    %1390 = arith.addf %1372, %1389 : vector<16x16xf32>
    %c103_422 = arith.constant 103 : index
    %1391 = memref.load %arg6[%c103_422] : memref<144xf32, #tpu.memory_space<smem>>
    %1392 = vector.broadcast %1391 : f32 to vector<16x16xf32>
    %1393 = arith.mulf %1392, %1382 : vector<16x16xf32>
    %1394 = arith.addf %1376, %1393 : vector<16x16xf32>
    %c139_423 = arith.constant 139 : index
    %1395 = memref.load %arg6[%c139_423] : memref<144xf32, #tpu.memory_space<smem>>
    %1396 = vector.broadcast %1395 : f32 to vector<16x16xf32>
    %1397 = arith.mulf %1396, %1382 : vector<16x16xf32>
    %1398 = arith.addf %1380, %1397 : vector<16x16xf32>
    %c3_424 = arith.constant 3 : index
    %c1_425 = arith.constant 1 : index
    %c2_426 = arith.constant 2 : index
    %1399 = vector.load %arg11[%c3_424, %c1_425, %c2_426] : memref<4x18x18xf32, #tpu.memory_space<vmem>>, vector<1x16x16xf32>
    %1400 = vector.shape_cast %1399 : vector<1x16x16xf32> to vector<16x16xf32>
    %c32_427 = arith.constant 32 : index
    %1401 = memref.load %arg6[%c32_427] : memref<144xf32, #tpu.memory_space<smem>>
    %1402 = vector.broadcast %1401 : f32 to vector<16x16xf32>
    %1403 = arith.mulf %1402, %1400 : vector<16x16xf32>
    %1404 = arith.addf %1386, %1403 : vector<16x16xf32>
    %c68_428 = arith.constant 68 : index
    %1405 = memref.load %arg6[%c68_428] : memref<144xf32, #tpu.memory_space<smem>>
    %1406 = vector.broadcast %1405 : f32 to vector<16x16xf32>
    %1407 = arith.mulf %1406, %1400 : vector<16x16xf32>
    %1408 = arith.addf %1390, %1407 : vector<16x16xf32>
    %c104_429 = arith.constant 104 : index
    %1409 = memref.load %arg6[%c104_429] : memref<144xf32, #tpu.memory_space<smem>>
    %1410 = vector.broadcast %1409 : f32 to vector<16x16xf32>
    %1411 = arith.mulf %1410, %1400 : vector<16x16xf32>
    %1412 = arith.addf %1394, %1411 : vector<16x16xf32>
    %c140_430 = arith.constant 140 : index
    %1413 = memref.load %arg6[%c140_430] : memref<144xf32, #tpu.memory_space<smem>>
    %1414 = vector.broadcast %1413 : f32 to vector<16x16xf32>
    %1415 = arith.mulf %1414, %1400 : vector<16x16xf32>
    %1416 = arith.addf %1398, %1415 : vector<16x16xf32>
    %c3_431 = arith.constant 3 : index
    %c2_432 = arith.constant 2 : index
    %c0_433 = arith.constant 0 : index
    %1417 = vector.load %arg11[%c3_431, %c2_432, %c0_433] : memref<4x18x18xf32, #tpu.memory_space<vmem>>, vector<1x16x16xf32>
    %1418 = vector.shape_cast %1417 : vector<1x16x16xf32> to vector<16x16xf32>
    %c33_434 = arith.constant 33 : index
    %1419 = memref.load %arg6[%c33_434] : memref<144xf32, #tpu.memory_space<smem>>
    %1420 = vector.broadcast %1419 : f32 to vector<16x16xf32>
    %1421 = arith.mulf %1420, %1418 : vector<16x16xf32>
    %1422 = arith.addf %1404, %1421 : vector<16x16xf32>
    %c69_435 = arith.constant 69 : index
    %1423 = memref.load %arg6[%c69_435] : memref<144xf32, #tpu.memory_space<smem>>
    %1424 = vector.broadcast %1423 : f32 to vector<16x16xf32>
    %1425 = arith.mulf %1424, %1418 : vector<16x16xf32>
    %1426 = arith.addf %1408, %1425 : vector<16x16xf32>
    %c105_436 = arith.constant 105 : index
    %1427 = memref.load %arg6[%c105_436] : memref<144xf32, #tpu.memory_space<smem>>
    %1428 = vector.broadcast %1427 : f32 to vector<16x16xf32>
    %1429 = arith.mulf %1428, %1418 : vector<16x16xf32>
    %1430 = arith.addf %1412, %1429 : vector<16x16xf32>
    %c141_437 = arith.constant 141 : index
    %1431 = memref.load %arg6[%c141_437] : memref<144xf32, #tpu.memory_space<smem>>
    %1432 = vector.broadcast %1431 : f32 to vector<16x16xf32>
    %1433 = arith.mulf %1432, %1418 : vector<16x16xf32>
    %1434 = arith.addf %1416, %1433 : vector<16x16xf32>
    %c3_438 = arith.constant 3 : index
    %c2_439 = arith.constant 2 : index
    %c1_440 = arith.constant 1 : index
    %1435 = vector.load %arg11[%c3_438, %c2_439, %c1_440] : memref<4x18x18xf32, #tpu.memory_space<vmem>>, vector<1x16x16xf32>
    %1436 = vector.shape_cast %1435 : vector<1x16x16xf32> to vector<16x16xf32>
    %c34_441 = arith.constant 34 : index
    %1437 = memref.load %arg6[%c34_441] : memref<144xf32, #tpu.memory_space<smem>>
    %1438 = vector.broadcast %1437 : f32 to vector<16x16xf32>
    %1439 = arith.mulf %1438, %1436 : vector<16x16xf32>
    %1440 = arith.addf %1422, %1439 : vector<16x16xf32>
    %c70_442 = arith.constant 70 : index
    %1441 = memref.load %arg6[%c70_442] : memref<144xf32, #tpu.memory_space<smem>>
    %1442 = vector.broadcast %1441 : f32 to vector<16x16xf32>
    %1443 = arith.mulf %1442, %1436 : vector<16x16xf32>
    %1444 = arith.addf %1426, %1443 : vector<16x16xf32>
    %c106_443 = arith.constant 106 : index
    %1445 = memref.load %arg6[%c106_443] : memref<144xf32, #tpu.memory_space<smem>>
    %1446 = vector.broadcast %1445 : f32 to vector<16x16xf32>
    %1447 = arith.mulf %1446, %1436 : vector<16x16xf32>
    %1448 = arith.addf %1430, %1447 : vector<16x16xf32>
    %c142_444 = arith.constant 142 : index
    %1449 = memref.load %arg6[%c142_444] : memref<144xf32, #tpu.memory_space<smem>>
    %1450 = vector.broadcast %1449 : f32 to vector<16x16xf32>
    %1451 = arith.mulf %1450, %1436 : vector<16x16xf32>
    %1452 = arith.addf %1434, %1451 : vector<16x16xf32>
    %c3_445 = arith.constant 3 : index
    %c2_446 = arith.constant 2 : index
    %c2_447 = arith.constant 2 : index
    %1453 = vector.load %arg11[%c3_445, %c2_446, %c2_447] : memref<4x18x18xf32, #tpu.memory_space<vmem>>, vector<1x16x16xf32>
    %1454 = vector.shape_cast %1453 : vector<1x16x16xf32> to vector<16x16xf32>
    %c35_448 = arith.constant 35 : index
    %1455 = memref.load %arg6[%c35_448] : memref<144xf32, #tpu.memory_space<smem>>
    %1456 = vector.broadcast %1455 : f32 to vector<16x16xf32>
    %1457 = arith.mulf %1456, %1454 : vector<16x16xf32>
    %1458 = arith.addf %1440, %1457 : vector<16x16xf32>
    %c71_449 = arith.constant 71 : index
    %1459 = memref.load %arg6[%c71_449] : memref<144xf32, #tpu.memory_space<smem>>
    %1460 = vector.broadcast %1459 : f32 to vector<16x16xf32>
    %1461 = arith.mulf %1460, %1454 : vector<16x16xf32>
    %1462 = arith.addf %1444, %1461 : vector<16x16xf32>
    %c107_450 = arith.constant 107 : index
    %1463 = memref.load %arg6[%c107_450] : memref<144xf32, #tpu.memory_space<smem>>
    %1464 = vector.broadcast %1463 : f32 to vector<16x16xf32>
    %1465 = arith.mulf %1464, %1454 : vector<16x16xf32>
    %1466 = arith.addf %1448, %1465 : vector<16x16xf32>
    %c143_451 = arith.constant 143 : index
    %1467 = memref.load %arg6[%c143_451] : memref<144xf32, #tpu.memory_space<smem>>
    %1468 = vector.broadcast %1467 : f32 to vector<16x16xf32>
    %1469 = arith.mulf %1468, %1454 : vector<16x16xf32>
    %1470 = arith.addf %1452, %1469 : vector<16x16xf32>
    %c0_452 = arith.constant 0 : index
    %1471 = memref.load %arg7[%c0_452] : memref<4xf32, #tpu.memory_space<smem>>
    %1472 = vector.broadcast %1471 : f32 to vector<16x16xf32>
    %1473 = arith.addf %1458, %1472 : vector<16x16xf32>
    %c1_453 = arith.constant 1 : index
    %1474 = memref.load %arg7[%c1_453] : memref<4xf32, #tpu.memory_space<smem>>
    %1475 = vector.broadcast %1474 : f32 to vector<16x16xf32>
    %1476 = arith.addf %1462, %1475 : vector<16x16xf32>
    %c2_454 = arith.constant 2 : index
    %1477 = memref.load %arg7[%c2_454] : memref<4xf32, #tpu.memory_space<smem>>
    %1478 = vector.broadcast %1477 : f32 to vector<16x16xf32>
    %1479 = arith.addf %1466, %1478 : vector<16x16xf32>
    %c3_455 = arith.constant 3 : index
    %1480 = memref.load %arg7[%c3_455] : memref<4xf32, #tpu.memory_space<smem>>
    %1481 = vector.broadcast %1480 : f32 to vector<16x16xf32>
    %1482 = arith.addf %1470, %1481 : vector<16x16xf32>
    %cst_456 = arith.constant 0.000000e+00 : f32
    %1483 = vector.broadcast %cst_456 : f32 to vector<1x1xf32>
    %cst_457 = arith.constant dense<0.000000e+00> : vector<16xf32>
    %1484 = vector.multi_reduction <add>, %1473, %cst_457 [1] : vector<16x16xf32> to vector<16xf32>
    %1485 = vector.shape_cast %1484 : vector<16xf32> to vector<16x1xf32>
    %cst_458 = arith.constant dense<0.000000e+00> : vector<1xf32>
    %1486 = vector.multi_reduction <add>, %1485, %cst_458 [0] : vector<16x1xf32> to vector<1xf32>
    %1487 = vector.shape_cast %1486 : vector<1xf32> to vector<1x1xf32>
    %1488 = arith.addf %1483, %1487 : vector<1x1xf32>
    %cst_459 = arith.constant dense<0.000000e+00> : vector<16xf32>
    %1489 = vector.multi_reduction <add>, %1476, %cst_459 [1] : vector<16x16xf32> to vector<16xf32>
    %1490 = vector.shape_cast %1489 : vector<16xf32> to vector<16x1xf32>
    %cst_460 = arith.constant dense<0.000000e+00> : vector<1xf32>
    %1491 = vector.multi_reduction <add>, %1490, %cst_460 [0] : vector<16x1xf32> to vector<1xf32>
    %1492 = vector.shape_cast %1491 : vector<1xf32> to vector<1x1xf32>
    %1493 = arith.addf %1488, %1492 : vector<1x1xf32>
    %cst_461 = arith.constant dense<0.000000e+00> : vector<16xf32>
    %1494 = vector.multi_reduction <add>, %1479, %cst_461 [1] : vector<16x16xf32> to vector<16xf32>
    %1495 = vector.shape_cast %1494 : vector<16xf32> to vector<16x1xf32>
    %cst_462 = arith.constant dense<0.000000e+00> : vector<1xf32>
    %1496 = vector.multi_reduction <add>, %1495, %cst_462 [0] : vector<16x1xf32> to vector<1xf32>
    %1497 = vector.shape_cast %1496 : vector<1xf32> to vector<1x1xf32>
    %1498 = arith.addf %1493, %1497 : vector<1x1xf32>
    %cst_463 = arith.constant dense<0.000000e+00> : vector<16xf32>
    %1499 = vector.multi_reduction <add>, %1482, %cst_463 [1] : vector<16x16xf32> to vector<16xf32>
    %1500 = vector.shape_cast %1499 : vector<16xf32> to vector<16x1xf32>
    %cst_464 = arith.constant dense<0.000000e+00> : vector<1xf32>
    %1501 = vector.multi_reduction <add>, %1500, %cst_464 [0] : vector<16x1xf32> to vector<1xf32>
    %1502 = vector.shape_cast %1501 : vector<1xf32> to vector<1x1xf32>
    %1503 = arith.addf %1498, %1502 : vector<1x1xf32>
    %cst_465 = arith.constant 9.765625E-4 : f32
    %1504 = vector.broadcast %cst_465 : f32 to vector<1x1xf32>
    %1505 = arith.mulf %1503, %1504 : vector<1x1xf32>
    %cst_466 = arith.constant 0.000000e+00 : f32
    %1506 = vector.broadcast %cst_466 : f32 to vector<1x1xf32>
    %1507 = vector.broadcast %1505 : vector<1x1xf32> to vector<16x16xf32>
    %1508 = arith.subf %1473, %1507 : vector<16x16xf32>
    %1509 = arith.mulf %1508, %1508 : vector<16x16xf32>
    %cst_467 = arith.constant dense<0.000000e+00> : vector<16xf32>
    %1510 = vector.multi_reduction <add>, %1509, %cst_467 [1] : vector<16x16xf32> to vector<16xf32>
    %1511 = vector.shape_cast %1510 : vector<16xf32> to vector<16x1xf32>
    %cst_468 = arith.constant dense<0.000000e+00> : vector<1xf32>
    %1512 = vector.multi_reduction <add>, %1511, %cst_468 [0] : vector<16x1xf32> to vector<1xf32>
    %1513 = vector.shape_cast %1512 : vector<1xf32> to vector<1x1xf32>
    %1514 = arith.addf %1506, %1513 : vector<1x1xf32>
    %1515 = vector.broadcast %1505 : vector<1x1xf32> to vector<16x16xf32>
    %1516 = arith.subf %1476, %1515 : vector<16x16xf32>
    %1517 = arith.mulf %1516, %1516 : vector<16x16xf32>
    %cst_469 = arith.constant dense<0.000000e+00> : vector<16xf32>
    %1518 = vector.multi_reduction <add>, %1517, %cst_469 [1] : vector<16x16xf32> to vector<16xf32>
    %1519 = vector.shape_cast %1518 : vector<16xf32> to vector<16x1xf32>
    %cst_470 = arith.constant dense<0.000000e+00> : vector<1xf32>
    %1520 = vector.multi_reduction <add>, %1519, %cst_470 [0] : vector<16x1xf32> to vector<1xf32>
    %1521 = vector.shape_cast %1520 : vector<1xf32> to vector<1x1xf32>
    %1522 = arith.addf %1514, %1521 : vector<1x1xf32>
    %1523 = vector.broadcast %1505 : vector<1x1xf32> to vector<16x16xf32>
    %1524 = arith.subf %1479, %1523 : vector<16x16xf32>
    %1525 = arith.mulf %1524, %1524 : vector<16x16xf32>
    %cst_471 = arith.constant dense<0.000000e+00> : vector<16xf32>
    %1526 = vector.multi_reduction <add>, %1525, %cst_471 [1] : vector<16x16xf32> to vector<16xf32>
    %1527 = vector.shape_cast %1526 : vector<16xf32> to vector<16x1xf32>
    %cst_472 = arith.constant dense<0.000000e+00> : vector<1xf32>
    %1528 = vector.multi_reduction <add>, %1527, %cst_472 [0] : vector<16x1xf32> to vector<1xf32>
    %1529 = vector.shape_cast %1528 : vector<1xf32> to vector<1x1xf32>
    %1530 = arith.addf %1522, %1529 : vector<1x1xf32>
    %1531 = vector.broadcast %1505 : vector<1x1xf32> to vector<16x16xf32>
    %1532 = arith.subf %1482, %1531 : vector<16x16xf32>
    %1533 = arith.mulf %1532, %1532 : vector<16x16xf32>
    %cst_473 = arith.constant dense<0.000000e+00> : vector<16xf32>
    %1534 = vector.multi_reduction <add>, %1533, %cst_473 [1] : vector<16x16xf32> to vector<16xf32>
    %1535 = vector.shape_cast %1534 : vector<16xf32> to vector<16x1xf32>
    %cst_474 = arith.constant dense<0.000000e+00> : vector<1xf32>
    %1536 = vector.multi_reduction <add>, %1535, %cst_474 [0] : vector<16x1xf32> to vector<1xf32>
    %1537 = vector.shape_cast %1536 : vector<1xf32> to vector<1x1xf32>
    %1538 = arith.addf %1530, %1537 : vector<1x1xf32>
    %cst_475 = arith.constant 9.765625E-4 : f32
    %1539 = vector.broadcast %cst_475 : f32 to vector<1x1xf32>
    %1540 = arith.mulf %1538, %1539 : vector<1x1xf32>
    %cst_476 = arith.constant 9.99999974E-6 : f32
    %1541 = vector.broadcast %cst_476 : f32 to vector<1x1xf32>
    %1542 = arith.addf %1540, %1541 : vector<1x1xf32>
    %1543 = math.rsqrt %1542 : vector<1x1xf32>
    %1544 = vector.broadcast %1505 : vector<1x1xf32> to vector<16x16xf32>
    %1545 = arith.subf %1473, %1544 : vector<16x16xf32>
    %1546 = vector.broadcast %1543 : vector<1x1xf32> to vector<16x16xf32>
    %1547 = arith.mulf %1545, %1546 : vector<16x16xf32>
    %c0_477 = arith.constant 0 : index
    %1548 = memref.load %arg8[%c0_477] : memref<4xf32, #tpu.memory_space<smem>>
    %1549 = vector.broadcast %1548 : f32 to vector<16x16xf32>
    %1550 = arith.mulf %1547, %1549 : vector<16x16xf32>
    %c0_478 = arith.constant 0 : index
    %1551 = memref.load %arg9[%c0_478] : memref<4xf32, #tpu.memory_space<smem>>
    %1552 = vector.broadcast %1551 : f32 to vector<16x16xf32>
    %1553 = arith.addf %1550, %1552 : vector<16x16xf32>
    %1554 = vector.broadcast %1505 : vector<1x1xf32> to vector<16x16xf32>
    %1555 = arith.subf %1476, %1554 : vector<16x16xf32>
    %1556 = vector.broadcast %1543 : vector<1x1xf32> to vector<16x16xf32>
    %1557 = arith.mulf %1555, %1556 : vector<16x16xf32>
    %c1_479 = arith.constant 1 : index
    %1558 = memref.load %arg8[%c1_479] : memref<4xf32, #tpu.memory_space<smem>>
    %1559 = vector.broadcast %1558 : f32 to vector<16x16xf32>
    %1560 = arith.mulf %1557, %1559 : vector<16x16xf32>
    %c1_480 = arith.constant 1 : index
    %1561 = memref.load %arg9[%c1_480] : memref<4xf32, #tpu.memory_space<smem>>
    %1562 = vector.broadcast %1561 : f32 to vector<16x16xf32>
    %1563 = arith.addf %1560, %1562 : vector<16x16xf32>
    %1564 = vector.broadcast %1505 : vector<1x1xf32> to vector<16x16xf32>
    %1565 = arith.subf %1479, %1564 : vector<16x16xf32>
    %1566 = vector.broadcast %1543 : vector<1x1xf32> to vector<16x16xf32>
    %1567 = arith.mulf %1565, %1566 : vector<16x16xf32>
    %c2_481 = arith.constant 2 : index
    %1568 = memref.load %arg8[%c2_481] : memref<4xf32, #tpu.memory_space<smem>>
    %1569 = vector.broadcast %1568 : f32 to vector<16x16xf32>
    %1570 = arith.mulf %1567, %1569 : vector<16x16xf32>
    %c2_482 = arith.constant 2 : index
    %1571 = memref.load %arg9[%c2_482] : memref<4xf32, #tpu.memory_space<smem>>
    %1572 = vector.broadcast %1571 : f32 to vector<16x16xf32>
    %1573 = arith.addf %1570, %1572 : vector<16x16xf32>
    %1574 = vector.broadcast %1505 : vector<1x1xf32> to vector<16x16xf32>
    %1575 = arith.subf %1482, %1574 : vector<16x16xf32>
    %1576 = vector.broadcast %1543 : vector<1x1xf32> to vector<16x16xf32>
    %1577 = arith.mulf %1575, %1576 : vector<16x16xf32>
    %c3_483 = arith.constant 3 : index
    %1578 = memref.load %arg8[%c3_483] : memref<4xf32, #tpu.memory_space<smem>>
    %1579 = vector.broadcast %1578 : f32 to vector<16x16xf32>
    %1580 = arith.mulf %1577, %1579 : vector<16x16xf32>
    %c3_484 = arith.constant 3 : index
    %1581 = memref.load %arg9[%c3_484] : memref<4xf32, #tpu.memory_space<smem>>
    %1582 = vector.broadcast %1581 : f32 to vector<16x16xf32>
    %1583 = arith.addf %1580, %1582 : vector<16x16xf32>
    %c0_485 = arith.constant 0 : index
    %c0_486 = arith.constant 0 : index
    %c0_487 = arith.constant 0 : index
    %c0_488 = arith.constant 0 : index
    %1584 = vector.load %arg1[%c0_485, %c0_486, %c0_487, %c0_488] : memref<1x4x16x16xf32, #tpu.memory_space<vmem>>, vector<1x1x16x16xf32>
    %1585 = vector.shape_cast %1584 : vector<1x1x16x16xf32> to vector<16x16xf32>
    %1586 = arith.addf %1585, %1553 : vector<16x16xf32>
    %c0_489 = arith.constant 0 : index
    %c0_490 = arith.constant 0 : index
    %c0_491 = arith.constant 0 : index
    %c0_492 = arith.constant 0 : index
    %1587 = vector.load %arg10[%c0_489, %c0_490, %c0_491, %c0_492] : memref<1x4x16x16xf32, #tpu.memory_space<vmem>>, vector<1x1x16x16xf32>
    %1588 = vector.shape_cast %1587 : vector<1x1x16x16xf32> to vector<16x16xf32>
    %1589 = vector.shape_cast %1586 : vector<16x16xf32> to vector<1x1x16x16xf32>
    tpu.vector_store %arg10[%c0_489, %c0_490, %c0_491, %c0_492], %1589 {strides = array<i32>} : memref<1x4x16x16xf32, #tpu.memory_space<vmem>>, vector<1x1x16x16xf32>,
    %c0_493 = arith.constant 0 : index
    %c1_494 = arith.constant 1 : index
    %c0_495 = arith.constant 0 : index
    %c0_496 = arith.constant 0 : index
    %1590 = vector.load %arg1[%c0_493, %c1_494, %c0_495, %c0_496] : memref<1x4x16x16xf32, #tpu.memory_space<vmem>>, vector<1x1x16x16xf32>
    %1591 = vector.shape_cast %1590 : vector<1x1x16x16xf32> to vector<16x16xf32>
    %1592 = arith.addf %1591, %1563 : vector<16x16xf32>
    %c0_497 = arith.constant 0 : index
    %c1_498 = arith.constant 1 : index
    %c0_499 = arith.constant 0 : index
    %c0_500 = arith.constant 0 : index
    %1593 = vector.load %arg10[%c0_497, %c1_498, %c0_499, %c0_500] : memref<1x4x16x16xf32, #tpu.memory_space<vmem>>, vector<1x1x16x16xf32>
    %1594 = vector.shape_cast %1593 : vector<1x1x16x16xf32> to vector<16x16xf32>
    %1595 = vector.shape_cast %1592 : vector<16x16xf32> to vector<1x1x16x16xf32>
    tpu.vector_store %arg10[%c0_497, %c1_498, %c0_499, %c0_500], %1595 {strides = array<i32>} : memref<1x4x16x16xf32, #tpu.memory_space<vmem>>, vector<1x1x16x16xf32>,
    %c0_501 = arith.constant 0 : index
    %c2_502 = arith.constant 2 : index
    %c0_503 = arith.constant 0 : index
    %c0_504 = arith.constant 0 : index
    %1596 = vector.load %arg1[%c0_501, %c2_502, %c0_503, %c0_504] : memref<1x4x16x16xf32, #tpu.memory_space<vmem>>, vector<1x1x16x16xf32>
    %1597 = vector.shape_cast %1596 : vector<1x1x16x16xf32> to vector<16x16xf32>
    %1598 = arith.addf %1597, %1573 : vector<16x16xf32>
    %c0_505 = arith.constant 0 : index
    %c2_506 = arith.constant 2 : index
    %c0_507 = arith.constant 0 : index
    %c0_508 = arith.constant 0 : index
    %1599 = vector.load %arg10[%c0_505, %c2_506, %c0_507, %c0_508] : memref<1x4x16x16xf32, #tpu.memory_space<vmem>>, vector<1x1x16x16xf32>
    %1600 = vector.shape_cast %1599 : vector<1x1x16x16xf32> to vector<16x16xf32>
    %1601 = vector.shape_cast %1598 : vector<16x16xf32> to vector<1x1x16x16xf32>
    tpu.vector_store %arg10[%c0_505, %c2_506, %c0_507, %c0_508], %1601 {strides = array<i32>} : memref<1x4x16x16xf32, #tpu.memory_space<vmem>>, vector<1x1x16x16xf32>,
    %c0_509 = arith.constant 0 : index
    %c3_510 = arith.constant 3 : index
    %c0_511 = arith.constant 0 : index
    %c0_512 = arith.constant 0 : index
    %1602 = vector.load %arg1[%c0_509, %c3_510, %c0_511, %c0_512] : memref<1x4x16x16xf32, #tpu.memory_space<vmem>>, vector<1x1x16x16xf32>
    %1603 = vector.shape_cast %1602 : vector<1x1x16x16xf32> to vector<16x16xf32>
    %1604 = arith.addf %1603, %1583 : vector<16x16xf32>
    %c0_513 = arith.constant 0 : index
    %c3_514 = arith.constant 3 : index
    %c0_515 = arith.constant 0 : index
    %c0_516 = arith.constant 0 : index
    %1605 = vector.load %arg10[%c0_513, %c3_514, %c0_515, %c0_516] : memref<1x4x16x16xf32, #tpu.memory_space<vmem>>, vector<1x1x16x16xf32>
    %1606 = vector.shape_cast %1605 : vector<1x1x16x16xf32> to vector<16x16xf32>
    %1607 = vector.shape_cast %1604 : vector<16x16xf32> to vector<1x1x16x16xf32>
    tpu.vector_store %arg10[%c0_513, %c3_514, %c0_515, %c0_516], %1607 {strides = array<i32>} : memref<1x4x16x16xf32, #tpu.memory_space<vmem>>, vector<1x1x16x16xf32>,
    return
  }
  func.func @transform_0(%arg0: i32) -> (i32, i32, i32, i32) {
    %c0_i32 = arith.constant 0 : i32
    %c0_i32_0 = arith.constant 0 : i32
    %c0_i32_1 = arith.constant 0 : i32
    %c0_i32_2 = arith.constant 0 : i32
    return %arg0, %c0_i32, %c0_i32_0, %c0_i32_1 : i32, i32, i32, i32
  }
  func.func @transform_1(%arg0: i32) -> i32 {
    %c0_i32 = arith.constant 0 : i32
    %c0_i32_0 = arith.constant 0 : i32
    return %c0_i32 : i32
  }
  func.func @transform_2(%arg0: i32) -> i32 {
    %c0_i32 = arith.constant 0 : i32
    %c0_i32_0 = arith.constant 0 : i32
    return %c0_i32 : i32
  }
  func.func @transform_3(%arg0: i32) -> i32 {
    %c0_i32 = arith.constant 0 : i32
    %c0_i32_0 = arith.constant 0 : i32
    return %c0_i32 : i32
  }
  func.func @transform_4(%arg0: i32) -> i32 {
    %c0_i32 = arith.constant 0 : i32
    %c0_i32_0 = arith.constant 0 : i32
    return %c0_i32 : i32
  }
  func.func @transform_5(%arg0: i32) -> i32 {
    %c0_i32 = arith.constant 0 : i32
    %c0_i32_0 = arith.constant 0 : i32
    return %c0_i32 : i32
  }
  func.func @transform_6(%arg0: i32) -> i32 {
    %c0_i32 = arith.constant 0 : i32
    %c0_i32_0 = arith.constant 0 : i32
    return %c0_i32 : i32
  }
  func.func @transform_7(%arg0: i32) -> i32 {
    %c0_i32 = arith.constant 0 : i32
    %c0_i32_0 = arith.constant 0 : i32
    return %c0_i32 : i32
  }
  func.func @transform_8(%arg0: i32) -> i32 {
    %c0_i32 = arith.constant 0 : i32
    %c0_i32_0 = arith.constant 0 : i32
    return %c0_i32 : i32
  }
  func.func @transform_9(%arg0: i32) -> (i32, i32, i32, i32) {
    %c0_i32 = arith.constant 0 : i32
    %c0_i32_0 = arith.constant 0 : i32
    %c0_i32_1 = arith.constant 0 : i32
    %c0_i32_2 = arith.constant 0 : i32
    return %arg0, %c0_i32, %c0_i32_0, %c0_i32_1 : i32, i32, i32, i32
  }
}

</mosaic_0001>

<bundles_post_ra>
// kernel: tpu_custom_call.1
= control target key start
LH: loop header
LB: loop body
LE: loop exit
PB: predicated region body
PF: predicated region fallthrough
CT: control target
= control target key end

     0   :  { %s8114_s0 = inlined_call_operand.hbm [shape: f32[2,4,16,16], index: 0, kind: input, shape index: {}]   ;;  %s8115_s1 = inlined_call_operand.vmem [shape: f32[144], index: 1, kind: input, shape index: {}]   ;;  %s8116_s2 = inlined_call_operand.vmem [shape: f32[4], index: 2, kind: input, shape index: {}]   ;;  %s8117_s3 = inlined_call_operand.vmem [shape: f32[4], index: 3, kind: input, shape index: {}]   ;;  %s8118_s4 = inlined_call_operand.vmem [shape: f32[4], index: 4, kind: input, shape index: {}]   ;;  %s8119_s5 = inlined_call_operand.vmem [shape: f32[144], index: 5, kind: input, shape index: {}]   ;;  %s8120_s6 = inlined_call_operand.vmem [shape: f32[4], index: 6, kind: input, shape index: {}]   ;;  %s8121_s7 = inlined_call_operand.vmem [shape: f32[4], index: 7, kind: input, shape index: {}]   ;;  %s8122_s8 = inlined_call_operand.vmem [shape: f32[4], index: 8, kind: input, shape index: {}]   ;;  %s8123_s9 = inlined_call_operand.hbm [shape: f32[2,4,16,16], index: 9, kind: output, shape index: {}]  }
   0x1   :  { %8141 = sst [smem:[#allocation147_spill]] %s8114_s0 }
   0x2   :  { %8142 = sst [smem:[#allocation148_spill]] %s8115_s1 }
   0x3   :  { %8143 = sst [smem:[#allocation149_spill]] %s8116_s2 }
   0x4   :  { %8144 = sst [smem:[#allocation150_spill]] %s8117_s3 }
   0x5   :  { %8145 = sst [smem:[#allocation151_spill]] %s8118_s4 }
   0x6   :  { %8146 = sst [smem:[#allocation152_spill]] %s8119_s5 }
   0x7   :  { %8147 = sst [smem:[#allocation153_spill]] %s8120_s6 }
   0x8   :  { %8148 = sst [smem:[#allocation154_spill]] %s8121_s7 }
   0x9   :  { %8149 = sst [smem:[#allocation155_spill]] %s8122_s8 }
   0xa   :  { %14 = vsyncpa [#allocation4], 0 }
   0xb   :  { %16 = vsyncpa [#allocation4 + $0x1], 0 }
   0xc   :  { %17 = vsyncpa [#allocation6], 0 }
   0xd   :  { %18 = vsyncpa [#allocation9], 0 }
   0xe   :  { %19 = vsyncpa [#allocation12], 0 }
   0xf   :  { %20 = vsyncpa [#allocation15], 0 }
  0x10   :  { %21 = vsyncpa [#allocation18], 0 }
  0x11   :  { %22 = vsyncpa [#allocation5], 0 }
  0x12   :  { %24 = vsyncpa [#allocation5 + $0x1], 0  ;;  %s5291_s30 = smov 0   ;;  %s5293_s10 = smov 0  }
  0x13   :  { %s5295_s11 = smov 0   ;;  %s5297_s12 = smov 0  }
  0x14 LB: > { %8150 = sst [smem:[#allocation27_spill]] %s5209_s30  ;;  %s8154_s2 = sld [smem:[#allocation149_spill]]  ;;  %s5221_s12 = sphi %s5297_s12, %s8456_s12   ;;  %s5217_s11 = sphi %s5295_s11, %s8459_s11   ;;  %s5213_s10 = sphi %s5293_s10, %s8458_s10   ;;  %s5209_s30 = sphi %s5291_s30, %s8457_s30  }
  0x15   : > { %8151 = sst [smem:[#allocation28_spill]] %s5213_s10  ;;  %s5315_s16 = sadd.s32 4294967295, %s5221_s12  }
  0x16   : > { %8152 = sst [smem:[#allocation29_spill]] %s5217_s11  ;;  %p4469_p0 = scmp.ge.s32.totalorder %s5221_s12, 1 }
  0x17   : > { %8153 = sst [smem:[#allocation30_spill]] %s5221_s12  ;;  %p8124_p1 = scmp.eq.s32.totalorder %s5315_s16, 0 }
  0x18   : > { %p255_p2 = scmp.lt.s32.totalorder %s5221_s12, 3  ;;  %s8156_s4 = sld [smem:[#allocation151_spill]] }
  0x19   : > { %s8157_s6 = sld [smem:[#allocation153_spill]]  ;;  %s8159_s1 = sld [smem:[#allocation148_spill]] }
  0x1a   : > { %s279_s15 = sshll.u32 %s8154_s2, 4  ;;  %p5320_p3 = pnand %p4469_p0, %p255_p2  ;;  %s280_s15 = int_to_ptr.vmem [resolvable:$true] %s279_s15 }
  0x1b   : > { %s4985_s28 = scalar_lea.vmem %s280_s15, 16  ;;  %p4993_p11 = scmp.lt.s32.totalorder %s280_s15, %s280_s15 }
  0x1c   : > { %s8155_s17 = scalar_select %p5320_p3, 1, 0 }
  0x1d   : > { %p4858_p5 = pneg %p5320_p3  ;;  %p4986_p7 = scmp.ne.s32.totalorder %s280_s15, %s4985_s28 }
  0x1e   : > { %s301_s20 = sshll.u32 %s8156_s4, 4  ;;  %p4994_p12 = scmp.lt.s32.totalorder %s4985_s28, %s4985_s28  ;;  %s302_s20 = int_to_ptr.vmem [resolvable:$true] %s301_s20 }
  0x1f   : > { %s323_s23 = sshll.u32 %s8157_s6, 4  ;;  %p5335_p6 = pnand %p4858_p5, %p8124_p1  ;;  %s5339_s23 = int_to_ptr.vmem [resolvable:$true] %s323_s23 }
  0x20   : > { %s268_s27 = sshll.u32 %s8159_s1, 4  ;;  %p4995_p13 = por %p4994_p12, %p4993_p11  ;;  %s5344_s27 = int_to_ptr.vmem [resolvable:$true] %s268_s27 }
  0x21   : > { %p5348_p8 = pneg %p5335_p6 }
  0x23   : > { %p4988_p9 = pnand %p5348_p8, %p4986_p7 }
  0x25   : > { %p4989_p10 = pneg %p4988_p9 }
  0x27   : > { %p4996_p0 = pnand %p4995_p13, %p4989_p10 }
  0x29   : > { %4999 = shalt.err (!%p4996_p0)
}
  0x2a   : > { %s5223_s13 = smov [#allocation8]   ;;  %s5000_s14 = scalar_lea.vmem %s302_s20, 16 }
  0x2b   : > { %4864 = dma.vmem_to_smem (!%p5335_p6), %s280_s15, 16, %s5223_s13, [#allocation9]  }
  0x2c   : > { %p5001_p2 = scmp.ne.s32.totalorder %s302_s20, %s5000_s14  ;;  %p5008_p1 = scmp.lt.s32.totalorder %s302_s20, %s302_s20 }
  0x2d   : > { %p5009_p3 = scmp.lt.s32.totalorder %s5000_s14, %s5000_s14 }
  0x2e   : > { %p5003_p5 = pnand %p5001_p2, %p5348_p8 }
  0x2f   : > { %p5010_p7 = por %p5009_p3, %p5008_p1 }
  0x30   : > { %p5004_p4 = pneg %p5003_p5 }
  0x32   : > { %p5011_p9 = pnand %p5010_p7, %p5004_p4 }
  0x34   : > { %5014 = shalt.err (!%p5011_p9)
}
  0x35   : > { %s5224_s18 = smov [#allocation11]   ;;  %s5015_s19 = scalar_lea.vmem %s5339_s23, 16 }
  0x36   : > { %4870 = dma.vmem_to_smem (!%p5335_p6), %s302_s20, 16, %s5224_s18, [#allocation12]  }
  0x37   : > { %p5016_p10 = scmp.ne.s32.totalorder %s5339_s23, %s5015_s19  ;;  %p5023_p13 = scmp.lt.s32.totalorder %s5339_s23, %s5339_s23 }
  0x38   : > { %p5024_p0 = scmp.lt.s32.totalorder %s5015_s19, %s5015_s19 }
  0x39   : > { %p5018_p11 = pnand %p5016_p10, %p5348_p8 }
  0x3a   : > { %p5025_p2 = por %p5024_p0, %p5023_p13 }
  0x3b   : > { %p5019_p12 = pneg %p5018_p11 }
  0x3d   : > { %p5026_p1 = pnand %p5025_p2, %p5019_p12 }
  0x3f   : > { %5029 = shalt.err (!%p5026_p1)
}
  0x40   : > { %s5225_s15 = smov [#allocation14]   ;;  %s5030_s20 = scalar_lea.vmem %s5344_s27, 32 }
  0x41   : > { %4876 = dma.vmem_to_smem (!%p5335_p6), %s5339_s23, 16, %s5225_s15, [#allocation15]  }
  0x42   : > { %p5031_p3 = scmp.ne.s32.totalorder %s5344_s27, %s5030_s20  ;;  %p5038_p7 = scmp.lt.s32.totalorder %s5344_s27, %s5344_s27 }
  0x43   : > { %p5039_p9 = scmp.lt.s32.totalorder %s5030_s20, %s5030_s20 }
  0x44   : > { %p5033_p4 = pnand %p5031_p3, %p5348_p8 }
  0x45   : > { %p5040_p10 = por %p5039_p9, %p5038_p7 }
  0x46   : > { %p5034_p5 = pneg %p5033_p4 }
  0x48   : > { %p5041_p11 = pnand %p5040_p10, %p5034_p5 }
  0x4a   : > { %5044 = shalt.err (!%p5041_p11)
}
  0x4b   : > { %s5226_s21 = smov [#allocation7]   ;;  %s8161_s3 = sld [smem:[#allocation150_spill]] }
  0x4c   : > { %4861 = dma.vmem_to_smem (!%p5335_p6), %s5344_s27, 32, %s5226_s21, [#allocation6]  }
  0x4d   : > { %s8162_s5 = sld [smem:[#allocation152_spill]] }
  0x51   : > { %s290_s23 = sshll.u32 %s8161_s3, 4  ;;  %s291_s23 = int_to_ptr.vmem [resolvable:$true] %s290_s23 }
  0x52   : > { %s5045_s14 = scalar_lea.vmem %s291_s23, 16  ;;  %p5053_p2 = scmp.lt.s32.totalorder %s291_s23, %s291_s23 }
  0x53   : > { %s312_s13 = sshll.u32 %s8162_s5, 4  ;;  %p5046_p12 = scmp.ne.s32.totalorder %s291_s23, %s5045_s14  ;;  %s313_s13 = int_to_ptr.vmem [resolvable:$true] %s312_s13 }
  0x54   : > { %p5054_p1 = scmp.lt.s32.totalorder %s5045_s14, %s5045_s14 }
  0x55   : > { %p5048_p13 = pnand %p5046_p12, %p5348_p8 }
  0x56   : > { %p5055_p3 = por %p5054_p1, %p5053_p2 }
  0x57   : > { %p5049_p0 = pneg %p5048_p13 }
  0x59   : > { %p5056_p4 = pnand %p5055_p3, %p5049_p0 }
  0x5b   : > { %5059 = shalt.err (!%p5056_p4)
}
  0x5c   : > { %s5227_s27 = smov [#allocation10]   ;;  %s5060_s18 = scalar_lea.vmem %s313_s13, 32 }
  0x5d   : > { %4867 = dma.vmem_to_smem (!%p5335_p6), %s291_s23, 16, %s5227_s27, [#allocation9]  }
  0x5e   : > { %p5061_p5 = scmp.ne.s32.totalorder %s313_s13, %s5060_s18  ;;  %p5068_p10 = scmp.lt.s32.totalorder %s313_s13, %s313_s13 }
  0x5f   : > { %p5069_p11 = scmp.lt.s32.totalorder %s5060_s18, %s5060_s18 }
  0x60   : > { %p5063_p7 = pnand %p5061_p5, %p5348_p8 }
  0x61   : > { %p5070_p12 = por %p5069_p11, %p5068_p10 }
  0x62   : > { %p5064_p9 = pneg %p5063_p7 }
  0x64   : > { %p5071_p13 = pnand %p5070_p12, %p5064_p9 }
  0x66   : > { %5074 = shalt.err (!%p5071_p13)
}
  0x67   : > { %s5228_s19 = smov [#allocation13]   ;;  %s8163_s7 = sld [smem:[#allocation154_spill]] }
  0x68   : > { %4873 = dma.vmem_to_smem (!%p5335_p6), %s313_s13, 32, %s5228_s19, [#allocation12]  }
  0x69   : > { %s8164_s8 = sld [smem:[#allocation155_spill]] }
  0x6d   : > { %s334_s21 = sshll.u32 %s8163_s7, 4  ;;  %s335_s21 = int_to_ptr.vmem [resolvable:$true] %s334_s21 }
  0x6e   : > { %s5075_s26 = scalar_lea.vmem %s335_s21, 16  ;;  %p5083_p3 = scmp.lt.s32.totalorder %s335_s21, %s335_s21 }
  0x6f   : > { %s345_s23 = sshll.u32 %s8164_s8, 4  ;;  %p5076_p0 = scmp.ne.s32.totalorder %s335_s21, %s5075_s26  ;;  %s346_s23 = int_to_ptr.vmem [resolvable:$true] %s345_s23 }
  0x70   : > { %p5084_p4 = scmp.lt.s32.totalorder %s5075_s26, %s5075_s26 }
  0x71   : > { %p5078_p2 = pnand %p5076_p0, %p5348_p8 }
  0x72   : > { %p5085_p5 = por %p5084_p4, %p5083_p3 }
  0x73   : > { %p5079_p1 = pneg %p5078_p2 }
  0x75   : > { %p5086_p7 = pnand %p5085_p5, %p5079_p1 }
  0x77   : > { %5089 = shalt.err (!%p5086_p7)
}
  0x78   : > { %s5229_s28 = smov [#allocation16]   ;;  %s5090_s13 = scalar_lea.vmem %s346_s23, 16 }
  0x79   : > { %4879 = dma.vmem_to_smem (!%p5335_p6), %s335_s21, 16, %s5229_s28, [#allocation15]  }
  0x7a   : > { %p5091_p9 = scmp.ne.s32.totalorder %s346_s23, %s5090_s13  ;;  %p5098_p12 = scmp.lt.s32.totalorder %s346_s23, %s346_s23 }
  0x7b   : > { %p5099_p13 = scmp.lt.s32.totalorder %s5090_s13, %s5090_s13 }
  0x7c   : > { %p5093_p10 = pnand %p5091_p9, %p5348_p8 }
  0x7d   : > { %p5100_p0 = por %p5099_p13, %p5098_p12 }
  0x7e   : > { %p5094_p11 = pneg %p5093_p10 }
  0x80   : > { %p5101_p2 = pnand %p5100_p0, %p5094_p11 }
  0x82   : > { %5104 = shalt.err (!%p5101_p2)
}
  0x83   : > { %s5230_s14 = smov [#allocation17]   ;;  %s4468_s29 = sadd.s32 4294967294, %s5221_s12  }
  0x84   : > { %4882 = dma.vmem_to_smem (!%p5335_p6), %s346_s23, 16, %s5230_s14, [#allocation18]  }
  0x85   : > { %s5408_s27 = sadd.s32 1, %s5221_s12   ;;  %s37_s18 = sadd.s32 1, %s5217_s11 }
  0x86   : > { %8165 = sst [smem:[#allocation31_spill]] %s5408_s27  ;;  %s34_s24 = ssub.s32 %s5221_s12, %s5408_s27 }
  0x87   : > { %p35_p8 = scmp.eq.s32.totalorder %s34_s24, 0  ;;  %p44_p1 = scmp.ne.s32.totalorder %s5217_s11, %s5213_s10 }
  0x88   : > { %p45_p3 = scmp.eq.s32.totalorder %s5221_s12, 0  ;;  %p50_p4 = scmp.ne.s32.totalorder %s5213_s10, %s5209_s30 }
  0x89   : > { %s5419_s19 = scalar_select %p35_p8, %s5217_s11, %s37_s18  }
  0x8a   : > { %p5421_p5 = por %p45_p3, %p44_p1  ;;  %p8168_p7 = scmp.eq.s32.totalorder %s5315_s16, 0 }
  0x8b   : > { %8166 = sst [smem:[#allocation32_spill]] %s5419_s19  ;;  %p242_p9 = scmp.eq.s32.totalorder %s5315_s16, 1 }
  0x8c   : > { %p5427_p6 = por %p8168_p7, %p50_p4  ;;  %p248_p10 = scmp.eq.s32.totalorder %s4468_s29, 1 }
  0x8d   : > { %p4899_p11 = scmp.lt.s32.totalorder %s5221_s12, 2  ;;  %s356_s21 = sand.u32 1, %s5217_s11  }
  0x8e   : > { %p5434_p12 = por %p242_p9, %p44_p1  ;;  %p5438_p13 = por %p248_p10, %p50_p4 }
  0x8f   : > { %s4479_s23 = sshll.u32 %s356_s21, 6  ;;  %s4820_s26 = sshll.u32 %s5221_s12, 10 }
  0x90   : > { %s8170_s22 = scalar_select %p5434_p12, 1, 0 }
  0x91   : > { %s8171_s25 = scalar_select %p5438_p13, 1, 0 }
  0x92   : > { %s8173_s0 = sld [smem:[#allocation147_spill]]  ;;  %s360_s29 = scalar_lea.vmem [#allocation3], %s4479_s23 }
  0x93   : > { %8172 = sst [smem:[#allocation33_spill]] %s8171_s25  ;;  %s367_s24 = sshll.u32 %s360_s29, 4  ;;  %s5448_s24 = int_to_ptr.vmem [resolvable:$true] %s367_s24 }
  0x94   : > { %p5452_p0 = pnand %p4899_p11, %p5421_p5  ;;  %s5456_s1 = scalar_lea.sflag [#allocation4], %s356_s21 }
  0x96   : > { %p5107_p8 = pneg %p5452_p0 }
  0x98   : > { %s5446_s14 = scalar_lea.hbm %s8173_s0, %s4820_s26  ;;  %s5110_s15 = scalar_lea.hbm %s8173_s0, 2048 }
  0x99   : > { %s5105_s28 = scalar_lea.hbm %s5446_s14, 1024  ;;  %p5111_p4 = scmp.lt.u32.totalorder %s5446_s14, %s8173_s0 }
  0x9a   : > { %p5106_p2 = scmp.ne.s32.totalorder %s5446_s14, %s5105_s28  ;;  %p5112_p5 = scmp.lt.u32.totalorder %s5110_s15, %s5105_s28 }
  0x9b   : > { %p5114_p9 = scmp.lt.u32.totalorder %s5105_s28, %s5446_s14 }
  0x9c   : > { %p5108_p1 = pnand %p5107_p8, %p5106_p2  ;;  %p5113_p7 = por %p5112_p5, %p5111_p4 }
  0x9e   : > { %p5109_p3 = pneg %p5108_p1  ;;  %p5115_p10 = por %p5114_p9, %p5113_p7 }
  0xa0   : > { %p5116_p11 = pnand %p5115_p10, %p5109_p3 }
  0xa2   : > { %5119 = shalt.err (!%p5116_p11)
}
  0xa3   : > { %s5120_s21 = scalar_lea.vmem %s5448_s24, 1024  ;;  %s5231_s23 = smov [#allocation3]  }
  0xa4   : > { %p5121_p2 = scmp.ne.s32.totalorder %s5448_s24, %s5120_s21  ;;  %s5125_s26 = sshll.u32 %s5231_s23, 4  ;;  %s5126_s26 = int_to_ptr.vmem [resolvable:$false] %s5125_s26 }
  0xa5   : > { %s5127_s13 = scalar_lea.vmem %s5126_s26, 2048  ;;  %p5128_p12 = scmp.lt.s32.totalorder %s5448_s24, %s5126_s26 }
  0xa6   : > { %p5123_p1 = pnand %p5121_p2, %p5107_p8  ;;  %p5129_p4 = scmp.lt.s32.totalorder %s5127_s13, %s5120_s21 }
  0xa8   : > { %p5124_p13 = pneg %p5123_p1  ;;  %p5130_p5 = por %p5129_p4, %p5128_p12 }
  0xaa   : > { %p5131_p7 = pnand %p5130_p5, %p5124_p13 }
  0xac   : > { %5134 = shalt.err (!%p5131_p7)
}
  0xad   : > { %s5232_s28 = smov 128   ;;  %s5233_s15 = smov 8  }
  0xae   : > { %4886 = dma.hbm_to_vmem [thread:$0]  (!%p5452_p0), %s5446_s14, 1024, %s5448_s24, %s5456_s1, %s5232_s28, %s5232_s28, %s5233_s15  }
  0xaf   : > { %p8175_p8 = scmp.ne.s32.totalorder %s8155_s17, 0 }
  0xb1   : > { %379 = sbr.rel (%p8175_p8) target bundleno = 2196 (0x894), region = 56 }
  0xb8   : > { %s5487_s29 = sand.u32 1, %s5213_s10  }
  0xb9   : > { %s8127_s21 = sshll.u32 %s5487_s29, 6  ;;  %s382_s23 = scalar_lea.sflag [#allocation4], %s5487_s29 }
  0xba   : > { %s5493_s26 = scalar_lea.vmem [#allocation3], %s8127_s21 }
  0xbb   : > { %5180 = dma.done.wait (%p5427_p6), %s382_s23, 1024  }
  0xbc   : > { %5182 = vsyncadd (%p5427_p6), %s382_s23, 4294966272  ;;  %p8176_p12 = scmp.eq.s32.totalorder %s5315_s16, 0 }
  0xbe   : > { %5184 = dma.done.wait (%p8176_p12), [#allocation6], 32   ;;  %p8177_p13 = pmov %p8176_p12 }
  0xbf   : > { %p8178_p0 = pmov %p8176_p12 }
  0xc0   : > { %5186 = vsyncadd (%p8177_p13), [#allocation6], 4294967264 }
  0xc1   : > { %5188 = dma.done.wait (%p8178_p0), [#allocation9], 32   ;;  %p8179_p3 = pmov %p8178_p0 }
  0xc2   : > { %p8180_p9 = pmov %p8178_p0 }
  0xc3   : > { %5190 = vsyncadd (%p8179_p3), [#allocation9], 4294967264 }
  0xc4   : > { %5192 = dma.done.wait (%p8180_p9), [#allocation12], 48   ;;  %p8181_p10 = pmov %p8178_p0 }
  0xc5   : > { %p8182_p6 = pmov %p8178_p0 }
  0xc6   : > { %5194 = vsyncadd (%p8181_p10), [#allocation12], 4294967248 }
  0xc7   : > { %5196 = dma.done.wait (%p8182_p6), [#allocation15], 32   ;;  %p8183_p11 = pmov %p8178_p0 }
  0xc8   : > { %p8184_p2 = pmov %p8178_p0 }
  0xc9   : > { %5198 = vsyncadd (%p8183_p11), [#allocation15], 4294967264 }
  0xca   : > { %5200 = dma.done.wait (%p8184_p2), [#allocation18], 16   ;;  %p8185_p1 = pmov %p8178_p0 }
  0xcc   : > { %5202 = vsyncadd (%p8185_p1), [#allocation18], 4294967280 }
  0xcd   : > { %422 = sfence }
  0xce   : > { %v467_v0 = vld [vmem:[%s5493_s26] sm:$0xff]  ;;  %v4493_v1 = vld [vmem:[%s5493_s26 + $0x10] sm:$0xff]  ;;  %vm453_vm0 = vcmask 146432   ;;  %s8128_s1 = smov 1   ;;  %vm456_vm1 = vcmask 140288   ;;  %v468_v2 = vld [vmem:[%s5493_s26 + $0x8] sm:$0xff] }
  0xcf   : > { %471 = vrot.lane.b32.xlu0 %v467_v0, %s8128_s1  ;;  %485 = vrot.lane.b32.xlu1 %v4493_v1, %s8128_s1  ;;  %v4494_v3 = vld [vmem:[%s5493_s26 + $0x18] sm:$0xff]  ;;  %v5235_v4 = vmov 0.0   ;;  %v4495_v5 = vld [vmem:[%s5493_s26 + $0x20] sm:$0xff]  ;;  %vm477_vm2 = vcmask 138248   ;;  %s4502_s17 = sld [smem:[#allocation7 + $0x1]]  ;;  %s4503_s20 = sld [smem:[#allocation7 + $0x25]] }
  0xd0   : > { %454 = vst.msk [vmem:[#allocation2] sm:$0xff] %vm453_vm0, %v5235_v4  ;;  %455 = vst.msk [vmem:[#allocation2 + $0x8] sm:$0xff] %vm453_vm0, %v5235_v4  ;;  %v4496_v6 = vld [vmem:[%s5493_s26 + $0x28] sm:$0xff]  ;;  %v4497_v7 = vld [vmem:[%s5493_s26 + $0x30] sm:$0xff]  ;;  %s4504_s14 = sld [smem:[#allocation7 + $0x49]]  ;;  %s4505_s24 = sld [smem:[#allocation7 + $0x6d]] }
  0xd1   : > { %458 = vst.msk [vmem:[#allocation2 + $0x18] sm:$0xff] %vm453_vm0, %v5235_v4  ;;  %459 = vst.msk [vmem:[#allocation2 + $0x20] sm:$0xff] %vm453_vm0, %v5235_v4  ;;  %v4498_v8 = vld [vmem:[%s5493_s26 + $0x38] sm:$0xff]  ;;  %s8132_s18 = smov 127   ;;  %s4506_s13 = sld [smem:[#allocation7 + $0x2]]  ;;  %vm2194_vm3 = vcmask 130048  }
  0xd2   : > { %461 = vst.msk [vmem:[#allocation2 + $0x30] sm:$0xff] %vm453_vm0, %v5235_v4  ;;  %462 = vst.msk [vmem:[#allocation2 + $0x38] sm:$0xff] %vm453_vm0, %v5235_v4  ;;  %s4507_s28 = sld [smem:[#allocation7 + $0x26]]  ;;  %s4508_s15 = sld [smem:[#allocation7 + $0x4a]] }
  0xd3   : > { %464 = vst.msk [vmem:[#allocation2 + $0x48] sm:$0xff] %vm453_vm0, %v5235_v4  ;;  %465 = vst.msk [vmem:[#allocation2 + $0x50] sm:$0xff] %vm453_vm0, %v5235_v4  ;;  %473 = vrot.lane.b32.xlu0 %v468_v2, %s8128_s1  ;;  %487 = vrot.lane.b32.xlu1 %v4494_v3, %s8128_s1  ;;  %s4509_s23 = sld [smem:[#allocation7 + $0x6e]]  ;;  %s6210_s21 = sld [smem:[#allocation7 + $0x27]] }
  0xd4   : > { %457 = vst.msk [vmem:[#allocation2 + $0x10] sm:$0x3] %vm456_vm1, %v5235_v4  ;;  %460 = vst.msk [vmem:[#allocation2 + $0x28] sm:$0x3] %vm456_vm1, %v5235_v4  ;;  %s6216_s0 = sld [smem:[#allocation7 + $0x6f]]  ;;  %s6218_s2 = sld [smem:[#allocation7 + $0x6]] }
  0xd5   : > { %463 = vst.msk [vmem:[#allocation2 + $0x40] sm:$0x3] %vm456_vm1, %v5235_v4  ;;  %466 = vst.msk [vmem:[#allocation2 + $0x58] sm:$0x3] %vm456_vm1, %v5235_v4  ;;  %v549_v13 = vstv %s4502_s17  ;;  %v563_v18 = vstv %s4503_s20  ;;  %s8130_s17 = smov 126   ;;  %s4514_s20 = sld [smem:[#allocation7 + $0x4]] }
  0xd6   : > { %v577_v24 = vstv %s4504_s14  ;;  %v591_v27 = vstv %s4505_s24  ;;  %s4515_s14 = sld [smem:[#allocation7 + $0x28]]  ;;  %s4516_s24 = sld [smem:[#allocation7 + $0x4c]] }
  0xd7   : > { %499 = vrot.lane.b32.xlu0 %v4495_v5, %s8128_s1  ;;  %501 = vrot.lane.b32.xlu1 %v4496_v6, %s8128_s1  ;;  %v605_v30 = vstv %s4506_s13  ;;  %s4517_s13 = sld [smem:[#allocation7 + $0x70]]  ;;  %s6220_s3 = sld [smem:[#allocation7 + $0x2a]] }
  0xd8   : > { %v619_v33 = vstv %s4507_s28  ;;  %v633_v36 = vstv %s4508_s15  ;;  %s4518_s28 = sld [smem:[#allocation7 + $0x5]]  ;;  %s4519_s15 = sld [smem:[#allocation7 + $0x29]] }
  0xd9   : > { %v647_v39 = vstv %s4509_s23  ;;  %s4520_s23 = sld [smem:[#allocation7 + $0x4d]]  ;;  %s8287_s5 = smov 127  }
  0xda   : > { %s6235_s4 = sld [smem:[#allocation7 + $0x2d]]  ;;  %s8288_s6 = smov 126  }
  0xdb   : > { %513 = vrot.lane.b32.xlu0 %v4497_v7, %s8128_s1  ;;  %515 = vrot.lane.b32.xlu1 %v4498_v8, %s8128_s1  ;;  %v687_v43 = vstv %s4514_s20  ;;  %s4521_s20 = sld [smem:[#allocation7 + $0x71]]  ;;  %s6214_s1 = sld [smem:[#allocation7 + $0x4b]] }
  0xdc   : > { %v701_v47 = vstv %s4515_s14  ;;  %v715_v50 = vstv %s4516_s24  ;;  %s4526_s14 = sld [smem:[#allocation7 + $0x7]]  ;;  %s4527_s24 = sld [smem:[#allocation7 + $0x2b]] }
  0xdd   : > { %v729_v53 = vstv %s4517_s13  ;;  %s4528_s13 = sld [smem:[#allocation7 + $0x4f]]  ;;  %s6239_s7 = sld [smem:[#allocation7 + $0x51]] }
  0xde   : > { %v743_v56 = vstv %s4518_s28  ;;  %v757_v59 = vstv %s4519_s15  ;;  %s4529_s28 = sld [smem:[#allocation7 + $0x73]]  ;;  %s4530_s15 = sld [smem:[#allocation7 + $0x8]] }
  0xdf   : > { %v771_v62 = vstv %s4520_s23  ;;  %s4531_s23 = sld [smem:[#allocation7 + $0x2c]]  ;;  %s6241_s8 = sld [smem:[#allocation7 + $0x75]] }
  0xe0   : > { %s6243_s19 = sld [smem:[#allocation7 + $0xc]]  ;;  %s6245_s11 = sld [smem:[#allocation7 + $0x30]] }
  0xe1   : > { %v785_v1 = vstv %s4521_s20  ;;  %s4532_s20 = sld [smem:[#allocation7 + $0x50]]  ;;  %s6257_s27 = sld [smem:[#allocation7 + $0xf]] }
  0xe2   : > { %v825_v5 = vstv %s4526_s14  ;;  %s4533_s14 = sld [smem:[#allocation7 + $0x74]]  ;;  %s6255_s10 = sld [smem:[#allocation7 + $0x78]] }
  0xe3   : > { %s6259_s12 = sld [smem:[#allocation7 + $0x33]]  ;;  %s6263_s25 = sld [smem:[#allocation7 + $0x57]] }
  0xe4   : > { %s6265_s30 = sld [smem:[#allocation7 + $0x7b]]  ;;  %p8450_p5 = scmp.ne.s32.totalorder %s8170_s22, 0 }
 0x141   : > { %v472_v9 = vpop.permute.xlu0 %471  ;;  %v486_v10 = vpop.permute.xlu1 %485 }
 0x142   : > { %478 = vst.msk [vmem:[#allocation2 + $0x1] sm:$0xff] %vm477_vm2, %v472_v9  ;;  %492 = vst.msk [vmem:[#allocation2 + $0x19] sm:$0xff] %vm477_vm2, %v486_v10  ;;  %v839_v9 = vstv %s4527_s24  ;;  %s4538_s24 = sld [smem:[#allocation7 + $0xa]] }
 0x145   : > { %v474_v11 = vpop.permute.xlu0 %473  ;;  %v488_v12 = vpop.permute.xlu1 %487 }
 0x146   : > { %479 = vst.msk [vmem:[#allocation2 + $0x9] sm:$0xff] %vm477_vm2, %v474_v11  ;;  %493 = vst.msk [vmem:[#allocation2 + $0x21] sm:$0xff] %vm477_vm2, %v488_v12  ;;  %v853_v12 = vstv %s4528_s13  ;;  %s4539_s13 = sld [smem:[#allocation7 + $0x2e]] }
 0x149   : > { %v522_v14 = vld [vmem:[#allocation2] sm:$0xff]  ;;  %v500_v15 = vpop.permute.xlu0 %499  ;;  %v502_v16 = vpop.permute.xlu1 %501 }
 0x14a   : > { %v550_v17 = vmul.f32 %v549_v13, %v522_v14  ;;  %506 = vst.msk [vmem:[#allocation2 + $0x31] sm:$0xff] %vm477_vm2, %v500_v15  ;;  %507 = vst.msk [vmem:[#allocation2 + $0x39] sm:$0xff] %vm477_vm2, %v502_v16  ;;  %v564_v23 = vmul.f32 %v563_v18, %v522_v14  ;;  %v578_v26 = vmul.f32 %v577_v24, %v522_v14  ;;  %v660_v42 = vld [vmem:[#allocation2 + $0x1] sm:$0xff]  ;;  %v867_v15 = vstv %s4529_s28  ;;  %s4540_s28 = sld [smem:[#allocation7 + $0x52]] }
 0x14b   : > { %v592_v29 = vmul.f32 %v591_v27, %v522_v14  ;;  %v606_v32 = vmul.f32 %v605_v30, %v522_v14  ;;  %v620_v35 = vmul.f32 %v619_v33, %v522_v14  ;;  %v634_v38 = vmul.f32 %v633_v36, %v522_v14 }
 0x14c   : > { %554 = vrot.lane.b32.xlu0 %v550_v17, %s8132_s18  ;;  %v648_v41 = vmul.f32 %v647_v39, %v522_v14  ;;  %v688_v45 = vmul.f32 %v687_v43, %v660_v42  ;;  %v702_v49 = vmul.f32 %v701_v47, %v660_v42  ;;  %v716_v52 = vmul.f32 %v715_v50, %v660_v42 }
 0x14d   : > { %v523_v19 = vld [vmem:[#allocation2 + $0x8] sm:$0xff]  ;;  %v514_v20 = vpop.permute.xlu0 %513  ;;  %v516_v21 = vpop.permute.xlu1 %515  ;;  %v730_v55 = vmul.f32 %v729_v53, %v660_v42  ;;  %v744_v58 = vmul.f32 %v743_v56, %v660_v42  ;;  %v758_v61 = vmul.f32 %v757_v59, %v660_v42  ;;  %v772_v0 = vmul.f32 %v771_v62, %v660_v42 }
 0x14e   : > { %v551_v22 = vmul.f32 %v549_v13, %v523_v19  ;;  %520 = vst.msk [vmem:[#allocation2 + $0x49] sm:$0xff] %vm477_vm2, %v514_v20  ;;  %521 = vst.msk [vmem:[#allocation2 + $0x51] sm:$0xff] %vm477_vm2, %v516_v21  ;;  %v565_v25 = vmul.f32 %v563_v18, %v523_v19  ;;  %v579_v28 = vmul.f32 %v577_v24, %v523_v19  ;;  %v661_v46 = vld [vmem:[#allocation2 + $0x9] sm:$0xff]  ;;  %v881_v18 = vstv %s4530_s15  ;;  %s4541_s15 = sld [smem:[#allocation7 + $0x76]] }
 0x14f   : > { %v593_v31 = vmul.f32 %v591_v27, %v523_v19  ;;  %v607_v34 = vmul.f32 %v605_v30, %v523_v19  ;;  %v621_v37 = vmul.f32 %v619_v33, %v523_v19  ;;  %v635_v40 = vmul.f32 %v633_v36, %v523_v19  ;;  %v798_v4 = vld [vmem:[#allocation2 + $0x2] sm:$0xff]  ;;  %v799_v8 = vld [vmem:[#allocation2 + $0xa] sm:$0xff] }
 0x150   : > { %556 = vrot.lane.b32.xlu1 %v551_v22, %s8132_s18  ;;  %568 = vrot.lane.b32.xlu0 %v564_v23, %s8132_s18  ;;  %v649_v44 = vmul.f32 %v647_v39, %v523_v19  ;;  %v689_v48 = vmul.f32 %v687_v43, %v661_v46  ;;  %v703_v51 = vmul.f32 %v701_v47, %v661_v46  ;;  %v895_v21 = vstv %s4531_s23  ;;  %s4542_s23 = sld [smem:[#allocation7 + $0xb]] }
 0x151   : > { %v717_v54 = vmul.f32 %v715_v50, %v661_v46  ;;  %v731_v57 = vmul.f32 %v729_v53, %v661_v46  ;;  %v745_v60 = vmul.f32 %v743_v56, %v661_v46  ;;  %v759_v63 = vmul.f32 %v757_v59, %v661_v46 }
 0x152   : > { %v773_v2 = vmul.f32 %v771_v62, %v661_v46  ;;  %v786_v3 = vmul.f32 %v785_v1, %v660_v42  ;;  %v787_v6 = vmul.f32 %v785_v1, %v661_v46  ;;  %v826_v7 = vmul.f32 %v825_v5, %v798_v4 }
 0x153   : > { %v827_v10 = vmul.f32 %v825_v5, %v799_v8  ;;  %v840_v11 = vmul.f32 %v839_v9, %v798_v4  ;;  %v841_v13 = vmul.f32 %v839_v9, %v799_v8  ;;  %v854_v14 = vmul.f32 %v853_v12, %v798_v4 }
 0x154   : > { %570 = vrot.lane.b32.xlu1 %v565_v25, %s8132_s18  ;;  %582 = vrot.lane.b32.xlu0 %v578_v26, %s8132_s18  ;;  %v855_v16 = vmul.f32 %v853_v12, %v799_v8  ;;  %v868_v17 = vmul.f32 %v867_v15, %v798_v4  ;;  %v869_v19 = vmul.f32 %v867_v15, %v799_v8  ;;  %v909_v24 = vstv %s4532_s20  ;;  %s4543_s20 = sld [smem:[#allocation7 + $0x2f]] }
 0x155   : > { %v882_v20 = vmul.f32 %v881_v18, %v798_v4  ;;  %v883_v22 = vmul.f32 %v881_v18, %v799_v8  ;;  %v896_v23 = vmul.f32 %v895_v21, %v798_v4  ;;  %v897_v25 = vmul.f32 %v895_v21, %v799_v8 }
 0x156   : > { %v910_v26 = vmul.f32 %v909_v24, %v798_v4  ;;  %v923_v27 = vstv %s4533_s14  ;;  %v911_v30 = vmul.f32 %v909_v24, %v799_v8  ;;  %s4544_s14 = sld [smem:[#allocation7 + $0x53]] }
 0x157   : > { %v925_v33 = vmul.f32 %v923_v27, %v799_v8 }
 0x158   : > { %584 = vrot.lane.b32.xlu1 %v579_v28, %s8132_s18  ;;  %596 = vrot.lane.b32.xlu0 %v592_v29, %s8132_s18  ;;  %v936_v28 = vld [vmem:[#allocation2 + $0x18] sm:$0xff]  ;;  %v963_v29 = vstv %s4538_s24  ;;  %s4545_s24 = sld [smem:[#allocation7 + $0x77]] }
 0x15a   : > { %v1033_v47 = vstv %s4543_s20  ;;  %s4554_s20 = sld [smem:[#allocation7 + $0xe]] }
 0x15b   : > { %v1034_v50 = vmul.f32 %v1033_v47, %v936_v28 }
 0x15c   : > { %598 = vrot.lane.b32.xlu1 %v593_v31, %s8132_s18  ;;  %610 = vrot.lane.b32.xlu0 %v606_v32, %s8130_s17  ;;  %v924_v31 = vmul.f32 %v923_v27, %v798_v4  ;;  %v964_v32 = vmul.f32 %v963_v29, %v936_v28 }
 0x15e   : > { %v1061_v56 = vstv %s4545_s24  ;;  %s4556_s24 = sld [smem:[#allocation7 + $0x56]] }
 0x160   : > { %612 = vrot.lane.b32.xlu1 %v607_v34, %s8130_s17  ;;  %624 = vrot.lane.b32.xlu0 %v620_v35, %s8130_s17  ;;  %v937_v34 = vld [vmem:[#allocation2 + $0x20] sm:$0xff]  ;;  %v977_v35 = vstv %s4539_s13  ;;  %s5602_s13 = sld [smem:[#allocation7 + $0xd]] }
 0x161   : > { %v965_v36 = vmul.f32 %v963_v29, %v937_v34  ;;  %v979_v39 = vmul.f32 %v977_v35, %v937_v34  ;;  %v1063_v1 = vmul.f32 %v1061_v56, %v937_v34 }
 0x164   : > { %626 = vrot.lane.b32.xlu1 %v621_v37, %s8130_s17  ;;  %638 = vrot.lane.b32.xlu0 %v634_v38, %s8130_s17  ;;  %v978_v37 = vmul.f32 %v977_v35, %v936_v28  ;;  %v991_v38 = vstv %s4540_s28  ;;  %s5610_s28 = sld [smem:[#allocation7 + $0x31]]  ;;  %v1185_v29 = vstv %s4556_s24  ;;  %s4565_s24 = sld [smem:[#allocation7 + $0x7c]] }
 0x165   : > { %v993_v42 = vmul.f32 %v991_v38, %v937_v34 }
 0x166   : > { %v1101_v62 = vstv %s5602_s13  ;;  %s4557_s13 = sld [smem:[#allocation7 + $0x7a]] }
 0x168   : > { %640 = vrot.lane.b32.xlu1 %v635_v40, %s8130_s17  ;;  %652 = vrot.lane.b32.xlu0 %v648_v41, %s8130_s17  ;;  %v992_v40 = vmul.f32 %v991_v38, %v936_v28  ;;  %v1005_v41 = vstv %s4541_s15  ;;  %s4552_s15 = sld [smem:[#allocation7 + $0x55]] }
 0x169   : > { %v1006_v43 = vmul.f32 %v1005_v41, %v936_v28 }
 0x16a   : > { %v1115_v4 = vstv %s5610_s28  ;;  %s5671_s28 = sld [smem:[#allocation7 + $0x10]] }
 0x16c   : > { %654 = vrot.lane.b32.xlu1 %v649_v44, %s8130_s17  ;;  %692 = vrot.lane.b32.xlu0 %v688_v45, %s8132_s18  ;;  %v1019_v44 = vstv %s4542_s23  ;;  %v1007_v45 = vmul.f32 %v1005_v41, %v937_v34  ;;  %s4553_s23 = sld [smem:[#allocation7 + $0x79]] }
 0x16d   : > { %v1020_v46 = vmul.f32 %v1019_v44, %v936_v28 }
 0x16e   : > { %v1129_v9 = vstv %s4552_s15  ;;  %s5681_s15 = sld [smem:[#allocation7 + $0x34]] }
 0x170   : > { %694 = vrot.lane.b32.xlu1 %v689_v48, %s8132_s18  ;;  %706 = vrot.lane.b32.xlu0 %v702_v49, %s8132_s18  ;;  %v1021_v49 = vmul.f32 %v1019_v44, %v937_v34 }
 0x174   : > { %708 = vrot.lane.b32.xlu1 %v703_v51, %s8132_s18  ;;  %720 = vrot.lane.b32.xlu0 %v716_v52, %s8132_s18  ;;  %v1047_v51 = vstv %s4544_s14  ;;  %s4555_s14 = sld [smem:[#allocation7 + $0x32]] }
 0x175   : > { %v1049_v59 = vmul.f32 %v1047_v51, %v937_v34 }
 0x178   : > { %722 = vrot.lane.b32.xlu1 %v717_v54, %s8132_s18  ;;  %734 = vrot.lane.b32.xlu0 %v730_v55, %s8132_s18  ;;  %v1035_v54 = vmul.f32 %v1033_v47, %v937_v34  ;;  %v1048_v55 = vmul.f32 %v1047_v51, %v936_v28  ;;  %v1199_v34 = vstv %s4557_s13  ;;  %s4568_s13 = sld [smem:[#allocation7 + $0x59]] }
 0x17a   : > { %v1171_v24 = vstv %s4555_s14  ;;  %s4567_s14 = sld [smem:[#allocation7 + $0x35]] }
 0x17c   : > { %736 = vrot.lane.b32.xlu1 %v731_v57, %s8132_s18  ;;  %748 = vrot.lane.b32.xlu0 %v744_v58, %s8130_s17 }
 0x180   : > { %750 = vrot.lane.b32.xlu1 %v745_v60, %s8130_s17  ;;  %762 = vrot.lane.b32.xlu0 %v758_v61, %s8130_s17  ;;  %v1062_v60 = vmul.f32 %v1061_v56, %v936_v28  ;;  %v5618_v61 = vld [vmem:[#allocation2 + $0x19] sm:$0xff] }
 0x181   : > { %v1116_v8 = vmul.f32 %v1115_v4, %v5618_v61  ;;  %v1172_v28 = vmul.f32 %v1171_v24, %v5618_v61  ;;  %v1200_v38 = vmul.f32 %v1199_v34, %v5618_v61 }
 0x184   : > { %764 = vrot.lane.b32.xlu1 %v759_v63, %s8130_s17  ;;  %776 = vrot.lane.b32.xlu0 %v772_v0, %s8130_s17 }
 0x188   : > { %778 = vrot.lane.b32.xlu1 %v773_v2, %s8130_s17  ;;  %790 = vrot.lane.b32.xlu0 %v786_v3, %s8130_s17  ;;  %v1102_v2 = vmul.f32 %v1101_v62, %v5618_v61  ;;  %v5628_v3 = vld [vmem:[#allocation2 + $0x21] sm:$0xff] }
 0x189   : > { %v1117_v12 = vmul.f32 %v1115_v4, %v5628_v3  ;;  %v1309_v4 = vstv %s4567_s14  ;;  %s4578_s14 = sld [smem:[#allocation7 + $0x14]] }
 0x18c   : > { %792 = vrot.lane.b32.xlu1 %v787_v6, %s8130_s17  ;;  %830 = vrot.lane.b32.xlu0 %v826_v7, %s8132_s18  ;;  %v1103_v7 = vmul.f32 %v1101_v62, %v5628_v3 }
 0x190   : > { %832 = vrot.lane.b32.xlu1 %v827_v10, %s8132_s18  ;;  %844 = vrot.lane.b32.xlu0 %v840_v11, %s8132_s18 }
 0x194   : > { %846 = vrot.lane.b32.xlu1 %v841_v13, %s8132_s18  ;;  %858 = vrot.lane.b32.xlu0 %v854_v14, %s8132_s18  ;;  %v1130_v13 = vmul.f32 %v1129_v9, %v5618_v61  ;;  %v1143_v14 = vstv %s4553_s23  ;;  %s4564_s23 = sld [smem:[#allocation7 + $0x58]] }
 0x195   : > { %v1144_v18 = vmul.f32 %v1143_v14, %v5618_v61 }
 0x198   : > { %860 = vrot.lane.b32.xlu1 %v855_v16, %s8132_s18  ;;  %872 = vrot.lane.b32.xlu0 %v868_v17, %s8132_s18  ;;  %v1131_v17 = vmul.f32 %v1129_v9, %v5628_v3 }
 0x19c   : > { %874 = vrot.lane.b32.xlu1 %v869_v19, %s8132_s18  ;;  %886 = vrot.lane.b32.xlu0 %v882_v20, %s8130_s17  ;;  %v1157_v19 = vstv %s4554_s20  ;;  %s4566_s20 = sld [smem:[#allocation7 + $0x11]] }
 0x19d   : > { %v1159_v27 = vmul.f32 %v1157_v19, %v5628_v3 }
 0x1a0   : > { %888 = vrot.lane.b32.xlu1 %v883_v22, %s8130_s17  ;;  %900 = vrot.lane.b32.xlu0 %v896_v23, %s8130_s17  ;;  %v1145_v22 = vmul.f32 %v1143_v14, %v5628_v3  ;;  %v1158_v23 = vmul.f32 %v1157_v19, %v5618_v61 }
 0x1a4   : > { %902 = vrot.lane.b32.xlu1 %v897_v25, %s8130_s17  ;;  %914 = vrot.lane.b32.xlu0 %v910_v26, %s8130_s17 }
 0x1a8   : > { %916 = vrot.lane.b32.xlu1 %v911_v30, %s8130_s17  ;;  %928 = vrot.lane.b32.xlu0 %v924_v31, %s8130_s17 }
 0x1ac   : > { %930 = vrot.lane.b32.xlu1 %v925_v33, %s8130_s17  ;;  %968 = vrot.lane.b32.xlu0 %v964_v32, %s8132_s18  ;;  %v1173_v32 = vmul.f32 %v1171_v24, %v5628_v3  ;;  %v1186_v33 = vmul.f32 %v1185_v29, %v5618_v61  ;;  %v1295_v61 = vstv %s4566_s20  ;;  %s4576_s20 = sld [smem:[#allocation7 + $0x5b]] }
 0x1b0   : > { %970 = vrot.lane.b32.xlu1 %v965_v36, %s8132_s18  ;;  %982 = vrot.lane.b32.xlu0 %v978_v37, %s8132_s18  ;;  %v1187_v37 = vmul.f32 %v1185_v29, %v5628_v3 }
 0x1b4   : > { %984 = vrot.lane.b32.xlu1 %v979_v39, %s8132_s18  ;;  %996 = vrot.lane.b32.xlu0 %v992_v40, %s8132_s18  ;;  %v5691_v39 = vld [vmem:[#allocation2 + $0x1a] sm:$0xff]  ;;  %v1239_v40 = vstv %s5671_s28  ;;  %s4569_s28 = sld [smem:[#allocation7 + $0x7d]] }
 0x1b5   : > { %v1240_v44 = vmul.f32 %v1239_v40, %v5691_v39 }
 0x1b8   : > { %998 = vrot.lane.b32.xlu1 %v993_v42, %s8132_s18  ;;  %1010 = vrot.lane.b32.xlu0 %v1006_v43, %s8132_s18  ;;  %v1201_v43 = vmul.f32 %v1199_v34, %v5628_v3  ;;  %v1296_v3 = vmul.f32 %v1295_v61, %v5691_v39 }
 0x1ba   : > { %v1337_v29 = vstv %s4569_s28  ;;  %s4580_s28 = sld [smem:[#allocation7 + $0x5c]] }
 0x1bc   : > { %1012 = vrot.lane.b32.xlu1 %v1007_v45, %s8132_s18  ;;  %1024 = vrot.lane.b32.xlu0 %v1020_v46, %s8130_s17  ;;  %v5702_v45 = vld [vmem:[#allocation2 + $0x22] sm:$0xff]  ;;  %v1253_v46 = vstv %s5681_s15  ;;  %s5745_s15 = sld [smem:[#allocation7 + $0x13]] }
 0x1bd   : > { %v1254_v51 = vmul.f32 %v1253_v46, %v5691_v39  ;;  %v1297_v9 = vmul.f32 %v1295_v61, %v5702_v45 }
 0x1be   : > { %v5600_v48 = vpop.permute.xlu0 %554 }
 0x1c0   : > { %1026 = vrot.lane.b32.xlu1 %v1021_v49, %s8130_s17  ;;  %1038 = vrot.lane.b32.xlu0 %v1034_v50, %s8130_s17  ;;  %v1241_v50 = vmul.f32 %v1239_v40, %v5702_v45 }
 0x1c2   : > { %v5606_v52 = vpop.permute.xlu1 %556  ;;  %v5608_v53 = vpop.permute.xlu0 %568  ;;  %v1377_v40 = vstv %s5745_s15  ;;  %s4581_s15 = sld [smem:[#allocation7 + $0x80]] }
 0x1c4   : > { %1040 = vrot.lane.b32.xlu1 %v1035_v54, %s8130_s17  ;;  %1052 = vrot.lane.b32.xlu0 %v1048_v55, %s8130_s17  ;;  %v1267_v54 = vstv %s4564_s23  ;;  %s5755_s23 = sld [smem:[#allocation7 + $0x37]] }
 0x1c6   : > { %v5614_v57 = vpop.permute.xlu1 %570  ;;  %v5616_v58 = vpop.permute.xlu0 %582 }
 0x1c8   : > { %1054 = vrot.lane.b32.xlu1 %v1049_v59, %s8130_s17  ;;  %1066 = vrot.lane.b32.xlu0 %v1062_v60, %s8130_s17  ;;  %v1255_v59 = vmul.f32 %v1253_v46, %v5702_v45  ;;  %v1268_v60 = vmul.f32 %v1267_v54, %v5691_v39  ;;  %v1339_v46 = vmul.f32 %v1337_v29, %v5702_v45 }
 0x1ca   : > { %v5623_v63 = vpop.permute.xlu1 %584  ;;  %v5625_v0 = vpop.permute.xlu0 %596 }
 0x1cc   : > { %1068 = vrot.lane.b32.xlu1 %v1063_v1, %s8130_s17  ;;  %1106 = vrot.lane.b32.xlu0 %v1102_v2, %s8132_s18  ;;  %v1269_v2 = vmul.f32 %v1267_v54, %v5702_v45  ;;  %v1391_v54 = vstv %s5755_s23  ;;  %s5819_s23 = sld [smem:[#allocation7 + $0x16]] }
 0x1ce   : > { %v5633_v5 = vpop.permute.xlu1 %598  ;;  %v5635_v6 = vpop.permute.xlu0 %610 }
 0x1d0   : > { %1108 = vrot.lane.b32.xlu1 %v1103_v7, %s8132_s18  ;;  %1120 = vrot.lane.b32.xlu0 %v1116_v8, %s8132_s18 }
 0x1d2   : > { %v5641_v10 = vpop.permute.xlu1 %612  ;;  %v5643_v11 = vpop.permute.xlu0 %624 }
 0x1d4   : > { %1122 = vrot.lane.b32.xlu1 %v1117_v12, %s8132_s18  ;;  %1134 = vrot.lane.b32.xlu0 %v1130_v13, %s8132_s18  ;;  %v1310_v12 = vmul.f32 %v1309_v4, %v5691_v39  ;;  %v1281_v13 = vstv %s4565_s24  ;;  %s4579_s24 = sld [smem:[#allocation7 + $0x38]] }
 0x1d5   : > { %v1282_v19 = vmul.f32 %v1281_v13, %v5691_v39 }
 0x1d6   : > { %v5649_v15 = vpop.permute.xlu1 %626  ;;  %v5651_v16 = vpop.permute.xlu0 %638 }
 0x1d8   : > { %1136 = vrot.lane.b32.xlu1 %v1131_v17, %s8132_s18  ;;  %1148 = vrot.lane.b32.xlu0 %v1144_v18, %s8132_s18  ;;  %v1311_v18 = vmul.f32 %v1309_v4, %v5702_v45 }
 0x1da   : > { %v5657_v20 = vpop.permute.xlu1 %640  ;;  %v5659_v21 = vpop.permute.xlu0 %652 }
 0x1dc   : > { %1150 = vrot.lane.b32.xlu1 %v1145_v22, %s8132_s18  ;;  %1162 = vrot.lane.b32.xlu0 %v1158_v23, %s8130_s17  ;;  %v1323_v22 = vstv %s4568_s13  ;;  %s4577_s13 = sld [smem:[#allocation7 + $0x7f]] }
 0x1dd   : > { %v1325_v34 = vmul.f32 %v1323_v22, %v5702_v45 }
 0x1de   : > { %v5665_v25 = vpop.permute.xlu1 %654  ;;  %v5667_v26 = vpop.permute.xlu0 %692 }
 0x1e0   : > { %1164 = vrot.lane.b32.xlu1 %v1159_v27, %s8130_s17  ;;  %1176 = vrot.lane.b32.xlu0 %v1172_v28, %s8130_s17  ;;  %v1283_v27 = vmul.f32 %v1281_v13, %v5702_v45  ;;  %v1324_v28 = vmul.f32 %v1323_v22, %v5691_v39 }
 0x1e2   : > { %v5675_v30 = vpop.permute.xlu1 %694  ;;  %v5677_v31 = vpop.permute.xlu0 %706 }
 0x1e4   : > { %1178 = vrot.lane.b32.xlu1 %v1173_v32, %s8130_s17  ;;  %1190 = vrot.lane.b32.xlu0 %v1186_v33, %s8130_s17 }
 0x1e6   : > { %v5685_v35 = vpop.permute.xlu1 %708  ;;  %v5687_v36 = vpop.permute.xlu0 %720 }
 0x1e8   : > { %1192 = vrot.lane.b32.xlu1 %v1187_v37, %s8130_s17  ;;  %1204 = vrot.lane.b32.xlu0 %v1200_v38, %s8130_s17  ;;  %v1338_v37 = vmul.f32 %v1337_v29, %v5691_v39  ;;  %v5765_v38 = vld [vmem:[#allocation2 + $0x30] sm:$0xff] }
 0x1e9   : > { %v1392_v61 = vmul.f32 %v1391_v54, %v5765_v38 }
 0x1ea   : > { %v5696_v41 = vpop.permute.xlu1 %722  ;;  %v5698_v42 = vpop.permute.xlu0 %734 }
 0x1eb   : > { %8186 = vst [vmem:[#allocation34_spill] sm:$0xff] %v5696_v41  ;;  %8187 = vst [vmem:[#allocation35_spill] sm:$0xff] %v5698_v42 }
 0x1ec   : > { %1206 = vrot.lane.b32.xlu1 %v1201_v43, %s8130_s17  ;;  %1244 = vrot.lane.b32.xlu0 %v1240_v44, %s8132_s18 }
 0x1ee   : > { %v5707_v47 = vpop.permute.xlu1 %736  ;;  %v5709_v49 = vpop.permute.xlu0 %748 }
 0x1ef   : > { %8188 = vst [vmem:[#allocation36_spill] sm:$0xff] %v5707_v47 }
 0x1f0   : > { %1246 = vrot.lane.b32.xlu1 %v1241_v50, %s8132_s18  ;;  %1258 = vrot.lane.b32.xlu0 %v1254_v51, %s8132_s18  ;;  %v1378_v50 = vmul.f32 %v1377_v40, %v5765_v38  ;;  %v5776_v51 = vld [vmem:[#allocation2 + $0x38] sm:$0xff] }
 0x1f1   : > { %v1393_v4 = vmul.f32 %v1391_v54, %v5776_v51 }
 0x1f2   : > { %v5715_v55 = vpop.permute.xlu1 %750  ;;  %v5717_v56 = vpop.permute.xlu0 %762 }
 0x1f4   : > { %1260 = vrot.lane.b32.xlu1 %v1255_v59, %s8132_s18  ;;  %1272 = vrot.lane.b32.xlu0 %v1268_v60, %s8132_s18  ;;  %v1379_v60 = vmul.f32 %v1377_v40, %v5776_v51  ;;  %v1419_v40 = vstv %s4577_s13  ;;  %s4591_s13 = sld [smem:[#allocation7 + $0x3b]] }
 0x1f6   : > { %v5723_v62 = vpop.permute.xlu1 %764  ;;  %v5725_v1 = vpop.permute.xlu0 %776 }
 0x1f8   : > { %1274 = vrot.lane.b32.xlu1 %v1269_v2, %s8132_s18  ;;  %1300 = vrot.lane.b32.xlu0 %v1296_v3, %s8130_s17  ;;  %v1405_v2 = vstv %s4576_s20  ;;  %s5829_s20 = sld [smem:[#allocation7 + $0x3a]] }
 0x1fa   : > { %v5731_v7 = vpop.permute.xlu1 %778  ;;  %v5733_v8 = vpop.permute.xlu0 %790 }
 0x1fb   : > { %8189 = vst [vmem:[#allocation37_spill] sm:$0xff] %v5731_v7  ;;  %8190 = vst [vmem:[#allocation38_spill] sm:$0xff] %v5733_v8 }
 0x1fc   : > { %1302 = vrot.lane.b32.xlu1 %v1297_v9, %s8130_s17  ;;  %1314 = vrot.lane.b32.xlu0 %v1310_v12, %s8130_s17  ;;  %v1406_v9 = vmul.f32 %v1405_v2, %v5765_v38  ;;  %v1433_v12 = vstv %s4578_s14  ;;  %s4588_s14 = sld [smem:[#allocation7 + $0x5e]] }
 0x1fd   : > { %v1434_v22 = vmul.f32 %v1433_v12, %v5765_v38 }
 0x1fe   : > { %v5739_v14 = vpop.permute.xlu1 %792  ;;  %v5741_v17 = vpop.permute.xlu0 %830 }
 0x1ff   : > { %8191 = vst [vmem:[#allocation39_spill] sm:$0xff] %v5739_v14 }
 0x200   : > { %1316 = vrot.lane.b32.xlu1 %v1311_v18, %s8130_s17  ;;  %1286 = vrot.lane.b32.xlu0 %v1282_v19, %s8132_s18  ;;  %v1407_v19 = vmul.f32 %v1405_v2, %v5776_v51 }
 0x202   : > { %v5749_v23 = vpop.permute.xlu1 %832  ;;  %v5751_v24 = vpop.permute.xlu0 %844 }
 0x204   : > { %1288 = vrot.lane.b32.xlu1 %v1283_v27, %s8132_s18  ;;  %1328 = vrot.lane.b32.xlu0 %v1324_v28, %s8130_s17  ;;  %v1447_v27 = vstv %s4579_s24  ;;  %s4590_s24 = sld [smem:[#allocation7 + $0x17]] }
 0x205   : > { %v1449_v54 = vmul.f32 %v1447_v27, %v5776_v51 }
 0x206   : > { %v5759_v32 = vpop.permute.xlu1 %846  ;;  %v5761_v33 = vpop.permute.xlu0 %858 }
 0x207   : > { %8192 = vst [vmem:[#allocation40_spill] sm:$0xff] %v5759_v32  ;;  %8193 = vst [vmem:[#allocation41_spill] sm:$0xff] %v5761_v33  ;;  %v4962_v32 = vld [vmem:[#allocation2 + $0x8] sm:$0xff] }
 0x208   : > { %1330 = vrot.lane.b32.xlu1 %v1325_v34, %s8130_s17  ;;  %1342 = vrot.lane.b32.xlu0 %v1338_v37, %s8130_s17  ;;  %v1435_v34 = vmul.f32 %v1433_v12, %v5776_v51  ;;  %v1448_v37 = vmul.f32 %v1447_v27, %v5765_v38 }
 0x20a   : > { %v5770_v43 = vpop.permute.xlu1 %860  ;;  %v5772_v44 = vpop.permute.xlu0 %872 }
 0x20b   : > { %8194 = vst [vmem:[#allocation42_spill] sm:$0xff] %v5770_v43  ;;  %8195 = vst [vmem:[#allocation43_spill] sm:$0xff] %v5772_v44  ;;  %v945_v44 = vstv %s6235_s4  ;;  %s6492_s4 = sld [smem:[#allocation7 + $0x7e]] }
 0x20c   : > { %1344 = vrot.lane.b32.xlu1 %v1339_v46, %s8130_s17  ;;  %1382 = vrot.lane.b32.xlu0 %v1378_v50, %s8132_s18 }
 0x20e   : > { %v5781_v39 = vpop.permute.xlu1 %874  ;;  %v5783_v59 = vpop.permute.xlu0 %886 }
 0x20f   : > { %8196 = vst [vmem:[#allocation44_spill] sm:$0xff] %v5781_v39 }
 0x210   : > { %1384 = vrot.lane.b32.xlu1 %v1379_v60, %s8132_s18  ;;  %1396 = vrot.lane.b32.xlu0 %v1392_v61, %s8132_s18  ;;  %v1420_v60 = vmul.f32 %v1419_v40, %v5765_v38  ;;  %v1461_v61 = vstv %s4580_s28  ;;  %s4589_s28 = sld [smem:[#allocation7 + $0x82]] }
 0x211   : > { %v1462_v12 = vmul.f32 %v1461_v61, %v5765_v38 }
 0x212   : > { %v5789_v45 = vpop.permute.xlu1 %888  ;;  %v5791_v3 = vpop.permute.xlu0 %900 }
 0x213   : > { %8197 = vst [vmem:[#allocation45_spill] sm:$0xff] %v5789_v45  ;;  %8198 = vst [vmem:[#allocation46_spill] sm:$0xff] %v5791_v3 }
 0x214   : > { %1398 = vrot.lane.b32.xlu1 %v1393_v4, %s8132_s18  ;;  %1410 = vrot.lane.b32.xlu0 %v1406_v9, %s8132_s18  ;;  %v1421_v9 = vmul.f32 %v1419_v40, %v5776_v51  ;;  %v1515_v40 = vstv %s5819_s23  ;;  %s4593_s23 = sld [smem:[#allocation7 + $0x83]] }
 0x216   : > { %v5797_v13 = vpop.permute.xlu1 %902  ;;  %v5799_v18 = vpop.permute.xlu0 %914 }
 0x217   : > { %8199 = vst [vmem:[#allocation47_spill] sm:$0xff] %v5797_v13  ;;  %8200 = vst [vmem:[#allocation48_spill] sm:$0xff] %v5799_v18 }
 0x218   : > { %1412 = vrot.lane.b32.xlu1 %v1407_v19, %s8132_s18  ;;  %1438 = vrot.lane.b32.xlu0 %v1434_v22, %s8130_s17  ;;  %v1475_v19 = vstv %s4581_s15  ;;  %s4592_s15 = sld [smem:[#allocation7 + $0x5f]] }
 0x21a   : > { %v5805_v28 = vpop.permute.xlu1 %916  ;;  %v5807_v29 = vpop.permute.xlu0 %928 }
 0x21b   : > { %8201 = vst [vmem:[#allocation49_spill] sm:$0xff] %v5805_v28  ;;  %8202 = vst [vmem:[#allocation50_spill] sm:$0xff] %v5807_v29  ;;  %v1585_v29 = vstv %s4591_s13  ;;  %s4602_s13 = sld [smem:[#allocation7 + $0x1a]] }
 0x21c   : > { %1440 = vrot.lane.b32.xlu1 %v1435_v34, %s8130_s17  ;;  %1452 = vrot.lane.b32.xlu0 %v1448_v37, %s8130_s17  ;;  %v1463_v34 = vmul.f32 %v1461_v61, %v5776_v51  ;;  %v1476_v37 = vmul.f32 %v1475_v19, %v5765_v38  ;;  %v1529_v61 = vstv %s5829_s20  ;;  %s5893_s20 = sld [smem:[#allocation7 + $0x19]] }
 0x21e   : > { %v5813_v46 = vpop.permute.xlu1 %930  ;;  %v5815_v50 = vpop.permute.xlu0 %968 }
 0x21f   : > { %8203 = vst [vmem:[#allocation51_spill] sm:$0xff] %v5813_v46  ;;  %8204 = vst [vmem:[#allocation52_spill] sm:$0xff] %v5815_v50  ;;  %v4964_v50 = vld [vmem:[#allocation2 + $0x9] sm:$0xff] }
 0x220   : > { %1454 = vrot.lane.b32.xlu1 %v1449_v54, %s8130_s17  ;;  %1424 = vrot.lane.b32.xlu0 %v1420_v60, %s8132_s18  ;;  %v5839_v54 = vld [vmem:[#allocation2 + $0x31] sm:$0xff] }
 0x221   : > { %v1516_v46 = vmul.f32 %v1515_v40, %v5839_v54 }
 0x222   : > { %v5823_v2 = vpop.permute.xlu1 %970  ;;  %v5825_v4 = vpop.permute.xlu0 %982 }
 0x223   : > { %8205 = vst [vmem:[#allocation53_spill] sm:$0xff] %v5823_v2  ;;  %8206 = vst [vmem:[#allocation54_spill] sm:$0xff] %v5825_v4 }
 0x224   : > { %1426 = vrot.lane.b32.xlu1 %v1421_v9, %s8132_s18  ;;  %1466 = vrot.lane.b32.xlu0 %v1462_v12, %s8130_s17  ;;  %v1477_v12 = vmul.f32 %v1475_v19, %v5776_v51 }
 0x226   : > { %v5833_v22 = vpop.permute.xlu1 %984  ;;  %v5835_v27 = vpop.permute.xlu0 %996 }
 0x227   : > { %8207 = vst [vmem:[#allocation55_spill] sm:$0xff] %v5833_v22  ;;  %8208 = vst [vmem:[#allocation56_spill] sm:$0xff] %v5835_v27  ;;  %v5850_v27 = vld [vmem:[#allocation2 + $0x39] sm:$0xff] }
 0x228   : > { %1468 = vrot.lane.b32.xlu1 %v1463_v34, %s8130_s17  ;;  %1480 = vrot.lane.b32.xlu0 %v1476_v37, %s8130_s17  ;;  %v1517_v37 = vmul.f32 %v1515_v40, %v5850_v27 }
 0x22a   : > { %v5844_v60 = vpop.permute.xlu1 %998  ;;  %v5846_v9 = vpop.permute.xlu0 %1010 }
 0x22b   : > { %8209 = vst [vmem:[#allocation57_spill] sm:$0xff] %v5844_v60  ;;  %8210 = vst [vmem:[#allocation58_spill] sm:$0xff] %v5846_v9  ;;  %v1530_v9 = vmul.f32 %v1529_v61, %v5839_v54  ;;  %v1543_v60 = vstv %s4588_s14  ;;  %s5903_s14 = sld [smem:[#allocation7 + $0x3d]] }
 0x22c   : > { %1482 = vrot.lane.b32.xlu1 %v1477_v12, %s8130_s17  ;;  %1520 = vrot.lane.b32.xlu0 %v1516_v46, %s8132_s18  ;;  %v1531_v46 = vmul.f32 %v1529_v61, %v5850_v27  ;;  %v1544_v12 = vmul.f32 %v1543_v60, %v5839_v54 }
 0x22e   : > { %v5855_v38 = vpop.permute.xlu1 %1012  ;;  %v5857_v34 = vpop.permute.xlu0 %1024 }
 0x22f   : > { %8211 = vst [vmem:[#allocation59_spill] sm:$0xff] %v5855_v38  ;;  %8212 = vst [vmem:[#allocation60_spill] sm:$0xff] %v5857_v34  ;;  %v1571_v38 = vstv %s4590_s24  ;;  %s4600_s24 = sld [smem:[#allocation7 + $0x61]] }
 0x230   : > { %1522 = vrot.lane.b32.xlu1 %v1517_v37, %s8132_s18  ;;  %1534 = vrot.lane.b32.xlu0 %v1530_v9, %s8132_s18  ;;  %v1545_v9 = vmul.f32 %v1543_v60, %v5850_v27  ;;  %v1572_v37 = vmul.f32 %v1571_v38, %v5839_v54 }
 0x232   : > { %v5863_v51 = vpop.permute.xlu1 %1026  ;;  %v5865_v19 = vpop.permute.xlu0 %1038 }
 0x233   : > { %8213 = vst [vmem:[#allocation61_spill] sm:$0xff] %v5863_v51  ;;  %8214 = vst [vmem:[#allocation62_spill] sm:$0xff] %v5865_v19 }
 0x234   : > { %1536 = vrot.lane.b32.xlu1 %v1531_v46, %s8132_s18  ;;  %1548 = vrot.lane.b32.xlu0 %v1544_v12, %s8132_s18  ;;  %v1573_v46 = vmul.f32 %v1571_v38, %v5850_v27  ;;  %v1586_v12 = vmul.f32 %v1585_v29, %v5839_v54 }
 0x236   : > { %v5871_v40 = vpop.permute.xlu1 %1040  ;;  %v5873_v39 = vpop.permute.xlu0 %1052 }
 0x237   : > { %8215 = vst [vmem:[#allocation63_spill] sm:$0xff] %v5871_v40  ;;  %8216 = vst [vmem:[#allocation64_spill] sm:$0xff] %v5873_v39  ;;  %v1557_v40 = vstv %s4589_s28  ;;  %s4603_s28 = sld [smem:[#allocation7 + $0x3e]] }
 0x238   : > { %1550 = vrot.lane.b32.xlu1 %v1545_v9, %s8132_s18  ;;  %1576 = vrot.lane.b32.xlu0 %v1572_v37, %s8130_s17  ;;  %v1587_v9 = vmul.f32 %v1585_v29, %v5850_v27  ;;  %v1558_v37 = vmul.f32 %v1557_v40, %v5839_v54 }
 0x23a   : > { %v5879_v61 = vpop.permute.xlu1 %1054  ;;  %v5881_v28 = vpop.permute.xlu0 %1066 }
 0x23b   : > { %8217 = vst [vmem:[#allocation65_spill] sm:$0xff] %v5879_v61  ;;  %8218 = vst [vmem:[#allocation66_spill] sm:$0xff] %v5881_v28  ;;  %v1599_v61 = vstv %s4592_s15  ;;  %v1613_v28 = vstv %s4593_s23  ;;  %s4601_s15 = sld [smem:[#allocation7 + $0x85]]  ;;  %s4604_s23 = sld [smem:[#allocation7 + $0x62]] }
 0x23c   : > { %1578 = vrot.lane.b32.xlu1 %v1573_v46, %s8130_s17  ;;  %1590 = vrot.lane.b32.xlu0 %v1586_v12, %s8130_s17  ;;  %v1559_v12 = vmul.f32 %v1557_v40, %v5850_v27  ;;  %v1653_v40 = vstv %s5893_s20  ;;  %s4605_s20 = sld [smem:[#allocation7 + $0x86]] }
 0x23e   : > { %v5887_v60 = vpop.permute.xlu1 %1068  ;;  %v5889_v39 = vpop.permute.xlu0 %1106 }
 0x23f   : > { %8219 = vst [vmem:[#allocation67_spill] sm:$0xff] %v5887_v60  ;;  %8220 = vst [vmem:[#allocation68_spill] sm:$0xff] %v5889_v39  ;;  %v1600_v60 = vmul.f32 %v1599_v61, %v5839_v54 }
 0x240   : > { %1592 = vrot.lane.b32.xlu1 %v1587_v9, %s8130_s17  ;;  %1562 = vrot.lane.b32.xlu0 %v1558_v37, %s8132_s18  ;;  %v1601_v37 = vmul.f32 %v1599_v61, %v5850_v27  ;;  %v1667_v61 = vstv %s5903_s14  ;;  %s5967_s14 = sld [smem:[#allocation7 + $0x1c]] }
 0x242   : > { %v5897_v38 = vpop.permute.xlu1 %1108  ;;  %v5899_v46 = vpop.permute.xlu0 %1120 }
 0x243   : > { %8221 = vst [vmem:[#allocation69_spill] sm:$0xff] %v5897_v38  ;;  %8222 = vst [vmem:[#allocation70_spill] sm:$0xff] %v5899_v46  ;;  %v1614_v46 = vmul.f32 %v1613_v28, %v5839_v54  ;;  %v5913_v38 = vld [vmem:[#allocation2 + $0x32] sm:$0xff] }
 0x244   : > { %1564 = vrot.lane.b32.xlu1 %v1559_v12, %s8132_s18  ;;  %1604 = vrot.lane.b32.xlu0 %v1600_v60, %s8130_s17  ;;  %v1615_v60 = vmul.f32 %v1613_v28, %v5850_v27 }
 0x246   : > { %v5907_v29 = vpop.permute.xlu1 %1122  ;;  %v5909_v9 = vpop.permute.xlu0 %1134 }
 0x247   : > { %8223 = vst [vmem:[#allocation71_spill] sm:$0xff] %v5907_v29  ;;  %8224 = vst [vmem:[#allocation72_spill] sm:$0xff] %v5909_v9  ;;  %v1654_v9 = vmul.f32 %v1653_v40, %v5913_v38  ;;  %v5924_v29 = vld [vmem:[#allocation2 + $0x3a] sm:$0xff] }
 0x248   : > { %1606 = vrot.lane.b32.xlu1 %v1601_v37, %s8130_s17  ;;  %1618 = vrot.lane.b32.xlu0 %v1614_v46, %s8130_s17  ;;  %v1655_v46 = vmul.f32 %v1653_v40, %v5924_v29 }
 0x24a   : > { %v5918_v12 = vpop.permute.xlu1 %1136  ;;  %v5920_v39 = vpop.permute.xlu0 %1148 }
 0x24b   : > { %8225 = vst [vmem:[#allocation73_spill] sm:$0xff] %v5918_v12  ;;  %8226 = vst [vmem:[#allocation74_spill] sm:$0xff] %v5920_v39  ;;  %v1668_v39 = vmul.f32 %v1667_v61, %v5913_v38  ;;  %v1681_v12 = vstv %s4600_s24  ;;  %s5977_s24 = sld [smem:[#allocation7 + $0x40]] }
 0x24c   : > { %1620 = vrot.lane.b32.xlu1 %v1615_v60, %s8130_s17  ;;  %1658 = vrot.lane.b32.xlu0 %v1654_v9, %s8132_s18  ;;  %v1669_v9 = vmul.f32 %v1667_v61, %v5924_v29  ;;  %v1682_v60 = vmul.f32 %v1681_v12, %v5913_v38 }
 0x24e   : > { %v5929_v54 = vpop.permute.xlu1 %1150  ;;  %v5931_v37 = vpop.permute.xlu0 %1162 }
 0x24f   : > { %8227 = vst [vmem:[#allocation75_spill] sm:$0xff] %v5929_v54  ;;  %8228 = vst [vmem:[#allocation76_spill] sm:$0xff] %v5931_v37  ;;  %v1709_v54 = vstv %s4602_s13  ;;  %s4612_s13 = sld [smem:[#allocation7 + $0x64]] }
 0x250   : > { %1660 = vrot.lane.b32.xlu1 %v1655_v46, %s8132_s18  ;;  %1672 = vrot.lane.b32.xlu0 %v1668_v39, %s8132_s18  ;;  %v1683_v39 = vmul.f32 %v1681_v12, %v5924_v29  ;;  %v1710_v46 = vmul.f32 %v1709_v54, %v5913_v38 }
 0x252   : > { %v5937_v28 = vpop.permute.xlu1 %1164  ;;  %v5939_v27 = vpop.permute.xlu0 %1176 }
 0x253   : > { %8229 = vst [vmem:[#allocation77_spill] sm:$0xff] %v5937_v28  ;;  %8230 = vst [vmem:[#allocation78_spill] sm:$0xff] %v5939_v27  ;;  %v1723_v28 = vstv %s4603_s28  ;;  %s4614_s28 = sld [smem:[#allocation7 + $0x1d]] }
 0x254   : > { %1674 = vrot.lane.b32.xlu1 %v1669_v9, %s8132_s18  ;;  %1686 = vrot.lane.b32.xlu0 %v1682_v60, %s8132_s18  ;;  %v1711_v9 = vmul.f32 %v1709_v54, %v5924_v29  ;;  %v1724_v60 = vmul.f32 %v1723_v28, %v5913_v38 }
 0x256   : > { %v5945_v40 = vpop.permute.xlu1 %1178  ;;  %v5947_v37 = vpop.permute.xlu0 %1190 }
 0x257   : > { %8231 = vst [vmem:[#allocation79_spill] sm:$0xff] %v5945_v40  ;;  %8232 = vst [vmem:[#allocation80_spill] sm:$0xff] %v5947_v37  ;;  %v1695_v40 = vstv %s4601_s15  ;;  %s4615_s15 = sld [smem:[#allocation7 + $0x41]] }
 0x258   : > { %1688 = vrot.lane.b32.xlu1 %v1683_v39, %s8132_s18  ;;  %1714 = vrot.lane.b32.xlu0 %v1710_v46, %s8130_s17  ;;  %v1725_v39 = vmul.f32 %v1723_v28, %v5924_v29  ;;  %v1696_v46 = vmul.f32 %v1695_v40, %v5913_v38 }
 0x25a   : > { %v5953_v61 = vpop.permute.xlu1 %1192  ;;  %v5955_v27 = vpop.permute.xlu0 %1204 }
 0x25b   : > { %8233 = vst [vmem:[#allocation81_spill] sm:$0xff] %v5953_v61  ;;  %8234 = vst [vmem:[#allocation82_spill] sm:$0xff] %v5955_v27  ;;  %v1737_v61 = vstv %s4604_s23  ;;  %v1751_v27 = vstv %s4605_s20  ;;  %s4613_s23 = sld [smem:[#allocation7 + $0x88]]  ;;  %s4616_s20 = sld [smem:[#allocation7 + $0x65]] }
 0x25c   : > { %1716 = vrot.lane.b32.xlu1 %v1711_v9, %s8130_s17  ;;  %1728 = vrot.lane.b32.xlu0 %v1724_v60, %s8130_s17  ;;  %v1697_v60 = vmul.f32 %v1695_v40, %v5924_v29  ;;  %v1791_v40 = vstv %s5967_s14  ;;  %s4617_s14 = sld [smem:[#allocation7 + $0x89]] }
 0x25e   : > { %v5961_v12 = vpop.permute.xlu1 %1206  ;;  %v5963_v37 = vpop.permute.xlu0 %1244 }
 0x25f   : > { %8235 = vst [vmem:[#allocation83_spill] sm:$0xff] %v5961_v12  ;;  %8236 = vst [vmem:[#allocation84_spill] sm:$0xff] %v5963_v37  ;;  %v1738_v12 = vmul.f32 %v1737_v61, %v5913_v38 }
 0x260   : > { %1730 = vrot.lane.b32.xlu1 %v1725_v39, %s8130_s17  ;;  %1700 = vrot.lane.b32.xlu0 %v1696_v46, %s8132_s18  ;;  %v1739_v46 = vmul.f32 %v1737_v61, %v5924_v29  ;;  %v1805_v61 = vstv %s5977_s24  ;;  %s6041_s24 = sld [smem:[#allocation7 + $0x1f]] }
 0x262   : > { %v5971_v54 = vpop.permute.xlu1 %1246  ;;  %v5973_v9 = vpop.permute.xlu0 %1258 }
 0x263   : > { %8237 = vst [vmem:[#allocation85_spill] sm:$0xff] %v5971_v54  ;;  %8238 = vst [vmem:[#allocation86_spill] sm:$0xff] %v5973_v9  ;;  %v1752_v9 = vmul.f32 %v1751_v27, %v5913_v38  ;;  %v5987_v54 = vld [vmem:[#allocation2 + $0x48] sm:$0xff] }
 0x264   : > { %1702 = vrot.lane.b32.xlu1 %v1697_v60, %s8132_s18  ;;  %1742 = vrot.lane.b32.xlu0 %v1738_v12, %s8130_s17  ;;  %v1753_v12 = vmul.f32 %v1751_v27, %v5924_v29 }
 0x266   : > { %v5981_v28 = vpop.permute.xlu1 %1260  ;;  %v5983_v39 = vpop.permute.xlu0 %1272 }
 0x267   : > { %8239 = vst [vmem:[#allocation87_spill] sm:$0xff] %v5981_v28  ;;  %8240 = vst [vmem:[#allocation88_spill] sm:$0xff] %v5983_v39  ;;  %v1792_v39 = vmul.f32 %v1791_v40, %v5987_v54  ;;  %v5998_v28 = vld [vmem:[#allocation2 + $0x50] sm:$0xff] }
 0x268   : > { %1744 = vrot.lane.b32.xlu1 %v1739_v46, %s8130_s17  ;;  %1756 = vrot.lane.b32.xlu0 %v1752_v9, %s8130_s17  ;;  %v1793_v9 = vmul.f32 %v1791_v40, %v5998_v28 }
 0x26a   : > { %v5992_v60 = vpop.permute.xlu1 %1274  ;;  %v5994_v37 = vpop.permute.xlu0 %1300 }
 0x26b   : > { %8241 = vst [vmem:[#allocation89_spill] sm:$0xff] %v5992_v60  ;;  %8242 = vst [vmem:[#allocation90_spill] sm:$0xff] %v5994_v37  ;;  %v1806_v60 = vmul.f32 %v1805_v61, %v5987_v54  ;;  %v1819_v37 = vstv %s4612_s13  ;;  %s6051_s13 = sld [smem:[#allocation7 + $0x43]] }
 0x26c   : > { %1758 = vrot.lane.b32.xlu1 %v1753_v12, %s8130_s17  ;;  %1796 = vrot.lane.b32.xlu0 %v1792_v39, %s8132_s18  ;;  %v1807_v39 = vmul.f32 %v1805_v61, %v5998_v28  ;;  %v1820_v12 = vmul.f32 %v1819_v37, %v5987_v54 }
 0x26e   : > { %v6003_v38 = vpop.permute.xlu1 %1302  ;;  %v6005_v46 = vpop.permute.xlu0 %1314 }
 0x26f   : > { %8243 = vst [vmem:[#allocation91_spill] sm:$0xff] %v6003_v38  ;;  %8244 = vst [vmem:[#allocation92_spill] sm:$0xff] %v6005_v46  ;;  %v1847_v38 = vstv %s4614_s28  ;;  %s4624_s28 = sld [smem:[#allocation7 + $0x67]] }
 0x270   : > { %1798 = vrot.lane.b32.xlu1 %v1793_v9, %s8132_s18  ;;  %1810 = vrot.lane.b32.xlu0 %v1806_v60, %s8132_s18  ;;  %v1821_v60 = vmul.f32 %v1819_v37, %v5998_v28  ;;  %v1848_v9 = vmul.f32 %v1847_v38, %v5987_v54 }
 0x272   : > { %v6011_v29 = vpop.permute.xlu1 %1316  ;;  %v6013_v27 = vpop.permute.xlu0 %1286 }
 0x273   : > { %8245 = vst [vmem:[#allocation93_spill] sm:$0xff] %v6011_v29  ;;  %8246 = vst [vmem:[#allocation94_spill] sm:$0xff] %v6013_v27  ;;  %v1861_v29 = vstv %s4615_s15  ;;  %s4626_s15 = sld [smem:[#allocation7 + $0x20]] }
 0x274   : > { %1812 = vrot.lane.b32.xlu1 %v1807_v39, %s8132_s18  ;;  %1824 = vrot.lane.b32.xlu0 %v1820_v12, %s8132_s18  ;;  %v1849_v39 = vmul.f32 %v1847_v38, %v5998_v28  ;;  %v1862_v12 = vmul.f32 %v1861_v29, %v5987_v54 }
 0x276   : > { %v6019_v40 = vpop.permute.xlu1 %1288  ;;  %v6021_v46 = vpop.permute.xlu0 %1328 }
 0x277   : > { %8247 = vst [vmem:[#allocation95_spill] sm:$0xff] %v6019_v40  ;;  %8248 = vst [vmem:[#allocation96_spill] sm:$0xff] %v6021_v46  ;;  %v1833_v40 = vstv %s4613_s23  ;;  %s4627_s23 = sld [smem:[#allocation7 + $0x44]] }
 0x278   : > { %1826 = vrot.lane.b32.xlu1 %v1821_v60, %s8132_s18  ;;  %1852 = vrot.lane.b32.xlu0 %v1848_v9, %s8130_s17  ;;  %v1863_v60 = vmul.f32 %v1861_v29, %v5998_v28  ;;  %v1834_v9 = vmul.f32 %v1833_v40, %v5987_v54 }
 0x27a   : > { %v6027_v61 = vpop.permute.xlu1 %1330  ;;  %v6029_v27 = vpop.permute.xlu0 %1342 }
 0x27b   : > { %8249 = vst [vmem:[#allocation97_spill] sm:$0xff] %v6027_v61  ;;  %8250 = vst [vmem:[#allocation98_spill] sm:$0xff] %v6029_v27  ;;  %v1875_v61 = vstv %s4616_s20  ;;  %v1889_v27 = vstv %s4617_s14  ;;  %s4625_s20 = sld [smem:[#allocation7 + $0x8b]]  ;;  %s4628_s14 = sld [smem:[#allocation7 + $0x68]] }
 0x27c   : > { %1854 = vrot.lane.b32.xlu1 %v1849_v39, %s8130_s17  ;;  %1866 = vrot.lane.b32.xlu0 %v1862_v12, %s8130_s17  ;;  %v1835_v12 = vmul.f32 %v1833_v40, %v5998_v28  ;;  %v1929_v40 = vstv %s6041_s24  ;;  %s4629_s24 = sld [smem:[#allocation7 + $0x8c]] }
 0x27e   : > { %v6035_v37 = vpop.permute.xlu1 %1344  ;;  %v6037_v46 = vpop.permute.xlu0 %1382 }
 0x27f   : > { %8251 = vst [vmem:[#allocation99_spill] sm:$0xff] %v6035_v37  ;;  %8252 = vst [vmem:[#allocation100_spill] sm:$0xff] %v6037_v46  ;;  %v1876_v37 = vmul.f32 %v1875_v61, %v5987_v54 }
 0x280   : > { %1868 = vrot.lane.b32.xlu1 %v1863_v60, %s8130_s17  ;;  %1838 = vrot.lane.b32.xlu0 %v1834_v9, %s8132_s18  ;;  %v1877_v9 = vmul.f32 %v1875_v61, %v5998_v28  ;;  %v1943_v61 = vstv %s6051_s13  ;;  %s6115_s13 = sld [smem:[#allocation7 + $0x22]] }
 0x282   : > { %v6045_v38 = vpop.permute.xlu1 %1384  ;;  %v6047_v39 = vpop.permute.xlu0 %1396 }
 0x283   : > { %8253 = vst [vmem:[#allocation101_spill] sm:$0xff] %v6045_v38  ;;  %8254 = vst [vmem:[#allocation102_spill] sm:$0xff] %v6047_v39  ;;  %v1890_v39 = vmul.f32 %v1889_v27, %v5987_v54  ;;  %v6061_v38 = vld [vmem:[#allocation2 + $0x49] sm:$0xff] }
 0x284   : > { %1840 = vrot.lane.b32.xlu1 %v1835_v12, %s8132_s18  ;;  %1880 = vrot.lane.b32.xlu0 %v1876_v37, %s8130_s17  ;;  %v1891_v37 = vmul.f32 %v1889_v27, %v5998_v28 }
 0x286   : > { %v6055_v29 = vpop.permute.xlu1 %1398  ;;  %v6057_v60 = vpop.permute.xlu0 %1410 }
 0x287   : > { %8255 = vst [vmem:[#allocation103_spill] sm:$0xff] %v6055_v29  ;;  %8256 = vst [vmem:[#allocation104_spill] sm:$0xff] %v6057_v60  ;;  %v1930_v60 = vmul.f32 %v1929_v40, %v6061_v38  ;;  %v6072_v29 = vld [vmem:[#allocation2 + $0x51] sm:$0xff] }
 0x288   : > { %1882 = vrot.lane.b32.xlu1 %v1877_v9, %s8130_s17  ;;  %1894 = vrot.lane.b32.xlu0 %v1890_v39, %s8130_s17  ;;  %v1931_v39 = vmul.f32 %v1929_v40, %v6072_v29 }
 0x28a   : > { %v6066_v12 = vpop.permute.xlu1 %1412  ;;  %v6068_v46 = vpop.permute.xlu0 %1438 }
 0x28b   : > { %8257 = vst [vmem:[#allocation105_spill] sm:$0xff] %v6066_v12  ;;  %8258 = vst [vmem:[#allocation106_spill] sm:$0xff] %v6068_v46  ;;  %v1944_v12 = vmul.f32 %v1943_v61, %v6061_v38  ;;  %v1957_v46 = vstv %s4624_s28  ;;  %s6125_s28 = sld [smem:[#allocation7 + $0x46]] }
 0x28c   : > { %1896 = vrot.lane.b32.xlu1 %v1891_v37, %s8130_s17  ;;  %1934 = vrot.lane.b32.xlu0 %v1930_v60, %s8132_s18  ;;  %v1945_v60 = vmul.f32 %v1943_v61, %v6072_v29  ;;  %v1958_v37 = vmul.f32 %v1957_v46, %v6061_v38 }
 0x28e   : > { %v6077_v54 = vpop.permute.xlu1 %1440  ;;  %v6079_v9 = vpop.permute.xlu0 %1452 }
 0x28f   : > { %8259 = vst [vmem:[#allocation107_spill] sm:$0xff] %v6077_v54  ;;  %8260 = vst [vmem:[#allocation108_spill] sm:$0xff] %v6079_v9  ;;  %v1985_v54 = vstv %s4626_s15  ;;  %s4636_s15 = sld [smem:[#allocation7 + $0x6a]] }
 0x290   : > { %1936 = vrot.lane.b32.xlu1 %v1931_v39, %s8132_s18  ;;  %1948 = vrot.lane.b32.xlu0 %v1944_v12, %s8132_s18  ;;  %v1959_v12 = vmul.f32 %v1957_v46, %v6072_v29  ;;  %v1986_v39 = vmul.f32 %v1985_v54, %v6061_v38 }
 0x292   : > { %v6085_v28 = vpop.permute.xlu1 %1454  ;;  %v6087_v27 = vpop.permute.xlu0 %1424 }
 0x293   : > { %8261 = vst [vmem:[#allocation109_spill] sm:$0xff] %v6085_v28  ;;  %8262 = vst [vmem:[#allocation110_spill] sm:$0xff] %v6087_v27  ;;  %v1999_v28 = vstv %s4627_s23  ;;  %s4638_s23 = sld [smem:[#allocation7 + $0x23]] }
 0x294   : > { %1950 = vrot.lane.b32.xlu1 %v1945_v60, %s8132_s18  ;;  %1962 = vrot.lane.b32.xlu0 %v1958_v37, %s8132_s18  ;;  %v1987_v60 = vmul.f32 %v1985_v54, %v6072_v29  ;;  %v2000_v37 = vmul.f32 %v1999_v28, %v6061_v38 }
 0x296   : > { %v6093_v40 = vpop.permute.xlu1 %1426  ;;  %v6095_v9 = vpop.permute.xlu0 %1466 }
 0x297   : > { %8263 = vst [vmem:[#allocation111_spill] sm:$0xff] %v6093_v40  ;;  %8264 = vst [vmem:[#allocation112_spill] sm:$0xff] %v6095_v9  ;;  %v1971_v40 = vstv %s4625_s20  ;;  %s6157_s20 = sld [smem:[#allocation7 + $0x47]] }
 0x298   : > { %1964 = vrot.lane.b32.xlu1 %v1959_v12, %s8132_s18  ;;  %1990 = vrot.lane.b32.xlu0 %v1986_v39, %s8130_s17  ;;  %v2001_v12 = vmul.f32 %v1999_v28, %v6072_v29  ;;  %v1972_v39 = vmul.f32 %v1971_v40, %v6061_v38 }
 0x29a   : > { %v6101_v61 = vpop.permute.xlu1 %1468  ;;  %v6103_v27 = vpop.permute.xlu0 %1480 }
 0x29b   : > { %8265 = vst [vmem:[#allocation113_spill] sm:$0xff] %v6101_v61  ;;  %8266 = vst [vmem:[#allocation114_spill] sm:$0xff] %v6103_v27  ;;  %v2013_v61 = vstv %s4628_s14  ;;  %v2027_v27 = vstv %s4629_s24  ;;  %s6167_s14 = sld [smem:[#allocation7 + $0x8e]]  ;;  %s6178_s24 = sld [smem:[#allocation7 + $0x6b]] }
 0x29c   : > { %1992 = vrot.lane.b32.xlu1 %v1987_v60, %s8130_s17  ;;  %2004 = vrot.lane.b32.xlu0 %v2000_v37, %s8130_s17  ;;  %v1973_v37 = vmul.f32 %v1971_v40, %v6072_v29  ;;  %v2067_v40 = vstv %s6115_s13  ;;  %s6189_s13 = sld [smem:[#allocation7 + $0x8f]] }
 0x29e   : > { %v6109_v46 = vpop.permute.xlu1 %1482  ;;  %v6111_v9 = vpop.permute.xlu0 %1520 }
 0x29f   : > { %8267 = vst [vmem:[#allocation115_spill] sm:$0xff] %v6109_v46  ;;  %8268 = vst [vmem:[#allocation116_spill] sm:$0xff] %v6111_v9  ;;  %v2014_v46 = vmul.f32 %v2013_v61, %v6061_v38 }
 0x2a0   : > { %2006 = vrot.lane.b32.xlu1 %v2001_v12, %s8130_s17  ;;  %1976 = vrot.lane.b32.xlu0 %v1972_v39, %s8132_s18  ;;  %v2015_v39 = vmul.f32 %v2013_v61, %v6072_v29  ;;  %v2081_v61 = vstv %s6125_s28  ;;  %s6193_s28 = sld [smem:[#allocation7]] }
 0x2a2   : > { %v6119_v54 = vpop.permute.xlu1 %1522  ;;  %v6121_v60 = vpop.permute.xlu0 %1534 }
 0x2a3   : > { %8269 = vst [vmem:[#allocation117_spill] sm:$0xff] %v6119_v54  ;;  %8270 = vst [vmem:[#allocation118_spill] sm:$0xff] %v6121_v60  ;;  %v2028_v60 = vmul.f32 %v2027_v27, %v6061_v38  ;;  %v6135_v54 = vld [vmem:[#allocation2 + $0x4a] sm:$0xff] }
 0x2a4   : > { %1978 = vrot.lane.b32.xlu1 %v1973_v37, %s8132_s18  ;;  %2018 = vrot.lane.b32.xlu0 %v2014_v46, %s8130_s17  ;;  %v2029_v46 = vmul.f32 %v2027_v27, %v6072_v29 }
 0x2a6   : > { %v6129_v28 = vpop.permute.xlu1 %1536  ;;  %v6131_v12 = vpop.permute.xlu0 %1548 }
 0x2a7   : > { %8271 = vst [vmem:[#allocation119_spill] sm:$0xff] %v6129_v28  ;;  %8272 = vst [vmem:[#allocation120_spill] sm:$0xff] %v6131_v12  ;;  %v2068_v12 = vmul.f32 %v2067_v40, %v6135_v54  ;;  %v6146_v28 = vld [vmem:[#allocation2 + $0x52] sm:$0xff] }
 0x2a8   : > { %2020 = vrot.lane.b32.xlu1 %v2015_v39, %s8130_s17  ;;  %2032 = vrot.lane.b32.xlu0 %v2028_v60, %s8130_s17  ;;  %v2069_v60 = vmul.f32 %v2067_v40, %v6146_v28 }
 0x2aa   : > { %v6140_v37 = vpop.permute.xlu1 %1550  ;;  %v6142_v9 = vpop.permute.xlu0 %1576 }
 0x2ab   : > { %8273 = vst [vmem:[#allocation121_spill] sm:$0xff] %v6140_v37  ;;  %8274 = vst [vmem:[#allocation122_spill] sm:$0xff] %v6142_v9  ;;  %v2082_v37 = vmul.f32 %v2081_v61, %v6135_v54  ;;  %v2095_v9 = vstv %s4636_s15  ;;  %s6195_s15 = sld [smem:[#allocation7 + $0x24]] }
 0x2ac   : > { %2034 = vrot.lane.b32.xlu1 %v2029_v46, %s8130_s17  ;;  %2072 = vrot.lane.b32.xlu0 %v2068_v12, %s8132_s18  ;;  %v2083_v12 = vmul.f32 %v2081_v61, %v6146_v28  ;;  %v2096_v46 = vmul.f32 %v2095_v9, %v6135_v54 }
 0x2ae   : > { %v6151_v38 = vpop.permute.xlu1 %1578  ;;  %v6153_v39 = vpop.permute.xlu0 %1590 }
 0x2af   : > { %8275 = vst [vmem:[#allocation123_spill] sm:$0xff] %v6151_v38  ;;  %8276 = vst [vmem:[#allocation124_spill] sm:$0xff] %v6153_v39  ;;  %v2123_v39 = vstv %s4638_s23  ;;  %s6203_s23 = sld [smem:[#allocation7 + $0x48]]  ;;  %v807_v38 = vstv %s6220_s3  ;;  %s6464_s3 = sld [smem:[#allocation7 + $0x5a]] }
 0x2b0   : > { %2074 = vrot.lane.b32.xlu1 %v2069_v60, %s8132_s18  ;;  %2086 = vrot.lane.b32.xlu0 %v2082_v37, %s8132_s18  ;;  %v2097_v37 = vmul.f32 %v2095_v9, %v6146_v28 }
 0x2b2   : > { %v6161_v29 = vpop.permute.xlu1 %1592  ;;  %v6163_v27 = vpop.permute.xlu0 %1562 }
 0x2b3   : > { %8277 = vst [vmem:[#allocation125_spill] sm:$0xff] %v6161_v29  ;;  %8278 = vst [vmem:[#allocation126_spill] sm:$0xff] %v6163_v27  ;;  %v2124_v27 = vmul.f32 %v2123_v39, %v6135_v54  ;;  %v2137_v29 = vstv %s6157_s20  ;;  %s6205_s20 = sld [smem:[#allocation7 + $0x6c]] }
 0x2b4   : > { %2088 = vrot.lane.b32.xlu1 %v2083_v12, %s8132_s18  ;;  %2100 = vrot.lane.b32.xlu0 %v2096_v46, %s8132_s18  ;;  %v2125_v46 = vmul.f32 %v2123_v39, %v6146_v28 }
 0x2b6   : > { %v6171_v40 = vpop.permute.xlu1 %1564  ;;  %v6173_v60 = vpop.permute.xlu0 %1604 }
 0x2b7   : > { %8279 = vst [vmem:[#allocation127_spill] sm:$0xff] %v6171_v40  ;;  %8280 = vst [vmem:[#allocation128_spill] sm:$0xff] %v6173_v60  ;;  %v2138_v40 = vmul.f32 %v2137_v29, %v6135_v54  ;;  %v2109_v60 = vstv %s6167_s14  ;;  %s6208_s14 = sld [smem:[#allocation7 + $0x3]] }
 0x2b8   : > { %2102 = vrot.lane.b32.xlu1 %v2097_v37, %s8132_s18  ;;  %2128 = vrot.lane.b32.xlu0 %v2124_v27, %s8130_s17  ;;  %v2139_v37 = vmul.f32 %v2137_v29, %v6146_v28  ;;  %v2110_v39 = vmul.f32 %v2109_v60, %v6135_v54 }
 0x2ba   : > { %v6182_v61 = vpop.permute.xlu1 %1606  ;;  %v6184_v12 = vpop.permute.xlu0 %1618 }
 0x2bb   : > { %8281 = vst [vmem:[#allocation129_spill] sm:$0xff] %v6182_v61  ;;  %8282 = vst [vmem:[#allocation130_spill] sm:$0xff] %v6184_v12 }
 0x2bc   : > { %2130 = vrot.lane.b32.xlu1 %v2125_v46, %s8130_s17  ;;  %2142 = vrot.lane.b32.xlu0 %v2138_v40, %s8130_s17  ;;  %v2151_v46 = vstv %s6178_s24  ;;  %s6228_s24 = sld [smem:[#allocation7 + $0x4e]] }
 0x2bd   : > { %v2152_v12 = vmul.f32 %v2151_v46, %v6135_v54  ;;  %v2153_v61 = vmul.f32 %v2151_v46, %v6146_v28 }
 0x2be   : > { %v6197_v9 = vpop.permute.xlu1 %1620  ;;  %v6199_v27 = vpop.permute.xlu0 %1658 }
 0x2bf   : > { %8283 = vst [vmem:[#allocation131_spill] sm:$0xff] %v6197_v9  ;;  %8284 = vst [vmem:[#allocation132_spill] sm:$0xff] %v6199_v27  ;;  %v2111_v9 = vmul.f32 %v2109_v60, %v6146_v28  ;;  %v675_v27 = vstv %s6214_s1  ;;  %s6712_s1 = sld [smem:[#allocation7 + $0x63]] }
 0x2c0   : > { %2144 = vrot.lane.b32.xlu1 %v2139_v37, %s8130_s17  ;;  %2114 = vrot.lane.b32.xlu0 %v2110_v39, %s8132_s18  ;;  %s6230_s17 = sld [smem:[#allocation7 + $0x72]]  ;;  %v2165_v37 = vstv %s6189_s13  ;;  %s6233_s18 = sld [smem:[#allocation7 + $0x9]] }
 0x2c1   : > { %s6253_s13 = sld [smem:[#allocation7 + $0x54]]  ;;  %v2167_v46 = vmul.f32 %v2165_v37, %v6146_v28 }
 0x2c2   : > { %v6222_v29 = vpop.permute.xlu1 %1660  ;;  %v6224_v40 = vpop.permute.xlu0 %1672  ;;  %v813_v28 = vstv %s6228_s24  ;;  %s6824_s24 = sld [smem:[#allocation8]] }
 0x2c3   : > { %8285 = vst [vmem:[#allocation133_spill] sm:$0xff] %v6222_v29  ;;  %8286 = vst [vmem:[#allocation134_spill] sm:$0xff] %v6224_v40  ;;  %v543_v40 = vstv %s6205_s20  ;;  %v669_v29 = vstv %s6210_s21  ;;  %s6669_s21 = sld [smem:[#allocation7 + $0x3f]]  ;;  %s6786_s20 = sld [smem:[#allocation7 + $0x21]] }
 0x2c4   : > { %2116 = vrot.lane.b32.xlu1 %v2111_v9, %s8287_s5  ;;  %2156 = vrot.lane.b32.xlu0 %v2152_v12, %s8288_s6  ;;  %v2166_v12 = vmul.f32 %v2165_v37, %v6135_v54  ;;  %v6310_v47 = vmul.f32 %v4962_v32, %v543_v40  ;;  %v671_v34 = vmul.f32 %v4964_v50, %v669_v29 }
 0x2c6   : > { %v6247_v60 = vpop.permute.xlu1 %1674  ;;  %v6249_v39 = vpop.permute.xlu0 %1686  ;;  %v819_v37 = vstv %s6230_s17  ;;  %v939_v22 = vstv %s6233_s18  ;;  %s6714_s18 = sld [smem:[#allocation7 + $0x87]]  ;;  %s6720_s17 = sld [smem:[#allocation7 + $0x1e]] }
 0x2c7   : > { %8289 = vst [vmem:[#allocation135_spill] sm:$0xff] %v6247_v60  ;;  %8290 = vst [vmem:[#allocation136_spill] sm:$0xff] %v6249_v39  ;;  %v525_v39 = vstv %s6193_s28  ;;  %v537_v60 = vstv %s6203_s23  ;;  %s6722_s28 = sld [smem:[#allocation7 + $0x42]] }
 0x2c8   : > { %2158 = vrot.lane.b32.xlu1 %v2153_v61, %s8288_s6  ;;  %2170 = vrot.lane.b32.xlu0 %v2166_v12, %s8288_s6  ;;  %v531_v61 = vstv %s6195_s15  ;;  %v663_v12 = vstv %s6208_s14  ;;  %v527_v42 = vmul.f32 %v4962_v32, %v525_v39  ;;  %v6306_v14 = vmul.f32 %v4962_v32, %v537_v60  ;;  %s6761_s15 = sld [smem:[#allocation7 + $0x66]]  ;;  %s6784_s23 = sld [smem:[#allocation7 + $0x8a]] }
 0x2c9   : > { %v665_v8 = vmul.f32 %v4964_v50, %v663_v12  ;;  %s6806_s14 = sld [smem:[#allocation7 + $0x45]] }
 0x2ca   : > { %v6267_v54 = vpop.permute.xlu1 %1688  ;;  %v6269_v9 = vpop.permute.xlu0 %1714 }
 0x2cb   : > { %8291 = vst [vmem:[#allocation137_spill] sm:$0xff] %v6267_v54  ;;  %8292 = vst [vmem:[#allocation138_spill] sm:$0xff] %v6269_v9  ;;  %v681_v54 = vstv %s6216_s0  ;;  %v801_v9 = vstv %s6218_s2  ;;  %s6425_s0 = sld [smem:[#allocation7 + $0x12]]  ;;  %s6427_s2 = sld [smem:[#allocation7 + $0x36]] }
 0x2cc   : > { %2172 = vrot.lane.b32.xlu1 %v2167_v46, %s8288_s6  ;;  %v4961_v46 = vld [vmem:[#allocation2] sm:$0xff] }
 0x2cd   : > { %v526_v51 = vmul.f32 %v4961_v46, %v525_v39  ;;  %v532_v41 = vmul.f32 %v4961_v46, %v531_v61  ;;  %v538_v3 = vmul.f32 %v4961_v46, %v537_v60  ;;  %v6308_v2 = vmul.f32 %v4961_v46, %v543_v40  ;;  %v4965_v40 = vld [vmem:[#allocation2 + $0x2] sm:$0xff] }
 0x2ce   : > { %v6287_v43 = vpop.permute.xlu1 %1716  ;;  %v6289_v19 = vpop.permute.xlu0 %1728  ;;  %v6317_v60 = vmul.f32 %v4964_v50, %v675_v27 }
 0x2cf   : > { %8293 = vst [vmem:[#allocation139_spill] sm:$0xff] %v6287_v43  ;;  %8294 = vst [vmem:[#allocation140_spill] sm:$0xff] %v6289_v19  ;;  %v560_v13 = vadd.f32 %v5600_v48, %v526_v51  ;;  %v533_v43 = vmul.f32 %v4962_v32, %v531_v61  ;;  %v4963_v51 = vld [vmem:[#allocation2 + $0x1] sm:$0xff]  ;;  %v561_v61 = vadd.f32 %v5606_v52, %v527_v42 }
 0x2d0   : > { %v664_v7 = vmul.f32 %v4963_v51, %v663_v12  ;;  %v670_v39 = vmul.f32 %v4963_v51, %v669_v29  ;;  %v574_v33 = vadd.f32 %v5608_v53, %v532_v41  ;;  %v6315_v4 = vmul.f32 %v4963_v51, %v675_v27 }
 0x2d1   : > { %v616_v48 = vadd.f32 %v5635_v6, %v560_v13  ;;  %v6319_v46 = vmul.f32 %v4963_v51, %v681_v54  ;;  %v6321_v32 = vmul.f32 %v4964_v50, %v681_v54  ;;  %v802_v6 = vmul.f32 %v4965_v40, %v801_v9  ;;  %v4966_v13 = vld [vmem:[#allocation2 + $0xa] sm:$0xff] }
 0x2d2   : > { %v6302_v19 = vpop.permute.xlu1 %1730  ;;  %v6304_v45 = vpop.permute.xlu0 %1700  ;;  %v6323_v18 = vmul.f32 %v4966_v13, %v801_v9  ;;  %v617_v52 = vadd.f32 %v5641_v10, %v561_v61  ;;  %v630_v53 = vadd.f32 %v5643_v11, %v574_v33  ;;  %v808_v42 = vmul.f32 %v4965_v40, %v807_v38  ;;  %v4967_v10 = vld [vmem:[#allocation2 + $0x18] sm:$0xff] }
 0x2d3   : > { %8295 = vst [vmem:[#allocation141_spill] sm:$0xff] %v6302_v19  ;;  %8296 = vst [vmem:[#allocation142_spill] sm:$0xff] %v6304_v45  ;;  %v666_v41 = vadd.f32 %v664_v7, %v616_v48  ;;  %v6331_v27 = vmul.f32 %v4966_v13, %v807_v38  ;;  %v6333_v50 = vmul.f32 %v4965_v40, %v813_v28  ;;  %v4968_v7 = vld [vmem:[#allocation2 + $0x20] sm:$0xff]  ;;  %v8299_v48 = vstv %s6239_s7  ;;  %s6517_s7 = sld [smem:[#allocation7 + $0x15]] }
 0x2d4   : > { %v6335_v54 = vmul.f32 %v4966_v13, %v813_v28  ;;  %v6337_v51 = vmul.f32 %v4965_v40, %v819_v37  ;;  %v575_v9 = vadd.f32 %v5614_v57, %v533_v43  ;;  %v6341_v45 = vmul.f32 %v4966_v13, %v819_v37 }
 0x2d5   : > { %v6343_v11 = vmul.f32 %v4967_v10, %v939_v22  ;;  %v6345_v33 = vmul.f32 %v4968_v7, %v939_v22  ;;  %v6347_v38 = vmul.f32 %v4967_v10, %v945_v44  ;;  %v6349_v28 = vmul.f32 %v4968_v7, %v945_v44 }
 0x2d6   : > { %v6325_v12 = vpop.permute.xlu1 %1702  ;;  %v6327_v29 = vpop.permute.xlu0 %1742  ;;  %v6353_v57 = vmul.f32 %v4967_v10, %v8299_v48  ;;  %v631_v37 = vadd.f32 %v5649_v15, %v575_v9  ;;  %v667_v61 = vadd.f32 %v665_v8, %v617_v52  ;;  %v672_v22 = vadd.f32 %v670_v39, %v630_v53  ;;  %v4969_v8 = vld [vmem:[#allocation2 + $0x19] sm:$0xff] }
 0x2d7   : > { %8297 = vst [vmem:[#allocation143_spill] sm:$0xff] %v6325_v12  ;;  %8298 = vst [vmem:[#allocation144_spill] sm:$0xff] %v6327_v29  ;;  %v698_v12 = vadd.f32 %v5667_v26, %v666_v41  ;;  %v588_v44 = vadd.f32 %v5616_v58, %v538_v3  ;;  %v8302_v13 = vmov %v8299_v48  ;;  %v8303_v48 = vstv %s6241_s8  ;;  %v4970_v58 = vld [vmem:[#allocation2 + $0x21] sm:$0xff]  ;;  %s6519_s8 = sld [smem:[#allocation7 + $0x39]] }
 0x2d8   : > { %v6364_v41 = vmul.f32 %v4968_v7, %v8302_v13  ;;  %v6368_v29 = vmul.f32 %v4967_v10, %v8303_v48  ;;  %v712_v15 = vadd.f32 %v5677_v31, %v672_v22  ;;  %v8305_v52 = vstv %s6243_s19  ;;  %s6644_s19 = sld [smem:[#allocation7 + $0x84]] }
 0x2d9   : > { %v754_v40 = vadd.f32 %v5709_v49, %v698_v12  ;;  %v6378_v39 = vmul.f32 %v4969_v8, %v8305_v52  ;;  %v8306_v49 = vmov %v8305_v52  ;;  %v644_v12 = vadd.f32 %v5651_v16, %v588_v44 }
 0x2da   : > { %v6355_v26 = vpop.permute.xlu1 %1744  ;;  %v6357_v43 = vpop.permute.xlu0 %1756  ;;  %v6382_v3 = vmul.f32 %v4970_v58, %v8306_v49  ;;  %v8307_v53 = vstv %s6245_s11  ;;  %v8309_v31 = vstv %s6253_s13  ;;  %v673_v22 = vadd.f32 %v671_v34, %v631_v37  ;;  %s6593_s11 = sld [smem:[#allocation7 + $0x18]]  ;;  %s6836_s13 = sld [smem:[#allocation7 + $0x69]] }
 0x2db   : > { %8300 = vst [vmem:[#allocation145_spill] sm:$0xff] %v6355_v26  ;;  %8301 = vst [vmem:[#allocation146_spill] sm:$0xff] %v6357_v43  ;;  %v8304_v26 = vmov %v8303_v48  ;;  %v699_v43 = vadd.f32 %v5675_v30, %v667_v61  ;;  %v6387_v9 = vmul.f32 %v4969_v8, %v8307_v53  ;;  %v8308_v10 = vmov %v8307_v53 }
 0x2dc   : > { %v6372_v19 = vmul.f32 %v4968_v7, %v8304_v26  ;;  %v6391_v30 = vmul.f32 %v4970_v58, %v8308_v10  ;;  %v6395_v7 = vmul.f32 %v4969_v8, %v8309_v31  ;;  %v768_v16 = vadd.f32 %v5717_v56, %v712_v15 }
 0x2dd   : > { %v755_v13 = vadd.f32 %v5715_v55, %v699_v43  ;;  %v804_v44 = vadd.f32 %v802_v6, %v754_v40  ;;  %v589_v48 = vadd.f32 %v5623_v63, %v6306_v14  ;;  %v602_v52 = vadd.f32 %v5625_v0, %v6308_v2  ;;  %v4971_v6 = vld [vmem:[#allocation2 + $0x1a] sm:$0xff]  ;;  %v4972_v14 = vld [vmem:[#allocation2 + $0x22] sm:$0xff] }
 0x2de   : > { %v6397_v26 = vpop.permute.xlu1 %1758  ;;  %v6399_v61 = vpop.permute.xlu0 %1796  ;;  %v8310_v49 = vmov %v8309_v31  ;;  %v8311_v10 = vstv %s6255_s10  ;;  %v713_v34 = vadd.f32 %v5685_v35, %v673_v22  ;;  %v8313_v37 = vstv %s6257_s27  ;;  %s6568_s10 = sld [smem:[#allocation7 + $0x81]]  ;;  %s6620_s27 = sld [smem:[#allocation7 + $0x60]] }
 0x2df   : > { %v6409_v53 = vmul.f32 %v4970_v58, %v8310_v49  ;;  %v6413_v31 = vmul.f32 %v4969_v8, %v8311_v10  ;;  %v836_v55 = vadd.f32 %v5741_v17, %v804_v44  ;;  %v8312_v43 = vmov %v8311_v10 }
 0x2e0   : > { %v6419_v56 = vmul.f32 %v4970_v58, %v8312_v43  ;;  %v6423_v40 = vmul.f32 %v4971_v6, %v8313_v37  ;;  %v645_v63 = vadd.f32 %v5657_v20, %v589_v48  ;;  %v658_v0 = vadd.f32 %v5659_v21, %v602_v52 }
 0x2e1   : > { %v678_v35 = vadd.f32 %v6315_v4, %v644_v12  ;;  %v8314_v17 = vmov %v8313_v37  ;;  %v769_v58 = vadd.f32 %v5723_v62, %v713_v34  ;;  %v805_v22 = vadd.f32 %v6323_v18, %v755_v13  ;;  %v8320_v37 = vld [vmem:[#allocation46_spill] sm:$0xff] }
 0x2e2   : > { %v6434_v2 = vmul.f32 %v4972_v14, %v8314_v17  ;;  %v6436_v15 = vpop.permute.xlu1 %1798  ;;  %v6438_v8 = vpop.permute.xlu0 %1810  ;;  %v810_v44 = vadd.f32 %v808_v42, %v768_v16  ;;  %v892_v20 = vadd.f32 %v5783_v59, %v836_v55  ;;  %v603_v21 = vadd.f32 %v5633_v5, %v6310_v47  ;;  %v8319_v55 = vld [vmem:[#allocation45_spill] sm:$0xff]  ;;  %v8321_v17 = vld [vmem:[#allocation34_spill] sm:$0xff] }
 0x2e3   : > { %v726_v4 = vadd.f32 %v5687_v36, %v678_v35  ;;  %v8315_v12 = vstv %s6259_s12  ;;  %v837_v10 = vadd.f32 %v5749_v23, %v805_v22  ;;  %v8317_v34 = vstv %s6263_s25  ;;  %s6595_s12 = sld [smem:[#allocation7 + $0x3c]]  ;;  %s6667_s25 = sld [smem:[#allocation7 + $0x1b]] }
 0x2e4   : > { %v6448_v48 = vmul.f32 %v4971_v6, %v8315_v12  ;;  %v8316_v52 = vmov %v8315_v12  ;;  %v850_v62 = vadd.f32 %v5751_v24, %v810_v44  ;;  %v6458_v18 = vmul.f32 %v4971_v6, %v8317_v34  ;;  %v8326_v12 = vld [vmem:[#allocation52_spill] sm:$0xff] }
 0x2e5   : > { %v6452_v49 = vmul.f32 %v4972_v14, %v8316_v52  ;;  %v8318_v59 = vmov %v8317_v34  ;;  %v659_v5 = vadd.f32 %v5665_v25, %v603_v21  ;;  %v679_v36 = vadd.f32 %v6317_v60, %v645_v63  ;;  %v8322_v60 = vld [vmem:[#allocation35_spill] sm:$0xff]  ;;  %v8325_v21 = vld [vmem:[#allocation40_spill] sm:$0xff] }
 0x2e6   : > { %v6462_v42 = vmul.f32 %v4972_v14, %v8318_v59  ;;  %v684_v47 = vadd.f32 %v6319_v46, %v658_v0  ;;  %v782_v23 = vadd.f32 %v5725_v1, %v726_v4  ;;  %v6470_v24 = vpop.permute.xlu1 %1812  ;;  %v6472_v13 = vpop.permute.xlu0 %1824  ;;  %v811_v16 = vadd.f32 %v6331_v27, %v769_v58 }
 0x2e7   : > { %v893_v43 = vadd.f32 %v8319_v55, %v837_v10  ;;  %v906_v35 = vadd.f32 %v8320_v37, %v850_v62  ;;  %v942_v25 = vadd.f32 %v6343_v11, %v892_v20  ;;  %v727_v22 = vadd.f32 %v8321_v17, %v679_v36  ;;  %v8327_v20 = vld [vmem:[#allocation37_spill] sm:$0xff]  ;;  %v8328_v62 = vld [vmem:[#allocation38_spill] sm:$0xff]  ;;  %v8329_v36 = vld [vmem:[#allocation47_spill] sm:$0xff] }
 0x2e8   : > { %v740_v63 = vadd.f32 %v8322_v60, %v684_v47  ;;  %v8323_v44 = vstv %s6265_s30  ;;  %v851_v4 = vadd.f32 %v8325_v21, %v811_v16  ;;  %v1353_v58 = vstv %s6425_s0  ;;  %v8330_v37 = vld [vmem:[#allocation60_spill] sm:$0xff]  ;;  %v8332_v17 = vld [vmem:[#allocation41_spill] sm:$0xff]  ;;  %v8334_v21 = vld [vmem:[#allocation54_spill] sm:$0xff]  ;;  %s6544_s30 = sld [smem:[#allocation7 + $0x5d]]  ;;  %s6844_s0 = sld [smem:[#allocation8 + $0x1]] }
 0x2e9   : > { %v6482_v46 = vmul.f32 %v4971_v6, %v8323_v44  ;;  %v8324_v1 = vmov %v8323_v44  ;;  %v974_v27 = vadd.f32 %v8326_v12, %v942_v25  ;;  %v1359_v52 = vstv %s6427_s2  ;;  %v4973_v60 = vld [vmem:[#allocation2 + $0x30] sm:$0xff]  ;;  %v8333_v44 = vld [vmem:[#allocation53_spill] sm:$0xff]  ;;  %s6866_s2 = sld [smem:[#allocation7 + $0x8d]] }
 0x2ea   : > { %v6486_v0 = vmul.f32 %v4972_v14, %v8324_v1  ;;  %v685_v11 = vadd.f32 %v6321_v32, %v659_v5  ;;  %v783_v10 = vadd.f32 %v8327_v20, %v727_v22  ;;  %v796_v34 = vadd.f32 %v8328_v62, %v740_v63  ;;  %v6498_v59 = vpop.permute.xlu1 %1826  ;;  %v6500_v14 = vpop.permute.xlu0 %1852  ;;  %v8331_v32 = vld [vmem:[#allocation36_spill] sm:$0xff] }
 0x2eb   : > { %v816_v6 = vadd.f32 %v6333_v50, %v782_v23  ;;  %v907_v47 = vadd.f32 %v8329_v36, %v851_v4  ;;  %v943_v16 = vadd.f32 %v6345_v33, %v893_v43  ;;  %v948_v55 = vadd.f32 %v6347_v38, %v906_v35  ;;  %v4974_v50 = vld [vmem:[#allocation2 + $0x38] sm:$0xff]  ;;  %v8335_v38 = vld [vmem:[#allocation39_spill] sm:$0xff] }
 0x2ec   : > { %v1030_v25 = vadd.f32 %v8330_v37, %v974_v27  ;;  %v741_v5 = vadd.f32 %v8331_v32, %v685_v11  ;;  %v6508_v63 = vmul.f32 %v4973_v60, %v1353_v58  ;;  %v6510_v23 = vmul.f32 %v4974_v50, %v1353_v58  ;;  %v8336_v58 = vld [vmem:[#allocation48_spill] sm:$0xff]  ;;  %v8337_v36 = vld [vmem:[#allocation61_spill] sm:$0xff] }
 0x2ed   : > { %v864_v22 = vadd.f32 %v8332_v17, %v816_v6  ;;  %v975_v1 = vadd.f32 %v8333_v44, %v943_v16  ;;  %v988_v4 = vadd.f32 %v8334_v21, %v948_v55  ;;  %v6514_v12 = vmul.f32 %v4973_v60, %v1359_v52  ;;  %v8338_v55 = vld [vmem:[#allocation62_spill] sm:$0xff]  ;;  %v8342_v21 = vld [vmem:[#allocation68_spill] sm:$0xff] }
 0x2ee   : > { %v1365_v33 = vstv %s6464_s3  ;;  %v797_v43 = vadd.f32 %v8335_v38, %v741_v5  ;;  %v817_v35 = vadd.f32 %v6335_v54, %v783_v10  ;;  %v822_v27 = vadd.f32 %v6337_v51, %v796_v34  ;;  %v6525_v20 = vpop.permute.xlu1 %1854  ;;  %v6527_v62 = vpop.permute.xlu0 %1866  ;;  %v8339_v5 = vld [vmem:[#allocation42_spill] sm:$0xff]  ;;  %v8340_v54 = vld [vmem:[#allocation43_spill] sm:$0xff]  ;;  %s6877_s3 = sld [smem:[#allocation8 + $0x2]] }
 0x2ef   : > { %v920_v11 = vadd.f32 %v8336_v58, %v864_v22  ;;  %v949_v6 = vadd.f32 %v6349_v28, %v907_v47  ;;  %v1031_v16 = vadd.f32 %v8337_v36, %v975_v1  ;;  %v1044_v37 = vadd.f32 %v8338_v55, %v988_v4  ;;  %v8341_v34 = vld [vmem:[#allocation55_spill] sm:$0xff]  ;;  %v8344_v1 = vld [vmem:[#allocation50_spill] sm:$0xff] }
 0x2f0   : > { %v1080_v32 = vadd.f32 %v6378_v39, %v1030_v25  ;;  %v865_v17 = vadd.f32 %v8339_v5, %v817_v35  ;;  %v878_v10 = vadd.f32 %v8340_v54, %v822_v27  ;;  %v6535_v44 = vmul.f32 %v4974_v50, %v1359_v52  ;;  %v8343_v39 = vld [vmem:[#allocation49_spill] sm:$0xff] }
 0x2f1   : > { %v6537_v51 = vmul.f32 %v4973_v60, %v1365_v33  ;;  %v989_v22 = vadd.f32 %v8341_v34, %v949_v6  ;;  %v6541_v58 = vmul.f32 %v4974_v50, %v1365_v33  ;;  %v1371_v28 = vstv %s6492_s4  ;;  %v8345_v6 = vld [vmem:[#allocation63_spill] sm:$0xff]  ;;  %s6893_s4 = sld [smem:[#allocation8 + $0x3]] }
 0x2f2   : > { %v1112_v38 = vadd.f32 %v8342_v21, %v1080_v32  ;;  %v823_v47 = vadd.f32 %v6341_v45, %v797_v43  ;;  %v921_v25 = vadd.f32 %v8343_v39, %v865_v17  ;;  %v934_v52 = vadd.f32 %v8344_v1, %v878_v10  ;;  %v6550_v35 = vpop.permute.xlu1 %1868  ;;  %v6552_v27 = vpop.permute.xlu0 %1838  ;;  %v8346_v32 = vld [vmem:[#allocation76_spill] sm:$0xff]  ;;  %v8350_v21 = vld [vmem:[#allocation70_spill] sm:$0xff] }
 0x2f3   : > { %v954_v4 = vadd.f32 %v6353_v57, %v920_v11  ;;  %v1045_v33 = vadd.f32 %v8345_v6, %v989_v22  ;;  %v1081_v36 = vadd.f32 %v6382_v3, %v1031_v16  ;;  %v1086_v55 = vadd.f32 %v6387_v9, %v1044_v37  ;;  %v8347_v43 = vld [vmem:[#allocation44_spill] sm:$0xff]  ;;  %v8349_v57 = vld [vmem:[#allocation69_spill] sm:$0xff]  ;;  %v8351_v3 = vld [vmem:[#allocation51_spill] sm:$0xff] }
 0x2f4   : > { %v1168_v45 = vadd.f32 %v8346_v32, %v1112_v38  ;;  %v879_v5 = vadd.f32 %v8347_v43, %v823_v47  ;;  %v8348_v17 = vld [vmem:[#allocation56_spill] sm:$0xff]  ;;  %v6560_v34 = vmul.f32 %v4973_v60, %v1371_v28  ;;  %v6562_v10 = vmul.f32 %v4974_v50, %v1371_v28  ;;  %v8356_v43 = vld [vmem:[#allocation57_spill] sm:$0xff] }
 0x2f5   : > { %v1002_v54 = vadd.f32 %v8348_v17, %v954_v4  ;;  %v1113_v11 = vadd.f32 %v8349_v57, %v1081_v36  ;;  %v1126_v39 = vadd.f32 %v8350_v21, %v1086_v55  ;;  %v1491_v1 = vstv %s6517_s7  ;;  %v8352_v38 = vld [vmem:[#allocation64_spill] sm:$0xff]  ;;  %v8354_v4 = vld [vmem:[#allocation77_spill] sm:$0xff]  ;;  %v8355_v36 = vld [vmem:[#allocation78_spill] sm:$0xff]  ;;  %s2329_s7 = sld [smem:[#allocation10]] }
 0x2f6   : > { %v1497_v22 = vstv %s6519_s8  ;;  %v935_v9 = vadd.f32 %v8351_v3, %v879_v5  ;;  %v955_v16 = vadd.f32 %v6364_v41, %v921_v25  ;;  %v960_v37 = vadd.f32 %v6368_v29, %v934_v52  ;;  %v6574_v60 = vpop.permute.xlu1 %1840  ;;  %v6576_v50 = vpop.permute.xlu0 %1880  ;;  %v8357_v41 = vld [vmem:[#allocation58_spill] sm:$0xff]  ;;  %v4975_v29 = vld [vmem:[#allocation2 + $0x31] sm:$0xff]  ;;  %v8358_v57 = vld [vmem:[#allocation71_spill] sm:$0xff]  ;;  %s2333_s8 = sld [smem:[#allocation11]] }
 0x2f7   : > { %v1058_v47 = vadd.f32 %v8352_v38, %v1002_v54  ;;  %8353 = vst [vmem:[#allocation45_spill] sm:$0xff] %v6574_v60  ;;  %v1087_v28 = vadd.f32 %v6391_v30, %v1045_v33  ;;  %v1169_v6 = vadd.f32 %v8354_v4, %v1113_v11  ;;  %v1182_v55 = vadd.f32 %v8355_v36, %v1126_v39  ;;  %v4976_v17 = vld [vmem:[#allocation2 + $0x39] sm:$0xff]  ;;  %v8359_v3 = vld [vmem:[#allocation84_spill] sm:$0xff]  ;;  %v8363_v4 = vld [vmem:[#allocation79_spill] sm:$0xff] }
 0x2f8   : > { %v1218_v32 = vadd.f32 %v6423_v40, %v1168_v45  ;;  %v1003_v5 = vadd.f32 %v8356_v43, %v955_v16  ;;  %v1016_v25 = vadd.f32 %v8357_v41, %v960_v37  ;;  %v6584_v52 = vmul.f32 %v4975_v29, %v1491_v1  ;;  %v8360_v45 = vld [vmem:[#allocation65_spill] sm:$0xff]  ;;  %v8361_v16 = vld [vmem:[#allocation66_spill] sm:$0xff] }
 0x2f9   : > { %v6586_v54 = vmul.f32 %v4976_v17, %v1491_v1  ;;  %v1127_v21 = vadd.f32 %v8358_v57, %v1087_v28  ;;  %v6590_v33 = vmul.f32 %v4975_v29, %v1497_v22  ;;  %v1503_v11 = vstv %s6544_s30  ;;  %v8364_v41 = vld [vmem:[#allocation90_spill] sm:$0xff]  ;;  %s6968_s30 = sld [smem:[#allocation10 + $0x2]] }
 0x2fa   : > { %v1250_v30 = vadd.f32 %v8359_v3, %v1218_v32  ;;  %v961_v40 = vadd.f32 %v6372_v19, %v935_v9  ;;  %v1059_v39 = vadd.f32 %v8360_v45, %v1003_v5  ;;  %v1072_v37 = vadd.f32 %v8361_v16, %v1016_v25  ;;  %v6601_v38 = vpop.permute.xlu1 %1882  ;;  %v6603_v28 = vpop.permute.xlu0 %1894  ;;  %v8365_v19 = vld [vmem:[#allocation59_spill] sm:$0xff]  ;;  %v8366_v5 = vld [vmem:[#allocation72_spill] sm:$0xff]  ;;  %v8368_v16 = vld [vmem:[#allocation86_spill] sm:$0xff] }
 0x2fb   : > { %v1092_v1 = vadd.f32 %v6395_v7, %v1058_v47  ;;  %8362 = vst [vmem:[#allocation46_spill] sm:$0xff] %v6603_v28  ;;  %v1183_v36 = vadd.f32 %v8363_v4, %v1127_v21  ;;  %v1219_v32 = vadd.f32 %v6434_v2, %v1169_v6  ;;  %v1224_v43 = vadd.f32 %v6448_v48, %v1182_v55  ;;  %v8367_v7 = vld [vmem:[#allocation85_spill] sm:$0xff]  ;;  %v8369_v2 = vld [vmem:[#allocation67_spill] sm:$0xff]  ;;  %v8370_v55 = vld [vmem:[#allocation80_spill] sm:$0xff] }
 0x2fc   : > { %v1306_v57 = vadd.f32 %v8364_v41, %v1250_v30  ;;  %v1017_v9 = vadd.f32 %v8365_v19, %v961_v40  ;;  %v6611_v45 = vmul.f32 %v4976_v17, %v1497_v22  ;;  %v6613_v25 = vmul.f32 %v4975_v29, %v1503_v11  ;;  %v8372_v4 = vld [vmem:[#allocation91_spill] sm:$0xff] }
 0x2fd   : > { %v1140_v3 = vadd.f32 %v8366_v5, %v1092_v1  ;;  %v1251_v47 = vadd.f32 %v8367_v7, %v1219_v32  ;;  %v1264_v60 = vadd.f32 %v8368_v16, %v1224_v43  ;;  %v6617_v28 = vmul.f32 %v4976_v17, %v1503_v11  ;;  %v8373_v43 = vld [vmem:[#allocation92_spill] sm:$0xff] }
 0x2fe   : > { %v1509_v21 = vstv %s6568_s10  ;;  %v1073_v48 = vadd.f32 %v8369_v2, %v1017_v9  ;;  %v1093_v6 = vadd.f32 %v6409_v53, %v1059_v39  ;;  %v1098_v22 = vadd.f32 %v6413_v31, %v1072_v37  ;;  %v6626_v40 = vpop.permute.xlu1 %1896  ;;  %v6628_v1 = vpop.permute.xlu0 %1934  ;;  %v8374_v9 = vld [vmem:[#allocation73_spill] sm:$0xff]  ;;  %v8375_v53 = vld [vmem:[#allocation74_spill] sm:$0xff]  ;;  %v8376_v37 = vld [vmem:[#allocation87_spill] sm:$0xff]  ;;  %s4645_s10 = sld [smem:[#allocation10 + $0x1]] }
 0x2ff   : > { %v1196_v30 = vadd.f32 %v8370_v55, %v1140_v3  ;;  %8371 = vst [vmem:[#allocation34_spill] sm:$0xff] %v6626_v40  ;;  %v1225_v11 = vadd.f32 %v6452_v49, %v1183_v36  ;;  %v1307_v32 = vadd.f32 %v8372_v4, %v1251_v47  ;;  %v1320_v41 = vadd.f32 %v8373_v43, %v1264_v60  ;;  %v8377_v16 = vld [vmem:[#allocation100_spill] sm:$0xff]  ;;  %v8378_v36 = vld [vmem:[#allocation81_spill] sm:$0xff]  ;;  %v8381_v43 = vld [vmem:[#allocation106_spill] sm:$0xff] }
 0x300   : > { %v1356_v19 = vadd.f32 %v6508_v63, %v1306_v57  ;;  %v1141_v5 = vadd.f32 %v8374_v9, %v1093_v6  ;;  %v1154_v39 = vadd.f32 %v8375_v53, %v1098_v22  ;;  %v6636_v7 = vmul.f32 %v4975_v29, %v1509_v21  ;;  %v8379_v57 = vld [vmem:[#allocation82_spill] sm:$0xff]  ;;  %v8383_v9 = vld [vmem:[#allocation88_spill] sm:$0xff] }
 0x301   : > { %v6638_v31 = vmul.f32 %v4976_v17, %v1509_v21  ;;  %v1265_v3 = vadd.f32 %v8376_v37, %v1225_v11  ;;  %v1629_v55 = vstv %s6593_s11  ;;  %v1635_v49 = vstv %s6595_s12  ;;  %v8380_v21 = vld [vmem:[#allocation93_spill] sm:$0xff]  ;;  %s6970_s11 = sld [smem:[#allocation10 + $0x3]]  ;;  %s6972_s12 = sld [smem:[#allocation11 + $0x2]] }
 0x302   : > { %v1388_v2 = vadd.f32 %v8377_v16, %v1356_v19  ;;  %v1099_v60 = vadd.f32 %v6419_v56, %v1073_v48  ;;  %v1197_v63 = vadd.f32 %v8378_v36, %v1141_v5  ;;  %v1210_v47 = vadd.f32 %v8379_v57, %v1154_v39  ;;  %v6650_v29 = vpop.permute.xlu1 %1936  ;;  %v6652_v17 = vpop.permute.xlu0 %1948  ;;  %v8382_v56 = vld [vmem:[#allocation75_spill] sm:$0xff]  ;;  %v4977_v53 = vld [vmem:[#allocation2 + $0x32] sm:$0xff]  ;;  %v8385_v36 = vld [vmem:[#allocation102_spill] sm:$0xff] }
 0x303   : > { %v1230_v6 = vadd.f32 %v6458_v18, %v1196_v30  ;;  %v1321_v22 = vadd.f32 %v8380_v21, %v1265_v3  ;;  %v1357_v11 = vadd.f32 %v6510_v23, %v1307_v32  ;;  %v1362_v4 = vadd.f32 %v6514_v12, %v1320_v41  ;;  %v4978_v18 = vld [vmem:[#allocation2 + $0x3a] sm:$0xff]  ;;  %v8386_v12 = vld [vmem:[#allocation83_spill] sm:$0xff] }
 0x304   : > { %v1444_v19 = vadd.f32 %v8381_v43, %v1388_v2  ;;  %v1155_v48 = vadd.f32 %v8382_v56, %v1099_v60  ;;  %v1630_v39 = vmul.f32 %v4977_v53, %v1629_v55  ;;  %v6660_v30 = vmul.f32 %v4978_v18, %v1629_v55  ;;  %v8384_v37 = vld [vmem:[#allocation101_spill] sm:$0xff]  ;;  %v8387_v55 = vld [vmem:[#allocation96_spill] sm:$0xff] }
 0x305   : > { %v1278_v5 = vadd.f32 %v8383_v9, %v1230_v6  ;;  %v1389_v16 = vadd.f32 %v8384_v37, %v1357_v11  ;;  %v1402_v57 = vadd.f32 %v8385_v36, %v1362_v4  ;;  %v6664_v3 = vmul.f32 %v4977_v53, %v1635_v49  ;;  %v8389_v4 = vld [vmem:[#allocation107_spill] sm:$0xff]  ;;  %v8390_v56 = vld [vmem:[#allocation108_spill] sm:$0xff] }
 0x306   : > { %v1641_v23 = vstv %s6620_s27  ;;  %v1211_v32 = vadd.f32 %v8386_v12, %v1155_v48  ;;  %v1231_v41 = vadd.f32 %v6462_v42, %v1197_v63  ;;  %v1236_v2 = vadd.f32 %v6482_v46, %v1210_v47  ;;  %v6675_v6 = vpop.permute.xlu1 %1950  ;;  %v6677_v21 = vpop.permute.xlu0 %1962  ;;  %v8391_v48 = vld [vmem:[#allocation89_spill] sm:$0xff]  ;;  %v8392_v42 = vld [vmem:[#allocation94_spill] sm:$0xff]  ;;  %v8393_v47 = vld [vmem:[#allocation103_spill] sm:$0xff]  ;;  %s6974_s27 = sld [smem:[#allocation11 + $0x1]] }
 0x307   : > { %v1334_v60 = vadd.f32 %v8387_v55, %v1278_v5  ;;  %8388 = vst [vmem:[#allocation35_spill] sm:$0xff] %v6677_v21  ;;  %v1363_v11 = vadd.f32 %v6535_v44, %v1321_v22  ;;  %v1445_v43 = vadd.f32 %v8389_v4, %v1389_v16  ;;  %v1458_v9 = vadd.f32 %v8390_v56, %v1402_v57  ;;  %v8394_v55 = vld [vmem:[#allocation116_spill] sm:$0xff]  ;;  %v8395_v16 = vld [vmem:[#allocation97_spill] sm:$0xff] }
 0x308   : > { %v1494_v37 = vadd.f32 %v6584_v52, %v1444_v19  ;;  %v1279_v36 = vadd.f32 %v8391_v48, %v1231_v41  ;;  %v1292_v63 = vadd.f32 %v8392_v42, %v1236_v2  ;;  %v6685_v12 = vmul.f32 %v4978_v18, %v1635_v49  ;;  %v8396_v52 = vld [vmem:[#allocation98_spill] sm:$0xff] }
 0x309   : > { %v6687_v46 = vmul.f32 %v4977_v53, %v1641_v23  ;;  %v1403_v5 = vadd.f32 %v8393_v47, %v1363_v11  ;;  %v6691_v21 = vmul.f32 %v4978_v18, %v1641_v23  ;;  %v1647_v44 = vstv %s6644_s19  ;;  %v8398_v11 = vld [vmem:[#allocation109_spill] sm:$0xff]  ;;  %s6976_s19 = sld [smem:[#allocation11 + $0x3]] }
 0x30a   : > { %v1526_v40 = vadd.f32 %v8394_v55, %v1494_v37  ;;  %v1237_v22 = vadd.f32 %v6486_v0, %v1211_v32  ;;  %v1335_v57 = vadd.f32 %v8395_v16, %v1279_v36  ;;  %v1348_v19 = vadd.f32 %v8396_v52, %v1292_v63  ;;  %v6698_v49 = vpop.permute.xlu1 %1964  ;;  %v6700_v2 = vpop.permute.xlu0 %1990  ;;  %v8399_v37 = vld [vmem:[#allocation122_spill] sm:$0xff]  ;;  %v8400_v32 = vld [vmem:[#allocation95_spill] sm:$0xff]  ;;  %v8401_v36 = vld [vmem:[#allocation104_spill] sm:$0xff] }
 0x30b   : > { %v1368_v41 = vadd.f32 %v6537_v51, %v1334_v60  ;;  %8397 = vst [vmem:[#allocation40_spill] sm:$0xff] %v6698_v49  ;;  %v1459_v4 = vadd.f32 %v8398_v11, %v1403_v5  ;;  %v1495_v23 = vadd.f32 %v6586_v54, %v1445_v43  ;;  %v1500_v56 = vadd.f32 %v6590_v33, %v1458_v9  ;;  %v8402_v60 = vld [vmem:[#allocation117_spill] sm:$0xff]  ;;  %v8403_v5 = vld [vmem:[#allocation118_spill] sm:$0xff]  ;;  %v8405_v55 = vld [vmem:[#allocation112_spill] sm:$0xff] }
 0x30c   : > { %v1582_v0 = vadd.f32 %v8399_v37, %v1526_v40  ;;  %v1293_v48 = vadd.f32 %v8400_v32, %v1237_v22  ;;  %v6708_v63 = vmul.f32 %v4977_v53, %v1647_v44  ;;  %v6710_v51 = vmul.f32 %v4978_v18, %v1647_v44  ;;  %v8404_v40 = vld [vmem:[#allocation99_spill] sm:$0xff]  ;;  %v8408_v32 = vld [vmem:[#allocation105_spill] sm:$0xff] }
 0x30d   : > { %v1416_v42 = vadd.f32 %v8401_v36, %v1368_v41  ;;  %v1527_v47 = vadd.f32 %v8402_v60, %v1495_v23  ;;  %v1540_v54 = vadd.f32 %v8403_v5, %v1500_v56  ;;  %v1767_v43 = vstv %s6667_s25  ;;  %v8406_v41 = vld [vmem:[#allocation123_spill] sm:$0xff]  ;;  %v8407_v23 = vld [vmem:[#allocation124_spill] sm:$0xff]  ;;  %s8448_s25 = smov 1  }
 0x30e   : > { %v1773_v33 = vstv %s6669_s21  ;;  %v1349_v9 = vadd.f32 %v8404_v40, %v1293_v48  ;;  %v1369_v53 = vadd.f32 %v6541_v58, %v1335_v57  ;;  %v1374_v18 = vadd.f32 %v6560_v34, %v1348_v19  ;;  %v6728_v22 = vpop.permute.xlu1 %1992  ;;  %v6730_v16 = vpop.permute.xlu0 %2004  ;;  %v8409_v48 = vld [vmem:[#allocation110_spill] sm:$0xff]  ;;  %v4979_v58 = vld [vmem:[#allocation2 + $0x48] sm:$0xff]  ;;  %v4980_v34 = vld [vmem:[#allocation2 + $0x50] sm:$0xff]  ;;  %s4654_s21 = sld [smem:[#allocation13 + $0x1]] }
 0x30f   : > { %v1472_v44 = vadd.f32 %v8405_v55, %v1416_v42  ;;  %v1501_v52 = vadd.f32 %v6611_v45, %v1459_v4  ;;  %v1583_v11 = vadd.f32 %v8406_v41, %v1527_v47  ;;  %v1596_v56 = vadd.f32 %v8407_v23, %v1540_v54  ;;  %v8410_v42 = vld [vmem:[#allocation119_spill] sm:$0xff]  ;;  %v8411_v40 = vld [vmem:[#allocation132_spill] sm:$0xff]  ;;  %v8413_v54 = vld [vmem:[#allocation114_spill] sm:$0xff] }
 0x310   : > { %v1632_v37 = vadd.f32 %v1630_v39, %v1582_v0  ;;  %v1417_v36 = vadd.f32 %v8408_v32, %v1369_v53  ;;  %v1430_v60 = vadd.f32 %v8409_v48, %v1374_v18  ;;  %v1768_v57 = vmul.f32 %v4979_v58, %v1767_v43  ;;  %v8412_v39 = vld [vmem:[#allocation113_spill] sm:$0xff]  ;;  %v8416_v32 = vld [vmem:[#allocation138_spill] sm:$0xff] }
 0x311   : > { %v1769_v19 = vmul.f32 %v4980_v34, %v1767_v43  ;;  %v1541_v5 = vadd.f32 %v8410_v42, %v1501_v52  ;;  %v1774_v45 = vmul.f32 %v4979_v58, %v1773_v33  ;;  %v6739_v4 = vmul.f32 %v4980_v34, %v1773_v33  ;;  %v8415_v41 = vld [vmem:[#allocation125_spill] sm:$0xff] }
 0x312   : > { %v1664_v55 = vadd.f32 %v8411_v40, %v1632_v37  ;;  %v1375_v47 = vadd.f32 %v6562_v10, %v1349_v9  ;;  %v1473_v0 = vadd.f32 %v8412_v39, %v1417_v36  ;;  %v1486_v53 = vadd.f32 %v8413_v54, %v1430_v60  ;;  %v6745_v43 = vpop.permute.xlu1 %2006  ;;  %v6747_v52 = vpop.permute.xlu0 %1976  ;;  %v8417_v9 = vld [vmem:[#allocation111_spill] sm:$0xff]  ;;  %v8418_v36 = vld [vmem:[#allocation120_spill] sm:$0xff]  ;;  %v8419_v39 = vld [vmem:[#allocation133_spill] sm:$0xff] }
 0x313   : > { %v1506_v18 = vadd.f32 %v6613_v25, %v1472_v44  ;;  %8414 = vst [vmem:[#allocation52_spill] sm:$0xff] %v6747_v52  ;;  %v1597_v23 = vadd.f32 %v8415_v41, %v1541_v5  ;;  %v1633_v37 = vadd.f32 %v6660_v30, %v1583_v11  ;;  %v1638_v33 = vadd.f32 %v6664_v3, %v1596_v56  ;;  %v8420_v44 = vld [vmem:[#allocation134_spill] sm:$0xff]  ;;  %v8421_v5 = vld [vmem:[#allocation115_spill] sm:$0xff]  ;;  %v8422_v56 = vld [vmem:[#allocation128_spill] sm:$0xff] }
 0x314   : > { %v1720_v10 = vadd.f32 %v8416_v32, %v1664_v55  ;;  %v1431_v48 = vadd.f32 %v8417_v9, %v1375_v47  ;;  %v1779_v40 = vstv %s6712_s1  ;;  %v1785_v60 = vstv %s6714_s18  ;;  %v8425_v32 = vld [vmem:[#allocation140_spill] sm:$0xff]  ;;  %s4655_s1 = sld [smem:[#allocation13 + $0x25]]  ;;  %s4656_s18 = sld [smem:[#allocation13 + $0x49]] }
 0x315   : > { %v1554_v42 = vadd.f32 %v8418_v36, %v1506_v18  ;;  %v1665_v25 = vadd.f32 %v8419_v39, %v1633_v37  ;;  %v1678_v54 = vadd.f32 %v8420_v44, %v1638_v33  ;;  %v1905_v49 = vstv %s6720_s17  ;;  %v8424_v37 = vld [vmem:[#allocation139_spill] sm:$0xff]  ;;  %v8426_v39 = vld [vmem:[#allocation121_spill] sm:$0xff]  ;;  %s4657_s17 = sld [smem:[#allocation13 + $0x6d]] }
 0x316   : > { %v1911_v52 = vstv %s6722_s28  ;;  %v1487_v30 = vadd.f32 %v8421_v5, %v1431_v48  ;;  %v1507_v3 = vadd.f32 %v6617_v28, %v1473_v0  ;;  %v1512_v11 = vadd.f32 %v6636_v7, %v1486_v53  ;;  %v6767_v47 = vpop.permute.xlu1 %1978  ;;  %v6769_v18 = vpop.permute.xlu0 %2018  ;;  %v8427_v48 = vld [vmem:[#allocation126_spill] sm:$0xff]  ;;  %v8428_v7 = vld [vmem:[#allocation135_spill] sm:$0xff]  ;;  %s4658_s28 = sld [smem:[#allocation13 + $0x2]] }
 0x317   : > { %v1610_v55 = vadd.f32 %v8422_v56, %v1554_v42  ;;  %8423 = vst [vmem:[#allocation37_spill] sm:$0xff] %v6767_v47  ;;  %v1639_v41 = vadd.f32 %v6685_v12, %v1597_v23  ;;  %v1721_v33 = vadd.f32 %v8424_v37, %v1665_v25  ;;  %v1734_v9 = vadd.f32 %v8425_v32, %v1678_v54  ;;  %v4981_v32 = vld [vmem:[#allocation2 + $0x49] sm:$0xff] }
 0x318   : > { %v1770_v36 = vadd.f32 %v1768_v57, %v1720_v10  ;;  %v1555_v44 = vadd.f32 %v8426_v39, %v1507_v3  ;;  %v1568_v5 = vadd.f32 %v8427_v48, %v1512_v11  ;;  %v1780_v28 = vmul.f32 %v4979_v58, %v1779_v40  ;;  %v8429_v57 = vld [vmem:[#allocation129_spill] sm:$0xff]  ;;  %v8430_v10 = vld [vmem:[#allocation130_spill] sm:$0xff] }
 0x319   : > { %v6776_v0 = vmul.f32 %v4980_v34, %v1779_v40  ;;  %v1679_v53 = vadd.f32 %v8428_v7, %v1639_v41  ;;  %v6780_v56 = vmul.f32 %v4979_v58, %v1785_v60  ;;  %v6782_v47 = vmul.f32 %v4980_v34, %v1785_v60  ;;  %v8431_v58 = vld [vmem:[#allocation141_spill] sm:$0xff]  ;;  %v8432_v41 = vld [vmem:[#allocation127_spill] sm:$0xff] }
 0x31a   : > { %v1802_v42 = vadd.f32 %v6399_v61, %v1770_v36  ;;  %v1513_v12 = vadd.f32 %v6638_v31, %v1487_v30  ;;  %v1611_v23 = vadd.f32 %v8429_v57, %v1555_v44  ;;  %v1624_v25 = vadd.f32 %v8430_v10, %v1568_v5  ;;  %v6792_v54 = vpop.permute.xlu1 %2020  ;;  %v6794_v61 = vpop.permute.xlu0 %2032  ;;  %v8433_v31 = vld [vmem:[#allocation136_spill] sm:$0xff]  ;;  %v8436_v57 = vld [vmem:[#allocation137_spill] sm:$0xff] }
 0x31b   : > { %v1644_v40 = vadd.f32 %v6687_v46, %v1610_v55  ;;  %v1735_v34 = vadd.f32 %v8431_v58, %v1679_v53  ;;  %v1771_v60 = vadd.f32 %v1769_v19, %v1721_v33  ;;  %v1776_v3 = vadd.f32 %v1774_v45, %v1734_v9  ;;  %v6800_v39 = vld [vmem:[#allocation2 + $0x51] sm:$0xff]  ;;  %v8434_v19 = vld [vmem:[#allocation131_spill] sm:$0xff] }
 0x31c   : > { %v1858_v11 = vadd.f32 %v6500_v14, %v1802_v42  ;;  %v1569_v37 = vadd.f32 %v8432_v41, %v1513_v12  ;;  %v1906_v36 = vmul.f32 %v4981_v32, %v1905_v49  ;;  %v1907_v46 = vmul.f32 %v6800_v39, %v1905_v49  ;;  %v8435_v9 = vld [vmem:[#allocation144_spill] sm:$0xff] }
 0x31d   : > { %v1692_v30 = vadd.f32 %v8433_v31, %v1644_v40  ;;  %v1803_v55 = vadd.f32 %v6436_v15, %v1771_v60  ;;  %v1816_v44 = vadd.f32 %v6438_v8, %v1776_v3  ;;  %v1912_v48 = vmul.f32 %v4981_v32, %v1911_v52  ;;  %v8437_v40 = vld [vmem:[#allocation142_spill] sm:$0xff] }
 0x31e   : > { %v1917_v5 = vstv %s6761_s15  ;;  %v1625_v14 = vadd.f32 %v8434_v19, %v1569_v37  ;;  %v1645_v45 = vadd.f32 %v6691_v21, %v1611_v23  ;;  %v1650_v33 = vadd.f32 %v6708_v63, %v1624_v25  ;;  %v6812_v53 = vpop.permute.xlu1 %2034  ;;  %v2073_v49 = vpop.permute.xlu0 %2072  ;;  %s4659_s15 = sld [smem:[#allocation13 + $0x26]] }
 0x31f   : > { %v1748_v7 = vadd.f32 %v8435_v9, %v1692_v30  ;;  %v1777_v15 = vadd.f32 %v6739_v4, %v1735_v34  ;;  %v1859_v8 = vadd.f32 %v6525_v20, %v1803_v55  ;;  %v1872_v42 = vadd.f32 %v6527_v62, %v1816_v44  ;;  %v8438_v62 = vld [vmem:[#allocation145_spill] sm:$0xff]  ;;  %v8439_v34 = vld [vmem:[#allocation146_spill] sm:$0xff] }
 0x320   : > { %v1908_v12 = vadd.f32 %v1906_v36, %v1858_v11  ;;  %v1693_v10 = vadd.f32 %v8436_v57, %v1645_v45  ;;  %v1706_v58 = vadd.f32 %v8437_v40, %v1650_v33  ;;  %v1913_v21 = vmul.f32 %v6800_v39, %v1911_v52  ;;  %v8440_v36 = vld [vmem:[#allocation143_spill] sm:$0xff] }
 0x321   : > { %v1918_v23 = vmul.f32 %v4981_v32, %v1917_v5  ;;  %v1817_v63 = vadd.f32 %v6470_v24, %v1777_v15  ;;  %v1923_v60 = vstv %s6784_s23  ;;  %v2043_v3 = vstv %s6786_s20  ;;  %v6840_v45 = vld [vmem:[#allocation2 + $0x4a] sm:$0xff]  ;;  %s4660_s23 = sld [smem:[#allocation13 + $0x4a]]  ;;  %s4661_s20 = sld [smem:[#allocation13 + $0x6e]] }
 0x322   : > { %v1940_v25 = vadd.f32 %v6628_v1, %v1908_v12  ;;  %v1651_v20 = vadd.f32 %v6710_v51, %v1625_v14  ;;  %v1749_v4 = vadd.f32 %v8438_v62, %v1693_v10  ;;  %v1762_v11 = vadd.f32 %v8439_v34, %v1706_v58  ;;  %v2075_v37 = vpop.permute.xlu1 %2074  ;;  %v2087_v52 = vpop.permute.xlu0 %2086 }
 0x323   : > { %v1782_v41 = vadd.f32 %v1780_v28, %v1748_v7  ;;  %v1873_v31 = vadd.f32 %v6550_v35, %v1817_v63  ;;  %v1909_v24 = vadd.f32 %v1907_v46, %v1859_v8  ;;  %v1914_v30 = vadd.f32 %v1912_v48, %v1872_v42  ;;  %v6856_v8 = vld [vmem:[#allocation2 + $0x52] sm:$0xff] }
 0x324   : > { %v1996_v1 = vadd.f32 %v6700_v2, %v1940_v25  ;;  %v1707_v55 = vadd.f32 %v8440_v36, %v1651_v20  ;;  %v1919_v51 = vmul.f32 %v6800_v39, %v1917_v5  ;;  %v1924_v19 = vmul.f32 %v4981_v32, %v1923_v60  ;;  %v8442_v25 = vld [vmem:[#allocation45_spill] sm:$0xff]  ;;  %v8443_v20 = vld [vmem:[#allocation35_spill] sm:$0xff] }
 0x325   : > { %v1830_v44 = vadd.f32 %v6472_v13, %v1782_v41  ;;  %v1941_v28 = vadd.f32 %v6650_v29, %v1909_v24  ;;  %v1954_v14 = vadd.f32 %v6652_v17, %v1914_v30  ;;  %v2044_v35 = vmul.f32 %v6840_v45, %v2043_v3 }
 0x326   : > { %v2049_v46 = vstv %s6806_s14  ;;  %v1763_v2 = vadd.f32 %v6397_v26, %v1707_v55  ;;  %v1783_v13 = vadd.f32 %v6776_v0, %v1749_v4  ;;  %v1788_v48 = vadd.f32 %v6780_v56, %v1762_v11  ;;  %v2089_v5 = vpop.permute.xlu1 %2088  ;;  %v6850_v29 = vpop.permute.xlu0 %2100  ;;  %v8444_v11 = vld [vmem:[#allocation34_spill] sm:$0xff]  ;;  %s4666_s14 = sld [smem:[#allocation13 + $0x4]] }
 0x327   : > { %v1886_v32 = vadd.f32 %v6576_v50, %v1830_v44  ;;  %v1915_v17 = vadd.f32 %v1913_v21, %v1873_v31  ;;  %v1997_v33 = vadd.f32 %v6728_v22, %v1941_v28  ;;  %v2010_v9 = vadd.f32 %v6730_v16, %v1954_v14 }
 0x328   : > { %v2046_v7 = vadd.f32 %v2044_v35, %v1996_v1  ;;  %v1831_v15 = vadd.f32 %v6498_v59, %v1783_v13  ;;  %v1844_v26 = vadd.f32 %v6552_v27, %v1788_v48  ;;  %v2045_v0 = vmul.f32 %v6856_v8, %v2043_v3  ;;  %v8441_v59 = vld [vmem:[#allocation46_spill] sm:$0xff] }
 0x329   : > { %v2050_v56 = vmul.f32 %v6840_v45, %v2049_v46  ;;  %v1955_v50 = vadd.f32 %v6675_v6, %v1915_v17  ;;  %v2051_v12 = vmul.f32 %v6856_v8, %v2049_v46  ;;  %v2179_v22 = vstv %s6824_s24  ;;  %s4667_s24 = sld [smem:[#allocation13 + $0x28]] }
 0x32a   : > { %v2078_v42 = vadd.f32 %v2073_v49, %v2046_v7  ;;  %v1789_v16 = vadd.f32 %v6782_v47, %v1763_v2  ;;  %v1887_v57 = vadd.f32 %v6601_v38, %v1831_v15  ;;  %v1900_v10 = vadd.f32 %v8441_v59, %v1844_v26  ;;  %v2103_v40 = vpop.permute.xlu1 %2102  ;;  %v2129_v58 = vpop.permute.xlu0 %2128 }
 0x32b   : > { %v1920_v27 = vadd.f32 %v1918_v23, %v1886_v32  ;;  %v2011_v21 = vadd.f32 %v6745_v43, %v1955_v50  ;;  %v2047_v6 = vadd.f32 %v2045_v0, %v1997_v33  ;;  %v2052_v49 = vadd.f32 %v2050_v56, %v2010_v9 }
 0x32c   : > { %v2134_v63 = vadd.f32 %v2129_v58, %v2078_v42  ;;  %v1845_v3 = vadd.f32 %v8442_v25, %v1789_v16  ;;  %v2055_v47 = vstv %s6836_s13  ;;  %v2183_v23 = vstv %s6844_s0  ;;  %s4668_s13 = sld [smem:[#allocation13 + $0x4c]]  ;;  %s4669_s0 = sld [smem:[#allocation13 + $0x70]] }
 0x32d   : > { %v1968_v62 = vadd.f32 %v8443_v20, %v1920_v27  ;;  %v2079_v38 = vadd.f32 %v2075_v37, %v2047_v6  ;;  %v2092_v4 = vadd.f32 %v2087_v52, %v2052_v49  ;;  %v1921_v31 = vadd.f32 %v1919_v51, %v1887_v57  ;;  %v8445_v52 = vld [vmem:[#allocation40_spill] sm:$0xff] }
 0x32e   : > { %v6872_v34 = vadd.f32 %v2179_v22, %v2134_v63  ;;  %v1901_v41 = vadd.f32 %v8444_v11, %v1845_v3  ;;  %v1926_v24 = vadd.f32 %v1924_v19, %v1900_v10  ;;  %v2131_v30 = vpop.permute.xlu1 %2130  ;;  %v2143_v1 = vpop.permute.xlu0 %2142  ;;  %v2053_v36 = vadd.f32 %v2051_v12, %v2011_v21 }
 0x32f   : > { %v2024_v43 = vadd.f32 %v6769_v18, %v1968_v62  ;;  %v2135_v55 = vadd.f32 %v2131_v30, %v2079_v38  ;;  %v2148_v44 = vadd.f32 %v2143_v1, %v2092_v4  ;;  %v1969_v28 = vadd.f32 %v8445_v52, %v1921_v31  ;;  %v8446_v18 = vld [vmem:[#allocation52_spill] sm:$0xff] }
 0x330   : > { %v2195_v37 = vsel %vm2194_vm3, %v6872_v34, 0.0  ;;  %v1925_v14 = vmul.f32 %v6800_v39, %v1923_v60  ;;  %v2056_v51 = vmul.f32 %v6840_v45, %v2055_v47  ;;  %v1982_v19 = vadd.f32 %v8446_v18, %v1926_v24 }
 0x331   : > { %2196 = vadd.xlane.f32.xlu0 %v2195_v37  ;;  %v2093_v35 = vadd.f32 %v2089_v5, %v2053_v36  ;;  %v6887_v46 = vadd.f32 %v2179_v22, %v2135_v55  ;;  %v6889_v2 = vadd.f32 %v2183_v23, %v2148_v44  ;;  %v2025_v48 = vadd.f32 %v6792_v54, %v1969_v28  ;;  %v8447_v54 = vld [vmem:[#allocation37_spill] sm:$0xff] }
 0x332   : > { %v1927_v13 = vadd.f32 %v1925_v14, %v1901_v41  ;;  %v2058_v32 = vadd.f32 %v2056_v51, %v2024_v43  ;;  %v2145_v17 = vpop.permute.xlu1 %2144  ;;  %v2061_v33 = vstv %s6866_s2  ;;  %v2115_v9 = vpop.permute.xlu0 %2114  ;;  %v2038_v39 = vadd.f32 %v6794_v61, %v1982_v19  ;;  %s4670_s2 = sld [smem:[#allocation13 + $0x5]] }
 0x333   : > { %v2149_v60 = vadd.f32 %v2145_v17, %v2093_v35  ;;  %v2198_v5 = vsel %vm2194_vm3, %v6887_v46, 0.0  ;;  %v2209_v7 = vsel %vm2194_vm3, %v6889_v2, 0.0  ;;  %v2057_v15 = vmul.f32 %v6856_v8, %v2055_v47 }
 0x334   : > { %2199 = vadd.xlane.f32.xlu1 %v2198_v5  ;;  %v1983_v26 = vadd.f32 %v8447_v54, %v1927_v13  ;;  %v2106_v0 = vadd.f32 %v6850_v29, %v2058_v32  ;;  %v2062_v56 = vmul.f32 %v6840_v45, %v2061_v33  ;;  %v2187_v22 = vstv %s6877_s3  ;;  %s4671_s3 = sld [smem:[#allocation13 + $0x29]] }
 0x335   : > { %2210 = vadd.xlane.f32.xlu0 %v2209_v7  ;;  %v6904_v50 = vadd.f32 %v2183_v23, %v2149_v60  ;;  %v2059_v61 = vadd.f32 %v2057_v15, %v2025_v48  ;;  %v2063_v29 = vmul.f32 %v6856_v8, %v2061_v33  ;;  %v2191_v49 = vstv %s6893_s4  ;;  %s4672_s4 = sld [smem:[#allocation13 + $0x4d]] }
 0x336   : > { %v2117_v42 = vpop.permute.xlu1 %2116  ;;  %v2157_v12 = vpop.permute.xlu0 %2156  ;;  %v2039_v16 = vadd.f32 %v6812_v53, %v1983_v26  ;;  %v2064_v57 = vadd.f32 %v2062_v56, %v2038_v39 }
 0x337   : > { %v2162_v59 = vadd.f32 %v2157_v12, %v2106_v0  ;;  %v2212_v10 = vsel %vm2194_vm3, %v6904_v50, 0.0  ;;  %v2107_v27 = vadd.f32 %v2103_v40, %v2059_v61 }
 0x338   : > { %v2120_v58 = vadd.f32 %v2115_v9, %v2064_v57  ;;  %v2065_v63 = vadd.f32 %v2063_v29, %v2039_v16 }
 0x339   : > { %2213 = vadd.xlane.f32.xlu0 %v2212_v10  ;;  %v6911_v45 = vadd.f32 %v2187_v22, %v2162_v59 }
 0x33a   : > { %v2159_v21 = vpop.permute.xlu1 %2158  ;;  %v2171_v6 = vpop.permute.xlu0 %2170  ;;  %v2121_v20 = vadd.f32 %v2117_v42, %v2065_v63 }
 0x33b   : > { %v2163_v25 = vadd.f32 %v2159_v21, %v2107_v27  ;;  %v2176_v3 = vadd.f32 %v2171_v6, %v2120_v58  ;;  %v2223_v53 = vsel %vm2194_vm3, %v6911_v45, 0.0 }
 0x33c   : > { %2224 = vadd.xlane.f32.xlu1 %v2223_v53 }
 0x33d   : > { %v6916_v62 = vadd.f32 %v2191_v49, %v2176_v3  ;;  %v2189_v47 = vadd.f32 %v2187_v22, %v2163_v25 }
 0x33e   : > { %v2173_v40 = vpop.permute.xlu1 %2172 }
 0x33f   : > { %v2177_v38 = vadd.f32 %v2173_v40, %v2121_v20  ;;  %v2237_v8 = vsel %vm2194_vm3, %v6916_v62, 0.0  ;;  %v2226_v4 = vsel %vm2194_vm3, %v2189_v47, 0.0 }
 0x340   : > { %2238 = vadd.xlane.f32.xlu1 %v2237_v8  ;;  %2227 = vadd.xlane.f32.xlu0 %v2226_v4 }
 0x341   : > { %v2193_v23 = vadd.f32 %v2191_v49, %v2177_v38 }
 0x343   : > { %v2240_v11 = vsel %vm2194_vm3, %v2193_v23, 0.0 }
 0x344   : > { %2241 = vadd.xlane.f32.xlu0 %v2240_v11 }
 0x3be   : > { %v2197_v41 = vpop.xlane.xlu0 %2196 }
 0x3c1   : > { %v2200_v31 = vpop.xlane.xlu1 %2199 }
 0x3c2   : > { %v2211_v24 = vpop.xlane.xlu0 %2210  ;;  %v2201_v43 = vadd.f32 %v2200_v31, %v2197_v41 }
 0x3c4   : > { %v2202_v1 = vrot.slane %v2201_v43, 4 }
 0x3c6   : > { %v2214_v30 = vpop.xlane.xlu0 %2213  ;;  %v2203_v44 = vadd.f32 %v2202_v1, %v2201_v43 }
 0x3c7   : > { %v2215_v36 = vadd.f32 %v2214_v30, %v2211_v24 }
 0x3c8   : > { %v2204_v51 = vrot.slane %v2203_v44, 2 }
 0x3c9   : > { %v2216_v55 = vrot.slane %v2215_v36, 4  ;;  %v2225_v52 = vpop.xlane.xlu1 %2224 }
 0x3ca   : > { %v2205_v32 = vadd.f32 %v2204_v51, %v2203_v44 }
 0x3cb   : > { %v2217_v37 = vadd.f32 %v2216_v55, %v2215_v36 }
 0x3cc   : > { %v2206_v5 = vrot.slane %v2205_v32, 1 }
 0x3cd   : > { %v2218_v28 = vrot.slane %v2217_v37, 2  ;;  %v2228_v14 = vpop.xlane.xlu0 %2227  ;;  %v2239_v13 = vpop.xlane.xlu1 %2238 }
 0x3ce   : > { %v2229_v18 = vadd.f32 %v2228_v14, %v2225_v52  ;;  %v2207_v56 = vadd.f32 %v2206_v5, %v2205_v32 }
 0x3cf   : > { %v2219_v19 = vadd.f32 %v2218_v28, %v2217_v37 }
 0x3d0   : > { %v2230_v35 = vrot.slane %v2229_v18, 4 }
 0x3d1   : > { %v2242_v48 = vpop.xlane.xlu0 %2241  ;;  %v2220_v9 = vrot.slane %v2219_v19, 1 }
 0x3d2   : > { %v2231_v17 = vadd.f32 %v2230_v35, %v2229_v18  ;;  %v2243_v33 = vadd.f32 %v2242_v48, %v2239_v13 }
 0x3d3   : > { %v2221_v54 = vadd.f32 %v2220_v9, %v2219_v19 }
 0x3d4   : > { %v2232_v39 = vrot.slane %v2231_v17, 2  ;;  %v2244_v60 = vrot.slane %v2243_v33, 4 }
 0x3d5   : > { %v2222_v12 = vadd.f32 %v2221_v54, %v2207_v56 }
 0x3d6   : > { %v2233_v7 = vadd.f32 %v2232_v39, %v2231_v17  ;;  %v2245_v15 = vadd.f32 %v2244_v60, %v2243_v33 }
 0x3d8   : > { %v2234_v26 = vrot.slane %v2233_v7, 1  ;;  %v2246_v0 = vrot.slane %v2245_v15, 2 }
 0x3da   : > { %v2235_v61 = vadd.f32 %v2234_v26, %v2233_v7  ;;  %v2247_v42 = vadd.f32 %v2246_v0, %v2245_v15 }
 0x3dc   : > { %v2248_v22 = vrot.slane %v2247_v42, 1  ;;  %v2236_v16 = vadd.f32 %v2235_v61, %v2222_v12 }
 0x3de   : > { %v2249_v57 = vadd.f32 %v2248_v22, %v2247_v42 }
 0x3e0   : > { %v2250_v59 = vadd.f32 %v2249_v57, %v2236_v16 }
 0x3e2   : > { %v2251_v10 = vmul.f32 0.0009765625, %v2250_v59 }
 0x3e4   : > { %v6923_v27 = vsub.f32 %v6887_v46, %v2251_v10  ;;  %v6926_v58 = vsub.f32 %v6872_v34, %v2251_v10  ;;  %v6929_v29 = vsub.f32 %v6904_v50, %v2251_v10  ;;  %v6932_v21 = vsub.f32 %v6889_v2, %v2251_v10 }
 0x3e5   : > { %v6938_v63 = vsub.f32 %v2189_v47, %v2251_v10  ;;  %v6941_v46 = vsub.f32 %v6911_v45, %v2251_v10  ;;  %v6949_v3 = vsub.f32 %v2193_v23, %v2251_v10  ;;  %v6952_v53 = vsub.f32 %v6916_v62, %v2251_v10 }
 0x3e6   : > { %v2255_v6 = vmul.f32 %v6923_v27, %v6923_v27  ;;  %v2254_v49 = vmul.f32 %v6926_v58, %v6926_v58  ;;  %v2273_v50 = vmul.f32 %v6929_v29, %v6929_v29  ;;  %v2272_v2 = vmul.f32 %v6932_v21, %v6932_v21 }
 0x3e7   : > { %v2291_v47 = vmul.f32 %v6938_v63, %v6938_v63  ;;  %v2290_v40 = vmul.f32 %v6941_v46, %v6941_v46  ;;  %v2309_v62 = vmul.f32 %v6949_v3, %v6949_v3  ;;  %v2308_v4 = vmul.f32 %v6952_v53, %v6952_v53 }
 0x3e8   : > { %v2259_v34 = vsel %vm2194_vm3, %v2255_v6, 0.0  ;;  %v2256_v25 = vsel %vm2194_vm3, %v2254_v49, 0.0  ;;  %v2277_v45 = vsel %vm2194_vm3, %v2273_v50, 0.0  ;;  %v2274_v20 = vsel %vm2194_vm3, %v2272_v2, 0.0 }
 0x3e9   : > { %2260 = vadd.xlane.f32.xlu0 %v2259_v34  ;;  %2257 = vadd.xlane.f32.xlu1 %v2256_v25  ;;  %v2295_v38 = vsel %vm2194_vm3, %v2291_v47, 0.0  ;;  %v2292_v8 = vsel %vm2194_vm3, %v2290_v40, 0.0  ;;  %v2313_v23 = vsel %vm2194_vm3, %v2309_v62, 0.0  ;;  %v2310_v11 = vsel %vm2194_vm3, %v2308_v4, 0.0 }
 0x3ea   : > { %v2330_v49 = vstv %s2329_s7  ;;  %v2334_v25 = vstv %s2333_s8  ;;  %v2362_v50 = vstv %s6968_s30  ;;  %v2346_v2 = vstv %s4645_s10  ;;  %s4673_s7 = sld [smem:[#allocation13 + $0x71]]  ;;  %s4678_s8 = sld [smem:[#allocation13 + $0x7]] }
 0x3eb   : > { %v2350_v62 = vstv %s6974_s27  ;;  %s4679_s30 = sld [smem:[#allocation13 + $0x2b]]  ;;  %s4680_s10 = sld [smem:[#allocation13 + $0x4f]] }
 0x3ec   : > { %s4683_s27 = sld [smem:[#allocation13 + $0x2c]] }
 0x3ed   : > { %2278 = vadd.xlane.f32.xlu0 %v2277_v45  ;;  %2275 = vadd.xlane.f32.xlu1 %v2274_v20  ;;  %v2378_v45 = vstv %s6970_s11  ;;  %s4681_s11 = sld [smem:[#allocation13 + $0x73]] }
 0x3f1   : > { %2296 = vadd.xlane.f32.xlu0 %v2295_v38  ;;  %2293 = vadd.xlane.f32.xlu1 %v2292_v8  ;;  %v2366_v8 = vstv %s6972_s12  ;;  %s4682_s12 = sld [smem:[#allocation13 + $0x8]] }
 0x3f5   : > { %2314 = vadd.xlane.f32.xlu0 %v2313_v23  ;;  %2311 = vadd.xlane.f32.xlu1 %v2310_v11 }
 0x476   : > { %v2261_v41 = vpop.xlane.xlu0 %2260  ;;  %v2258_v31 = vpop.xlane.xlu1 %2257 }
 0x477   : > { %v2262_v24 = vadd.f32 %v2261_v41, %v2258_v31 }
 0x479   : > { %v2263_v43 = vrot.slane %v2262_v24, 4 }
 0x47a   : > { %v2279_v30 = vpop.xlane.xlu0 %2278  ;;  %v2276_v1 = vpop.xlane.xlu1 %2275 }
 0x47b   : > { %v2264_v36 = vadd.f32 %v2263_v43, %v2262_v24  ;;  %v2280_v55 = vadd.f32 %v2279_v30, %v2276_v1  ;;  %v2382_v30 = vstv %s6976_s19  ;;  %s4684_s19 = sld [smem:[#allocation13 + $0x50]] }
 0x47d   : > { %v2281_v44 = vrot.slane %v2280_v55, 4  ;;  %v2265_v28 = vrot.slane %v2264_v36, 2 }
 0x47e   : > { %v2297_v37 = vpop.xlane.xlu0 %2296  ;;  %v2294_v52 = vpop.xlane.xlu1 %2293 }
 0x47f   : > { %v2282_v14 = vadd.f32 %v2281_v44, %v2280_v55  ;;  %v2298_v51 = vadd.f32 %v2297_v37, %v2294_v52  ;;  %v2266_v48 = vadd.f32 %v2265_v28, %v2264_v36 }
 0x481   : > { %v2283_v18 = vrot.slane %v2282_v14, 2  ;;  %v2299_v19 = vrot.slane %v2298_v51, 4  ;;  %v2267_v5 = vrot.slane %v2266_v48, 1 }
 0x482   : > { %v2315_v35 = vpop.xlane.xlu0 %2314  ;;  %v2312_v13 = vpop.xlane.xlu1 %2311 }
 0x483   : > { %v2284_v32 = vadd.f32 %v2283_v18, %v2282_v14  ;;  %v2300_v17 = vadd.f32 %v2299_v19, %v2298_v51  ;;  %v2316_v33 = vadd.f32 %v2315_v35, %v2312_v13  ;;  %v2268_v56 = vadd.f32 %v2267_v5, %v2266_v48 }
 0x485   : > { %v2285_v9 = vrot.slane %v2284_v32, 1  ;;  %v2301_v39 = vrot.slane %v2300_v17, 2  ;;  %v2317_v60 = vrot.slane %v2316_v33, 4 }
 0x487   : > { %v2302_v7 = vadd.f32 %v2301_v39, %v2300_v17  ;;  %v2318_v15 = vadd.f32 %v2317_v60, %v2316_v33  ;;  %v2286_v54 = vadd.f32 %v2285_v9, %v2284_v32 }
 0x489   : > { %v2303_v26 = vrot.slane %v2302_v7, 1  ;;  %v2319_v0 = vrot.slane %v2318_v15, 2  ;;  %v2287_v12 = vadd.f32 %v2286_v54, %v2268_v56 }
 0x48b   : > { %v2304_v61 = vadd.f32 %v2303_v26, %v2302_v7  ;;  %v2320_v42 = vadd.f32 %v2319_v0, %v2318_v15  ;;  %v2458_v0 = vstv %s4654_s21  ;;  %s4690_s21 = sld [smem:[#allocation13 + $0xa]] }
 0x48d   : > { %v2321_v22 = vrot.slane %v2320_v42, 1  ;;  %v2305_v16 = vadd.f32 %v2304_v61, %v2287_v12 }
 0x48f   : > { %v2322_v57 = vadd.f32 %v2321_v22, %v2320_v42 }
 0x491   : > { %v2323_v59 = vadd.f32 %v2322_v57, %v2305_v16  ;;  %v2472_v57 = vstv %s4655_s1  ;;  %s4691_s1 = sld [smem:[#allocation13 + $0x2e]] }
 0x493   : > { %v2324_v10 = vmul.f32 0.0009765625, %v2323_v59 }
 0x495   : > { %v2325_v6 = vadd.f32 1e-05, %v2324_v10 }
 0x497   : > { %4957 = vrsqrt.f32 %v2325_v6 }
 0x4a1   : > { %v4958_v34 = vpop.eup %4957 }
 0x4a2   : > { %v2328_v20 = vmul.f32 %v4958_v34, %v6923_v27  ;;  %v2327_v47 = vmul.f32 %v4958_v34, %v6926_v58  ;;  %v2359_v40 = vmul.f32 %v4958_v34, %v6941_v46  ;;  %v2343_v38 = vmul.f32 %v4958_v34, %v6932_v21 }
 0x4a3   : > { %v2375_v4 = vmul.f32 %v4958_v34, %v6952_v53  ;;  %v2344_v23 = vmul.f32 %v4958_v34, %v6929_v29  ;;  %v2360_v27 = vmul.f32 %v4958_v34, %v6938_v63  ;;  %v2376_v52 = vmul.f32 %v4958_v34, %v6949_v3 }
 0x4a4   : > { %v2332_v11 = vmul.f32 %v2330_v49, %v2328_v20  ;;  %v2331_v41 = vmul.f32 %v2330_v49, %v2327_v47  ;;  %v2363_v31 = vmul.f32 %v2362_v50, %v2359_v40  ;;  %v2347_v24 = vmul.f32 %v2346_v2, %v2343_v38 }
 0x4a5   : > { %v2379_v43 = vmul.f32 %v2378_v45, %v2375_v4  ;;  %v2348_v1 = vmul.f32 %v2346_v2, %v2344_v23  ;;  %v2364_v29 = vmul.f32 %v2362_v50, %v2360_v27  ;;  %v2380_v19 = vmul.f32 %v2378_v45, %v2376_v52 }
 0x4a6   : > { %v2336_v58 = vadd.f32 %v2334_v25, %v2332_v11  ;;  %v2335_v36 = vadd.f32 %v2334_v25, %v2331_v41  ;;  %v2367_v46 = vadd.f32 %v2366_v8, %v2363_v31  ;;  %v2351_v55 = vadd.f32 %v2350_v62, %v2347_v24 }
 0x4a7   : > { %v2383_v53 = vadd.f32 %v2382_v30, %v2379_v43  ;;  %v2352_v37 = vadd.f32 %v2350_v62, %v2348_v1  ;;  %v2368_v63 = vadd.f32 %v2366_v8, %v2364_v29  ;;  %v2384_v9 = vadd.f32 %v2382_v30, %v2380_v19 }
 0x4a8   : > { %vm2338_vm4 = vcmp.gt.f32.partialorder %v2336_v58, 0.0  ;;  %v2340_v21 = vmul.f32 0.2, %v2336_v58  ;;  %vm2337_vm5 = vcmp.gt.f32.partialorder %v2335_v36, 0.0  ;;  %v2339_v44 = vmul.f32 0.2, %v2335_v36 }
 0x4a9   : > { %v2371_v51 = vmul.f32 0.2, %v2367_v46  ;;  %v2355_v18 = vmul.f32 0.2, %v2351_v55  ;;  %vm2369_vm6 = vcmp.gt.f32.partialorder %v2367_v46, 0.0  ;;  %vm2353_vm7 = vcmp.gt.f32.partialorder %v2351_v55, 0.0 }
 0x4aa   : > { %v2342_v28 = vsel %vm2338_vm4, %v2336_v58, %v2340_v21  ;;  %v2341_v14 = vsel %vm2337_vm5, %v2335_v36, %v2339_v44  ;;  %v2387_v48 = vmul.f32 0.2, %v2383_v53  ;;  %v2356_v32 = vmul.f32 0.2, %v2352_v37 }
 0x4ab   : > { %2395 = vrot.lane.b32.xlu0 %v2342_v28, %s8448_s25  ;;  %2393 = vrot.lane.b32.xlu1 %v2341_v14, %s8448_s25  ;;  %v2373_v35 = vsel %vm2369_vm6, %v2367_v46, %v2371_v51  ;;  %v2357_v13 = vsel %vm2353_vm7, %v2351_v55, %v2355_v18  ;;  %vm2385_vm8 = vcmp.gt.f32.partialorder %v2383_v53, 0.0  ;;  %vm2354_vm9 = vcmp.gt.f32.partialorder %v2352_v37, 0.0 }
 0x4ac   : > { %v2389_v3 = vsel %vm2385_vm8, %v2383_v53, %v2387_v48  ;;  %v2358_v17 = vsel %vm2354_vm9, %v2352_v37, %v2356_v32  ;;  %v2372_v33 = vmul.f32 0.2, %v2368_v63  ;;  %vm2370_vm10 = vcmp.gt.f32.partialorder %v2368_v63, 0.0 }
 0x4ad   : > { %v2388_v60 = vmul.f32 0.2, %v2384_v9  ;;  %vm2386_vm11 = vcmp.gt.f32.partialorder %v2384_v9, 0.0  ;;  %v2486_v49 = vstv %s4656_s18  ;;  %v2500_v2 = vstv %s4657_s17  ;;  %s4692_s18 = sld [smem:[#allocation13 + $0x52]]  ;;  %s4694_s17 = sld [smem:[#allocation13 + $0xb]] }
 0x4ae   : > { %v2374_v39 = vsel %vm2370_vm10, %v2368_v63, %v2372_v33  ;;  %v2514_v47 = vstv %s4658_s28  ;;  %v2528_v8 = vstv %s4659_s15  ;;  %v2542_v23 = vstv %s4660_s23  ;;  %s4695_s28 = sld [smem:[#allocation13 + $0x2f]]  ;;  %s4693_s15 = sld [smem:[#allocation13 + $0x76]] }
 0x4af   : > { %2413 = vrot.lane.b32.xlu0 %v2373_v35, %s8448_s25  ;;  %2403 = vrot.lane.b32.xlu1 %v2357_v13, %s8448_s25  ;;  %v2390_v5 = vsel %vm2386_vm11, %v2384_v9, %v2388_v60  ;;  %v2556_v31 = vstv %s4661_s20  ;;  %v2596_v1 = vstv %s4666_s14  ;;  %s4696_s23 = sld [smem:[#allocation13 + $0x53]]  ;;  %s4697_s20 = sld [smem:[#allocation13 + $0x77]] }
 0x4b0   : > { %v2610_v46 = vstv %s4667_s24  ;;  %v2624_v44 = vstv %s4668_s13  ;;  %v2638_v29 = vstv %s4669_s0  ;;  %v2652_v14 = vstv %s4670_s2  ;;  %s7141_s14 = sld [smem:[#allocation13 + $0xd]]  ;;  %s7143_s24 = sld [smem:[#allocation13]] }
 0x4b1   : > { %v2666_v63 = vstv %s4671_s3  ;;  %v2680_v13 = vstv %s4672_s4  ;;  %s7149_s13 = sld [smem:[#allocation13 + $0x24]]  ;;  %s7151_s0 = sld [smem:[#allocation13 + $0x31]] }
 0x4b2   : > { %s7155_s2 = sld [smem:[#allocation13 + $0x48]]  ;;  %s7157_s3 = sld [smem:[#allocation13 + $0x3]] }
 0x4b3   : > { %2423 = vrot.lane.b32.xlu0 %v2389_v3, %s8448_s25  ;;  %2405 = vrot.lane.b32.xlu1 %v2358_v17, %s8448_s25  ;;  %v2694_v3 = vstv %s4673_s7  ;;  %s7159_s4 = sld [smem:[#allocation13 + $0x6c]]  ;;  %s7161_s7 = sld [smem:[#allocation13 + $0x55]] }
 0x4b7   : > { %2415 = vrot.lane.b32.xlu1 %v2374_v39, %s8448_s25  ;;  %v2734_v39 = vstv %s4678_s8  ;;  %s7177_s8 = sld [smem:[#allocation13 + $0xe]] }
 0x4bb   : > { %2425 = vrot.lane.b32.xlu1 %v2390_v5, %s8448_s25  ;;  %s4685_s25 = sld [smem:[#allocation13 + $0x74]] }
 0x51d   : > { %v2396_v7 = vpop.permute.xlu0 %2395  ;;  %v2394_v15 = vpop.permute.xlu1 %2393 }
 0x51e   : > { %2400 = vst.msk [vmem:[#allocation2 + $0x9] sm:$0xff] %vm477_vm2, %v2396_v7  ;;  %2399 = vst.msk [vmem:[#allocation2 + $0x1] sm:$0xff] %vm477_vm2, %v2394_v15  ;;  %v2748_v15 = vstv %s4679_s30  ;;  %s7179_s30 = sld [smem:[#allocation13 + $0x27]] }
 0x521   : > { %v2414_v54 = vpop.permute.xlu0 %2413  ;;  %v2404_v26 = vpop.permute.xlu1 %2403 }
 0x522   : > { %2419 = vst.msk [vmem:[#allocation2 + $0x31] sm:$0xff] %vm477_vm2, %v2414_v54  ;;  %2409 = vst.msk [vmem:[#allocation2 + $0x19] sm:$0xff] %vm477_vm2, %v2404_v26 }
 0x525   : > { %v2424_v56 = vpop.permute.xlu0 %2423  ;;  %v2406_v61 = vpop.permute.xlu1 %2405  ;;  %v7003_v42 = vld [vmem:[#allocation2 + $0x8] sm:$0xff]  ;;  %v7005_v12 = vld [vmem:[#allocation2] sm:$0xff] }
 0x526   : > { %2429 = vst.msk [vmem:[#allocation2 + $0x49] sm:$0xff] %vm477_vm2, %v2424_v56  ;;  %2410 = vst.msk [vmem:[#allocation2 + $0x21] sm:$0xff] %vm477_vm2, %v2406_v61  ;;  %v2460_v22 = vmul.f32 %v2458_v0, %v7003_v42  ;;  %v2459_v16 = vmul.f32 %v2458_v0, %v7005_v12  ;;  %v2474_v10 = vmul.f32 %v2472_v57, %v7003_v42  ;;  %v7041_v30 = vld [vmem:[#allocation2 + $0x9] sm:$0xff]  ;;  %v7043_v27 = vld [vmem:[#allocation2 + $0x1] sm:$0xff]  ;;  %v2762_v0 = vstv %s4680_s10  ;;  %s7194_s10 = sld [smem:[#allocation13 + $0x32]] }
 0x527   : > { %v2473_v6 = vmul.f32 %v2472_v57, %v7005_v12  ;;  %v2488_v25 = vmul.f32 %v2486_v49, %v7003_v42  ;;  %v2487_v50 = vmul.f32 %v2486_v49, %v7005_v12  ;;  %v2502_v45 = vmul.f32 %v2500_v2, %v7003_v42  ;;  %v7077_v9 = vld [vmem:[#allocation2 + $0xa] sm:$0xff]  ;;  %v7079_v60 = vld [vmem:[#allocation2 + $0x2] sm:$0xff] }
 0x528   : > { %2465 = vrot.lane.b32.xlu1 %v2460_v22, %s8287_s5  ;;  %2463 = vrot.lane.b32.xlu0 %v2459_v16, %s8287_s5  ;;  %v2501_v20 = vmul.f32 %v2500_v2, %v7005_v12  ;;  %v2516_v40 = vmul.f32 %v2514_v47, %v7003_v42  ;;  %v2515_v38 = vmul.f32 %v2514_v47, %v7005_v12  ;;  %v2776_v22 = vstv %s4681_s11  ;;  %s7197_s11 = sld [smem:[#allocation13 + $0x4b]] }
 0x529   : > { %v2416_v59 = vpop.permute.xlu1 %2415  ;;  %v2530_v62 = vmul.f32 %v2528_v8, %v7003_v42  ;;  %v2529_v4 = vmul.f32 %v2528_v8, %v7005_v12  ;;  %v2544_v11 = vmul.f32 %v2542_v23, %v7003_v42  ;;  %v2543_v41 = vmul.f32 %v2542_v23, %v7005_v12 }
 0x52a   : > { %2420 = vst.msk [vmem:[#allocation2 + $0x39] sm:$0xff] %vm477_vm2, %v2416_v59  ;;  %v2558_v24 = vmul.f32 %v2556_v31, %v7003_v42  ;;  %v2557_v43 = vmul.f32 %v2556_v31, %v7005_v12  ;;  %v2598_v58 = vmul.f32 %v2596_v1, %v7041_v30  ;;  %v2597_v36 = vmul.f32 %v2596_v1, %v7043_v27 }
 0x52b   : > { %v2612_v55 = vmul.f32 %v2610_v46, %v7041_v30  ;;  %v2611_v21 = vmul.f32 %v2610_v46, %v7043_v27  ;;  %v2626_v53 = vmul.f32 %v2624_v44, %v7041_v30  ;;  %v2625_v37 = vmul.f32 %v2624_v44, %v7043_v27 }
 0x52c   : > { %2479 = vrot.lane.b32.xlu1 %v2474_v10, %s8287_s5  ;;  %2477 = vrot.lane.b32.xlu0 %v2473_v6, %s8287_s5  ;;  %v2640_v52 = vmul.f32 %v2638_v29, %v7041_v30  ;;  %v2639_v28 = vmul.f32 %v2638_v29, %v7043_v27  ;;  %v2654_v51 = vmul.f32 %v2652_v14, %v7041_v30  ;;  %v2790_v59 = vstv %s4682_s12  ;;  %s7211_s12 = sld [smem:[#allocation13 + $0x6f]] }
 0x52d   : > { %v2426_v34 = vpop.permute.xlu1 %2425  ;;  %v2653_v18 = vmul.f32 %v2652_v14, %v7043_v27  ;;  %v2668_v19 = vmul.f32 %v2666_v63, %v7041_v30  ;;  %v2667_v35 = vmul.f32 %v2666_v63, %v7043_v27  ;;  %v2682_v48 = vmul.f32 %v2680_v13, %v7041_v30 }
 0x52e   : > { %2430 = vst.msk [vmem:[#allocation2 + $0x51] sm:$0xff] %vm477_vm2, %v2426_v34  ;;  %v2681_v32 = vmul.f32 %v2680_v13, %v7043_v27  ;;  %v2696_v17 = vmul.f32 %v2694_v3, %v7041_v30  ;;  %v2695_v33 = vmul.f32 %v2694_v3, %v7043_v27  ;;  %v2736_v5 = vmul.f32 %v2734_v39, %v7077_v9 }
 0x52f   : > { %v2735_v7 = vmul.f32 %v2734_v39, %v7079_v60  ;;  %v2750_v54 = vmul.f32 %v2748_v15, %v7077_v9  ;;  %v2749_v26 = vmul.f32 %v2748_v15, %v7079_v60  ;;  %v2764_v56 = vmul.f32 %v2762_v0, %v7077_v9  ;;  %v7172_v39 = vld [vmem:[#allocation2 + $0x21] sm:$0xff] }
 0x530   : > { %2493 = vrot.lane.b32.xlu1 %v2488_v25, %s8287_s5  ;;  %2491 = vrot.lane.b32.xlu0 %v2487_v50, %s8287_s5  ;;  %v2763_v61 = vmul.f32 %v2762_v0, %v7079_v60  ;;  %v2778_v16 = vmul.f32 %v2776_v22, %v7077_v9  ;;  %v2777_v57 = vmul.f32 %v2776_v22, %v7079_v60  ;;  %v2804_v49 = vstv %s4683_s27  ;;  %s7221_s27 = sld [smem:[#allocation13 + $0x79]] }
 0x531   : > { %v2792_v10 = vmul.f32 %v2790_v59, %v7077_v9  ;;  %v2791_v6 = vmul.f32 %v2790_v59, %v7079_v60  ;;  %v2806_v34 = vmul.f32 %v2804_v49, %v7077_v9  ;;  %v2805_v25 = vmul.f32 %v2804_v49, %v7079_v60 }
 0x532   : > { %v2818_v50 = vstv %s4684_s19  ;;  %v2872_v8 = vstv %s4690_s21  ;;  %v2956_v14 = vstv %s4696_s23  ;;  %v3024_v22 = vstv %s7151_s0  ;;  %s7239_s19 = sld [smem:[#allocation13 + $0x56]]  ;;  %s4714_s21 = sld [smem:[#allocation13 + $0x10]] }
 0x533   : > { %v2820_v2 = vmul.f32 %v2818_v50, %v7077_v9  ;;  %v3038_v49 = vstv %s7161_s7  ;;  %s7293_s23 = sld [smem:[#allocation13 + $0x4e]]  ;;  %s4721_s0 = sld [smem:[#allocation13 + $0x7d]] }
 0x534   : > { %2507 = vrot.lane.b32.xlu1 %v2502_v45, %s8287_s5  ;;  %2505 = vrot.lane.b32.xlu0 %v2501_v20, %s8287_s5  ;;  %v2819_v45 = vmul.f32 %v2818_v50, %v7079_v60  ;;  %v2832_v20 = vstv %s4685_s25  ;;  %s4709_s25 = sld [smem:[#allocation13 + $0x7a]]  ;;  %s7371_s7 = sld [smem:[#allocation13 + $0x5b]] }
 0x535   : > { %v2834_v47 = vmul.f32 %v2832_v20, %v7077_v9 }
 0x538   : > { %2521 = vrot.lane.b32.xlu1 %v2516_v40, %s8288_s6  ;;  %2519 = vrot.lane.b32.xlu0 %v2515_v38, %s8288_s6  ;;  %v2833_v40 = vmul.f32 %v2832_v20, %v7079_v60  ;;  %v7113_v38 = vld [vmem:[#allocation2 + $0x18] sm:$0xff]  ;;  %v3026_v20 = vmul.f32 %v3024_v22, %v7172_v39 }
 0x539   : > { %v2957_v63 = vmul.f32 %v2956_v14, %v7113_v38 }
 0x53c   : > { %2535 = vrot.lane.b32.xlu1 %v2530_v62, %s8288_s6  ;;  %2533 = vrot.lane.b32.xlu0 %v2529_v4, %s8288_s6  ;;  %v7115_v62 = vld [vmem:[#allocation2 + $0x20] sm:$0xff]  ;;  %v2873_v4 = vmul.f32 %v2872_v8, %v7113_v38 }
 0x53d   : > { %v2874_v23 = vmul.f32 %v2872_v8, %v7115_v62 }
 0x540   : > { %2549 = vrot.lane.b32.xlu1 %v2544_v11, %s8288_s6  ;;  %2547 = vrot.lane.b32.xlu0 %v2543_v41, %s8288_s6  ;;  %v2886_v11 = vstv %s4691_s1  ;;  %s4715_s1 = sld [smem:[#allocation13 + $0x34]] }
 0x541   : > { %v2887_v41 = vmul.f32 %v2886_v11, %v7113_v38  ;;  %v2888_v31 = vmul.f32 %v2886_v11, %v7115_v62  ;;  %v2578_v11 = vstv %s7179_s30  ;;  %s7383_s30 = sld [smem:[#allocation13 + $0x14]] }
 0x544   : > { %2563 = vrot.lane.b32.xlu1 %v2558_v24, %s8288_s6  ;;  %2561 = vrot.lane.b32.xlu0 %v2557_v43, %s8288_s6  ;;  %v2900_v24 = vstv %s4692_s18  ;;  %s7272_s18 = sld [smem:[#allocation13 + $0x6]] }
 0x545   : > { %v2901_v43 = vmul.f32 %v2900_v24, %v7113_v38  ;;  %v2902_v1 = vmul.f32 %v2900_v24, %v7115_v62 }
 0x548   : > { %2603 = vrot.lane.b32.xlu1 %v2598_v58, %s8287_s5  ;;  %2601 = vrot.lane.b32.xlu0 %v2597_v36, %s8287_s5  ;;  %v2928_v58 = vstv %s4694_s17  ;;  %s7276_s17 = sld [smem:[#allocation13 + $0x58]] }
 0x549   : > { %v2929_v36 = vmul.f32 %v2928_v58, %v7113_v38  ;;  %v2930_v46 = vmul.f32 %v2928_v58, %v7115_v62 }
 0x54c   : > { %2617 = vrot.lane.b32.xlu1 %v2612_v55, %s8287_s5  ;;  %2615 = vrot.lane.b32.xlu0 %v2611_v21, %s8287_s5  ;;  %v2942_v55 = vstv %s4695_s28  ;;  %s7284_s28 = sld [smem:[#allocation13 + $0x2a]] }
 0x54d   : > { %v2943_v21 = vmul.f32 %v2942_v55, %v7113_v38  ;;  %v2944_v44 = vmul.f32 %v2942_v55, %v7115_v62 }
 0x550   : > { %2631 = vrot.lane.b32.xlu1 %v2626_v53, %s8287_s5  ;;  %2629 = vrot.lane.b32.xlu0 %v2625_v37, %s8287_s5  ;;  %v2914_v53 = vstv %s4693_s15  ;;  %s7288_s15 = sld [smem:[#allocation13 + $0x11]] }
 0x554   : > { %2645 = vrot.lane.b32.xlu1 %v2640_v52, %s8287_s5  ;;  %2643 = vrot.lane.b32.xlu0 %v2639_v28, %s8287_s5  ;;  %v2915_v52 = vmul.f32 %v2914_v53, %v7113_v38  ;;  %v2916_v28 = vmul.f32 %v2914_v53, %v7115_v62 }
 0x558   : > { %2659 = vrot.lane.b32.xlu1 %v2654_v51, %s8288_s6  ;;  %2657 = vrot.lane.b32.xlu0 %v2653_v18, %s8288_s6 }
 0x55c   : > { %2673 = vrot.lane.b32.xlu1 %v2668_v19, %s8288_s6  ;;  %2671 = vrot.lane.b32.xlu0 %v2667_v35, %s8288_s6  ;;  %v2958_v19 = vmul.f32 %v2956_v14, %v7115_v62  ;;  %v2970_v35 = vstv %s4697_s20  ;;  %s7300_s20 = sld [smem:[#allocation13 + $0x35]] }
 0x55d   : > { %v2972_v3 = vmul.f32 %v2970_v35, %v7115_v62 }
 0x560   : > { %2687 = vrot.lane.b32.xlu1 %v2682_v48, %s8288_s6  ;;  %2685 = vrot.lane.b32.xlu0 %v2681_v32, %s8288_s6  ;;  %v2971_v32 = vmul.f32 %v2970_v35, %v7113_v38 }
 0x564   : > { %2701 = vrot.lane.b32.xlu1 %v2696_v17, %s8288_s6  ;;  %2699 = vrot.lane.b32.xlu0 %v2695_v33, %s8288_s6  ;;  %v7169_v17 = vld [vmem:[#allocation2 + $0x19] sm:$0xff]  ;;  %v3010_v33 = vstv %s7141_s14  ;;  %s7307_s14 = sld [smem:[#allocation13 + $0x72]] }
 0x565   : > { %v3039_v55 = vmul.f32 %v3038_v49, %v7169_v17 }
 0x568   : > { %2741 = vrot.lane.b32.xlu1 %v2736_v5, %s8287_s5  ;;  %2739 = vrot.lane.b32.xlu0 %v2735_v7, %s8287_s5  ;;  %v2434_v5 = vstv %s7143_s24  ;;  %s7318_s24 = sld [smem:[#allocation13 + $0x7c]] }
 0x569   : > { %v2435_v0 = vmul.f32 %v2434_v5, %v7005_v12 }
 0x56c   : > { %2755 = vrot.lane.b32.xlu1 %v2750_v54, %s8287_s5  ;;  %2753 = vrot.lane.b32.xlu0 %v2749_v26, %s8287_s5  ;;  %v3011_v54 = vmul.f32 %v3010_v33, %v7169_v17  ;;  %v3012_v26 = vmul.f32 %v3010_v33, %v7172_v39 }
 0x570   : > { %2769 = vrot.lane.b32.xlu1 %v2764_v56, %s8287_s5  ;;  %2767 = vrot.lane.b32.xlu0 %v2763_v61, %s8287_s5  ;;  %v2436_v56 = vmul.f32 %v2434_v5, %v7003_v42  ;;  %v2440_v61 = vstv %s7149_s13  ;;  %s7334_s13 = sld [smem:[#allocation13 + $0x59]] }
 0x574   : > { %2783 = vrot.lane.b32.xlu1 %v2778_v16, %s8287_s5  ;;  %2781 = vrot.lane.b32.xlu0 %v2777_v57, %s8287_s5  ;;  %v2446_v16 = vstv %s7155_s2  ;;  %v2572_v57 = vstv %s7157_s3  ;;  %s4726_s2 = sld [smem:[#allocation13 + $0x13]]  ;;  %s4727_s3 = sld [smem:[#allocation13 + $0x37]] }
 0x575   : > { %v2573_v8 = vmul.f32 %v2572_v57, %v7043_v27  ;;  %v2448_v58 = vmul.f32 %v2446_v16, %v7003_v42 }
 0x578   : > { %2797 = vrot.lane.b32.xlu1 %v2792_v10, %s8288_s6  ;;  %2795 = vrot.lane.b32.xlu0 %v2791_v6, %s8288_s6  ;;  %v2452_v6 = vstv %s7159_s4  ;;  %s7367_s4 = sld [smem:[#allocation13 + $0x9]] }
 0x579   : > { %v2454_v35 = vmul.f32 %v2452_v6, %v7003_v42 }
 0x57c   : > { %2811 = vrot.lane.b32.xlu1 %v2806_v34, %s8288_s6  ;;  %2809 = vrot.lane.b32.xlu0 %v2805_v25, %s8288_s6  ;;  %v2441_v34 = vmul.f32 %v2440_v61, %v7005_v12  ;;  %v2442_v25 = vmul.f32 %v2440_v61, %v7003_v42  ;;  %v2590_v42 = vstv %s7211_s12  ;;  %s7402_s12 = sld [smem:[#allocation13 + $0x75]] }
 0x580   : > { %2825 = vrot.lane.b32.xlu1 %v2820_v2, %s8288_s6  ;;  %2823 = vrot.lane.b32.xlu0 %v2819_v45, %s8288_s6  ;;  %v3025_v45 = vmul.f32 %v3024_v22, %v7169_v17 }
 0x584   : > { %2839 = vrot.lane.b32.xlu1 %v2834_v47, %s8288_s6  ;;  %2837 = vrot.lane.b32.xlu0 %v2833_v40, %s8288_s6 }
 0x588   : > { %2877 = vrot.lane.b32.xlu0 %v2873_v4, %s8287_s5  ;;  %2879 = vrot.lane.b32.xlu1 %v2874_v23, %s8287_s5  ;;  %v2574_v4 = vmul.f32 %v2572_v57, %v7041_v30  ;;  %v3066_v23 = vstv %s7177_s8  ;;  %s7379_s8 = sld [smem:[#allocation13 + $0x2d]] }
 0x589   : > { %v3067_v33 = vmul.f32 %v3066_v23, %v7169_v17  ;;  %v3068_v5 = vmul.f32 %v3066_v23, %v7172_v39 }
 0x58c   : > { %2891 = vrot.lane.b32.xlu0 %v2887_v41, %s8287_s5  ;;  %2893 = vrot.lane.b32.xlu1 %v2888_v31, %s8287_s5 }
 0x590   : > { %2905 = vrot.lane.b32.xlu0 %v2901_v43, %s8287_s5  ;;  %2907 = vrot.lane.b32.xlu1 %v2902_v1, %s8287_s5  ;;  %v2447_v1 = vmul.f32 %v2446_v16, %v7005_v12 }
 0x594   : > { %2933 = vrot.lane.b32.xlu0 %v2929_v36, %s8288_s6  ;;  %2935 = vrot.lane.b32.xlu1 %v2930_v46, %s8288_s6 }
 0x598   : > { %2947 = vrot.lane.b32.xlu0 %v2943_v21, %s8288_s6  ;;  %2949 = vrot.lane.b32.xlu1 %v2944_v44, %s8288_s6  ;;  %v3040_v21 = vmul.f32 %v3038_v49, %v7172_v39 }
 0x59a   : > { %v2464_v37 = vpop.permute.xlu0 %2463  ;;  %v2466_v29 = vpop.permute.xlu1 %2465 }
 0x59b   : > { %v2469_v59 = vadd.f32 %v2464_v37, %v2435_v0  ;;  %v2470_v10 = vadd.f32 %v2466_v29, %v2436_v56  ;;  %v2579_v37 = vmul.f32 %v2578_v11, %v7043_v27  ;;  %v2580_v29 = vmul.f32 %v2578_v11, %v7041_v30 }
 0x59c   : > { %2919 = vrot.lane.b32.xlu0 %v2915_v52, %s8287_s5  ;;  %2921 = vrot.lane.b32.xlu1 %v2916_v28, %s8287_s5  ;;  %v3080_v52 = vstv %s7194_s10  ;;  %v2584_v28 = vstv %s7197_s11  ;;  %s7388_s10 = sld [smem:[#allocation13 + $0x51]]  ;;  %s7395_s11 = sld [smem:[#allocation13 + $0x38]] }
 0x59d   : > { %v3081_v57 = vmul.f32 %v3080_v52, %v7169_v17 }
 0x59e   : > { %v2478_v51 = vpop.permute.xlu0 %2477  ;;  %v2480_v18 = vpop.permute.xlu1 %2479 }
 0x59f   : > { %v2483_v41 = vadd.f32 %v2478_v51, %v2441_v34  ;;  %v2484_v31 = vadd.f32 %v2480_v18, %v2442_v25  ;;  %v2591_v34 = vmul.f32 %v2590_v42, %v7043_v27 }
 0x5a0   : > { %2961 = vrot.lane.b32.xlu0 %v2957_v63, %s8288_s6  ;;  %2963 = vrot.lane.b32.xlu1 %v2958_v19, %s8288_s6  ;;  %v2453_v19 = vmul.f32 %v2452_v6, %v7005_v12 }
 0x5a2   : > { %v7163_v13 = vpop.permute.xlu0 %2491  ;;  %v7165_v48 = vpop.permute.xlu1 %2493 }
 0x5a3   : > { %v2497_v14 = vadd.f32 %v7163_v13, %v2447_v1  ;;  %v2498_v51 = vadd.f32 %v7165_v48, %v2448_v58  ;;  %v2585_v48 = vmul.f32 %v2584_v28, %v7043_v27  ;;  %v7278_v1 = vld [vmem:[#allocation2 + $0x1a] sm:$0xff]  ;;  %v3148_v58 = vstv %s4714_s21  ;;  %s4738_s21 = sld [smem:[#allocation13 + $0x16]] }
 0x5a4   : > { %2975 = vrot.lane.b32.xlu0 %v2971_v32, %s8288_s6  ;;  %2977 = vrot.lane.b32.xlu1 %v2972_v3, %s8288_s6 }
 0x5a6   : > { %v7181_v7 = vpop.permute.xlu0 %2505  ;;  %v7183_v15 = vpop.permute.xlu1 %2507 }
 0x5a7   : > { %v2511_v12 = vadd.f32 %v7181_v7, %v2453_v19  ;;  %v2512_v0 = vadd.f32 %v7183_v15, %v2454_v35  ;;  %v2592_v7 = vmul.f32 %v2590_v42, %v7041_v30  ;;  %v3176_v35 = vstv %s7276_s17  ;;  %s7466_s17 = sld [smem:[#allocation13 + $0x30]] }
 0x5a8   : > { %3015 = vrot.lane.b32.xlu0 %v3011_v54, %s8287_s5  ;;  %3017 = vrot.lane.b32.xlu1 %v3012_v26, %s8287_s5  ;;  %v2586_v26 = vmul.f32 %v2584_v28, %v7041_v30 }
 0x5aa   : > { %v2520_v50 = vpop.permute.xlu0 %2519  ;;  %v2522_v2 = vpop.permute.xlu1 %2521 }
 0x5ab   : > { %v2525_v47 = vadd.f32 %v2520_v50, %v2469_v59  ;;  %v2526_v40 = vadd.f32 %v2522_v2, %v2470_v10  ;;  %v3082_v59 = vmul.f32 %v3080_v52, %v7172_v39  ;;  %v3052_v10 = vstv %s7221_s27  ;;  %s7413_s27 = sld [smem:[#allocation13 + $0x7f]] }
 0x5ac   : > { %3029 = vrot.lane.b32.xlu0 %v3025_v45, %s8287_s5  ;;  %3031 = vrot.lane.b32.xlu1 %v3026_v20, %s8287_s5  ;;  %v3053_v45 = vmul.f32 %v3052_v10, %v7169_v17  ;;  %v3054_v20 = vmul.f32 %v3052_v10, %v7172_v39 }
 0x5ad   : > { %v7213_v24 = vadd.f32 %v2573_v8, %v2525_v47  ;;  %v7215_v43 = vadd.f32 %v2574_v4, %v2526_v40  ;;  %v3094_v47 = vstv %s7239_s19  ;;  %v3108_v4 = vstv %s4709_s25  ;;  %s7429_s19 = sld [smem:[#allocation13 + $0x5c]]  ;;  %s4733_s25 = sld [smem:[#allocation13 + $0x80]] }
 0x5ae   : > { %v2534_v36 = vpop.permute.xlu0 %2533  ;;  %v2536_v46 = vpop.permute.xlu1 %2535  ;;  %v3095_v40 = vmul.f32 %v3094_v47, %v7169_v17  ;;  %v3096_v8 = vmul.f32 %v3094_v47, %v7172_v39 }
 0x5af   : > { %v2539_v44 = vadd.f32 %v2534_v36, %v2483_v41  ;;  %v2540_v53 = vadd.f32 %v2536_v46, %v2484_v31  ;;  %v3109_v41 = vmul.f32 %v3108_v4, %v7169_v17  ;;  %v3110_v31 = vmul.f32 %v3108_v4, %v7172_v39  ;;  %v7280_v36 = vld [vmem:[#allocation2 + $0x22] sm:$0xff] }
 0x5b0   : > { %3043 = vrot.lane.b32.xlu0 %v3039_v55, %s8287_s5  ;;  %3045 = vrot.lane.b32.xlu1 %v3040_v21, %s8287_s5  ;;  %v3149_v21 = vmul.f32 %v3148_v58, %v7278_v1 }
 0x5b1   : > { %v7231_v18 = vadd.f32 %v2579_v37, %v2539_v44  ;;  %v7233_v63 = vadd.f32 %v2580_v29, %v2540_v53  ;;  %v3150_v44 = vmul.f32 %v3148_v58, %v7280_v36  ;;  %v3162_v53 = vstv %s4715_s1  ;;  %s7458_s1 = sld [smem:[#allocation13 + $0xc]] }
 0x5b2   : > { %v2548_v32 = vpop.permute.xlu0 %2547  ;;  %v2550_v3 = vpop.permute.xlu1 %2549  ;;  %v2710_v37 = vstv %s7272_s18  ;;  %v3164_v19 = vmul.f32 %v3162_v53, %v7280_v36  ;;  %s7462_s18 = sld [smem:[#allocation13 + $0x3a]] }
 0x5b3   : > { %v2553_v54 = vadd.f32 %v2548_v32, %v2497_v14  ;;  %v2554_v13 = vadd.f32 %v2550_v3, %v2498_v51  ;;  %v3163_v51 = vmul.f32 %v3162_v53, %v7278_v1 }
 0x5b4   : > { %3071 = vrot.lane.b32.xlu0 %v3067_v33, %s8288_s6  ;;  %3073 = vrot.lane.b32.xlu1 %v3068_v5, %s8288_s6  ;;  %v2711_v33 = vmul.f32 %v2710_v37, %v7079_v60  ;;  %v2712_v5 = vmul.f32 %v2710_v37, %v7077_v9 }
 0x5b5   : > { %v7248_v56 = vadd.f32 %v2585_v48, %v2553_v54  ;;  %v7250_v61 = vadd.f32 %v2586_v26, %v2554_v13 }
 0x5b6   : > { %v2562_v22 = vpop.permute.xlu0 %2561  ;;  %v2564_v16 = vpop.permute.xlu1 %2563 }
 0x5b7   : > { %v2567_v6 = vadd.f32 %v2562_v22, %v2511_v12  ;;  %v2568_v49 = vadd.f32 %v2564_v16, %v2512_v0  ;;  %v3177_v12 = vmul.f32 %v3176_v35, %v7278_v1  ;;  %v3178_v0 = vmul.f32 %v3176_v35, %v7280_v36 }
 0x5b8   : > { %3085 = vrot.lane.b32.xlu0 %v3081_v57, %s8288_s6  ;;  %3087 = vrot.lane.b32.xlu1 %v3082_v59, %s8288_s6  ;;  %v3204_v22 = vstv %s7288_s15  ;;  %v2722_v59 = vstv %s7293_s23  ;;  %s7484_s15 = sld [smem:[#allocation13 + $0x17]]  ;;  %s7491_s23 = sld [smem:[#allocation13 + $0x54]] }
 0x5b9   : > { %v7259_v15 = vadd.f32 %v2591_v34, %v2567_v6  ;;  %v7261_v25 = vadd.f32 %v2592_v7, %v2568_v49  ;;  %v3246_v35 = vstv %s4721_s0  ;;  %s4745_s0 = sld [smem:[#allocation13 + $0x83]] }
 0x5ba   : > { %v2602_v50 = vpop.permute.xlu0 %2601  ;;  %v2604_v2 = vpop.permute.xlu1 %2603 }
 0x5bb   : > { %v2607_v29 = vadd.f32 %v2602_v50, %v7213_v24  ;;  %v2608_v52 = vadd.f32 %v2604_v2, %v7215_v43  ;;  %v2716_v24 = vstv %s7284_s28  ;;  %v3205_v2 = vmul.f32 %v3204_v22, %v7278_v1  ;;  %s7470_s28 = sld [smem:[#allocation13 + $0x5e]] }
 0x5bc   : > { %3057 = vrot.lane.b32.xlu0 %v3053_v45, %s8287_s5  ;;  %3059 = vrot.lane.b32.xlu1 %v3054_v20, %s8287_s5  ;;  %v3206_v45 = vmul.f32 %v3204_v22, %v7280_v36  ;;  %v3218_v20 = vstv %s7300_s20  ;;  %v3300_v22 = vstv %s4727_s3  ;;  %s7502_s20 = sld [smem:[#allocation13 + $0x3b]]  ;;  %s7556_s3 = sld [smem:[#allocation13 + $0xf]] }
 0x5bd   : > { %v3220_v58 = vmul.f32 %v3218_v20, %v7280_v36 }
 0x5be   : > { %v2616_v30 = vpop.permute.xlu0 %2615  ;;  %v2618_v27 = vpop.permute.xlu1 %2617 }
 0x5bf   : > { %v2621_v43 = vadd.f32 %v2616_v30, %v7231_v18  ;;  %v2622_v54 = vadd.f32 %v2618_v27, %v7233_v63  ;;  %v2717_v18 = vmul.f32 %v2716_v24, %v7079_v60  ;;  %v2718_v63 = vmul.f32 %v2716_v24, %v7077_v9  ;;  %v7373_v24 = vld [vmem:[#allocation2 + $0x30] sm:$0xff] }
 0x5c0   : > { %3099 = vrot.lane.b32.xlu0 %v3095_v40, %s8288_s6  ;;  %3101 = vrot.lane.b32.xlu1 %v3096_v8, %s8288_s6  ;;  %v2728_v27 = vstv %s7307_s14  ;;  %s7508_s14 = sld [smem:[#allocation13 + $0x78]] }
 0x5c1   : > { %v2729_v37 = vmul.f32 %v2728_v27, %v7079_v60 }
 0x5c2   : > { %v2630_v23 = vpop.permute.xlu0 %2629  ;;  %v2632_v11 = vpop.permute.xlu1 %2631 }
 0x5c3   : > { %v2635_v10 = vadd.f32 %v2630_v23, %v7248_v56  ;;  %v2636_v6 = vadd.f32 %v2632_v11, %v7250_v61  ;;  %v2723_v56 = vmul.f32 %v2722_v59, %v7079_v60  ;;  %v2724_v61 = vmul.f32 %v2722_v59, %v7077_v9 }
 0x5c4   : > { %3113 = vrot.lane.b32.xlu0 %v3109_v41, %s8288_s6  ;;  %3115 = vrot.lane.b32.xlu1 %v3110_v31, %s8288_s6  ;;  %v3219_v31 = vmul.f32 %v3218_v20, %v7278_v1 }
 0x5c6   : > { %v2644_v46 = vpop.permute.xlu0 %2643  ;;  %v2646_v55 = vpop.permute.xlu1 %2645 }
 0x5c7   : > { %v2649_v40 = vadd.f32 %v2644_v46, %v7259_v15  ;;  %v2650_v8 = vadd.f32 %v2646_v55, %v7261_v25  ;;  %v2730_v15 = vmul.f32 %v2728_v27, %v7077_v9 }
 0x5c8   : > { %3153 = vrot.lane.b32.xlu0 %v3149_v21, %s8287_s5  ;;  %3155 = vrot.lane.b32.xlu1 %v3150_v44, %s8287_s5  ;;  %v3190_v21 = vstv %s7318_s24  ;;  %s7516_s24 = sld [smem:[#allocation13 + $0x82]] }
 0x5ca   : > { %v2658_v28 = vpop.permute.xlu0 %2657  ;;  %v2660_v14 = vpop.permute.xlu1 %2659 }
 0x5cb   : > { %v2663_v32 = vadd.f32 %v2658_v28, %v2607_v29  ;;  %v2664_v3 = vadd.f32 %v2660_v14, %v2608_v52  ;;  %v3191_v52 = vmul.f32 %v3190_v21, %v7278_v1  ;;  %v3192_v28 = vmul.f32 %v3190_v21, %v7280_v36 }
 0x5cc   : > { %3167 = vrot.lane.b32.xlu0 %v3163_v51, %s8287_s5  ;;  %3169 = vrot.lane.b32.xlu1 %v3164_v19, %s8287_s5  ;;  %v3232_v14 = vstv %s7334_s13  ;;  %s7527_s13 = sld [smem:[#allocation13 + $0x5f]] }
 0x5cd   : > { %v7311_v13 = vadd.f32 %v2711_v33, %v2663_v32  ;;  %v7313_v48 = vadd.f32 %v2712_v5, %v2664_v3  ;;  %v3233_v51 = vmul.f32 %v3232_v14, %v7278_v1  ;;  %v3234_v19 = vmul.f32 %v3232_v14, %v7280_v36 }
 0x5ce   : > { %v2672_v26 = vpop.permute.xlu0 %2671  ;;  %v2674_v42 = vpop.permute.xlu1 %2673  ;;  %v3247_v33 = vmul.f32 %v3246_v35, %v7278_v1  ;;  %v3248_v5 = vmul.f32 %v3246_v35, %v7280_v36 }
 0x5cf   : > { %v2677_v16 = vadd.f32 %v2672_v26, %v2621_v43  ;;  %v2678_v57 = vadd.f32 %v2674_v42, %v2622_v54  ;;  %v3286_v43 = vstv %s4726_s2  ;;  %v7375_v54 = vld [vmem:[#allocation2 + $0x38] sm:$0xff]  ;;  %s4750_s2 = sld [smem:[#allocation13 + $0x19]] }
 0x5d0   : > { %3181 = vrot.lane.b32.xlu0 %v3177_v12, %s8287_s5  ;;  %3183 = vrot.lane.b32.xlu1 %v3178_v0, %s8287_s5  ;;  %v3287_v12 = vmul.f32 %v3286_v43, %v7373_v24  ;;  %v3288_v0 = vmul.f32 %v3286_v43, %v7375_v54 }
 0x5d1   : > { %v7327_v49 = vadd.f32 %v2717_v18, %v2677_v16  ;;  %v7329_v34 = vadd.f32 %v2718_v63, %v2678_v57  ;;  %v2848_v16 = vstv %s7367_s4  ;;  %s7560_s4 = sld [smem:[#allocation13 + $0x3d]] }
 0x5d2   : > { %v2686_v7 = vpop.permute.xlu0 %2685  ;;  %v2688_v50 = vpop.permute.xlu1 %2687  ;;  %v2850_v20 = vmul.f32 %v2848_v16, %v7115_v62 }
 0x5d3   : > { %v2691_v47 = vadd.f32 %v2686_v7, %v2635_v10  ;;  %v2692_v30 = vadd.f32 %v2688_v50, %v2636_v6  ;;  %v3301_v10 = vmul.f32 %v3300_v22, %v7373_v24  ;;  %v3302_v6 = vmul.f32 %v3300_v22, %v7375_v54 }
 0x5d4   : > { %3209 = vrot.lane.b32.xlu0 %v3205_v2, %s8288_s6  ;;  %3211 = vrot.lane.b32.xlu1 %v3206_v45, %s8288_s6  ;;  %v3314_v7 = vstv %s7371_s7  ;;  %v2849_v45 = vmul.f32 %v2848_v16, %v7113_v38  ;;  %s7564_s7 = sld [smem:[#allocation13 + $0x33]] }
 0x5d5   : > { %v7343_v4 = vadd.f32 %v2723_v56, %v2691_v47  ;;  %v7345_v23 = vadd.f32 %v2724_v61, %v2692_v30 }
 0x5d6   : > { %v2700_v11 = vpop.permute.xlu0 %2699  ;;  %v2702_v41 = vpop.permute.xlu1 %2701 }
 0x5d7   : > { %v2705_v44 = vadd.f32 %v2700_v11, %v2649_v40  ;;  %v2706_v53 = vadd.f32 %v2702_v41, %v2650_v8  ;;  %v3315_v40 = vmul.f32 %v3314_v7, %v7373_v24  ;;  %v3316_v8 = vmul.f32 %v3314_v7, %v7375_v54 }
 0x5d8   : > { %3223 = vrot.lane.b32.xlu0 %v3219_v31, %s8288_s6  ;;  %3225 = vrot.lane.b32.xlu1 %v3220_v58, %s8288_s6  ;;  %v3342_v11 = vstv %s7383_s30  ;;  %v2860_v58 = vstv %s7388_s10  ;;  %s7582_s30 = sld [smem:[#allocation13 + $0x1a]]  ;;  %s7589_s10 = sld [smem:[#allocation13 + $0x57]] }
 0x5d9   : > { %v7354_v25 = vadd.f32 %v2729_v37, %v2705_v44  ;;  %v7356_v46 = vadd.f32 %v2730_v15, %v2706_v53  ;;  %v3384_v7 = vstv %s4733_s25  ;;  %s4757_s25 = sld [smem:[#allocation13 + $0x86]] }
 0x5da   : > { %v2740_v55 = vpop.permute.xlu0 %2739  ;;  %v2742_v29 = vpop.permute.xlu1 %2741 }
 0x5db   : > { %v2745_v57 = vadd.f32 %v2740_v55, %v7311_v13  ;;  %v2746_v18 = vadd.f32 %v2742_v29, %v7313_v48  ;;  %v2854_v13 = vstv %s7379_s8  ;;  %v3343_v29 = vmul.f32 %v3342_v11, %v7373_v24  ;;  %s7568_s8 = sld [smem:[#allocation13 + $0x61]] }
 0x5dc   : > { %3195 = vrot.lane.b32.xlu0 %v3191_v52, %s8287_s5  ;;  %3197 = vrot.lane.b32.xlu1 %v3192_v28, %s8287_s5  ;;  %v3344_v52 = vmul.f32 %v3342_v11, %v7375_v54  ;;  %v3356_v28 = vstv %s7395_s11  ;;  %s7600_s11 = sld [smem:[#allocation13 + $0x3e]] }
 0x5dd   : > { %v3358_v43 = vmul.f32 %v3356_v28, %v7375_v54 }
 0x5de   : > { %v2754_v9 = vpop.permute.xlu0 %2753  ;;  %v2756_v60 = vpop.permute.xlu1 %2755 }
 0x5df   : > { %v2759_v48 = vadd.f32 %v2754_v9, %v7327_v49  ;;  %v2760_v47 = vadd.f32 %v2756_v60, %v7329_v34  ;;  %v2855_v49 = vmul.f32 %v2854_v13, %v7113_v38  ;;  %v2856_v34 = vmul.f32 %v2854_v13, %v7115_v62  ;;  %v7472_v13 = vld [vmem:[#allocation2 + $0x31] sm:$0xff] }
 0x5e0   : > { %3237 = vrot.lane.b32.xlu0 %v3233_v51, %s8288_s6  ;;  %3239 = vrot.lane.b32.xlu1 %v3234_v19, %s8288_s6  ;;  %v2866_v60 = vstv %s7402_s12  ;;  %s7606_s12 = sld [smem:[#allocation13 + $0x7b]] }
 0x5e1   : > { %v2867_v16 = vmul.f32 %v2866_v60, %v7113_v38 }
 0x5e2   : > { %v2768_v32 = vpop.permute.xlu0 %2767  ;;  %v2770_v3 = vpop.permute.xlu1 %2769 }
 0x5e3   : > { %v2773_v21 = vadd.f32 %v2768_v32, %v7343_v4  ;;  %v2774_v44 = vadd.f32 %v2770_v3, %v7345_v23  ;;  %v2861_v4 = vmul.f32 %v2860_v58, %v7113_v38  ;;  %v2862_v23 = vmul.f32 %v2860_v58, %v7115_v62 }
 0x5e4   : > { %3251 = vrot.lane.b32.xlu0 %v3247_v33, %s8288_s6  ;;  %3253 = vrot.lane.b32.xlu1 %v3248_v5, %s8288_s6  ;;  %v3357_v5 = vmul.f32 %v3356_v28, %v7373_v24 }
 0x5e6   : > { %v2782_v26 = vpop.permute.xlu0 %2781  ;;  %v2784_v42 = vpop.permute.xlu1 %2783 }
 0x5e7   : > { %v2787_v51 = vadd.f32 %v2782_v26, %v7354_v25  ;;  %v2788_v19 = vadd.f32 %v2784_v42, %v7356_v46  ;;  %v2868_v25 = vmul.f32 %v2866_v60, %v7115_v62 }
 0x5e8   : > { %3291 = vrot.lane.b32.xlu0 %v3287_v12, %s8287_s5  ;;  %3293 = vrot.lane.b32.xlu1 %v3288_v0, %s8287_s5  ;;  %v3328_v12 = vstv %s7413_s27  ;;  %s7614_s27 = sld [smem:[#allocation13 + $0x85]] }
 0x5ea   : > { %v2796_v63 = vpop.permute.xlu0 %2795  ;;  %v2798_v59 = vpop.permute.xlu1 %2797 }
 0x5eb   : > { %v2801_v50 = vadd.f32 %v2796_v63, %v2745_v57  ;;  %v2802_v2 = vadd.f32 %v2798_v59, %v2746_v18  ;;  %v3329_v18 = vmul.f32 %v3328_v12, %v7373_v24  ;;  %v3330_v63 = vmul.f32 %v3328_v12, %v7375_v54 }
 0x5ec   : > { %3305 = vrot.lane.b32.xlu0 %v3301_v10, %s8287_s5  ;;  %3307 = vrot.lane.b32.xlu1 %v3302_v6, %s8287_s5  ;;  %v3370_v59 = vstv %s7429_s19  ;;  %v3480_v12 = vstv %s7484_s15  ;;  %s7625_s19 = sld [smem:[#allocation13 + $0x62]]  ;;  %s7680_s15 = sld [smem:[#allocation13 + $0x1d]] }
 0x5ed   : > { %v7406_v30 = vadd.f32 %v2849_v45, %v2801_v50  ;;  %v7408_v56 = vadd.f32 %v2850_v20, %v2802_v2  ;;  %v3371_v10 = vmul.f32 %v3370_v59, %v7373_v24  ;;  %v3372_v6 = vmul.f32 %v3370_v59, %v7375_v54 }
 0x5ee   : > { %v2810_v61 = vpop.permute.xlu0 %2809  ;;  %v2812_v27 = vpop.permute.xlu1 %2811  ;;  %v3385_v45 = vmul.f32 %v3384_v7, %v7373_v24  ;;  %v3386_v20 = vmul.f32 %v3384_v7, %v7375_v54 }
 0x5ef   : > { %v2815_v41 = vadd.f32 %v2810_v61, %v2759_v48  ;;  %v2816_v31 = vadd.f32 %v2812_v27, %v2760_v47  ;;  %v3424_v48 = vstv %s4738_s21  ;;  %v7474_v47 = vld [vmem:[#allocation2 + $0x39] sm:$0xff]  ;;  %v2986_v61 = vstv %s7458_s1  ;;  %s4762_s21 = sld [smem:[#allocation13 + $0x1c]]  ;;  %s7654_s1 = sld [smem:[#allocation13 + $0x12]] }
 0x5f0   : > { %3319 = vrot.lane.b32.xlu0 %v3315_v40, %s8287_s5  ;;  %3321 = vrot.lane.b32.xlu1 %v3316_v8, %s8287_s5 }
 0x5f1   : > { %v7422_v53 = vadd.f32 %v2855_v49, %v2815_v41  ;;  %v7424_v37 = vadd.f32 %v2856_v34, %v2816_v31  ;;  %v3425_v41 = vmul.f32 %v3424_v48, %v7472_v13  ;;  %v3426_v31 = vmul.f32 %v3424_v48, %v7474_v47 }
 0x5f2   : > { %v2824_v15 = vpop.permute.xlu0 %2823  ;;  %v2826_v55 = vpop.permute.xlu1 %2825  ;;  %v3438_v49 = vstv %s7462_s18  ;;  %s7658_s18 = sld [smem:[#allocation13 + $0x40]] }
 0x5f3   : > { %v2829_v14 = vadd.f32 %v2824_v15, %v2773_v21  ;;  %v2830_v9 = vadd.f32 %v2826_v55, %v2774_v44  ;;  %v2987_v21 = vmul.f32 %v2986_v61, %v7169_v17  ;;  %v2988_v44 = vmul.f32 %v2986_v61, %v7172_v39 }
 0x5f4   : > { %3347 = vrot.lane.b32.xlu0 %v3343_v29, %s8288_s6  ;;  %3349 = vrot.lane.b32.xlu1 %v3344_v52, %s8288_s6  ;;  %v3466_v61 = vstv %s7516_s24  ;;  %s7712_s24 = sld [smem:[#allocation13 + $0x88]] }
 0x5f5   : > { %v7438_v35 = vadd.f32 %v2861_v4, %v2829_v14  ;;  %v7440_v32 = vadd.f32 %v2862_v23, %v2830_v9  ;;  %v3439_v14 = vmul.f32 %v3438_v49, %v7472_v13  ;;  %v3440_v9 = vmul.f32 %v3438_v49, %v7474_v47 }
 0x5f6   : > { %v2838_v3 = vpop.permute.xlu0 %2837  ;;  %v2840_v33 = vpop.permute.xlu1 %2839  ;;  %v3452_v4 = vstv %s7470_s28  ;;  %v3467_v49 = vmul.f32 %v3466_v61, %v7472_v13  ;;  %s7666_s28 = sld [smem:[#allocation13 + $0x64]] }
 0x5f7   : > { %v2843_v0 = vadd.f32 %v2838_v3, %v2787_v51  ;;  %v2844_v22 = vadd.f32 %v2840_v33, %v2788_v19 }
 0x5f8   : > { %3361 = vrot.lane.b32.xlu0 %v3357_v5, %s8288_s6  ;;  %3363 = vrot.lane.b32.xlu1 %v3358_v43, %s8288_s6  ;;  %v3453_v5 = vmul.f32 %v3452_v4, %v7472_v13  ;;  %v3454_v43 = vmul.f32 %v3452_v4, %v7474_v47  ;;  %v7572_v4 = vld [vmem:[#allocation2 + $0x3a] sm:$0xff] }
 0x5f9   : > { %v7449_v46 = vadd.f32 %v2867_v16, %v2843_v0  ;;  %v7451_v26 = vadd.f32 %v2868_v25, %v2844_v22  ;;  %v2998_v0 = vstv %s7491_s23  ;;  %s7687_s23 = sld [smem:[#allocation13 + $0x5a]] }
 0x5fa   : > { %v2878_v42 = vpop.permute.xlu0 %2877  ;;  %v2880_v57 = vpop.permute.xlu1 %2879 }
 0x5fb   : > { %v2883_v27 = vadd.f32 %v2878_v42, %v7406_v30  ;;  %v2884_v40 = vadd.f32 %v2880_v57, %v7408_v56  ;;  %v2992_v30 = vstv %s7466_s17  ;;  %v3481_v57 = vmul.f32 %v3480_v12, %v7472_v13  ;;  %s7662_s17 = sld [smem:[#allocation13 + $0x36]] }
 0x5fc   : > { %3333 = vrot.lane.b32.xlu0 %v3329_v18, %s8287_s5  ;;  %3335 = vrot.lane.b32.xlu1 %v3330_v63, %s8287_s5  ;;  %v3482_v18 = vmul.f32 %v3480_v12, %v7474_v47  ;;  %v3494_v63 = vstv %s7502_s20  ;;  %s7698_s20 = sld [smem:[#allocation13 + $0x41]] }
 0x5fd   : > { %v3496_v48 = vmul.f32 %v3494_v63, %v7474_v47 }
 0x5fe   : > { %v2892_v38 = vpop.permute.xlu0 %2891  ;;  %v2894_v62 = vpop.permute.xlu1 %2893 }
 0x5ff   : > { %v2897_v56 = vadd.f32 %v2892_v38, %v7422_v53  ;;  %v2898_v15 = vadd.f32 %v2894_v62, %v7424_v37  ;;  %v2993_v53 = vmul.f32 %v2992_v30, %v7169_v17  ;;  %v2994_v37 = vmul.f32 %v2992_v30, %v7172_v39 }
 0x600   : > { %3375 = vrot.lane.b32.xlu0 %v3371_v10, %s8288_s6  ;;  %3377 = vrot.lane.b32.xlu1 %v3372_v6, %s8288_s6  ;;  %v2999_v62 = vmul.f32 %v2998_v0, %v7169_v17  ;;  %v3000_v10 = vmul.f32 %v2998_v0, %v7172_v39  ;;  %v3522_v30 = vstv %s4745_s0  ;;  %s4769_s0 = sld [smem:[#allocation13 + $0x89]] }
 0x602   : > { %v2906_v50 = vpop.permute.xlu0 %2905  ;;  %v2908_v2 = vpop.permute.xlu1 %2907 }
 0x603   : > { %v2911_v22 = vadd.f32 %v2906_v50, %v7438_v35  ;;  %v2912_v16 = vadd.f32 %v2908_v2, %v7440_v32  ;;  %v3004_v35 = vstv %s7508_s14  ;;  %s7704_s14 = sld [smem:[#allocation13 + $0x7e]] }
 0x604   : > { %3389 = vrot.lane.b32.xlu0 %v3385_v45, %s8288_s6  ;;  %3391 = vrot.lane.b32.xlu1 %v3386_v20, %s8288_s6  ;;  %v3495_v20 = vmul.f32 %v3494_v63, %v7472_v13 }
 0x606   : > { %v2934_v8 = vpop.permute.xlu0 %2933  ;;  %v2936_v11 = vpop.permute.xlu1 %2935 }
 0x607   : > { %v2939_v34 = vadd.f32 %v2934_v8, %v2883_v27  ;;  %v2940_v58 = vadd.f32 %v2936_v11, %v2884_v40  ;;  %v3005_v8 = vmul.f32 %v3004_v35, %v7169_v17 }
 0x608   : > { %3429 = vrot.lane.b32.xlu0 %v3425_v41, %s8287_s5  ;;  %3431 = vrot.lane.b32.xlu1 %v3426_v31, %s8287_s5 }
 0x609   : > { %v7495_v55 = vadd.f32 %v2987_v21, %v2939_v34  ;;  %v7497_v29 = vadd.f32 %v2988_v44, %v2940_v58  ;;  %v3468_v34 = vmul.f32 %v3466_v61, %v7474_v47  ;;  %v3508_v58 = vstv %s7527_s13  ;;  %s7723_s13 = sld [smem:[#allocation13 + $0x65]] }
 0x60a   : > { %v2948_v52 = vpop.permute.xlu0 %2947  ;;  %v2950_v28 = vpop.permute.xlu1 %2949  ;;  %v3509_v21 = vmul.f32 %v3508_v58, %v7472_v13  ;;  %v3510_v44 = vmul.f32 %v3508_v58, %v7474_v47  ;;  %v3618_v61 = vstv %s7582_s30  ;;  %s7778_s30 = sld [smem:[#allocation13 + $0x20]] }
 0x60b   : > { %v2953_v23 = vadd.f32 %v2948_v52, %v2897_v56  ;;  %v2954_v60 = vadd.f32 %v2950_v28, %v2898_v15  ;;  %v3523_v52 = vmul.f32 %v3522_v30, %v7472_v13  ;;  %v3524_v28 = vmul.f32 %v3522_v30, %v7474_v47 }
 0x60c   : > { %3443 = vrot.lane.b32.xlu0 %v3439_v14, %s8287_s5  ;;  %3445 = vrot.lane.b32.xlu1 %v3440_v9, %s8287_s5  ;;  %v7570_v14 = vld [vmem:[#allocation2 + $0x32] sm:$0xff]  ;;  %v3562_v9 = vstv %s4750_s2  ;;  %s4774_s2 = sld [smem:[#allocation13 + $0x1f]] }
 0x60d   : > { %v7510_v51 = vadd.f32 %v2993_v53, %v2953_v23  ;;  %v7512_v19 = vadd.f32 %v2994_v37, %v2954_v60  ;;  %v3124_v23 = vstv %s7556_s3  ;;  %s7752_s3 = sld [smem:[#allocation13 + $0x15]] }
 0x60e   : > { %v2920_v3 = vpop.permute.xlu0 %2919  ;;  %v2922_v33 = vpop.permute.xlu1 %2921 }
 0x60f   : > { %v2925_v32 = vadd.f32 %v2920_v3, %v7449_v46  ;;  %v2926_v6 = vadd.f32 %v2922_v33, %v7451_v26  ;;  %v3006_v46 = vmul.f32 %v3004_v35, %v7172_v39  ;;  %v3563_v33 = vmul.f32 %v3562_v9, %v7570_v14 }
 0x610   : > { %3457 = vrot.lane.b32.xlu0 %v3453_v5, %s8287_s5  ;;  %3459 = vrot.lane.b32.xlu1 %v3454_v43, %s8287_s5  ;;  %v3564_v5 = vmul.f32 %v3562_v9, %v7572_v4  ;;  %v3576_v43 = vstv %s7560_s4  ;;  %s7756_s4 = sld [smem:[#allocation13 + $0x43]] }
 0x612   : > { %v2962_v25 = vpop.permute.xlu0 %2961  ;;  %v2964_v42 = vpop.permute.xlu1 %2963 }
 0x613   : > { %v2967_v59 = vadd.f32 %v2962_v25, %v2911_v22  ;;  %v2968_v38 = vadd.f32 %v2964_v42, %v2912_v16  ;;  %v3125_v22 = vmul.f32 %v3124_v23, %v7278_v1  ;;  %v3126_v16 = vmul.f32 %v3124_v23, %v7280_v36 }
 0x614   : > { %3485 = vrot.lane.b32.xlu0 %v3481_v57, %s8288_s6  ;;  %3487 = vrot.lane.b32.xlu1 %v3482_v18, %s8288_s6  ;;  %v3604_v23 = vstv %s7614_s27  ;;  %s7806_s27 = sld [smem:[#allocation13 + $0x8b]] }
 0x615   : > { %v7536_v7 = vadd.f32 %v2999_v62, %v2967_v59  ;;  %v7538_v50 = vadd.f32 %v3000_v10, %v2968_v38  ;;  %v3577_v59 = vmul.f32 %v3576_v43, %v7570_v14  ;;  %v3578_v38 = vmul.f32 %v3576_v43, %v7572_v4 }
 0x616   : > { %v2976_v2 = vpop.permute.xlu0 %2975  ;;  %v2978_v45 = vpop.permute.xlu1 %2977  ;;  %v3590_v62 = vstv %s7568_s8  ;;  %v3605_v43 = vmul.f32 %v3604_v23, %v7570_v14  ;;  %s7764_s8 = sld [smem:[#allocation13 + $0x67]] }
 0x617   : > { %v2981_v27 = vadd.f32 %v2976_v2, %v2925_v32  ;;  %v2982_v40 = vadd.f32 %v2978_v45, %v2926_v6 }
 0x618   : > { %3499 = vrot.lane.b32.xlu0 %v3495_v20, %s8288_s6  ;;  %3501 = vrot.lane.b32.xlu1 %v3496_v48, %s8288_s6  ;;  %v3591_v20 = vmul.f32 %v3590_v62, %v7570_v14  ;;  %v3592_v48 = vmul.f32 %v3590_v62, %v7572_v4  ;;  %v7670_v62 = vld [vmem:[#allocation2 + $0x50] sm:$0xff] }
 0x619   : > { %v7547_v26 = vadd.f32 %v3005_v8, %v2981_v27  ;;  %v7549_v11 = vadd.f32 %v3006_v46, %v2982_v40  ;;  %v3136_v27 = vstv %s7589_s10  ;;  %s7785_s10 = sld [smem:[#allocation13 + $0x5d]] }
 0x61a   : > { %v3016_v41 = vpop.permute.xlu0 %3015  ;;  %v3018_v31 = vpop.permute.xlu1 %3017 }
 0x61b   : > { %v3021_v60 = vadd.f32 %v3016_v41, %v7495_v55  ;;  %v3022_v53 = vadd.f32 %v3018_v31, %v7497_v29  ;;  %v3130_v55 = vstv %s7564_s7  ;;  %v3619_v31 = vmul.f32 %v3618_v61, %v7570_v14  ;;  %s7760_s7 = sld [smem:[#allocation13 + $0x39]] }
 0x61c   : > { %3471 = vrot.lane.b32.xlu0 %v3467_v49, %s8287_s5  ;;  %3473 = vrot.lane.b32.xlu1 %v3468_v34, %s8287_s5  ;;  %v3620_v49 = vmul.f32 %v3618_v61, %v7572_v4  ;;  %v3632_v34 = vstv %s7600_s11  ;;  %s7796_s11 = sld [smem:[#allocation13 + $0x44]] }
 0x61d   : > { %v3634_v9 = vmul.f32 %v3632_v34, %v7572_v4 }
 0x61e   : > { %v3030_v17 = vpop.permute.xlu0 %3029  ;;  %v3032_v39 = vpop.permute.xlu1 %3031 }
 0x61f   : > { %v3035_v29 = vadd.f32 %v3030_v17, %v7510_v51  ;;  %v3036_v25 = vadd.f32 %v3032_v39, %v7512_v19  ;;  %v3131_v51 = vmul.f32 %v3130_v55, %v7278_v1  ;;  %v3132_v19 = vmul.f32 %v3130_v55, %v7280_v36 }
 0x620   : > { %3513 = vrot.lane.b32.xlu0 %v3509_v21, %s8288_s6  ;;  %3515 = vrot.lane.b32.xlu1 %v3510_v44, %s8288_s6  ;;  %v3137_v39 = vmul.f32 %v3136_v27, %v7278_v1  ;;  %v3138_v21 = vmul.f32 %v3136_v27, %v7280_v36  ;;  %v3660_v55 = vstv %s4757_s25  ;;  %s7829_s25 = sld [smem:[#allocation13 + $0x8c]] }
 0x622   : > { %v3044_v56 = vpop.permute.xlu0 %3043  ;;  %v3046_v15 = vpop.permute.xlu1 %3045 }
 0x623   : > { %v3049_v40 = vadd.f32 %v3044_v56, %v7536_v7  ;;  %v3050_v8 = vadd.f32 %v3046_v15, %v7538_v50  ;;  %v3142_v7 = vstv %s7606_s12  ;;  %s7802_s12 = sld [smem:[#allocation13 + $0x81]] }
 0x624   : > { %3527 = vrot.lane.b32.xlu0 %v3523_v52, %s8288_s6  ;;  %3529 = vrot.lane.b32.xlu1 %v3524_v28, %s8288_s6  ;;  %v3633_v28 = vmul.f32 %v3632_v34, %v7570_v14 }
 0x626   : > { %v3072_v37 = vpop.permute.xlu0 %3071  ;;  %v3074_v3 = vpop.permute.xlu1 %3073 }
 0x627   : > { %v3077_v12 = vadd.f32 %v3072_v37, %v3021_v60  ;;  %v3078_v0 = vadd.f32 %v3074_v3, %v3022_v53  ;;  %v3143_v37 = vmul.f32 %v3142_v7, %v7278_v1 }
 0x628   : > { %3567 = vrot.lane.b32.xlu0 %v3563_v33, %s8287_s5  ;;  %3569 = vrot.lane.b32.xlu1 %v3564_v5, %s8287_s5 }
 0x629   : > { %v7593_v42 = vadd.f32 %v3125_v22, %v3077_v12  ;;  %v7595_v57 = vadd.f32 %v3126_v16, %v3078_v0  ;;  %v3606_v12 = vmul.f32 %v3604_v23, %v7572_v4  ;;  %v3646_v0 = vstv %s7625_s19  ;;  %s7817_s19 = sld [smem:[#allocation13 + $0x68]] }
 0x62a   : > { %v3086_v18 = vpop.permute.xlu0 %3085  ;;  %v3088_v63 = vpop.permute.xlu1 %3087  ;;  %v3647_v22 = vmul.f32 %v3646_v0, %v7570_v14  ;;  %v3648_v16 = vmul.f32 %v3646_v0, %v7572_v4  ;;  %v3756_v23 = vstv %s7680_s15  ;;  %s7874_s15 = sld [smem:[#allocation13 + $0x23]] }
 0x62b   : > { %v3091_v10 = vadd.f32 %v3086_v18, %v3035_v29  ;;  %v3092_v35 = vadd.f32 %v3088_v63, %v3036_v25  ;;  %v3661_v18 = vmul.f32 %v3660_v55, %v7570_v14  ;;  %v3662_v63 = vmul.f32 %v3660_v55, %v7572_v4 }
 0x62c   : > { %3581 = vrot.lane.b32.xlu0 %v3577_v59, %s8287_s5  ;;  %3583 = vrot.lane.b32.xlu1 %v3578_v38, %s8287_s5  ;;  %v7668_v59 = vld [vmem:[#allocation2 + $0x48] sm:$0xff]  ;;  %v3700_v38 = vstv %s4762_s21  ;;  %s7844_s21 = sld [smem:[#allocation13 + $0x22]] }
 0x62d   : > { %v7608_v32 = vadd.f32 %v3131_v51, %v3091_v10  ;;  %v7610_v6 = vadd.f32 %v3132_v19, %v3092_v35  ;;  %v3262_v10 = vstv %s7654_s1  ;;  %s7848_s1 = sld [smem:[#allocation13 + $0x18]] }
 0x62e   : > { %v3058_v2 = vpop.permute.xlu0 %3057  ;;  %v3060_v45 = vpop.permute.xlu1 %3059 }
 0x62f   : > { %v3063_v50 = vadd.f32 %v3058_v2, %v7547_v26  ;;  %v3064_v44 = vadd.f32 %v3060_v45, %v7549_v11  ;;  %v3144_v26 = vmul.f32 %v3142_v7, %v7280_v36  ;;  %v3701_v45 = vmul.f32 %v3700_v38, %v7668_v59 }
 0x630   : > { %3595 = vrot.lane.b32.xlu0 %v3591_v20, %s8287_s5  ;;  %3597 = vrot.lane.b32.xlu1 %v3592_v48, %s8287_s5  ;;  %v3702_v20 = vmul.f32 %v3700_v38, %v7670_v62  ;;  %v3714_v48 = vstv %s7658_s18  ;;  %s7852_s18 = sld [smem:[#allocation13 + $0x46]] }
 0x632   : > { %v3100_v46 = vpop.permute.xlu0 %3099  ;;  %v3102_v41 = vpop.permute.xlu1 %3101 }
 0x633   : > { %v3105_v58 = vadd.f32 %v3100_v46, %v3049_v40  ;;  %v3106_v17 = vadd.f32 %v3102_v41, %v3050_v8  ;;  %v3263_v40 = vmul.f32 %v3262_v10, %v7373_v24  ;;  %v3264_v8 = vmul.f32 %v3262_v10, %v7375_v54 }
 0x634   : > { %3623 = vrot.lane.b32.xlu0 %v3619_v31, %s8288_s6  ;;  %3625 = vrot.lane.b32.xlu1 %v3620_v49, %s8288_s6  ;;  %v3742_v10 = vstv %s7712_s24  ;;  %s7896_s24 = sld [smem:[#allocation13 + $0x8e]] }
 0x635   : > { %v7634_v30 = vadd.f32 %v3137_v39, %v3105_v58  ;;  %v7636_v56 = vadd.f32 %v3138_v21, %v3106_v17  ;;  %v3715_v58 = vmul.f32 %v3714_v48, %v7668_v59  ;;  %v3716_v17 = vmul.f32 %v3714_v48, %v7670_v62 }
 0x636   : > { %v3114_v15 = vpop.permute.xlu0 %3113  ;;  %v3116_v52 = vpop.permute.xlu1 %3115  ;;  %v3728_v39 = vstv %s7666_s28  ;;  %v3743_v48 = vmul.f32 %v3742_v10, %v7668_v59  ;;  %s7861_s28 = sld [smem:[#allocation13 + $0x6a]] }
 0x637   : > { %v3119_v60 = vadd.f32 %v3114_v15, %v3063_v50  ;;  %v3120_v53 = vadd.f32 %v3116_v52, %v3064_v44 }
 0x638   : > { %3637 = vrot.lane.b32.xlu0 %v3633_v28, %s8288_s6  ;;  %3639 = vrot.lane.b32.xlu1 %v3634_v9, %s8288_s6  ;;  %v3729_v28 = vmul.f32 %v3728_v39, %v7668_v59  ;;  %v3730_v9 = vmul.f32 %v3728_v39, %v7670_v62  ;;  %v7768_v39 = vld [vmem:[#allocation2 + $0x51] sm:$0xff] }
 0x639   : > { %v7645_v11 = vadd.f32 %v3143_v37, %v3119_v60  ;;  %v7647_v3 = vadd.f32 %v3144_v26, %v3120_v53  ;;  %v3274_v60 = vstv %s7687_s23  ;;  %s7881_s23 = sld [smem:[#allocation13 + $0x60]] }
 0x63a   : > { %v3154_v33 = vpop.permute.xlu0 %3153  ;;  %v3156_v5 = vpop.permute.xlu1 %3155 }
 0x63b   : > { %v3159_v35 = vadd.f32 %v3154_v33, %v7593_v42  ;;  %v3160_v51 = vadd.f32 %v3156_v5, %v7595_v57  ;;  %v3268_v42 = vstv %s7662_s17  ;;  %v3757_v5 = vmul.f32 %v3756_v23, %v7668_v59  ;;  %s7857_s17 = sld [smem:[#allocation13 + $0x3c]] }
 0x63c   : > { %3609 = vrot.lane.b32.xlu0 %v3605_v43, %s8287_s5  ;;  %3611 = vrot.lane.b32.xlu1 %v3606_v12, %s8287_s5  ;;  %v3758_v43 = vmul.f32 %v3756_v23, %v7670_v62  ;;  %v3770_v12 = vstv %s7698_s20  ;;  %s7886_s20 = sld [smem:[#allocation13 + $0x47]] }
 0x63d   : > { %v3772_v38 = vmul.f32 %v3770_v12, %v7670_v62 }
 0x63e   : > { %v3168_v1 = vpop.permute.xlu0 %3167  ;;  %v3170_v36 = vpop.permute.xlu1 %3169 }
 0x63f   : > { %v3173_v57 = vadd.f32 %v3168_v1, %v7608_v32  ;;  %v3174_v46 = vadd.f32 %v3170_v36, %v7610_v6  ;;  %v3269_v32 = vmul.f32 %v3268_v42, %v7373_v24  ;;  %v3270_v6 = vmul.f32 %v3268_v42, %v7375_v54 }
 0x640   : > { %3651 = vrot.lane.b32.xlu0 %v3647_v22, %s8288_s6  ;;  %3653 = vrot.lane.b32.xlu1 %v3648_v16, %s8288_s6  ;;  %v3275_v36 = vmul.f32 %v3274_v60, %v7373_v24  ;;  %v3276_v22 = vmul.f32 %v3274_v60, %v7375_v54  ;;  %v3798_v42 = vstv %s4769_s0  ;;  %s4793_s0 = sld [smem:[#allocation13 + $0x8f]] }
 0x642   : > { %v3182_v29 = vpop.permute.xlu0 %3181  ;;  %v3184_v25 = vpop.permute.xlu1 %3183 }
 0x643   : > { %v3187_v53 = vadd.f32 %v3182_v29, %v7634_v30  ;;  %v3188_v37 = vadd.f32 %v3184_v25, %v7636_v56  ;;  %v3280_v30 = vstv %s7704_s14  ;;  %s7892_s14 = sld [smem:[#allocation13 + $0x84]] }
 0x644   : > { %3665 = vrot.lane.b32.xlu0 %v3661_v18, %s8288_s6  ;;  %3667 = vrot.lane.b32.xlu1 %v3662_v63, %s8288_s6  ;;  %v3771_v63 = vmul.f32 %v3770_v12, %v7668_v59 }
 0x646   : > { %v3210_v19 = vpop.permute.xlu0 %3209  ;;  %v3212_v2 = vpop.permute.xlu1 %3211 }
 0x647   : > { %v3215_v61 = vadd.f32 %v3210_v19, %v3159_v35  ;;  %v3216_v27 = vadd.f32 %v3212_v2, %v3160_v51  ;;  %v3281_v19 = vmul.f32 %v3280_v30, %v7373_v24 }
 0x648   : > { %3705 = vrot.lane.b32.xlu0 %v3701_v45, %s8287_s5  ;;  %3707 = vrot.lane.b32.xlu1 %v3702_v20, %s8287_s5 }
 0x649   : > { %v7691_v41 = vadd.f32 %v3263_v40, %v3215_v61  ;;  %v7693_v31 = vadd.f32 %v3264_v8, %v3216_v27  ;;  %v3744_v61 = vmul.f32 %v3742_v10, %v7670_v62  ;;  %v3784_v27 = vstv %s7723_s13  ;;  %s7907_s13 = sld [smem:[#allocation13 + $0x6b]] }
 0x64a   : > { %v3224_v49 = vpop.permute.xlu0 %3223  ;;  %v3226_v34 = vpop.permute.xlu1 %3225  ;;  %v3785_v40 = vmul.f32 %v3784_v27, %v7668_v59  ;;  %v3786_v8 = vmul.f32 %v3784_v27, %v7670_v62  ;;  %v3894_v10 = vstv %s7778_s30  ;;  %s4773_s30 = sld [smem:[#allocation13 + $0x8a]] }
 0x64b   : > { %v3229_v21 = vadd.f32 %v3224_v49, %v3173_v57  ;;  %v3230_v7 = vadd.f32 %v3226_v34, %v3174_v46  ;;  %v3799_v49 = vmul.f32 %v3798_v42, %v7668_v59  ;;  %v3800_v34 = vmul.f32 %v3798_v42, %v7670_v62 }
 0x64c   : > { %3719 = vrot.lane.b32.xlu0 %v3715_v58, %s8287_s5  ;;  %3721 = vrot.lane.b32.xlu1 %v3716_v17, %s8287_s5  ;;  %v7766_v58 = vld [vmem:[#allocation2 + $0x49] sm:$0xff]  ;;  %v3838_v17 = vstv %s4774_s2  ;;  %s4758_s2 = sld [smem:[#allocation13 + $0x1b]] }
 0x64d   : > { %v7706_v50 = vadd.f32 %v3269_v32, %v3229_v21  ;;  %v7708_v44 = vadd.f32 %v3270_v6, %v3230_v7  ;;  %v3400_v21 = vstv %s7752_s3  ;;  %s4759_s3 = sld [smem:[#allocation13 + $0x3f]] }
 0x64e   : > { %v3196_v15 = vpop.permute.xlu0 %3195  ;;  %v3198_v52 = vpop.permute.xlu1 %3197 }
 0x64f   : > { %v3201_v56 = vadd.f32 %v3196_v15, %v7645_v11  ;;  %v3202_v16 = vadd.f32 %v3198_v52, %v7647_v3  ;;  %v3282_v11 = vmul.f32 %v3280_v30, %v7375_v54  ;;  %v3839_v52 = vmul.f32 %v3838_v17, %v7766_v58 }
 0x650   : > { %3733 = vrot.lane.b32.xlu0 %v3729_v28, %s8287_s5  ;;  %3735 = vrot.lane.b32.xlu1 %v3730_v9, %s8287_s5  ;;  %v3840_v28 = vmul.f32 %v3838_v17, %v7768_v39  ;;  %v3852_v9 = vstv %s7756_s4  ;;  %s4770_s4 = sld [smem:[#allocation13 + $0x1e]] }
 0x652   : > { %v3238_v26 = vpop.permute.xlu0 %3237  ;;  %v3240_v33 = vpop.permute.xlu1 %3239 }
 0x653   : > { %v3243_v0 = vadd.f32 %v3238_v26, %v3187_v53  ;;  %v3244_v1 = vadd.f32 %v3240_v33, %v3188_v37  ;;  %v3401_v53 = vmul.f32 %v3400_v21, %v7472_v13  ;;  %v3402_v37 = vmul.f32 %v3400_v21, %v7474_v47 }
 0x654   : > { %3761 = vrot.lane.b32.xlu0 %v3757_v5, %s8288_s6  ;;  %3763 = vrot.lane.b32.xlu1 %v3758_v43, %s8288_s6  ;;  %v3880_v21 = vstv %s7806_s27  ;;  %s4785_s27 = sld [smem:[#allocation13 + $0x8d]] }
 0x655   : > { %v7732_v55 = vadd.f32 %v3275_v36, %v3243_v0  ;;  %v7734_v29 = vadd.f32 %v3276_v22, %v3244_v1  ;;  %v3853_v0 = vmul.f32 %v3852_v9, %v7766_v58  ;;  %v3854_v1 = vmul.f32 %v3852_v9, %v7768_v39 }
 0x656   : > { %v3252_v25 = vpop.permute.xlu0 %3251  ;;  %v3254_v18 = vpop.permute.xlu1 %3253  ;;  %v3866_v36 = vstv %s7764_s8  ;;  %v3881_v9 = vmul.f32 %v3880_v21, %v7766_v58  ;;  %s4772_s8 = sld [smem:[#allocation13 + $0x66]] }
 0x657   : > { %v3257_v35 = vadd.f32 %v3252_v25, %v3201_v56  ;;  %v3258_v51 = vadd.f32 %v3254_v18, %v3202_v16 }
 0x658   : > { %3775 = vrot.lane.b32.xlu0 %v3771_v63, %s8288_s6  ;;  %3777 = vrot.lane.b32.xlu1 %v3772_v38, %s8288_s6  ;;  %v3867_v63 = vmul.f32 %v3866_v36, %v7766_v58  ;;  %v3868_v38 = vmul.f32 %v3866_v36, %v7768_v39 }
 0x659   : > { %v7743_v3 = vadd.f32 %v3281_v19, %v3257_v35  ;;  %v7745_v2 = vadd.f32 %v3282_v11, %v3258_v51  ;;  %v3412_v35 = vstv %s7785_s10  ;;  %s4782_s10 = sld [smem:[#allocation13 + $0x21]] }
 0x65a   : > { %v3292_v45 = vpop.permute.xlu0 %3291  ;;  %v3294_v20 = vpop.permute.xlu1 %3293 }
 0x65b   : > { %v3297_v7 = vadd.f32 %v3292_v45, %v7691_v41  ;;  %v3298_v32 = vadd.f32 %v3294_v20, %v7693_v31  ;;  %v3406_v41 = vstv %s7760_s7  ;;  %v3895_v20 = vmul.f32 %v3894_v10, %v7766_v58  ;;  %s4771_s7 = sld [smem:[#allocation13 + $0x42]] }
 0x65c   : > { %3747 = vrot.lane.b32.xlu0 %v3743_v48, %s8287_s5  ;;  %3749 = vrot.lane.b32.xlu1 %v3744_v61, %s8287_s5  ;;  %v3896_v48 = vmul.f32 %v3894_v10, %v7768_v39  ;;  %v3908_v61 = vstv %s7796_s11  ;;  %s4783_s11 = sld [smem:[#allocation13 + $0x45]] }
 0x65d   : > { %v3910_v17 = vmul.f32 %v3908_v61, %v7768_v39 }
 0x65e   : > { %v3306_v24 = vpop.permute.xlu0 %3305  ;;  %v3308_v54 = vpop.permute.xlu1 %3307 }
 0x65f   : > { %v3311_v31 = vadd.f32 %v3306_v24, %v7706_v50  ;;  %v3312_v26 = vadd.f32 %v3308_v54, %v7708_v44  ;;  %v3407_v50 = vmul.f32 %v3406_v41, %v7472_v13  ;;  %v3408_v44 = vmul.f32 %v3406_v41, %v7474_v47 }
 0x660   : > { %3789 = vrot.lane.b32.xlu0 %v3785_v40, %s8288_s6  ;;  %3791 = vrot.lane.b32.xlu1 %v3786_v8, %s8288_s6  ;;  %v3413_v54 = vmul.f32 %v3412_v35, %v7472_v13  ;;  %v3414_v40 = vmul.f32 %v3412_v35, %v7474_v47 }
 0x662   : > { %v3320_v57 = vpop.permute.xlu0 %3319  ;;  %v3322_v46 = vpop.permute.xlu1 %3321 }
 0x663   : > { %v3325_v51 = vadd.f32 %v3320_v57, %v7732_v55  ;;  %v3326_v19 = vadd.f32 %v3322_v46, %v7734_v29  ;;  %v3418_v55 = vstv %s7802_s12  ;;  %s4784_s12 = sld [smem:[#allocation13 + $0x69]] }
 0x664   : > { %3803 = vrot.lane.b32.xlu0 %v3799_v49, %s8288_s6  ;;  %3805 = vrot.lane.b32.xlu1 %v3800_v34, %s8288_s6  ;;  %v3909_v34 = vmul.f32 %v3908_v61, %v7766_v58 }
 0x666   : > { %v3348_v6 = vpop.permute.xlu0 %3347  ;;  %v3350_v15 = vpop.permute.xlu1 %3349 }
 0x667   : > { %v3353_v23 = vadd.f32 %v3348_v6, %v3297_v7  ;;  %v3354_v60 = vadd.f32 %v3350_v15, %v3298_v32  ;;  %v3419_v6 = vmul.f32 %v3418_v55, %v7472_v13 }
 0x668   : > { %3843 = vrot.lane.b32.xlu0 %v3839_v52, %s8287_s5  ;;  %3845 = vrot.lane.b32.xlu1 %v3840_v28, %s8287_s5 }
 0x669   : > { %v7789_v33 = vadd.f32 %v3401_v53, %v3353_v23  ;;  %v7791_v5 = vadd.f32 %v3402_v37, %v3354_v60  ;;  %v3882_v23 = vmul.f32 %v3880_v21, %v7768_v39 }
 0x66a   : > { %v3362_v43 = vpop.permute.xlu0 %3361  ;;  %v3364_v12 = vpop.permute.xlu1 %3363 }
 0x66b   : > { %v3367_v22 = vadd.f32 %v3362_v43, %v3311_v31  ;;  %v3368_v30 = vadd.f32 %v3364_v12, %v3312_v26 }
 0x66c   : > { %3857 = vrot.lane.b32.xlu0 %v3853_v0, %s8287_s5  ;;  %3859 = vrot.lane.b32.xlu1 %v3854_v1, %s8287_s5 }
 0x66d   : > { %v3409_v56 = vadd.f32 %v3407_v50, %v3367_v22  ;;  %v3410_v16 = vadd.f32 %v3408_v44, %v3368_v30  ;;  %v7863_v30 = vld [vmem:[#allocation2 + $0x4a] sm:$0xff]  ;;  %v3976_v50 = vstv %s7844_s21  ;;  %v7866_v44 = vld [vmem:[#allocation2 + $0x52] sm:$0xff]  ;;  %s4795_s21 = sld [smem:[#allocation14 + $0x2]] }
 0x66e   : > { %v3334_v25 = vpop.permute.xlu0 %3333  ;;  %v3336_v18 = vpop.permute.xlu1 %3335 }
 0x66f   : > { %v3339_v29 = vadd.f32 %v3334_v25, %v7743_v3  ;;  %v3340_v8 = vadd.f32 %v3336_v18, %v7745_v2  ;;  %v3420_v3 = vmul.f32 %v3418_v55, %v7474_v47  ;;  %v3922_v47 = vstv %s7817_s19  ;;  %s4087_s19 = sld [smem:[#allocation14]] }
 0x670   : > { %3871 = vrot.lane.b32.xlu0 %v3867_v63, %s8287_s5  ;;  %3873 = vrot.lane.b32.xlu1 %v3868_v38, %s8287_s5  ;;  %v3923_v41 = vmul.f32 %v3922_v47, %v7766_v58  ;;  %v3924_v31 = vmul.f32 %v3922_v47, %v7768_v39  ;;  %v3977_v18 = vmul.f32 %v3976_v50, %v7863_v30  ;;  %v3990_v38 = vstv %s7852_s18  ;;  %s4237_s18 = sld [smem:[#allocation16]] }
 0x671   : > { %v3978_v63 = vmul.f32 %v3976_v50, %v7866_v44  ;;  %v3556_v47 = vstv %s7892_s14  ;;  %s4801_s14 = sld [smem:[#allocation16 + $0x3]] }
 0x672   : > { %v3376_v11 = vpop.permute.xlu0 %3375  ;;  %v3378_v45 = vpop.permute.xlu1 %3377 }
 0x673   : > { %v3381_v27 = vadd.f32 %v3376_v11, %v3325_v51  ;;  %v3382_v24 = vadd.f32 %v3378_v45, %v3326_v19  ;;  %v3544_v11 = vstv %s7857_s17  ;;  %s8026_s17 = sld [smem:[#allocation17]] }
 0x674   : > { %3899 = vrot.lane.b32.xlu0 %v3895_v20, %s8288_s6  ;;  %3901 = vrot.lane.b32.xlu1 %v3896_v48, %s8288_s6 }
 0x675   : > { %v3415_v42 = vadd.f32 %v3413_v54, %v3381_v27  ;;  %v3416_v57 = vadd.f32 %v3414_v40, %v3382_v24  ;;  %v3991_v27 = vmul.f32 %v3990_v38, %v7863_v30  ;;  %v3992_v24 = vmul.f32 %v3990_v38, %v7866_v44 }
 0x676   : > { %v3390_v46 = vpop.permute.xlu0 %3389  ;;  %v3392_v49 = vpop.permute.xlu1 %3391  ;;  %v4004_v54 = vstv %s7861_s28  ;;  %v4060_v38 = vstv %s7907_s13  ;;  %s4797_s28 = sld [smem:[#allocation16 + $0x1]]  ;;  %s4821_s13 = sshll.u32 %s5315_s16, 10 }
 0x677   : > { %v3395_v7 = vadd.f32 %v3390_v46, %v3339_v29  ;;  %v3396_v32 = vadd.f32 %v3392_v49, %v3340_v8  ;;  %v3545_v29 = vmul.f32 %v3544_v11, %v7570_v14  ;;  %v3546_v8 = vmul.f32 %v3544_v11, %v7572_v4 }
 0x678   : > { %3913 = vrot.lane.b32.xlu0 %v3909_v34, %s8288_s6  ;;  %3915 = vrot.lane.b32.xlu1 %v3910_v17, %s8288_s6  ;;  %v4005_v34 = vmul.f32 %v4004_v54, %v7863_v30  ;;  %v4006_v17 = vmul.f32 %v4004_v54, %v7866_v44  ;;  %v4074_v11 = vstv %s4793_s0  ;;  %v3676_v54 = vstv %s4758_s2  ;;  %s8449_s0 = sshll.u32 %s5487_s29, 6 }
 0x679   : > { %v7835_v2 = vadd.f32 %v3419_v6, %v3395_v7  ;;  %v7837_v15 = vadd.f32 %v3420_v3, %v3396_v32  ;;  %v4032_v32 = vstv %s7874_s15  ;;  %v3550_v6 = vstv %s7881_s23  ;;  %s8028_s15 = sld [smem:[#allocation17 + $0x1]]  ;;  %s4799_s23 = sld [smem:[#allocation16 + $0x2]] }
 0x67a   : > { %v3430_v52 = vpop.permute.xlu0 %3429  ;;  %v3432_v28 = vpop.permute.xlu1 %3431  ;;  %s452_s2 = scalar_lea.vmem [#allocation19], %s8449_s0 }
 0x67b   : > { %v3435_v60 = vadd.f32 %v3430_v52, %v7789_v33  ;;  %v3436_v13 = vadd.f32 %v3432_v28, %v7791_v5  ;;  %v3936_v5 = vstv %s7829_s25  ;;  %v4033_v28 = vmul.f32 %v4032_v32, %v7863_v30  ;;  %s4794_s25 = sld [smem:[#allocation14 + $0x1]] }
 0x67c   : > { %3885 = vrot.lane.b32.xlu0 %v3881_v9, %s8287_s5  ;;  %3887 = vrot.lane.b32.xlu1 %v3882_v23, %s8287_s5  ;;  %v3937_v0 = vmul.f32 %v3936_v5, %v7766_v58  ;;  %v3938_v1 = vmul.f32 %v3936_v5, %v7768_v39  ;;  %v4034_v9 = vmul.f32 %v4032_v32, %v7866_v44  ;;  %v4046_v23 = vstv %s7886_s20  ;;  %s8030_s20 = sld [smem:[#allocation17 + $0x2]] }
 0x67d   : > { %v4018_v5 = vstv %s7896_s24  ;;  %s8032_s24 = sld [smem:[#allocation17 + $0x3]] }
 0x67e   : > { %v3444_v53 = vpop.permute.xlu0 %3443  ;;  %v3446_v37 = vpop.permute.xlu1 %3445 }
 0x67f   : > { %v3449_v26 = vadd.f32 %v3444_v53, %v3409_v56  ;;  %v3450_v33 = vadd.f32 %v3446_v37, %v3410_v16  ;;  %v3538_v56 = vstv %s7848_s1  ;;  %s4796_s1 = sld [smem:[#allocation14 + $0x3]] }
 0x680   : > { %3927 = vrot.lane.b32.xlu0 %v3923_v41, %s8288_s6  ;;  %3929 = vrot.lane.b32.xlu1 %v3924_v31, %s8288_s6  ;;  %v3539_v51 = vmul.f32 %v3538_v56, %v7570_v14  ;;  %v3540_v19 = vmul.f32 %v3538_v56, %v7572_v4 }
 0x682   : > { %v3458_v43 = vpop.permute.xlu0 %3457  ;;  %v3460_v12 = vpop.permute.xlu1 %3459 }
 0x683   : > { %v3463_v36 = vadd.f32 %v3458_v43, %v3415_v42  ;;  %v3464_v22 = vadd.f32 %v3460_v12, %v3416_v57 }
 0x684   : > { %3941 = vrot.lane.b32.xlu0 %v3937_v0, %s8288_s6  ;;  %3943 = vrot.lane.b32.xlu1 %v3938_v1, %s8288_s6  ;;  %v3557_v0 = vmul.f32 %v3556_v47, %v7570_v14  ;;  %v3558_v1 = vmul.f32 %v3556_v47, %v7572_v4 }
 0x686   : > { %v3486_v16 = vpop.permute.xlu0 %3485  ;;  %v3488_v25 = vpop.permute.xlu1 %3487 }
 0x687   : > { %v3491_v10 = vadd.f32 %v3486_v16, %v3435_v60  ;;  %v3492_v35 = vadd.f32 %v3488_v25, %v3436_v13  ;;  %v4019_v16 = vmul.f32 %v4018_v5, %v7863_v30  ;;  %v4020_v25 = vmul.f32 %v4018_v5, %v7866_v44 }
 0x688   : > { %3981 = vrot.lane.b32.xlu0 %v3977_v18, %s8287_s5  ;;  %3983 = vrot.lane.b32.xlu1 %v3978_v63, %s8287_s5 }
 0x689   : > { %v3541_v45 = vadd.f32 %v3539_v51, %v3491_v10  ;;  %v3542_v20 = vadd.f32 %v3540_v19, %v3492_v35  ;;  %v4061_v10 = vmul.f32 %v4060_v38, %v7863_v30  ;;  %v4062_v35 = vmul.f32 %v4060_v38, %v7866_v44 }
 0x68a   : > { %v3500_v48 = vpop.permute.xlu0 %3499  ;;  %v3502_v61 = vpop.permute.xlu1 %3501 }
 0x68b   : > { %v3505_v40 = vadd.f32 %v3500_v48, %v3449_v26  ;;  %v3506_v55 = vadd.f32 %v3502_v61, %v3450_v33  ;;  %v4047_v26 = vmul.f32 %v4046_v23, %v7863_v30  ;;  %v4048_v33 = vmul.f32 %v4046_v23, %v7866_v44 }
 0x68c   : > { %3995 = vrot.lane.b32.xlu0 %v3991_v27, %s8287_s5  ;;  %3997 = vrot.lane.b32.xlu1 %v3992_v24, %s8287_s5  ;;  %v4075_v48 = vmul.f32 %v4074_v11, %v7863_v30  ;;  %v4076_v61 = vmul.f32 %v4074_v11, %v7866_v44 }
 0x68d   : > { %v3547_v42 = vadd.f32 %v3545_v29, %v3505_v40  ;;  %v3548_v57 = vadd.f32 %v3546_v8, %v3506_v55 }
 0x68e   : > { %v3472_v46 = vpop.permute.xlu0 %3471  ;;  %v3474_v49 = vpop.permute.xlu1 %3473 }
 0x68f   : > { %v3477_v21 = vadd.f32 %v3472_v46, %v7835_v2  ;;  %v3478_v7 = vadd.f32 %v3474_v49, %v7837_v15  ;;  %v3551_v2 = vmul.f32 %v3550_v6, %v7570_v14  ;;  %v3552_v15 = vmul.f32 %v3550_v6, %v7572_v4 }
 0x690   : > { %4009 = vrot.lane.b32.xlu0 %v4005_v34, %s8287_s5  ;;  %4011 = vrot.lane.b32.xlu1 %v4006_v17, %s8287_s5  ;;  %v3682_v46 = vstv %s4759_s3  ;;  %s4316_s3 = sshll.u32 %s452_s2, 4  ;;  %s8062_s3 = int_to_ptr.vmem [resolvable:$true] %s4316_s3 }
 0x691   : > { %v3683_v6 = vmul.f32 %v3682_v46, %v7668_v59 }
 0x692   : > { %v3514_v3 = vpop.permute.xlu0 %3513  ;;  %v3516_v52 = vpop.permute.xlu1 %3515 }
 0x693   : > { %v3519_v60 = vadd.f32 %v3514_v3, %v3463_v36  ;;  %v3520_v13 = vadd.f32 %v3516_v52, %v3464_v22  ;;  %v3684_v3 = vmul.f32 %v3682_v46, %v7670_v62 }
 0x694   : > { %4037 = vrot.lane.b32.xlu0 %v4033_v28, %s8288_s6  ;;  %4039 = vrot.lane.b32.xlu1 %v4034_v9, %s8288_s6 }
 0x695   : > { %v3553_v53 = vadd.f32 %v3551_v2, %v3519_v60  ;;  %v3554_v37 = vadd.f32 %v3552_v15, %v3520_v13 }
 0x696   : > { %v3528_v41 = vpop.permute.xlu0 %3527  ;;  %v3530_v31 = vpop.permute.xlu1 %3529 }
 0x697   : > { %v3533_v43 = vadd.f32 %v3528_v41, %v3477_v21  ;;  %v3534_v12 = vadd.f32 %v3530_v31, %v3478_v7 }
 0x698   : > { %4051 = vrot.lane.b32.xlu0 %v4047_v26, %s8288_s6  ;;  %4053 = vrot.lane.b32.xlu1 %v4048_v33, %s8288_s6 }
 0x699   : > { %v3559_v36 = vadd.f32 %v3557_v0, %v3533_v43  ;;  %v3560_v22 = vadd.f32 %v3558_v1, %v3534_v12 }
 0x69a   : > { %v3568_v50 = vpop.permute.xlu0 %3567  ;;  %v3570_v56 = vpop.permute.xlu1 %3569 }
 0x69b   : > { %v3573_v18 = vadd.f32 %v3568_v50, %v3541_v45  ;;  %v3574_v63 = vadd.f32 %v3570_v56, %v3542_v20 }
 0x69c   : > { %4023 = vrot.lane.b32.xlu0 %v4019_v16, %s8287_s5  ;;  %4025 = vrot.lane.b32.xlu1 %v4020_v25, %s8287_s5  ;;  %s4760_s5 = sld [smem:[#allocation13 + $0x63]] }
 0x69e   : > { %v3582_v14 = vpop.permute.xlu0 %3581  ;;  %v3584_v4 = vpop.permute.xlu1 %3583 }
 0x69f   : > { %v3587_v51 = vadd.f32 %v3582_v14, %v3547_v42  ;;  %v3588_v19 = vadd.f32 %v3584_v4, %v3548_v57  ;;  %v3677_v42 = vmul.f32 %v3676_v54, %v7668_v59  ;;  %v3678_v57 = vmul.f32 %v3676_v54, %v7670_v62 }
 0x6a0   : > { %4065 = vrot.lane.b32.xlu0 %v4061_v10, %s8288_s6  ;;  %4067 = vrot.lane.b32.xlu1 %v4062_v35, %s8288_s6 }
 0x6a2   : > { %v3596_v45 = vpop.permute.xlu0 %3595  ;;  %v3598_v20 = vpop.permute.xlu1 %3597  ;;  %v3688_v2 = vstv %s4760_s5 }
 0x6a3   : > { %v3601_v27 = vadd.f32 %v3596_v45, %v3553_v53  ;;  %v3602_v24 = vadd.f32 %v3598_v20, %v3554_v37  ;;  %v3689_v41 = vmul.f32 %v3688_v2, %v7668_v59  ;;  %v3690_v31 = vmul.f32 %v3688_v2, %v7670_v62 }
 0x6a4   : > { %4079 = vrot.lane.b32.xlu0 %v4075_v48, %s8288_s6  ;;  %4081 = vrot.lane.b32.xlu1 %v4076_v61, %s8288_s6  ;;  %s4761_s6 = sld [smem:[#allocation13 + $0x87]] }
 0x6a6   : > { %v3624_v40 = vpop.permute.xlu0 %3623  ;;  %v3626_v55 = vpop.permute.xlu1 %3625 }
 0x6a7   : > { %v3629_v29 = vadd.f32 %v3624_v40, %v3573_v18  ;;  %v3630_v8 = vadd.f32 %v3626_v55, %v3574_v63 }
 0x6a9   : > { %v3679_v49 = vadd.f32 %v3677_v42, %v3629_v29  ;;  %v3680_v34 = vadd.f32 %v3678_v57, %v3630_v8 }
 0x6aa   : > { %v3638_v17 = vpop.permute.xlu0 %3637  ;;  %v3640_v21 = vpop.permute.xlu1 %3639  ;;  %v3694_v26 = vstv %s4761_s6  ;;  %s8060_s6 = scalar_lea.hbm %s8123_s9, %s4821_s13 }
 0x6ab   : > { %v3643_v7 = vadd.f32 %v3638_v17, %v3587_v51  ;;  %v3644_v32 = vadd.f32 %v3640_v21, %v3588_v19  ;;  %v3695_v50 = vmul.f32 %v3694_v26, %v7668_v59  ;;  %v3814_v51 = vstv %s4770_s4  ;;  %s5135_s4 = scalar_lea.vmem %s8062_s3, 1024 }
 0x6ac   : > { %v3815_v48 = vmul.f32 %v3814_v51, %v7766_v58  ;;  %v3816_v61 = vmul.f32 %v3814_v51, %v7768_v39  ;;  %p5136_p4 = scmp.ne.s32.totalorder %s8062_s3, %s5135_s4 }
 0x6ad   : > { %v3685_v52 = vadd.f32 %v3683_v6, %v3643_v7  ;;  %v3686_v28 = vadd.f32 %v3684_v3, %v3644_v32  ;;  %v3826_v7 = vstv %s4772_s8 }
 0x6ae   : > { %v3610_v9 = vpop.permute.xlu0 %3609  ;;  %v3612_v23 = vpop.permute.xlu1 %3611  ;;  %p5137_p7 = pnand %p5136_p4, %p8450_p5 }
 0x6af   : > { %v3615_v60 = vadd.f32 %v3610_v9, %v3559_v36  ;;  %v3616_v13 = vadd.f32 %v3612_v23, %v3560_v22  ;;  %v3696_v36 = vmul.f32 %v3694_v26, %v7670_v62  ;;  %v3828_v9 = vmul.f32 %v3826_v7, %v7768_v39 }
 0x6b0   : > { %v3832_v23 = vstv %s4773_s30  ;;  %p5138_p8 = pneg %p5137_p7 }
 0x6b1   : > { %v3834_v26 = vmul.f32 %v3832_v23, %v7768_v39 }
 0x6b2   : > { %v3652_v15 = vpop.permute.xlu0 %3651  ;;  %v3654_v47 = vpop.permute.xlu1 %3653 }
 0x6b3   : > { %v3657_v53 = vadd.f32 %v3652_v15, %v3601_v27  ;;  %v3658_v37 = vadd.f32 %v3654_v47, %v3602_v24  ;;  %v3820_v27 = vstv %s4771_s7  ;;  %s5238_s7 = smov [#allocation19]  }
 0x6b4   : > { %v3821_v57 = vmul.f32 %v3820_v27, %v7766_v58  ;;  %v3822_v46 = vmul.f32 %v3820_v27, %v7768_v39  ;;  %s5139_s8 = sshll.u32 %s5238_s7, 4  ;;  %s5140_s8 = int_to_ptr.vmem [resolvable:$false] %s5139_s8 }
 0x6b5   : > { %v3691_v33 = vadd.f32 %v3689_v41, %v3657_v53  ;;  %v3692_v5 = vadd.f32 %v3690_v31, %v3658_v37  ;;  %v3833_v31 = vmul.f32 %v3832_v23, %v7766_v58  ;;  %s5141_s30 = scalar_lea.vmem %s5140_s8, 2048  ;;  %p5142_p12 = scmp.lt.s32.totalorder %s8062_s3, %s5140_s8 }
 0x6b6   : > { %v3666_v43 = vpop.permute.xlu0 %3665  ;;  %v3668_v12 = vpop.permute.xlu1 %3667  ;;  %p5143_p13 = scmp.lt.s32.totalorder %s5141_s30, %s5135_s4 }
 0x6b7   : > { %v3671_v0 = vadd.f32 %v3666_v43, %v3615_v60  ;;  %v3672_v1 = vadd.f32 %v3668_v12, %v3616_v13 }
 0x6b8   : > { %p5144_p0 = por %p5143_p13, %p5142_p12 }
 0x6b9   : > { %v3697_v22 = vadd.f32 %v3695_v50, %v3671_v0  ;;  %v3698_v56 = vadd.f32 %v3696_v36, %v3672_v1 }
 0x6ba   : > { %v3706_v16 = vpop.permute.xlu0 %3705  ;;  %v3708_v25 = vpop.permute.xlu1 %3707  ;;  %p5145_p3 = pnand %p5144_p0, %p5138_p8 }
 0x6bb   : > { %v3711_v19 = vadd.f32 %v3706_v16, %v3679_v49  ;;  %v3712_v11 = vadd.f32 %v3708_v25, %v3680_v34 }
 0x6be   : > { %v3720_v18 = vpop.permute.xlu0 %3719  ;;  %v3722_v63 = vpop.permute.xlu1 %3721 }
 0x6bf   : > { %v3726_v38 = vadd.f32 %v3722_v63, %v3686_v28  ;;  %v3725_v24 = vadd.f32 %v3720_v18, %v3685_v52  ;;  %v3827_v28 = vmul.f32 %v3826_v7, %v7766_v58 }
 0x6c2   : > { %v3734_v14 = vpop.permute.xlu0 %3733  ;;  %v3736_v4 = vpop.permute.xlu1 %3735 }
 0x6c3   : > { %v3739_v10 = vadd.f32 %v3734_v14, %v3691_v33  ;;  %v3740_v35 = vadd.f32 %v3736_v4, %v3692_v5  ;;  %v3958_v14 = vstv %s4783_s11 }
 0x6c6   : > { %v3762_v45 = vpop.permute.xlu0 %3761  ;;  %v3764_v59 = vpop.permute.xlu1 %3763 }
 0x6c7   : > { %v3767_v20 = vadd.f32 %v3762_v45, %v3711_v19  ;;  %v3768_v62 = vadd.f32 %v3764_v59, %v3712_v11 }
 0x6c9   : > { %v3817_v54 = vadd.f32 %v3815_v48, %v3767_v20  ;;  %v3818_v40 = vadd.f32 %v3816_v61, %v3768_v62  ;;  %v3959_v20 = vmul.f32 %v3958_v14, %v7863_v30  ;;  %v3960_v62 = vmul.f32 %v3958_v14, %v7866_v44 }
 0x6ca   : > { %v3776_v55 = vpop.permute.xlu0 %3775  ;;  %v3778_v29 = vpop.permute.xlu1 %3777 }
 0x6cb   : > { %v3781_v8 = vadd.f32 %v3776_v55, %v3725_v24  ;;  %v3782_v42 = vadd.f32 %v3778_v29, %v3726_v38 }
 0x6cd   : > { %v3823_v49 = vadd.f32 %v3821_v57, %v3781_v8  ;;  %v3824_v34 = vadd.f32 %v3822_v46, %v3782_v42 }
 0x6ce   : > { %v3748_v17 = vpop.permute.xlu0 %3747  ;;  %v3750_v21 = vpop.permute.xlu1 %3749 }
 0x6cf   : > { %v3753_v60 = vadd.f32 %v3748_v17, %v3697_v22  ;;  %v3754_v13 = vadd.f32 %v3750_v21, %v3698_v56  ;;  %v3952_v22 = vstv %s4782_s10 }
 0x6d0   : > { %v3953_v58 = vmul.f32 %v3952_v22, %v7863_v30  ;;  %v3954_v39 = vmul.f32 %v3952_v22, %v7866_v44 }
 0x6d2   : > { %v3790_v32 = vpop.permute.xlu0 %3789  ;;  %v3792_v6 = vpop.permute.xlu1 %3791 }
 0x6d3   : > { %v3795_v3 = vadd.f32 %v3790_v32, %v3739_v10  ;;  %v3796_v52 = vadd.f32 %v3792_v6, %v3740_v35 }
 0x6d5   : > { %v3829_v2 = vadd.f32 %v3827_v28, %v3795_v3  ;;  %v3830_v15 = vadd.f32 %v3828_v9, %v3796_v52 }
 0x6d6   : > { %v3804_v47 = vpop.permute.xlu0 %3803  ;;  %v3806_v53 = vpop.permute.xlu1 %3805 }
 0x6d7   : > { %v3809_v37 = vadd.f32 %v3804_v47, %v3753_v60  ;;  %v3810_v41 = vadd.f32 %v3806_v53, %v3754_v13 }
 0x6d9   : > { %v3835_v33 = vadd.f32 %v3833_v31, %v3809_v37  ;;  %v3836_v5 = vadd.f32 %v3834_v26, %v3810_v41 }
 0x6da   : > { %v3844_v43 = vpop.permute.xlu0 %3843  ;;  %v3846_v12 = vpop.permute.xlu1 %3845 }
 0x6db   : > { %v3849_v56 = vadd.f32 %v3844_v43, %v3817_v54  ;;  %v3850_v16 = vadd.f32 %v3846_v12, %v3818_v40  ;;  %v3964_v54 = vstv %s4784_s12 }
 0x6dc   : > { %v3965_v46 = vmul.f32 %v3964_v54, %v7863_v30 }
 0x6de   : > { %v3858_v0 = vpop.permute.xlu0 %3857  ;;  %v3860_v1 = vpop.permute.xlu1 %3859 }
 0x6df   : > { %v3863_v4 = vadd.f32 %v3858_v0, %v3823_v49  ;;  %v3864_v10 = vadd.f32 %v3860_v1, %v3824_v34  ;;  %v3966_v49 = vmul.f32 %v3964_v54, %v7866_v44  ;;  %v3970_v34 = vstv %s4785_s27 }
 0x6e0   : > { %v3971_v9 = vmul.f32 %v3970_v34, %v7863_v30  ;;  %v3972_v23 = vmul.f32 %v3970_v34, %v7866_v44 }
 0x6e2   : > { %v3872_v50 = vpop.permute.xlu0 %3871  ;;  %v3874_v36 = vpop.permute.xlu1 %3873 }
 0x6e3   : > { %v3877_v40 = vadd.f32 %v3872_v50, %v3829_v2  ;;  %v3878_v55 = vadd.f32 %v3874_v36, %v3830_v15  ;;  %v4092_v36 = vstv %s4794_s25 }
 0x6e6   : > { %v3900_v25 = vpop.permute.xlu0 %3899  ;;  %v3902_v18 = vpop.permute.xlu1 %3901 }
 0x6e7   : > { %v3905_v63 = vadd.f32 %v3900_v25, %v3849_v56  ;;  %v3906_v38 = vadd.f32 %v3902_v18, %v3850_v16 }
 0x6e9   : > { %v3955_v35 = vadd.f32 %v3953_v58, %v3905_v63  ;;  %v3956_v51 = vadd.f32 %v3954_v39, %v3906_v38 }
 0x6ea   : > { %v3914_v19 = vpop.permute.xlu0 %3913  ;;  %v3916_v11 = vpop.permute.xlu1 %3915 }
 0x6eb   : > { %v3919_v45 = vadd.f32 %v3914_v19, %v3863_v4  ;;  %v3920_v59 = vadd.f32 %v3916_v11, %v3864_v10 }
 0x6ed   : > { %v3961_v48 = vadd.f32 %v3959_v20, %v3919_v45  ;;  %v3962_v61 = vadd.f32 %v3960_v62, %v3920_v59 }
 0x6ee   : > { %v3886_v27 = vpop.permute.xlu0 %3885  ;;  %v3888_v24 = vpop.permute.xlu1 %3887 }
 0x6ef   : > { %v3891_v17 = vadd.f32 %v3886_v27, %v3835_v33  ;;  %v3892_v21 = vadd.f32 %v3888_v24, %v3836_v5  ;;  %v4088_v33 = vstv %s4087_s19  ;;  %v4100_v24 = vstv %s4796_s1 }
 0x6f2   : > { %v3928_v29 = vpop.permute.xlu0 %3927  ;;  %v3930_v8 = vpop.permute.xlu1 %3929 }
 0x6f3   : > { %v3933_v42 = vadd.f32 %v3928_v29, %v3877_v40  ;;  %v3934_v57 = vadd.f32 %v3930_v8, %v3878_v55 }
 0x6f5   : > { %v3967_v7 = vadd.f32 %v3965_v46, %v3933_v42  ;;  %v3968_v32 = vadd.f32 %v3966_v49, %v3934_v57 }
 0x6f6   : > { %v3942_v6 = vpop.permute.xlu0 %3941  ;;  %v3944_v3 = vpop.permute.xlu1 %3943 }
 0x6f7   : > { %v3947_v52 = vadd.f32 %v3942_v6, %v3891_v17  ;;  %v3948_v28 = vadd.f32 %v3944_v3, %v3892_v21 }
 0x6f9   : > { %v3973_v60 = vadd.f32 %v3971_v9, %v3947_v52  ;;  %v3974_v13 = vadd.f32 %v3972_v23, %v3948_v28 }
 0x6fa   : > { %v3982_v2 = vpop.permute.xlu0 %3981  ;;  %v3984_v15 = vpop.permute.xlu1 %3983 }
 0x6fb   : > { %v3987_v31 = vadd.f32 %v3982_v2, %v3955_v35  ;;  %v3988_v26 = vadd.f32 %v3984_v15, %v3956_v51  ;;  %v4096_v51 = vstv %s4795_s21 }
 0x6fe   : > { %v3996_v47 = vpop.permute.xlu0 %3995  ;;  %v3998_v53 = vpop.permute.xlu1 %3997 }
 0x6ff   : > { %v4001_v30 = vadd.f32 %v3996_v47, %v3961_v48  ;;  %v4002_v1 = vadd.f32 %v3998_v53, %v3962_v61 }
 0x702   : > { %v4010_v37 = vpop.permute.xlu0 %4009  ;;  %v4012_v41 = vpop.permute.xlu1 %4011 }
 0x703   : > { %v4015_v10 = vadd.f32 %v4010_v37, %v3967_v7  ;;  %v4016_v35 = vadd.f32 %v4012_v41, %v3968_v32 }
 0x706   : > { %v4038_v5 = vpop.permute.xlu0 %4037  ;;  %v4040_v43 = vpop.permute.xlu1 %4039 }
 0x707   : > { %v4043_v12 = vadd.f32 %v4038_v5, %v3987_v31  ;;  %v4044_v0 = vadd.f32 %v4040_v43, %v3988_v26 }
 0x709   : > { %v7958_v44 = vadd.f32 %v4088_v33, %v4043_v12  ;;  %v7960_v50 = vadd.f32 %v4088_v33, %v4044_v0 }
 0x70a   : > { %v4052_v22 = vpop.permute.xlu0 %4051  ;;  %v4054_v56 = vpop.permute.xlu1 %4053 }
 0x70b   : > { %v4057_v16 = vadd.f32 %v4052_v22, %v4001_v30  ;;  %v4058_v25 = vadd.f32 %v4054_v56, %v4002_v1  ;;  %v4103_v18 = vsel %vm2194_vm3, %v7958_v44, 0.0  ;;  %v4106_v63 = vsel %vm2194_vm3, %v7960_v50, 0.0 }
 0x70c   : > { %4104 = vadd.xlane.f32.xlu0 %v4103_v18  ;;  %4107 = vadd.xlane.f32.xlu1 %v4106_v63 }
 0x70d   : > { %v7966_v38 = vadd.f32 %v4092_v36, %v4057_v16  ;;  %v7968_v14 = vadd.f32 %v4092_v36, %v4058_v25 }
 0x70e   : > { %v4024_v58 = vpop.permute.xlu0 %4023  ;;  %v4026_v39 = vpop.permute.xlu1 %4025 }
 0x70f   : > { %v4117_v4 = vsel %vm2194_vm3, %v7966_v38, 0.0  ;;  %v4120_v20 = vsel %vm2194_vm3, %v7968_v14, 0.0  ;;  %v4029_v62 = vadd.f32 %v4024_v58, %v3973_v60  ;;  %v4030_v48 = vadd.f32 %v4026_v39, %v3974_v13 }
 0x710   : > { %4118 = vadd.xlane.f32.xlu0 %v4117_v4 }
 0x712   : > { %v4066_v19 = vpop.permute.xlu0 %4065  ;;  %v4068_v11 = vpop.permute.xlu1 %4067 }
 0x713   : > { %v4071_v45 = vadd.f32 %v4066_v19, %v4015_v10  ;;  %v4072_v59 = vadd.f32 %v4068_v11, %v4016_v35 }
 0x714   : > { %4121 = vadd.xlane.f32.xlu0 %v4120_v20 }
 0x715   : > { %v7974_v61 = vadd.f32 %v4096_v51, %v4071_v45  ;;  %v4098_v27 = vadd.f32 %v4096_v51, %v4072_v59 }
 0x716   : > { %v4080_v54 = vpop.permute.xlu0 %4079  ;;  %v4082_v40 = vpop.permute.xlu1 %4081 }
 0x717   : > { %v4085_v55 = vadd.f32 %v4080_v54, %v4029_v62  ;;  %v4086_v29 = vadd.f32 %v4082_v40, %v4030_v48  ;;  %v4131_v8 = vsel %vm2194_vm3, %v7974_v61, 0.0  ;;  %v4134_v42 = vsel %vm2194_vm3, %v4098_v27, 0.0 }
 0x718   : > { %4132 = vadd.xlane.f32.xlu1 %v4131_v8  ;;  %4135 = vadd.xlane.f32.xlu0 %v4134_v42 }
 0x719   : > { %v4101_v57 = vadd.f32 %v4100_v24, %v4085_v55  ;;  %v4102_v46 = vadd.f32 %v4100_v24, %v4086_v29 }
 0x71b   : > { %v4145_v49 = vsel %vm2194_vm3, %v4101_v57, 0.0  ;;  %v4148_v34 = vsel %vm2194_vm3, %v4102_v46, 0.0 }
 0x71c   : > { %4146 = vadd.xlane.f32.xlu1 %v4145_v49  ;;  %4149 = vadd.xlane.f32.xlu0 %v4148_v34 }
 0x799   : > { %v4105_v17 = vpop.xlane.xlu0 %4104  ;;  %v4108_v21 = vpop.xlane.xlu1 %4107 }
 0x79a   : > { %v4109_v7 = vadd.f32 %v4108_v21, %v4105_v17 }
 0x79c   : > { %v4110_v6 = vrot.slane %v4109_v7, 4 }
 0x79d   : > { %v4119_v32 = vpop.xlane.xlu0 %4118 }
 0x79e   : > { %v4111_v52 = vadd.f32 %v4110_v6, %v4109_v7 }
 0x7a0   : > { %v4112_v13 = vrot.slane %v4111_v52, 2 }
 0x7a1   : > { %v4122_v3 = vpop.xlane.xlu0 %4121 }
 0x7a2   : > { %v4123_v28 = vadd.f32 %v4122_v3, %v4119_v32  ;;  %v4113_v31 = vadd.f32 %v4112_v13, %v4111_v52 }
 0x7a4   : > { %v4124_v9 = vrot.slane %v4123_v28, 4  ;;  %v4114_v30 = vrot.slane %v4113_v31, 1 }
 0x7a5   : > { %v4136_v23 = vpop.xlane.xlu0 %4135  ;;  %v4133_v60 = vpop.xlane.xlu1 %4132 }
 0x7a6   : > { %v4125_v2 = vadd.f32 %v4124_v9, %v4123_v28  ;;  %v4137_v15 = vadd.f32 %v4136_v23, %v4133_v60  ;;  %v4115_v25 = vadd.f32 %v4114_v30, %v4113_v31 }
 0x7a8   : > { %v4126_v47 = vrot.slane %v4125_v2, 2  ;;  %v4138_v53 = vrot.slane %v4137_v15, 4 }
 0x7a9   : > { %v4150_v37 = vpop.xlane.xlu0 %4149  ;;  %v4147_v41 = vpop.xlane.xlu1 %4146 }
 0x7aa   : > { %v4127_v26 = vadd.f32 %v4126_v47, %v4125_v2  ;;  %v4139_v33 = vadd.f32 %v4138_v53, %v4137_v15  ;;  %v4151_v5 = vadd.f32 %v4150_v37, %v4147_v41 }
 0x7ac   : > { %v4128_v43 = vrot.slane %v4127_v26, 1  ;;  %v4140_v12 = vrot.slane %v4139_v33, 2  ;;  %v4152_v0 = vrot.slane %v4151_v5, 4 }
 0x7ae   : > { %v4141_v1 = vadd.f32 %v4140_v12, %v4139_v33  ;;  %v4153_v36 = vadd.f32 %v4152_v0, %v4151_v5  ;;  %v4129_v22 = vadd.f32 %v4128_v43, %v4127_v26 }
 0x7b0   : > { %v4142_v56 = vrot.slane %v4141_v1, 1  ;;  %v4154_v16 = vrot.slane %v4153_v36, 2  ;;  %v4130_v58 = vadd.f32 %v4129_v22, %v4115_v25 }
 0x7b2   : > { %v4143_v18 = vadd.f32 %v4142_v56, %v4141_v1  ;;  %v4155_v63 = vadd.f32 %v4154_v16, %v4153_v36 }
 0x7b4   : > { %v4156_v39 = vrot.slane %v4155_v63, 1  ;;  %v4144_v4 = vadd.f32 %v4143_v18, %v4130_v58 }
 0x7b6   : > { %v4157_v10 = vadd.f32 %v4156_v39, %v4155_v63 }
 0x7b8   : > { %v4158_v35 = vadd.f32 %v4157_v10, %v4144_v4 }
 0x7ba   : > { %v4159_v51 = vmul.f32 0.0009765625, %v4158_v35 }
 0x7bc   : > { %v7982_v19 = vsub.f32 %v7960_v50, %v4159_v51  ;;  %v7985_v11 = vsub.f32 %v7958_v44, %v4159_v51  ;;  %v7988_v45 = vsub.f32 %v7968_v14, %v4159_v51  ;;  %v7991_v59 = vsub.f32 %v7966_v38, %v4159_v51 }
 0x7bd   : > { %v7997_v48 = vsub.f32 %v4098_v27, %v4159_v51  ;;  %v8000_v50 = vsub.f32 %v7974_v61, %v4159_v51  ;;  %v8008_v54 = vsub.f32 %v4102_v46, %v4159_v51  ;;  %v8010_v40 = vsub.f32 %v4101_v57, %v4159_v51 }
 0x7be   : > { %v4163_v20 = vmul.f32 %v7982_v19, %v7982_v19  ;;  %v4162_v62 = vmul.f32 %v7985_v11, %v7985_v11  ;;  %v4181_v14 = vmul.f32 %v7988_v45, %v7988_v45  ;;  %v4180_v38 = vmul.f32 %v7991_v59, %v7991_v59 }
 0x7bf   : > { %v4199_v55 = vmul.f32 %v7997_v48, %v7997_v48  ;;  %v4198_v29 = vmul.f32 %v8000_v50, %v8000_v50  ;;  %v4217_v57 = vmul.f32 %v8008_v54, %v8008_v54  ;;  %v4216_v46 = vmul.f32 %v8010_v40, %v8010_v40 }
 0x7c0   : > { %v4167_v44 = vsel %vm2194_vm3, %v4163_v20, 0.0  ;;  %v4164_v24 = vsel %vm2194_vm3, %v4162_v62, 0.0  ;;  %v4185_v27 = vsel %vm2194_vm3, %v4181_v14, 0.0  ;;  %v4182_v61 = vsel %vm2194_vm3, %v4180_v38, 0.0 }
 0x7c1   : > { %4168 = vadd.xlane.f32.xlu0 %v4167_v44  ;;  %4165 = vadd.xlane.f32.xlu1 %v4164_v24  ;;  %v4203_v8 = vsel %vm2194_vm3, %v4199_v55, 0.0  ;;  %v4200_v42 = vsel %vm2194_vm3, %v4198_v29, 0.0  ;;  %v4221_v49 = vsel %vm2194_vm3, %v4217_v57, 0.0  ;;  %v4218_v34 = vsel %vm2194_vm3, %v4216_v46, 0.0 }
 0x7c2   : > { %v4238_v62 = vstv %s4237_s18  ;;  %v4242_v44 = vstv %s8026_s17  ;;  %v4248_v24 = vstv %s4797_s28  ;;  %v4252_v14 = vstv %s8028_s15 }
 0x7c3   : > { %v4268_v55 = vstv %s4801_s14  ;;  %v4272_v29 = vstv %s8032_s24 }
 0x7c5   : > { %4186 = vadd.xlane.f32.xlu0 %v4185_v27  ;;  %4183 = vadd.xlane.f32.xlu1 %v4182_v61  ;;  %v4258_v27 = vstv %s4799_s23  ;;  %v4262_v61 = vstv %s8030_s20 }
 0x7c9   : > { %4204 = vadd.xlane.f32.xlu0 %v4203_v8  ;;  %4201 = vadd.xlane.f32.xlu1 %v4200_v42 }
 0x7cd   : > { %4222 = vadd.xlane.f32.xlu0 %v4221_v49  ;;  %4219 = vadd.xlane.f32.xlu1 %v4218_v34 }
 0x84e   : > { %v4169_v17 = vpop.xlane.xlu0 %4168  ;;  %v4166_v21 = vpop.xlane.xlu1 %4165 }
 0x84f   : > { %v4170_v7 = vadd.f32 %v4169_v17, %v4166_v21 }
 0x851   : > { %v4171_v32 = vrot.slane %v4170_v7, 4 }
 0x852   : > { %v4187_v6 = vpop.xlane.xlu0 %4186  ;;  %v4184_v3 = vpop.xlane.xlu1 %4183 }
 0x853   : > { %v4172_v52 = vadd.f32 %v4171_v32, %v4170_v7  ;;  %v4188_v28 = vadd.f32 %v4187_v6, %v4184_v3  ;;  %v4276_v6 = vld [vmem:[%s5493_s26 + $0x8] sm:$0xff] }
 0x855   : > { %v4189_v9 = vrot.slane %v4188_v28, 4  ;;  %v4173_v13 = vrot.slane %v4172_v52, 2 }
 0x856   : > { %v4205_v23 = vpop.xlane.xlu0 %4204  ;;  %v4202_v60 = vpop.xlane.xlu1 %4201 }
 0x857   : > { %v4190_v2 = vadd.f32 %v4189_v9, %v4188_v28  ;;  %v4206_v15 = vadd.f32 %v4205_v23, %v4202_v60  ;;  %v4174_v31 = vadd.f32 %v4173_v13, %v4172_v52  ;;  %v4804_v28 = vld [vmem:[%s5493_s26 + $0x18] sm:$0xff]  ;;  %v4807_v9 = vld [vmem:[%s5493_s26 + $0x20] sm:$0xff]  ;;  %v4808_v13 = vld [vmem:[%s5493_s26 + $0x28] sm:$0xff] }
 0x859   : > { %v4191_v47 = vrot.slane %v4190_v2, 2  ;;  %v4207_v53 = vrot.slane %v4206_v15, 4  ;;  %v4175_v30 = vrot.slane %v4174_v31, 1 }
 0x85a   : > { %v4223_v37 = vpop.xlane.xlu0 %4222  ;;  %v4220_v41 = vpop.xlane.xlu1 %4219 }
 0x85b   : > { %v4192_v26 = vadd.f32 %v4191_v47, %v4190_v2  ;;  %v4208_v33 = vadd.f32 %v4207_v53, %v4206_v15  ;;  %v4224_v5 = vadd.f32 %v4223_v37, %v4220_v41  ;;  %v4176_v25 = vadd.f32 %v4175_v30, %v4174_v31  ;;  %v4811_v2 = vld [vmem:[%s5493_s26 + $0x30] sm:$0xff]  ;;  %v4812_v15 = vld [vmem:[%s5493_s26 + $0x38] sm:$0xff] }
 0x85d   : > { %v4193_v43 = vrot.slane %v4192_v26, 1  ;;  %v4209_v12 = vrot.slane %v4208_v33, 2  ;;  %v4225_v0 = vrot.slane %v4224_v5, 4 }
 0x85f   : > { %v4210_v1 = vadd.f32 %v4209_v12, %v4208_v33  ;;  %v4226_v36 = vadd.f32 %v4225_v0, %v4224_v5  ;;  %v4194_v22 = vadd.f32 %v4193_v43, %v4192_v26 }
 0x861   : > { %v4211_v56 = vrot.slane %v4210_v1, 1  ;;  %v4227_v16 = vrot.slane %v4226_v36, 2  ;;  %v4195_v58 = vadd.f32 %v4194_v22, %v4176_v25 }
 0x863   : > { %v4212_v18 = vadd.f32 %v4211_v56, %v4210_v1  ;;  %v4228_v63 = vadd.f32 %v4227_v16, %v4226_v36 }
 0x865   : > { %v4229_v39 = vrot.slane %v4228_v63, 1  ;;  %v4213_v4 = vadd.f32 %v4212_v18, %v4195_v58 }
 0x867   : > { %v4230_v10 = vadd.f32 %v4229_v39, %v4228_v63 }
 0x869   : > { %v4231_v35 = vadd.f32 %v4230_v10, %v4213_v4 }
 0x86b   : > { %v4232_v51 = vmul.f32 0.0009765625, %v4231_v35 }
 0x86d   : > { %v4233_v20 = vadd.f32 1e-05, %v4232_v51 }
 0x86f   : > { %4959 = vrsqrt.f32 %v4233_v20 }
 0x879   : > { %v4960_v38 = vpop.eup %4959 }
 0x87a   : > { %v4235_v8 = vmul.f32 %v4960_v38, %v7985_v11  ;;  %v4236_v42 = vmul.f32 %v4960_v38, %v7982_v19  ;;  %v4245_v57 = vmul.f32 %v4960_v38, %v7991_v59  ;;  %v4246_v46 = vmul.f32 %v4960_v38, %v7988_v45  ;;  %v4275_v59 = vld [vmem:[%s5493_s26] sm:$0xff] }
 0x87b   : > { %v4255_v49 = vmul.f32 %v4960_v38, %v8000_v50  ;;  %v4256_v34 = vmul.f32 %v4960_v38, %v7997_v48  ;;  %v4265_v17 = vmul.f32 %v4960_v38, %v8010_v40  ;;  %v4266_v21 = vmul.f32 %v4960_v38, %v8008_v54  ;;  %v4803_v48 = vld [vmem:[%s5493_s26 + $0x10] sm:$0xff]  ;;  %s4303_s26 = scalar_lea.sflag [#allocation5], %s5487_s29 }
 0x87c   : > { %v4239_v11 = vmul.f32 %v4238_v62, %v4235_v8  ;;  %v4240_v7 = vmul.f32 %v4238_v62, %v4236_v42  ;;  %v4249_v19 = vmul.f32 %v4248_v24, %v4245_v57  ;;  %v4250_v32 = vmul.f32 %v4248_v24, %v4246_v46 }
 0x87d   : > { %v4259_v45 = vmul.f32 %v4258_v27, %v4255_v49  ;;  %v4260_v50 = vmul.f32 %v4258_v27, %v4256_v34  ;;  %v4269_v3 = vmul.f32 %v4268_v55, %v4265_v17  ;;  %v4270_v52 = vmul.f32 %v4268_v55, %v4266_v21 }
 0x87e   : > { %v4243_v54 = vadd.f32 %v4242_v44, %v4239_v11  ;;  %v4244_v40 = vadd.f32 %v4242_v44, %v4240_v7  ;;  %v4253_v23 = vadd.f32 %v4252_v14, %v4249_v19  ;;  %v4254_v60 = vadd.f32 %v4252_v14, %v4250_v32 }
 0x87f   : > { %v4263_v47 = vadd.f32 %v4262_v61, %v4259_v45  ;;  %v4264_v53 = vadd.f32 %v4262_v61, %v4260_v50  ;;  %v4273_v37 = vadd.f32 %v4272_v29, %v4269_v3  ;;  %v4274_v41 = vadd.f32 %v4272_v29, %v4270_v52 }
 0x880   : > { %v4277_v31 = vadd.f32 %v4275_v59, %v4243_v54  ;;  %v4278_v26 = vadd.f32 %v4276_v6, %v4244_v40  ;;  %v4283_v33 = vadd.f32 %v4803_v48, %v4253_v23  ;;  %v4284_v5 = vadd.f32 %v4804_v28, %v4254_v60 }
 0x881   : > { %v4290_v43 = vadd.f32 %v4807_v9, %v4263_v47  ;;  %v4291_v12 = vadd.f32 %v4808_v13, %v4264_v53  ;;  %v4297_v0 = vadd.f32 %v4811_v2, %v4273_v37  ;;  %v4298_v30 = vadd.f32 %v4812_v15, %v4274_v41 }
 0x882   : > { %4279 = vst.msk [vmem:[%s452_s2] sm:$0xff] %vm2194_vm3, %v4277_v31  ;;  %4280 = vst.msk [vmem:[%s452_s2 + $0x8] sm:$0xff] %vm2194_vm3, %v4278_v26 }
 0x883   : > { %4805 = vst.msk [vmem:[%s452_s2 + $0x10] sm:$0xff] %vm2194_vm3, %v4283_v33  ;;  %4806 = vst.msk [vmem:[%s452_s2 + $0x18] sm:$0xff] %vm2194_vm3, %v4284_v5 }
 0x884   : > { %4809 = vst.msk [vmem:[%s452_s2 + $0x20] sm:$0xff] %vm2194_vm3, %v4290_v43  ;;  %4810 = vst.msk [vmem:[%s452_s2 + $0x28] sm:$0xff] %vm2194_vm3, %v4291_v12 }
 0x885   : > { %4813 = vst.msk [vmem:[%s452_s2 + $0x30] sm:$0xff] %vm2194_vm3, %v4297_v0  ;;  %4814 = vst.msk [vmem:[%s452_s2 + $0x38] sm:$0xff] %vm2194_vm3, %v4298_v30 }
 0x886   : > { %5148 = shalt.err (!%p5145_p3)
}
 0x887   : > { %s5149_s10 = scalar_lea.hbm %s8060_s6, 1024  ;;  %s5153_s27 = scalar_lea.hbm %s8123_s9, 2048 }
 0x888   : > { %p5150_p9 = scmp.ne.s32.totalorder %s8060_s6, %s5149_s10  ;;  %p5154_p11 = scmp.lt.u32.totalorder %s8060_s6, %s8123_s9 }
 0x889   : > { %p5155_p2 = scmp.lt.u32.totalorder %s5153_s27, %s5149_s10  ;;  %p5157_p4 = scmp.lt.u32.totalorder %s5149_s10, %s8060_s6 }
 0x88a   : > { %p5151_p10 = pnand %p5150_p9, %p8450_p5 }
 0x88b   : > { %p5156_p1 = por %p5155_p2, %p5154_p11 }
 0x88c   : > { %p5152_p6 = pneg %p5151_p10 }
 0x88d   : > { %p5158_p7 = por %p5157_p4, %p5156_p1 }
 0x88f   : > { %p5159_p8 = pnand %p5158_p7, %p5152_p6 }
 0x891   : > { %5162 = shalt.err (!%p5159_p8)
}
 0x892   : > { %s5239_s21 = smov 128   ;;  %s5240_s1 = smov 8  }
 0x893   : > { %4856 = dma.vmem_to_hbm [thread:$0]  (%p8450_p5), %s8062_s3, 1024, %s8060_s6, %s4303_s26, %s5239_s21, %s5239_s21, %s5240_s1  }
 0x894 PF: > { %s8451_s18 = sld [smem:[#allocation27_spill]]  ;;  %s8452_s17 = sld [smem:[#allocation33_spill]] }
 0x895   : > { %s8453_s28 = sld [smem:[#allocation30_spill]] }
 0x89a   : > { %s4331_s15 = sand.u32 1, %s8451_s18   ;;  %p8454_p12 = scmp.ne.s32.totalorder %s8452_s17, 0 }
 0x89b   : > { %p8455_p13 = scmp.ge.s32.totalorder %s8453_s28, 2  ;;  %s4332_s23 = scalar_lea.sflag [#allocation5], %s4331_s15 }
 0x89d   : > { %p4888_p0 = pnand %p8455_p13, %p8454_p12 }
 0x89f   : > { %5204 = dma.done.wait (!%p4888_p0), %s4332_s23, 1024  }
 0x8a0   : > { %5206 = vsyncadd (!%p4888_p0), %s4332_s23, 4294966272  ;;  %s8456_s12 = sld [smem:[#allocation31_spill]]  ;;  %s8457_s30 = sld [smem:[#allocation28_spill]] }
 0x8a1   : > { %s8458_s10 = sld [smem:[#allocation29_spill]]  ;;  %s8459_s11 = sld [smem:[#allocation32_spill]] }
 0x8a6   : > { %p27_p3 = scmp.ge.s32.totalorder %s8456_s12, 4  }
 0x8a8   :  { %29 = sbr.rel (!%p27_p3) target bundleno = 20 (0x14), region = 143 }
 0x8af   :  { %4337 = vsyncpa [#allocation4], 1 }
 0x8b0   :  { %4339 = vsyncpa [#allocation4 + $0x1], 1 }
 0x8b1   :  { %4340 = vsyncpa [#allocation5], 1 }
 0x8b2   :  { %4342 = vsyncpa [#allocation5 + $0x1], 1 }
 0x8b3   :  { %4343 = vsyncpa [#allocation6], 1 }
 0x8b4   :  { %4345 = vsyncpa [#allocation6 + $0x1], 1 }
 0x8b5   :  { %4346 = vsyncpa [#allocation9], 1 }
 0x8b6   :  { %4347 = vsyncpa [#allocation12], 1 }
 0x8b7   :  { %4348 = vsyncpa [#allocation15], 1 }
 0x8b8   :  { %4349 = vsyncpa [#allocation18], 1 }

</bundles_post_ra>
